<compile_context>
chip_gen: v5e
topology: v5e:2x2
jax: 0.10.0
libtpu: 0.0.40
codegen_flags: <defaults>
</compile_context>

<pallas_src>
import jax
import jax.numpy as jnp
from jax.experimental import pallas as pl
from jax.experimental.pallas import tpu as pltpu

_NEG = -1e30  # additive mask for conv positions that do not exist for a filter


def _round_up(x, m):
    return (x + m - 1) // m * m


def _build_fused_conv_weights(params, filters, C, D):
    """Pack every (filter, tap, output position) into one matmul.

    Returns:
      Wbig     : (C*D, Lmax*F_total) f32 — scores = emb_flat @ Wbig
      biasmask : (1, Lmax*F_total)  f32 — conv bias, or -1e30 on invalid
                 (position, filter) columns (narrower-than-Lmax filters).
      Lmax, F_total
    In a real model this packing would be done once at parameter-load time.
    """
    F_total = sum(nf for _, nf in filters)
    Lmax = C - min(k for k, _ in filters) + 1
    Wbig = jnp.zeros((C * D, Lmax * F_total), jnp.float32)
    biasmask = jnp.full((1, Lmax * F_total), _NEG, jnp.float32)
    off = 0
    for fi, (k, nf) in enumerate(filters):
        w = params[f"conv_w_{fi}"].astype(jnp.float32)      # (nf, k, D)
        b = params[f"conv_b_{fi}"].astype(jnp.float32)      # (nf,)
        L = C - k + 1
        for l in range(L):
            cols = slice(l * F_total + off, l * F_total + off + nf)
            biasmask = biasmask.at[0, cols].set(b)
            for j in range(k):
                rows = slice((l + j) * D, (l + j + 1) * D)
                Wbig = Wbig.at[rows, cols].set(w[:, j, :].T)  # (D, nf)
        off += nf
    return Wbig, biasmask, Lmax, F_total


def _make_kernel(C, D, V, Lmax, F_total):
    prec = jax.lax.Precision.HIGHEST  # keep f32 matmuls at full f32 precision

    def kernel(idx_ref, tbl_ref, wconv_ref, bias_ref, wlin_ref, blin_ref, out_ref):
        idx = idx_ref[...]                                   # (tn, C) int32
        tn = idx.shape[0]

        # ---- embedding gather, in-kernel, as an exact one-hot matmul (MXU) ----
        iota_v = jax.lax.broadcasted_iota(jnp.int32, (tn, C, V), 2)
        onehot = (idx[:, :, None] == iota_v).astype(jnp.float32)    # (tn, C, V)
        emb = jax.lax.dot_general(                                  # (tn, C, D)
            onehot, tbl_ref[...],                                   # table is (D, V)
            dimension_numbers=(((2,), (1,)), ((), ())),
            precision=prec, preferred_element_type=jnp.float32)

        # ---- all filters / taps / positions in ONE matmul (im2col folded into W) ----
        emb_flat = emb.reshape(tn, C * D)
        scores = jnp.dot(emb_flat, wconv_ref[...],
                         precision=prec, preferred_element_type=jnp.float32)
        scores = scores + bias_ref[...]     # conv bias + (-1e30) on invalid positions
        act = jnp.tanh(scores)              # (tn, Lmax*F_total); masked cols -> -1.0

        # ---- max-pool over conv positions (invalid positions can never win) ----
        pooled = jnp.max(act.reshape(tn, Lmax, F_total), axis=1)    # (tn, F_total)

        # ---- linear (pre-transposed weight) + leaky_relu(0.01) ----
        y = jnp.dot(pooled, wlin_ref[...],
                    precision=prec, preferred_element_type=jnp.float32)
        y = y + blin_ref[...]
        out_ref[...] = jnp.where(y > 0, y, 0.01 * y).astype(out_ref.dtype)

    return kernel


def char_cnn_forward(inputs, params, filters, *, padding_idx=0, tn=256):
    """Pallas-backed CharCNN forward.

    inputs: int32 (B, S, C) character indices.
    params: 'embed' (V, D), per-filter 'conv_w_i' (nf, k, D) / 'conv_b_i' (nf,),
            'lin_w' (out, F_total), 'lin_b' (out,).
    """
    B, S, C = inputs.shape
    N = B * S
    V, D = params["embed"].shape
    out_size = params["lin_w"].shape[0]

    # ---- wrapper-side, one-time weight plumbing (no per-step cost) ----
    Wbig, biasmask, Lmax, F_total = _build_fused_conv_weights(params, filters, C, D)
    table_t = params["embed"].astype(jnp.float32).T              # (D, V)
    lin_w_t = params["lin_w"].astype(jnp.float32).T              # (F_total, out)
    lin_b = params["lin_b"].astype(jnp.float32).reshape(1, out_size)

    # ---- row tiling: big tiles, pad (with padding_idx) instead of asserting ----
    tn = max(8, min(tn, _round_up(N, 8)))
    N_pad = _round_up(N, tn)
    flat_idx = inputs.reshape(N, C).astype(jnp.int32)
    if N_pad != N:
        flat_idx = jnp.pad(flat_idx, ((0, N_pad - N), (0, 0)),
                           constant_values=padding_idx)

    kernel = _make_kernel(C, D, V, Lmax, F_total)
    grid = (N_pad // tn,)
    const = lambda i: (0, 0)   # grid-invariant operands: fetched once, stay in VMEM

    out = pl.pallas_call(
        kernel,
        out_shape=jax.ShapeDtypeStruct((N_pad, out_size), jnp.float32),
        grid_spec=pltpu.PrefetchScalarGridSpec(
            num_scalar_prefetch=0,
            grid=grid,
            in_specs=[
                pl.BlockSpec((tn, C), lambda i: (i, 0)),          # only per-tile HBM read
                pl.BlockSpec((D, V), const),                      # embedding table^T
                pl.BlockSpec((C * D, Lmax * F_total), const),     # fused conv weights
                pl.BlockSpec((1, Lmax * F_total), const),         # conv bias + mask row
                pl.BlockSpec((F_total, out_size), const),         # linear weight^T
                pl.BlockSpec((1, out_size), const),               # linear bias
            ],
            out_specs=pl.BlockSpec((tn, out_size), lambda i: (i, 0)),
        ),
        compiler_params=pltpu.CompilerParams(
            dimension_semantics=("parallel",),        # megacore-shardable on v7x
            vmem_limit_bytes=32 * 1024 * 1024,
        ),
    )(flat_idx, table_t, Wbig, biasmask, lin_w_t, lin_b)

    return out[:N].reshape(B, S, out_size)


def _reference_forward(inputs, params, filters):
    """Plain-JAX reference reproducing the PyTorch forward exactly."""
    B, S, C = inputs.shape
    prec = jax.lax.Precision.HIGHEST
    emb = jnp.take(params["embed"], inputs.reshape(-1, C), axis=0)   # (N, C, D)
    pooled = []
    for fi, (k, nf) in enumerate(filters):
        W = params[f"conv_w_{fi}"]                        # (nf, k, D)
        b = params[f"conv_b_{fi}"]                        # (nf,)
        L = C - k + 1
        score = jnp.zeros((emb.shape[0], L, nf), jnp.float32)
        for j in range(k):
            score = score + jnp.einsum("nld,fd->nlf", emb[:, j:j + L, :], W[:, j, :],
                                       precision=prec)
        act = jnp.tanh(score + b[None, None, :])
        pooled.append(jnp.max(act, axis=1))
    feat = jnp.concatenate(pooled, axis=-1)
    y = jnp.dot(feat, params["lin_w"].T, precision=prec) + params["lin_b"]
    y = jnp.where(y > 0, y, 0.01 * y)
    return y.reshape(B, S, -1)


if __name__ == "__main__":
    # Module config (small, consistent with the PyTorch __init__).
    embedding_num = 20
    embedding_dim = 32
    filters = [(2, 16), (3, 16)]            # (kernel_width, num_filters)
    padding_idx = 0
    conv_output_size = sum(nf for _, nf in filters)       # 32
    output_size = conv_output_size                        # default: output_size=None

    # Input shape: batch=2, seq=8, char_dim=16.
    B, S, C = 2, 8, 16

    key = jax.random.PRNGKey(0)
    keys = jax.random.split(key, 4 + len(filters))
    k_emb, k_in, k_lw, k_lb = keys[0], keys[1], keys[2], keys[3]
    k_filters = keys[4:]

    embed = 0.1 * jax.random.normal(k_emb, (embedding_num, embedding_dim), jnp.float32)
    embed = embed.at[padding_idx].set(0.0)                # padding_idx => zero row

    params = {"embed": embed}
    for fi, (k, nf) in enumerate(filters):
        kw, kb = jax.random.split(k_filters[fi])
        params[f"conv_w_{fi}"] = 0.1 * jax.random.normal(kw, (nf, k, embedding_dim), jnp.float32)
        params[f"conv_b_{fi}"] = 0.1 * jax.random.normal(kb, (nf,), jnp.float32)
    params["lin_w"] = 0.1 * jax.random.normal(k_lw, (output_size, conv_output_size), jnp.float32)
    params["lin_b"] = 0.1 * jax.random.normal(k_lb, (output_size,), jnp.float32)

    inputs = jax.random.randint(k_in, (B, S, C), 0, embedding_num, dtype=jnp.int32)

    out = jax.block_until_ready(
        char_cnn_forward(inputs, params, filters, padding_idx=padding_idx))
    ref = _reference_forward(inputs, params, filters)

    assert out.shape == (B, S, output_size), out.shape
    max_err = float(jnp.max(jnp.abs(out - ref)))
    assert jnp.allclose(out, ref, atol=1e-5, rtol=1e-5), f"mismatch vs reference: {max_err}"

    print("KERNEL_OK")
</pallas_src>

<mosaic_0001>
module attributes {stable_mosaic.version = 11 : i64} {
  func.func @kernel(%arg0: i32, %arg1: memref<16x16xi32, #tpu.memory_space<vmem>>, %arg2: memref<32x20xf32, #tpu.memory_space<vmem>>, %arg3: memref<512x480xf32, #tpu.memory_space<vmem>>, %arg4: memref<1x480xf32, #tpu.memory_space<vmem>>, %arg5: memref<32x32xf32, #tpu.memory_space<vmem>>, %arg6: memref<1x32xf32, #tpu.memory_space<vmem>>, %arg7: memref<16x32xf32, #tpu.memory_space<vmem>>) attributes {dimension_semantics = [#tpu.dimension_semantics<parallel>], iteration_bounds = array<i64: 1>, scalar_prefetch = 0 : i64, scratch_operands = 0 : i64, tpu.core_type = #tpu.core_type<tc>, window_params = [{transform_indices = @transform_0, window_bounds = array<i64: 16, 16>}, {pipeline_mode = #tpu.pipeline_mode<synchronous>, transform_indices = @transform_1, window_bounds = array<i64: 32, 20>}, {pipeline_mode = #tpu.pipeline_mode<synchronous>, transform_indices = @transform_2, window_bounds = array<i64: 512, 480>}, {pipeline_mode = #tpu.pipeline_mode<synchronous>, transform_indices = @transform_3, window_bounds = array<i64: 1, 480>}, {pipeline_mode = #tpu.pipeline_mode<synchronous>, transform_indices = @transform_4, window_bounds = array<i64: 32, 32>}, {pipeline_mode = #tpu.pipeline_mode<synchronous>, transform_indices = @transform_5, window_bounds = array<i64: 1, 32>}, {transform_indices = @transform_6, window_bounds = array<i64: 16, 32>}]} {
    %c0 = arith.constant 0 : index
    %c0_0 = arith.constant 0 : index
    %0 = vector.load %arg1[%c0, %c0_0] : memref<16x16xi32, #tpu.memory_space<vmem>>, vector<16x16xi32>
    %1 = tpu.iota {dimensions = array<i32: 2>} : vector<16x16x20xi32>
    %2 = vector.shape_cast %0 : vector<16x16xi32> to vector<16x16x1xi32>
    %3 = vector.broadcast %2 : vector<16x16x1xi32> to vector<16x16x20xi32>
    %4 = arith.cmpi eq, %3, %1 : vector<16x16x20xi32>
    %5 = arith.extui %4 : vector<16x16x20xi1> to vector<16x16x20xi32>
    %6 = arith.sitofp %5 : vector<16x16x20xi32> to vector<16x16x20xf32>
    %c0_1 = arith.constant 0 : index
    %c0_2 = arith.constant 0 : index
    %7 = vector.load %arg2[%c0_1, %c0_2] : memref<32x20xf32, #tpu.memory_space<vmem>>, vector<32x20xf32>
    %cst = arith.constant dense<0.000000e+00> : vector<16x16x32xf32>
    %8 = tpu.matmul %6, %7, %cst {dimension_numbers = #tpu.dot_dimension_numbers<[2], [1], [0, 1], [0], [0, 0, 0, 1, 1, 0], [], []>, precision = #tpu.contract_precision<fp32>} : vector<16x16x20xf32>, vector<32x20xf32>, vector<16x16x32xf32> -> vector<16x16x32xf32>
    %9 = vector.shape_cast %8 : vector<16x16x32xf32> to vector<16x512xf32>
    %c0_3 = arith.constant 0 : index
    %c0_4 = arith.constant 0 : index
    %10 = vector.load %arg3[%c0_3, %c0_4] : memref<512x480xf32, #tpu.memory_space<vmem>>, vector<512x480xf32>
    %cst_5 = arith.constant dense<0.000000e+00> : vector<16x480xf32>
    %11 = tpu.matmul %9, %10, %cst_5 {dimension_numbers = #tpu.dot_dimension_numbers<[1], [0], [0], [1], [0, 0, 1, 1], [], []>, precision = #tpu.contract_precision<fp32>} : vector<16x512xf32>, vector<512x480xf32>, vector<16x480xf32> -> vector<16x480xf32>
    %c0_6 = arith.constant 0 : index
    %c0_7 = arith.constant 0 : index
    %12 = vector.load %arg4[%c0_6, %c0_7] : memref<1x480xf32, #tpu.memory_space<vmem>>, vector<1x480xf32>
    %13 = vector.broadcast %12 : vector<1x480xf32> to vector<16x480xf32>
    %14 = arith.addf %11, %13 : vector<16x480xf32>
    %15 = math.tanh %14 : vector<16x480xf32>
    %16 = vector.shape_cast %15 : vector<16x480xf32> to vector<16x15x32xf32>
    %cst_8 = arith.constant dense<0xFF800000> : vector<16x32xf32>
    %17 = vector.multi_reduction <maximumf>, %16, %cst_8 [1] : vector<16x15x32xf32> to vector<16x32xf32>
    %c0_9 = arith.constant 0 : index
    %c0_10 = arith.constant 0 : index
    %18 = vector.load %arg5[%c0_9, %c0_10] : memref<32x32xf32, #tpu.memory_space<vmem>>, vector<32x32xf32>
    %cst_11 = arith.constant dense<0.000000e+00> : vector<16x32xf32>
    %19 = tpu.matmul %17, %18, %cst_11 {dimension_numbers = #tpu.dot_dimension_numbers<[1], [0], [0], [1], [0, 0, 1, 1], [], []>, precision = #tpu.contract_precision<fp32>} : vector<16x32xf32>, vector<32x32xf32>, vector<16x32xf32> -> vector<16x32xf32>
    %c0_12 = arith.constant 0 : index
    %c0_13 = arith.constant 0 : index
    %20 = vector.load %arg6[%c0_12, %c0_13] : memref<1x32xf32, #tpu.memory_space<vmem>>, vector<1x32xf32>
    %21 = vector.broadcast %20 : vector<1x32xf32> to vector<16x32xf32>
    %22 = arith.addf %19, %21 : vector<16x32xf32>
    %cst_14 = arith.constant 0.000000e+00 : f32
    %23 = vector.broadcast %cst_14 : f32 to vector<16x32xf32>
    %24 = arith.cmpf ogt, %22, %23 : vector<16x32xf32>
    %cst_15 = arith.constant 0.00999999977 : f32
    %25 = vector.broadcast %cst_15 : f32 to vector<16x32xf32>
    %26 = arith.mulf %25, %22 : vector<16x32xf32>
    %27 = arith.select %24, %22, %26 : vector<16x32xi1>, vector<16x32xf32>
    %c0_16 = arith.constant 0 : index
    %c0_17 = arith.constant 0 : index
    %28 = vector.load %arg7[%c0_16, %c0_17] : memref<16x32xf32, #tpu.memory_space<vmem>>, vector<16x32xf32>
    tpu.vector_store %arg7[%c0_16, %c0_17], %27 {strides = array<i32>} : memref<16x32xf32, #tpu.memory_space<vmem>>, vector<16x32xf32>,
    return
  }
  func.func @transform_0(%arg0: i32) -> (i32, i32) {
    %c0_i32 = arith.constant 0 : i32
    %c0_i32_0 = arith.constant 0 : i32
    return %arg0, %c0_i32 : i32, i32
  }
  func.func @transform_1(%arg0: i32) -> (i32, i32) {
    %c0_i32 = arith.constant 0 : i32
    %c0_i32_0 = arith.constant 0 : i32
    %c0_i32_1 = arith.constant 0 : i32
    return %c0_i32, %c0_i32_0 : i32, i32
  }
  func.func @transform_2(%arg0: i32) -> (i32, i32) {
    %c0_i32 = arith.constant 0 : i32
    %c0_i32_0 = arith.constant 0 : i32
    %c0_i32_1 = arith.constant 0 : i32
    return %c0_i32, %c0_i32_0 : i32, i32
  }
  func.func @transform_3(%arg0: i32) -> (i32, i32) {
    %c0_i32 = arith.constant 0 : i32
    %c0_i32_0 = arith.constant 0 : i32
    %c0_i32_1 = arith.constant 0 : i32
    return %c0_i32, %c0_i32_0 : i32, i32
  }
  func.func @transform_4(%arg0: i32) -> (i32, i32) {
    %c0_i32 = arith.constant 0 : i32
    %c0_i32_0 = arith.constant 0 : i32
    %c0_i32_1 = arith.constant 0 : i32
    return %c0_i32, %c0_i32_0 : i32, i32
  }
  func.func @transform_5(%arg0: i32) -> (i32, i32) {
    %c0_i32 = arith.constant 0 : i32
    %c0_i32_0 = arith.constant 0 : i32
    %c0_i32_1 = arith.constant 0 : i32
    return %c0_i32, %c0_i32_0 : i32, i32
  }
  func.func @transform_6(%arg0: i32) -> (i32, i32) {
    %c0_i32 = arith.constant 0 : i32
    %c0_i32_0 = arith.constant 0 : i32
    return %arg0, %c0_i32 : i32, i32
  }
}

</mosaic_0001>

<bundles_post_ra>
// kernel: tpu_custom_call.1
= control target key start
LH: loop header
LB: loop body
LE: loop exit
PB: predicated region body
PF: predicated region fallthrough
CT: control target
= control target key end

     0   :  { %v26_v0 = vlaneseq  ;;  %s16468_s0 = inlined_call_operand.vmem [shape: s32[16,16], index: 0, kind: input, shape index: {}]   ;;  %s16469_s1 = inlined_call_operand.vmem [shape: f32[32,20], index: 1, kind: input, shape index: {}]   ;;  %s16470_s2 = inlined_call_operand.vmem [shape: f32[512,480], index: 2, kind: input, shape index: {}]   ;;  %s16471_s3 = inlined_call_operand.vmem [shape: f32[1,480], index: 3, kind: input, shape index: {}]   ;;  %s16472_s4 = inlined_call_operand.vmem [shape: f32[32,32], index: 4, kind: input, shape index: {}]   ;;  %s16473_s5 = inlined_call_operand.vmem [shape: f32[1,32], index: 5, kind: input, shape index: {}]   ;;  %s16474_s6 = inlined_call_operand.hbm [shape: f32[16,32], index: 6, kind: output, shape index: {}]  }
   0x1   :  { %11 = vsyncpa [#allocation3], 0  ;;  %v9608_v2 = vld [vmem:[%s16468_s0] sm:$0xff]  ;;  %v335_v8 = vld [vmem:[%s16469_s1 + $0x18] sm:$0xff]  ;;  %vm336_vm0 = vcmask 162816   ;;  %v9556_v44 = vmov 0.0  }
   0x2   :  { %v9601_v1 = vshrl.u32 %v26_v0, 7  ;;  %v28_v3 = vperm.slane %v9608_v2, 0  ;;  %v41_v4 = vperm.slane %v9608_v2, 1  ;;  %v54_v5 = vperm.slane %v9608_v2, 2  ;;  %v334_v15 = vld [vmem:[%s16469_s1 + $0x10] sm:$0xff]  ;;  %v333_v16 = vld [vmem:[%s16469_s1 + $0x8] sm:$0xff] }
   0x3   :  { %v67_v7 = vperm.slane %v9608_v2, 3  ;;  %v443_v9 = vsel %vm336_vm0, %v335_v8, 0  ;;  %v80_v11 = vperm.slane %v9608_v2, 4  ;;  %v440_v17 = vsel %vm336_vm0, %v334_v15, 0  ;;  %v332_v29 = vld [vmem:[%s16469_s1] sm:$0xff]  ;;  %v9652_v40 = vld [vmem:[%s16468_s0 + $0x8] sm:$0xff] }
   0x4   :  { %9488 = vset.pattern.permute.xlu0 %v9601_v1  ;;  %9490 = vset.pattern.permute.xlu1 %v9601_v1  ;;  %v9615_v6 = vadd.s32 8, %v9601_v1  ;;  %v457_v10 = vand.u32 4294901760, %v443_v9  ;;  %v437_v18 = vsel %vm336_vm0, %v333_v16, 0  ;;  %v459_v20 = vand.u32 4294901760, %v440_v17  ;;  %s9559_s0 = smov 96   ;;  %s9560_s8 = smov 64  }
   0x5   :  { %9492 = vset.pattern.permute.xlu2 %v9601_v1  ;;  %v461_v21 = vand.u32 4294901760, %v437_v18  ;;  %v93_v26 = vperm.slane %v9608_v2, 5  ;;  %v434_v30 = vsel %vm336_vm0, %v332_v29, 0  ;;  %v106_v35 = vperm.slane %v9608_v2, 6  ;;  %s9561_s9 = smov 32   ;;  %s9331_s29 = sshll.u32 %s16474_s6, 4  ;;  %s9332_s29 = int_to_ptr.hbm [resolvable:$true] %s9331_s29 }
   0x6   :  { %v735_v12 = vsub.f32 %v443_v9, %v457_v10  ;;  %1085 = vmatpush.xpose.msra.mxu3 %v457_v10  ;;  %458 = vmatpush.xpose.msra.mxu0 %v457_v10  ;;  %v741_v22 = vsub.f32 %v440_v17, %v459_v20  ;;  %v463_v32 = vand.u32 4294901760, %v434_v30  ;;  %v119_v39 = vperm.slane %v9608_v2, 7  ;;  %s9563_s30 = smov 128   ;;  %s9564_s1 = smov 8  }
   0x7   :  { %v747_v23 = vsub.f32 %v437_v18, %v461_v21  ;;  %v132_v41 = vperm.slane %v9652_v40, 0  ;;  %v9658_v42 = vand.u32 127, %v26_v0  ;;  %v145_v46 = vperm.slane %v9652_v40, 1 }
   0x8   :  { %v736_v13 = vand.u32 4294901760, %v735_v12  ;;  %901 = vmatpush.xpose.msra.mxu2 %v735_v12  ;;  %v742_v24 = vand.u32 4294901760, %v741_v22  ;;  %v753_v34 = vsub.f32 %v434_v30, %v463_v32  ;;  %v158_v53 = vperm.slane %v9652_v40, 2 }
   0x9   :  { %v748_v25 = vand.u32 4294901760, %v747_v23  ;;  %v197_v29 = vperm.slane %v9652_v40, 5 }
   0xa   :  { %v737_v14 = vsub.f32 %v735_v12, %v736_v13  ;;  %1087 = vmatpush.xpose.msra.mxu3 %v459_v20  ;;  %460 = vmatpush.xpose.msra.mxu0 %v459_v20  ;;  %v743_v27 = vsub.f32 %v741_v22, %v742_v24  ;;  %v754_v36 = vand.u32 4294901760, %v753_v34 }
   0xb   :  { %v749_v28 = vsub.f32 %v747_v23, %v748_v25 }
   0xc   :  { %33 = vperm.xlu0 %9488, %v28_v3   ;;  %46 = vperm.xlu1 %9490, %v41_v4   ;;  %v738_v19 = vand.u32 4294901760, %v737_v14  ;;  %v744_v31 = vand.u32 4294901760, %v743_v27  ;;  %v755_v37 = vsub.f32 %v753_v34, %v754_v36 }
   0xd   :  { %59 = vperm.xlu2 %9492, %v54_v5   ;;  %904 = vmatpush.xpose.msra.mxu2 %v741_v22  ;;  %v750_v33 = vand.u32 4294901760, %v749_v28 }
   0xe   :  { %739 = vmatpush.xpose.msra.mxu1 %v738_v19  ;;  %1089 = vmatpush.xpose.msra.mxu3 %v461_v21  ;;  %v756_v38 = vand.u32 4294901760, %v755_v37 }
   0xf   :  { %462 = vmatpush.xpose.msra.mxu0 %v461_v21 }
  0x11   :  { %907 = vmatpush.xpose.msra.mxu2 %v747_v23 }
  0x12   :  { %745 = vmatpush.xpose.msra.mxu1 %v744_v31  ;;  %1091 = vmatpush.xpose.msra.mxu3 %v463_v32 }
  0x13   :  { %464 = vmatpush.xpose.msra.mxu0 %v463_v32 }
  0x14   :  { %9489 = vset.pattern.permute.xlu0 %v9615_v6  ;;  %9491 = vset.pattern.permute.xlu1 %v9615_v6 }
  0x15   :  { %9493 = vset.pattern.permute.xlu2 %v9615_v6  ;;  %910 = vmatpush.xpose.msra.mxu2 %v753_v34 }
  0x16   :  { %751 = vmatpush.xpose.msra.mxu1 %v750_v33 }
  0x17   :  { %1300 = vmatpush.xpose.msrb.mxu0 %v736_v13 }
  0x1a   :  { %757 = vmatpush.xpose.msra.mxu1 %v756_v38 }
  0x1b   :  { %1304 = vmatpush.xpose.msrb.mxu0 %v742_v24 }
  0x1c   :  { %39 = vperm.xlu0 %9489, %v28_v3   ;;  %52 = vperm.xlu1 %9491, %v41_v4  }
  0x1d   :  { %65 = vperm.xlu2 %9493, %v54_v5  }
  0x1e   :  { %1455 = vmatpush.xpose.msrb.mxu1 %v457_v10 }
  0x1f   :  { %1308 = vmatpush.xpose.msrb.mxu0 %v748_v25 }
  0x22   :  { %1457 = vmatpush.xpose.msrb.mxu1 %v459_v20  ;;  %v171_v20 = vperm.slane %v9652_v40, 3 }
  0x23   :  { %1312 = vmatpush.xpose.msrb.mxu0 %v754_v36 }
  0x24   :  { %9494 = vset.pattern.permute.xlu1 %v9601_v1  ;;  %9495 = vset.pattern.permute.xlu0 %v9601_v1 }
  0x25   :  { %78 = vperm.xlu2 %9493, %v67_v7  }
  0x26   :  { %1459 = vmatpush.xpose.msrb.mxu1 %v461_v21  ;;  %v184_v21 = vperm.slane %v9652_v40, 4 }
  0x2a   :  { %1461 = vmatpush.xpose.msrb.mxu1 %v463_v32 }
  0x2c   :  { %72 = vperm.xlu1 %9494, %v67_v7   ;;  %85 = vperm.xlu0 %9495, %v80_v11  }
  0x2d   :  { %9497 = vset.pattern.permute.xlu2 %v9601_v1 }
  0x34   :  { %9496 = vset.pattern.permute.xlu1 %v9615_v6  ;;  %9498 = vset.pattern.permute.xlu0 %v9615_v6 }
  0x35   :  { %98 = vperm.xlu2 %9497, %v93_v26  }
  0x3c   :  { %91 = vperm.xlu1 %9496, %v80_v11   ;;  %117 = vperm.xlu0 %9498, %v106_v35  }
  0x3d   :  { %111 = vperm.xlu2 %9497, %v106_v35  }
  0x44   :  { %104 = vperm.xlu1 %9496, %v93_v26   ;;  %9501 = vset.pattern.permute.xlu0 %v9601_v1 }
  0x45   :  { %9500 = vset.pattern.permute.xlu2 %v9615_v6 }
  0x4c   :  { %9499 = vset.pattern.permute.xlu1 %v9601_v1  ;;  %150 = vperm.xlu0 %9501, %v145_v46  }
  0x4d   :  { %130 = vperm.xlu2 %9500, %v119_v39  }
  0x54   :  { %124 = vperm.xlu1 %9499, %v119_v39   ;;  %9504 = vset.pattern.permute.xlu0 %v9615_v6 }
  0x55   :  { %143 = vperm.xlu2 %9500, %v132_v41  }
  0x5c   :  { %137 = vperm.xlu1 %9499, %v132_v41   ;;  %182 = vperm.xlu0 %9504, %v171_v20  }
  0x5d   :  { %9503 = vset.pattern.permute.xlu2 %v9601_v1 }
  0x64   :  { %9502 = vset.pattern.permute.xlu1 %v9615_v6  ;;  %9507 = vset.pattern.permute.xlu0 %v9601_v1 }
  0x65   :  { %163 = vperm.xlu2 %9503, %v158_v53  }
  0x67   :  { %v60_v3 = vpop.permute.xlu2 %59 }
  0x68   :  { %vm240_vm5 = vcmp.eq.s32.totalorder %v60_v3, %v9658_v42 }
  0x69   :  { %v9696_v9 = vsel %vm240_vm5, 1.0, %v9556_v44 }
  0x6a   :  { %v350_v12 = vsel %vm336_vm0, %v9696_v9, 0 }
  0x6b   :  { %v498_v15 = vsub.f32 %v350_v12, %v350_v12 }
  0x6c   :  { %156 = vperm.xlu1 %9502, %v145_v46  }
  0x6d   :  { %v499_v18 = vand.u32 4294901760, %v498_v15  ;;  %176 = vperm.xlu2 %9503, %v171_v20  }
  0x6f   :  { %v500_v23 = vsub.f32 %v498_v15, %v499_v18 }
  0x71   :  { %v501_v27 = vand.u32 4294901760, %v500_v23 }
  0x74   :  { %169 = vperm.xlu1 %9502, %v158_v53  }
  0x75   :  { %9506 = vset.pattern.permute.xlu2 %v9615_v6 }
  0x77   :  { %v66_v13 = vpop.permute.xlu2 %65 }
  0x78   :  { %vm241_vm6 = vcmp.eq.s32.totalorder %v66_v13, %v9658_v42 }
  0x79   :  { %v9704_v16 = vsel %vm241_vm6, 1.0, %v9556_v44 }
  0x7a   :  { %v353_v22 = vsel %vm336_vm0, %v9704_v16, 0 }
  0x7b   :  { %v506_v24 = vsub.f32 %v353_v22, %v353_v22 }
  0x7c   :  { %9505 = vset.pattern.permute.xlu1 %v9601_v1 }
  0x7d   :  { %v507_v28 = vand.u32 4294901760, %v506_v24  ;;  %195 = vperm.xlu2 %9506, %v184_v21  }
  0x7e   :  { %v34_v43 = vpop.permute.xlu0 %33  ;;  %v47_v52 = vpop.permute.xlu1 %46 }
  0x7f   :  { %vm236_vm1 = vcmp.eq.s32.totalorder %v34_v43, %v9658_v42  ;;  %vm238_vm2 = vcmp.eq.s32.totalorder %v47_v52, %v9658_v42  ;;  %v79_v26 = vpop.permute.xlu2 %78  ;;  %v508_v31 = vsub.f32 %v506_v24, %v507_v28 }
  0x80   :  { %v9662_v45 = vsel %vm236_vm1, 1.0, %v9556_v44  ;;  %v9673_v54 = vsel %vm238_vm2, 1.0, %v9556_v44  ;;  %vm243_vm8 = vcmp.eq.s32.totalorder %v79_v26, %v9658_v42 }
  0x81   :  { %9375 = vmatmul.msk.f32.vlgmr.msra.gmra.mxu1 %vm336_vm0, %v9662_v45  ;;  %v338_v47 = vsel %vm336_vm0, %v9662_v45, 0  ;;  %v344_v59 = vsel %vm336_vm0, %v9673_v54, 0  ;;  %v9725_v33 = vsel %vm243_vm8, 1.0, %v9556_v44  ;;  %v509_v34 = vand.u32 4294901760, %v508_v31 }
  0x82   :  { %v466_v48 = vsub.f32 %v338_v47, %v338_v47  ;;  %v482_v62 = vsub.f32 %v344_v59, %v344_v59  ;;  %v359_v37 = vsel %vm336_vm0, %v9725_v33, 0 }
  0x83   :  { %v522_v39 = vsub.f32 %v359_v37, %v359_v37 }
  0x84   :  { %913 = vmatmul.f32.vlgmr.msra.gmra.mxu2 %v466_v48  ;;  %v467_v49 = vand.u32 4294901760, %v466_v48  ;;  %v483_v4 = vand.u32 4294901760, %v482_v62  ;;  %189 = vperm.xlu1 %9505, %v184_v21  }
  0x85   :  { %v523_v46 = vand.u32 4294901760, %v522_v39  ;;  %208 = vperm.xlu2 %9506, %v197_v29  }
  0x86   :  { %1095 = vmatmul.f32.vlgmr.msra.gmra.mxu3 %v467_v49  ;;  %v468_v50 = vsub.f32 %v466_v48, %v467_v49  ;;  %v484_v7 = vsub.f32 %v482_v62, %v483_v4 }
  0x87   :  { %v524_v49 = vsub.f32 %v522_v39, %v523_v46 }
  0x88   :  { %v469_v51 = vand.u32 4294901760, %v468_v50  ;;  %v485_v10 = vand.u32 4294901760, %v484_v7 }
  0x89   :  { %v525_v52 = vand.u32 4294901760, %v524_v49 }
  0x8a   :  { %470 = vmatmul.f32.vlgmr.msra.gmra.mxu0 %v469_v51 }
  0x8c   :  { %202 = vperm.xlu1 %9505, %v197_v29  }
  0x8d   :  { %9509 = vset.pattern.permute.xlu2 %v9601_v1 }
  0x8e   :  { %v40_v55 = vpop.permute.xlu0 %39  ;;  %v53_v57 = vpop.permute.xlu1 %52 }
  0x8f   :  { %vm237_vm3 = vcmp.eq.s32.totalorder %v40_v55, %v9658_v42  ;;  %vm239_vm4 = vcmp.eq.s32.totalorder %v53_v57, %v9658_v42  ;;  %v99_v57 = vpop.permute.xlu2 %98 }
  0x90   :  { %v9677_v56 = vsel %vm237_vm3, 1.0, %v9556_v44  ;;  %v9688_v0 = vsel %vm239_vm4, 1.0, %v9556_v44  ;;  %vm246_vm11 = vcmp.eq.s32.totalorder %v99_v57, %v9658_v42 }
  0x91   :  { %9376 = vmatmul.msk.f32.gmra.mxu1 %vm336_vm0, %v9677_v56  ;;  %v341_v58 = vsel %vm336_vm0, %v9677_v56, 0  ;;  %v347_v5 = vsel %vm336_vm0, %v9688_v0, 0 }
  0x92   :  { %v474_v60 = vsub.f32 %v341_v58, %v341_v58  ;;  %v490_v8 = vsub.f32 %v347_v5, %v347_v5 }
  0x94   :  { %918 = vmatmul.f32.gmra.mxu2 %v474_v60  ;;  %v475_v61 = vand.u32 4294901760, %v474_v60  ;;  %v491_v11 = vand.u32 4294901760, %v490_v8  ;;  %9508 = vset.pattern.permute.xlu1 %v9615_v6 }
  0x96   :  { %1101 = vmatmul.f32.gmra.mxu3 %v475_v61  ;;  %v476_v63 = vsub.f32 %v474_v60, %v475_v61  ;;  %v492_v14 = vsub.f32 %v490_v8, %v491_v11  ;;  %v9751_v60 = vsel %vm246_vm11, 1.0, %v9556_v44 }
  0x97   :  { %v368_v1 = vsel %vm336_vm0, %v9751_v60, 0  ;;  %v112_v7 = vpop.permute.xlu2 %111 }
  0x98   :  { %v477_v2 = vand.u32 4294901760, %v476_v63  ;;  %v493_v17 = vand.u32 4294901760, %v492_v14  ;;  %vm248_vm13 = vcmp.eq.s32.totalorder %v112_v7, %v9658_v42 }
  0x99   :  { %9377 = vmatmul.msk.f32.gmra.mxu1 %vm336_vm0, %v9673_v54 }
  0x9a   :  { %478 = vmatmul.f32.gmra.mxu0 %v477_v2  ;;  %v210_v2 = vperm.slane %v9652_v40, 6 }
  0x9c   :  { %923 = vmatmul.f32.gmra.mxu2 %v482_v62  ;;  %221 = vperm.xlu1 %9508, %v210_v2  }
  0x9d   :  { %215 = vperm.xlu0 %9507, %v210_v2  }
  0x9e   :  { %1107 = vmatmul.f32.gmra.mxu3 %v483_v4  ;;  %v73_v19 = vpop.permute.xlu1 %72  ;;  %v86_v36 = vpop.permute.xlu0 %85  ;;  %v546_v4 = vsub.f32 %v368_v1, %v368_v1 }
  0x9f   :  { %vm242_vm7 = vcmp.eq.s32.totalorder %v73_v19, %v9658_v42  ;;  %vm244_vm9 = vcmp.eq.s32.totalorder %v86_v36, %v9658_v42 }
  0xa0   :  { %v9714_v25 = vsel %vm242_vm7, 1.0, %v9556_v44  ;;  %v9734_v41 = vsel %vm244_vm9, 1.0, %v9556_v44 }
  0xa1   :  { %9378 = vmatmul.msk.f32.gmra.mxu1 %vm336_vm0, %v9688_v0  ;;  %v356_v30 = vsel %vm336_vm0, %v9714_v25, 0  ;;  %v362_v47 = vsel %vm336_vm0, %v9734_v41, 0 }
  0xa2   :  { %486 = vmatmul.f32.gmra.mxu0 %v485_v10  ;;  %v514_v32 = vsub.f32 %v356_v30, %v356_v30  ;;  %v530_v50 = vsub.f32 %v362_v47, %v362_v47  ;;  %v547_v10 = vand.u32 4294901760, %v546_v4 }
  0xa4   :  { %928 = vmatmul.f32.gmra.mxu2 %v490_v8  ;;  %v515_v35 = vand.u32 4294901760, %v514_v32  ;;  %v531_v53 = vand.u32 4294901760, %v530_v50  ;;  %v548_v13 = vsub.f32 %v546_v4, %v547_v10 }
  0xa5   :  { %9510 = vset.pattern.permute.xlu0 %v9615_v6 }
  0xa6   :  { %1113 = vmatmul.f32.gmra.mxu3 %v491_v11  ;;  %v516_v38 = vsub.f32 %v514_v32, %v515_v35  ;;  %v532_v58 = vsub.f32 %v530_v50, %v531_v53  ;;  %v223_v11 = vperm.slane %v9652_v40, 7  ;;  %v549_v40 = vand.u32 4294901760, %v548_v13 }
  0xa8   :  { %v517_v43 = vand.u32 4294901760, %v516_v38  ;;  %v533_v62 = vand.u32 4294901760, %v532_v58  ;;  %234 = vperm.xlu1 %9508, %v223_v11   ;;  %228 = vperm.xlu2 %9509, %v223_v11  }
  0xa9   :  { %9379 = vmatmul.msk.f32.gmra.mxu1 %vm336_vm0, %v9696_v9 }
  0xaa   :  { %494 = vmatmul.f32.gmra.mxu0 %v493_v17 }
  0xac   :  { %933 = vmatmul.f32.gmra.mxu2 %v498_v15  ;;  %v9770_v15 = vsel %vm248_vm13, 1.0, %v9556_v44 }
  0xad   :  { %v374_v19 = vsel %vm336_vm0, %v9770_v15, 0 }
  0xae   :  { %1119 = vmatmul.f32.gmra.mxu3 %v499_v18  ;;  %v92_v48 = vpop.permute.xlu1 %91  ;;  %v118_v18 = vpop.permute.xlu0 %117  ;;  %v562_v20 = vsub.f32 %v374_v19, %v374_v19 }
  0xaf   :  { %vm245_vm10 = vcmp.eq.s32.totalorder %v92_v48, %v9658_v42  ;;  %vm249_vm14 = vcmp.eq.s32.totalorder %v118_v18, %v9658_v42 }
  0xb0   :  { %v9742_v51 = vsel %vm245_vm10, 1.0, %v9556_v44  ;;  %v9778_v21 = vsel %vm249_vm14, 1.0, %v9556_v44  ;;  %v563_v23 = vand.u32 4294901760, %v562_v20 }
  0xb1   :  { %9380 = vmatmul.msk.f32.gmra.mxu1 %vm336_vm0, %v9704_v16  ;;  %v365_v55 = vsel %vm336_vm0, %v9742_v51, 0 }
  0xb2   :  { %502 = vmatmul.f32.gmra.mxu0 %v501_v27  ;;  %v538_v59 = vsub.f32 %v365_v55, %v365_v55  ;;  %v564_v27 = vsub.f32 %v562_v20, %v563_v23 }
  0xb4   :  { %938 = vmatmul.f32.gmra.mxu2 %v506_v24  ;;  %v539_v63 = vand.u32 4294901760, %v538_v59  ;;  %v377_v24 = vsel %vm336_vm0, %v9778_v21, 0  ;;  %v565_v30 = vand.u32 4294901760, %v564_v27 }
  0xb6   :  { %1125 = vmatmul.f32.gmra.mxu3 %v507_v28  ;;  %v105_v61 = vpop.permute.xlu1 %104  ;;  %v540_v3 = vsub.f32 %v538_v59, %v539_v63  ;;  %v570_v28 = vsub.f32 %v377_v24, %v377_v24 }
  0xb7   :  { %vm247_vm12 = vcmp.eq.s32.totalorder %v105_v61, %v9658_v42 }
  0xb8   :  { %v9760_v5 = vsel %vm247_vm12, 1.0, %v9556_v44  ;;  %v541_v8 = vand.u32 4294901760, %v540_v3  ;;  %v571_v31 = vand.u32 4294901760, %v570_v28 }
  0xb9   :  { %9381 = vmatmul.msk.f32.gmra.mxu1 %vm336_vm0, %v9714_v25  ;;  %v371_v12 = vsel %vm336_vm0, %v9760_v5, 0 }
  0xba   :  { %510 = vmatmul.f32.gmra.mxu0 %v509_v34  ;;  %v554_v14 = vsub.f32 %v371_v12, %v371_v12  ;;  %v131_v34 = vpop.permute.xlu2 %130 }
  0xbb   :  { %vm251_vm1 = vcmp.eq.s32.totalorder %v131_v34, %v9658_v42 }
  0xbc   :  { %943 = vmatmul.f32.gmra.mxu2 %v514_v32  ;;  %v555_v17 = vand.u32 4294901760, %v554_v14  ;;  %v9794_v37 = vsel %vm251_vm1, 1.0, %v9556_v44 }
  0xbe   :  { %1131 = vmatmul.f32.gmra.mxu3 %v515_v35  ;;  %v556_v6 = vsub.f32 %v554_v14, %v555_v17  ;;  %v572_v35 = vsub.f32 %v570_v28, %v571_v31  ;;  %v151_v2 = vpop.permute.xlu0 %150 }
  0xbf   :  { %vm254_vm4 = vcmp.eq.s32.totalorder %v151_v2, %v9658_v42 }
  0xc0   :  { %v557_v22 = vand.u32 4294901760, %v556_v6 }
  0xc1   :  { %9382 = vmatmul.msk.f32.gmra.mxu1 %vm336_vm0, %v9725_v33 }
  0xc2   :  { %518 = vmatmul.f32.gmra.mxu0 %v517_v43 }
  0xc4   :  { %948 = vmatmul.f32.gmra.mxu2 %v522_v39  ;;  %v573_v39 = vand.u32 4294901760, %v572_v35 }
  0xc6   :  { %1137 = vmatmul.f32.gmra.mxu3 %v523_v46  ;;  %v125_v26 = vpop.permute.xlu1 %124  ;;  %v383_v46 = vsel %vm336_vm0, %v9794_v37, 0 }
  0xc7   :  { %vm250_vm15 = vcmp.eq.s32.totalorder %v125_v26, %v9658_v42  ;;  %v586_v48 = vsub.f32 %v383_v46, %v383_v46 }
  0xc8   :  { %v9786_v29 = vsel %vm250_vm15, 1.0, %v9556_v44 }
  0xc9   :  { %9383 = vmatmul.msk.f32.gmra.mxu1 %vm336_vm0, %v9734_v41  ;;  %v380_v32 = vsel %vm336_vm0, %v9786_v29, 0 }
  0xca   :  { %526 = vmatmul.f32.gmra.mxu0 %v525_v52  ;;  %v578_v36 = vsub.f32 %v380_v32, %v380_v32 }
  0xcc   :  { %953 = vmatmul.f32.gmra.mxu2 %v530_v50  ;;  %v579_v43 = vand.u32 4294901760, %v578_v36  ;;  %v144_v50 = vpop.permute.xlu2 %143 }
  0xcd   :  { %vm253_vm3 = vcmp.eq.s32.totalorder %v144_v50, %v9658_v42 }
  0xce   :  { %1143 = vmatmul.f32.gmra.mxu3 %v531_v53  ;;  %v138_v38 = vpop.permute.xlu1 %137  ;;  %v580_v47 = vsub.f32 %v578_v36, %v579_v43  ;;  %v587_v53 = vand.u32 4294901760, %v586_v48 }
  0xcf   :  { %vm252_vm2 = vcmp.eq.s32.totalorder %v138_v38, %v9658_v42 }
  0xd0   :  { %v9802_v49 = vsel %vm252_vm2, 1.0, %v9556_v44  ;;  %v581_v52 = vand.u32 4294901760, %v580_v47  ;;  %v588_v57 = vsub.f32 %v586_v48, %v587_v53 }
  0xd1   :  { %9384 = vmatmul.msk.f32.gmra.mxu1 %vm336_vm0, %v9742_v51  ;;  %v386_v55 = vsel %vm336_vm0, %v9802_v49, 0 }
  0xd2   :  { %534 = vmatmul.f32.gmra.mxu0 %v533_v62  ;;  %v594_v58 = vsub.f32 %v386_v55, %v386_v55  ;;  %v589_v62 = vand.u32 4294901760, %v588_v57 }
  0xd4   :  { %958 = vmatmul.f32.gmra.mxu2 %v538_v59  ;;  %v9810_v59 = vsel %vm253_vm3, 1.0, %v9556_v44  ;;  %v164_v32 = vpop.permute.xlu2 %163  ;;  %vm1592_vm3 = vcmask 1047556  }
  0xd5   :  { %v389_v1 = vsel %vm336_vm0, %v9810_v59, 0  ;;  %vm256_vm6 = vcmp.eq.s32.totalorder %v164_v32, %v9658_v42 }
  0xd6   :  { %1149 = vmatmul.f32.gmra.mxu3 %v539_v63  ;;  %v595_v63 = vand.u32 4294901760, %v594_v58  ;;  %v9844_v38 = vsel %vm256_vm6, 1.0, %v9556_v44  ;;  %vm8908_vm6 = vcmask 260096  }
  0xd7   :  { %v398_v55 = vsel %vm336_vm0, %v9844_v38, 0 }
  0xd8   :  { %v596_v3 = vsub.f32 %v594_v58, %v595_v63 }
  0xd9   :  { %9385 = vmatmul.msk.f32.gmra.mxu1 %vm336_vm0, %v9751_v60 }
  0xda   :  { %542 = vmatmul.f32.gmra.mxu0 %v541_v8  ;;  %v9820_v8 = vsel %vm254_vm4, 1.0, %v9556_v44  ;;  %v597_v12 = vand.u32 4294901760, %v596_v3  ;;  %vm2139_vm4 = vcmask 523264  }
  0xdc   :  { %963 = vmatmul.f32.gmra.mxu2 %v546_v4  ;;  %v602_v4 = vsub.f32 %v389_v1, %v389_v1 }
  0xde   :  { %1155 = vmatmul.f32.gmra.mxu3 %v547_v10  ;;  %v603_v13 = vand.u32 4294901760, %v602_v4 }
  0xe0   :  { %v604_v18 = vsub.f32 %v602_v4, %v603_v13 }
  0xe1   :  { %9386 = vmatmul.msk.f32.gmra.mxu1 %vm336_vm0, %v9760_v5 }
  0xe2   :  { %550 = vmatmul.f32.gmra.mxu0 %v549_v40  ;;  %v392_v40 = vsel %vm336_vm0, %v9820_v8, 0  ;;  %v605_v26 = vand.u32 4294901760, %v604_v18 }
  0xe3   :  { %v610_v19 = vsub.f32 %v392_v40, %v392_v40 }
  0xe4   :  { %968 = vmatmul.f32.gmra.mxu2 %v554_v14 }
  0xe5   :  { %v611_v27 = vand.u32 4294901760, %v610_v19 }
  0xe6   :  { %1161 = vmatmul.f32.gmra.mxu3 %v555_v17  ;;  %v157_v17 = vpop.permute.xlu1 %156 }
  0xe7   :  { %vm255_vm5 = vcmp.eq.s32.totalorder %v157_v17, %v9658_v42  ;;  %v612_v35 = vsub.f32 %v610_v19, %v611_v27 }
  0xe8   :  { %v9834_v6 = vsel %vm255_vm5, 1.0, %v9556_v44  ;;  %vm2142_vm5 = vcmask 785408  }
  0xe9   :  { %9387 = vmatmul.msk.f32.gmra.mxu1 %vm336_vm0, %v9770_v15  ;;  %v613_v50 = vand.u32 4294901760, %v612_v35  ;;  %v183_v35 = vpop.permute.xlu0 %182 }
  0xea   :  { %558 = vmatmul.f32.gmra.mxu0 %v557_v22  ;;  %vm259_vm9 = vcmp.eq.s32.totalorder %v183_v35, %v9658_v42 }
  0xec   :  { %973 = vmatmul.f32.gmra.mxu2 %v562_v20 }
  0xee   :  { %1167 = vmatmul.f32.gmra.mxu3 %v563_v23  ;;  %v170_v47 = vpop.permute.xlu1 %169 }
  0xef   :  { %vm257_vm7 = vcmp.eq.s32.totalorder %v170_v47, %v9658_v42 }
  0xf0   :  { %v9854_v2 = vsel %vm257_vm7, 1.0, %v9556_v44  ;;  %vm9076_vm7 = vcmask 1041409  }
  0xf1   :  { %9388 = vmatmul.msk.f32.gmra.mxu1 %vm336_vm0, %v9778_v21  ;;  %v401_v18 = vsel %vm336_vm0, %v9854_v2, 0 }
  0xf2   :  { %566 = vmatmul.f32.gmra.mxu0 %v565_v30  ;;  %v395_v30 = vsel %vm336_vm0, %v9834_v6, 0 }
  0xf4   :  { %978 = vmatmul.f32.gmra.mxu2 %v570_v28 }
  0xf6   :  { %1173 = vmatmul.f32.gmra.mxu3 %v571_v31 }
  0xf9   :  { %9389 = vmatmul.msk.f32.gmra.mxu1 %vm336_vm0, %v9786_v29 }
  0xfa   :  { %574 = vmatmul.f32.gmra.mxu0 %v573_v39 }
  0xfc   :  { %983 = vmatmul.f32.gmra.mxu2 %v578_v36  ;;  %v618_v36 = vsub.f32 %v395_v30, %v395_v30 }
  0xfe   :  { %1179 = vmatmul.f32.gmra.mxu3 %v579_v43  ;;  %v9812_v61 = vpop.f32.mrf.mxu1 }
 0x101   :  { %9390 = vmatmul.msk.f32.gmra.mxu1 %vm336_vm0, %v9794_v37 }
 0x102   :  { %582 = vmatmul.f32.gmra.mxu0 %v581_v52  ;;  %v619_v52 = vand.u32 4294901760, %v618_v36 }
 0x104   :  { %988 = vmatmul.f32.gmra.mxu2 %v586_v48 }
 0x106   :  { %1185 = vmatmul.f32.gmra.mxu3 %v587_v53 }
 0x107   :  { %v9822_v10 = vpop.f32.mrf.mxu0  ;;  %v9824_v11 = vpop.f32.mrf.mxu2 }
 0x109   :  { %9391 = vmatmul.msk.f32.gmra.mxu1 %vm336_vm0, %v9802_v49  ;;  %v9826_v14 = vpop.f32.mrf.mxu3 }
 0x10a   :  { %590 = vmatmul.f32.gmra.mxu0 %v589_v62  ;;  %v620_v62 = vsub.f32 %v618_v36, %v619_v52 }
 0x10c   :  { %993 = vmatmul.f32.gmra.mxu2 %v594_v58 }
 0x10e   :  { %v764_v7 = vpop.f32.mrf.mxu1  ;;  %1191 = vmatmul.f32.gmra.mxu3 %v595_v63  ;;  %v626_v63 = vsub.f32 %v398_v55, %v398_v55 }
 0x110   :  { %v627_v40 = vand.u32 4294901760, %v626_v63 }
 0x111   :  { %9392 = vmatmul.msk.f32.gmra.mxu1 %vm336_vm0, %v9810_v59 }
 0x112   :  { %598 = vmatmul.f32.gmra.mxu0 %v597_v12 }
 0x114   :  { %998 = vmatmul.f32.gmra.mxu2 %v602_v4 }
 0x116   :  { %v768_v20 = vpop.f32.mrf.mxu1  ;;  %1197 = vmatmul.f32.gmra.mxu3 %v603_v13  ;;  %v621_v13 = vand.u32 4294901760, %v620_v62 }
 0x117   :  { %v479_v22 = vpop.f32.mrf.mxu0  ;;  %v919_v23 = vpop.f32.mrf.mxu2 }
 0x118   :  { %v765_v24 = vadd.f32 %v764_v7, %v479_v22  ;;  %v177_v7 = vpop.permute.xlu2 %176  ;;  %v628_v22 = vsub.f32 %v626_v63, %v627_v40 }
 0x119   :  { %9393 = vmatmul.msk.f32.gmra.mxu1 %vm336_vm0, %v9820_v8  ;;  %v1102_v28 = vpop.f32.mrf.mxu3  ;;  %vm258_vm8 = vcmp.eq.s32.totalorder %v177_v7, %v9658_v42  ;;  %v190_v7 = vpop.permute.xlu1 %189 }
 0x11a   :  { %v920_v31 = vadd.f32 %v919_v23, %v765_v24  ;;  %606 = vmatmul.f32.gmra.mxu0 %v605_v26  ;;  %v634_v23 = vsub.f32 %v401_v18, %v401_v18  ;;  %v9864_v24 = vsel %vm258_vm8, 1.0, %v9556_v44  ;;  %vm260_vm10 = vcmp.eq.s32.totalorder %v190_v7, %v9658_v42 }
 0x11b   :  { %vm9078_vm8 = vcmask 1042434  }
 0x11c   :  { %v9841_v34 = vadd.f32 %v1102_v28, %v920_v31  ;;  %1003 = vmatmul.f32.gmra.mxu2 %v610_v19  ;;  %v629_v31 = vand.u32 4294901760, %v628_v22  ;;  %v635_v32 = vand.u32 4294901760, %v634_v23 }
 0x11e   :  { %v772_v39 = vpop.f32.mrf.mxu1  ;;  %1203 = vmatmul.f32.gmra.mxu3 %v611_v27  ;;  %v636_v47 = vsub.f32 %v634_v23, %v635_v32 }
 0x11f   :  { %v487_v43 = vpop.f32.mrf.mxu0  ;;  %v924_v46 = vpop.f32.mrf.mxu2 }
 0x120   :  { %v769_v48 = vadd.f32 %v768_v20, %v487_v43  ;;  %v637_v62 = vand.u32 4294901760, %v636_v47 }
 0x121   :  { %9394 = vmatmul.msk.f32.gmra.mxu1 %vm336_vm0, %v9834_v6  ;;  %v1108_v53 = vpop.f32.mrf.mxu3 }
 0x122   :  { %v925_v57 = vadd.f32 %v924_v46, %v769_v48  ;;  %614 = vmatmul.f32.gmra.mxu0 %v613_v50 }
 0x124   :  { %v9851_v58 = vadd.f32 %v1108_v53, %v925_v57  ;;  %1008 = vmatmul.f32.gmra.mxu2 %v618_v36 }
 0x126   :  { %v776_v1 = vpop.f32.mrf.mxu1  ;;  %1209 = vmatmul.f32.gmra.mxu3 %v619_v52  ;;  %v9874_v52 = vsel %vm259_vm9, 1.0, %v9556_v44  ;;  %vm9080_vm9 = vcmask 1043459  }
 0x127   :  { %v495_v3 = vpop.f32.mrf.mxu0  ;;  %v929_v4 = vpop.f32.mrf.mxu2 }
 0x128   :  { %v773_v12 = vadd.f32 %v772_v39, %v495_v3  ;;  %v404_v39 = vsel %vm336_vm0, %v9864_v24, 0  ;;  %v407_v3 = vsel %vm336_vm0, %v9874_v52, 0 }
 0x129   :  { %9395 = vmatmul.msk.f32.gmra.mxu1 %vm336_vm0, %v9844_v38  ;;  %v1114_v17 = vpop.f32.mrf.mxu3  ;;  %v642_v48 = vsub.f32 %v404_v39, %v404_v39 }
 0x12a   :  { %v930_v19 = vadd.f32 %v929_v4, %v773_v12  ;;  %622 = vmatmul.f32.gmra.mxu0 %v621_v13 }
 0x12c   :  { %v9861_v20 = vadd.f32 %v1114_v17, %v930_v19  ;;  %1013 = vmatmul.f32.gmra.mxu2 %v626_v63  ;;  %v643_v63 = vand.u32 4294901760, %v642_v48  ;;  %v9884_v17 = vsel %vm260_vm10, 1.0, %v9556_v44  ;;  %vm9082_vm10 = vcmask 1044484  }
 0x12e   :  { %v780_v26 = vpop.f32.mrf.mxu1  ;;  %1215 = vmatmul.f32.gmra.mxu3 %v627_v40  ;;  %v644_v13 = vsub.f32 %v642_v48, %v643_v63  ;;  %v650_v40 = vsub.f32 %v407_v3, %v407_v3 }
 0x12f   :  { %v503_v27 = vpop.f32.mrf.mxu0  ;;  %v934_v28 = vpop.f32.mrf.mxu2 }
 0x130   :  { %v777_v30 = vadd.f32 %v776_v1, %v503_v27  ;;  %v651_v27 = vand.u32 4294901760, %v650_v40 }
 0x131   :  { %9396 = vmatmul.msk.f32.gmra.mxu1 %vm336_vm0, %v9854_v2  ;;  %v1120_v36 = vpop.f32.mrf.mxu3 }
 0x132   :  { %v935_v43 = vadd.f32 %v934_v28, %v777_v30  ;;  %630 = vmatmul.f32.gmra.mxu0 %v629_v31  ;;  %v410_v30 = vsel %vm336_vm0, %v9884_v17, 0 }
 0x133   :  { %v658_v39 = vsub.f32 %v410_v30, %v410_v30 }
 0x134   :  { %v9871_v46 = vadd.f32 %v1120_v36, %v935_v43  ;;  %1018 = vmatmul.f32.gmra.mxu2 %v634_v23  ;;  %v652_v36 = vsub.f32 %v650_v40, %v651_v27 }
 0x136   :  { %v784_v50 = vpop.f32.mrf.mxu1  ;;  %1221 = vmatmul.f32.gmra.mxu3 %v635_v32  ;;  %v196_v32 = vpop.permute.xlu2 %195 }
 0x137   :  { %v511_v53 = vpop.f32.mrf.mxu0  ;;  %v939_v55 = vpop.f32.mrf.mxu2  ;;  %vm261_vm11 = vcmp.eq.s32.totalorder %v196_v32, %v9658_v42 }
 0x138   :  { %v781_v57 = vadd.f32 %v780_v26, %v511_v53  ;;  %v645_v26 = vand.u32 4294901760, %v644_v13  ;;  %v9894_v43 = vsel %vm261_vm11, 1.0, %v9556_v44  ;;  %vm9084_vm11 = vcmask 1045509  }
 0x139   :  { %9397 = vmatmul.msk.f32.gmra.mxu1 %vm336_vm0, %v9864_v24  ;;  %v1126_v1 = vpop.f32.mrf.mxu3 }
 0x13a   :  { %v940_v4 = vadd.f32 %v939_v55, %v781_v57  ;;  %638 = vmatmul.f32.gmra.mxu0 %v637_v62  ;;  %v653_v55 = vand.u32 4294901760, %v652_v36  ;;  %v659_v57 = vand.u32 4294901760, %v658_v39 }
 0x13c   :  { %v9881_v12 = vadd.f32 %v1126_v1, %v940_v4  ;;  %1023 = vmatmul.f32.gmra.mxu2 %v642_v48  ;;  %v660_v7 = vsub.f32 %v658_v39, %v659_v57 }
 0x13e   :  { %v788_v18 = vpop.f32.mrf.mxu1  ;;  %1227 = vmatmul.f32.gmra.mxu3 %v643_v63  ;;  %v413_v63 = vsel %vm336_vm0, %v9894_v43, 0 }
 0x13f   :  { %v519_v19 = vpop.f32.mrf.mxu0  ;;  %v944_v22 = vpop.f32.mrf.mxu2  ;;  %v666_v13 = vsub.f32 %v413_v63, %v413_v63 }
 0x140   :  { %v785_v23 = vadd.f32 %v784_v50, %v519_v19  ;;  %v203_v50 = vpop.permute.xlu1 %202 }
 0x141   :  { %9398 = vmatmul.msk.f32.gmra.mxu1 %vm336_vm0, %v9874_v52  ;;  %v1132_v28 = vpop.f32.mrf.mxu3  ;;  %vm262_vm12 = vcmp.eq.s32.totalorder %v203_v50, %v9658_v42  ;;  %v216_v50 = vpop.permute.xlu0 %215 }
 0x142   :  { %v945_v31 = vadd.f32 %v944_v22, %v785_v23  ;;  %646 = vmatmul.f32.gmra.mxu0 %v645_v26  ;;  %v209_v22 = vpop.permute.xlu2 %208  ;;  %v661_v23 = vand.u32 4294901760, %v660_v7  ;;  %v667_v26 = vand.u32 4294901760, %v666_v13  ;;  %vm264_vm14 = vcmp.eq.s32.totalorder %v216_v50, %v9658_v42 }
 0x143   :  { %vm263_vm13 = vcmp.eq.s32.totalorder %v209_v22, %v9658_v42  ;;  %v9932_v63 = vsel %vm264_vm14, 1.0, %v9556_v44 }
 0x144   :  { %v9891_v35 = vadd.f32 %v1132_v28, %v945_v31  ;;  %1028 = vmatmul.f32.gmra.mxu2 %v650_v40  ;;  %v9906_v40 = vsel %vm262_vm12, 1.0, %v9556_v44  ;;  %v668_v28 = vsub.f32 %v666_v13, %v667_v26  ;;  %v9918_v31 = vsel %vm263_vm13, 1.0, %v9556_v44 }
 0x145   :  { %vm9086_vm12 = vcmask 1046534   ;;  %vm9088_vm13 = vcmask 1047559  }
 0x146   :  { %v9896_v47 = vpop.f32.mrf.mxu1  ;;  %1233 = vmatmul.f32.gmra.mxu3 %v651_v27  ;;  %v416_v27 = vsel %vm336_vm0, %v9906_v40, 0 }
 0x147   :  { %v527_v48 = vpop.f32.mrf.mxu0  ;;  %v949_v62 = vpop.f32.mrf.mxu2  ;;  %v674_v30 = vsub.f32 %v416_v27, %v416_v27 }
 0x148   :  { %v789_v53 = vadd.f32 %v788_v18, %v527_v48  ;;  %v222_v22 = vpop.permute.xlu1 %221 }
 0x149   :  { %9399 = vmatmul.msk.f32.gmra.mxu1 %vm336_vm0, %v9884_v17  ;;  %v1138_v3 = vpop.f32.mrf.mxu3  ;;  %v675_v48 = vand.u32 4294901760, %v674_v30  ;;  %vm265_vm15 = vcmp.eq.s32.totalorder %v222_v22, %v9658_v42 }
 0x14a   :  { %v950_v1 = vadd.f32 %v949_v62, %v789_v53  ;;  %654 = vmatmul.f32.gmra.mxu0 %v653_v55  ;;  %v419_v53 = vsel %vm336_vm0, %v9918_v31, 0  ;;  %v9942_v27 = vsel %vm265_vm15, 1.0, %v9556_v44  ;;  %v229_v50 = vpop.permute.xlu2 %228 }
 0x14b   :  { %v676_v55 = vsub.f32 %v674_v30, %v675_v48  ;;  %vm266_vm1 = vcmp.eq.s32.totalorder %v229_v50, %v9658_v42 }
 0x14c   :  { %v9903_v4 = vadd.f32 %v1138_v3, %v950_v1  ;;  %1033 = vmatmul.f32.gmra.mxu2 %v658_v39  ;;  %v669_v39 = vand.u32 4294901760, %v668_v28 }
 0x14d   :  { %v677_v3 = vand.u32 4294901760, %v676_v55 }
 0x14e   :  { %v9908_v18 = vpop.f32.mrf.mxu1  ;;  %1239 = vmatmul.f32.gmra.mxu3 %v659_v57  ;;  %v682_v57 = vsub.f32 %v419_v53, %v419_v53  ;;  %v425_v53 = vsel %vm336_vm0, %v9942_v27, 0 }
 0x14f   :  { %v9910_v19 = vpop.f32.mrf.mxu0 }
 0x150   :  { %v683_v7 = vand.u32 4294901760, %v682_v57  ;;  %v235_v22 = vpop.permute.xlu1 %234 }
 0x151   :  { %9400 = vmatmul.msk.f32.gmra.mxu1 %vm336_vm0, %v9894_v43  ;;  %vm267_vm2 = vcmp.eq.s32.totalorder %v235_v22, %v9658_v42 }
 0x152   :  { %662 = vmatmul.f32.gmra.mxu0 %v661_v23  ;;  %v684_v23 = vsub.f32 %v682_v57, %v683_v7  ;;  %v9966_v50 = vsel %vm267_vm2, 1.0, %v9556_v44 }
 0x154   :  { %1038 = vmatmul.f32.gmra.mxu2 %v666_v13  ;;  %v422_v13 = vsel %vm336_vm0, %v9932_v63, 0 }
 0x156   :  { %v9920_v32 = vpop.f32.mrf.mxu1  ;;  %1245 = vmatmul.f32.gmra.mxu3 %v667_v26  ;;  %v690_v26 = vsub.f32 %v422_v13, %v422_v13 }
 0x157   :  { %17451 = vst [vmem:[#allocation5_spill] sm:$0xff] %v9920_v32  ;;  %v9922_v36 = vpop.f32.mrf.mxu0 }
 0x159   :  { %9401 = vmatmul.msk.f32.gmra.mxu1 %vm336_vm0, %v9906_v40 }
 0x15a   :  { %670 = vmatmul.f32.gmra.mxu0 %v669_v39  ;;  %v685_v39 = vand.u32 4294901760, %v684_v23 }
 0x15c   :  { %1043 = vmatmul.f32.gmra.mxu2 %v674_v30 }
 0x15e   :  { %v9929_v62 = vpop.f32.mrf.mxu1  ;;  %1251 = vmatmul.f32.gmra.mxu3 %v675_v48  ;;  %v691_v48 = vand.u32 4294901760, %v690_v26 }
 0x15f   :  { %17452 = vst [vmem:[#allocation6_spill] sm:$0xff] %v9929_v62  ;;  %v9934_v1 = vpop.f32.mrf.mxu0 }
 0x160   :  { %v692_v55 = vsub.f32 %v690_v26, %v691_v48 }
 0x161   :  { %9402 = vmatmul.msk.f32.gmra.mxu1 %vm336_vm0, %v9918_v31 }
 0x162   :  { %678 = vmatmul.f32.gmra.mxu0 %v677_v3  ;;  %v693_v23 = vand.u32 4294901760, %v692_v55 }
 0x164   :  { %1048 = vmatmul.f32.gmra.mxu2 %v682_v57  ;;  %v698_v57 = vsub.f32 %v425_v53, %v425_v53 }
 0x166   :  { %v9944_v28 = vpop.f32.mrf.mxu1  ;;  %1257 = vmatmul.f32.gmra.mxu3 %v683_v7  ;;  %v9956_v7 = vsel %vm266_vm1, 1.0, %v9556_v44  ;;  %v699_v62 = vand.u32 4294901760, %v698_v57 }
 0x167   :  { %v9946_v30 = vpop.f32.mrf.mxu0  ;;  %17454 = vst [vmem:[#allocation8_spill] sm:$0xff] %v9956_v7 }
 0x168   :  { %17453 = vst [vmem:[#allocation7_spill] sm:$0xff] %v9946_v30 }
 0x169   :  { %9403 = vmatmul.msk.f32.gmra.mxu1 %vm336_vm0, %v9932_v63 }
 0x16a   :  { %686 = vmatmul.f32.gmra.mxu0 %v685_v39  ;;  %v428_v39 = vsel %vm336_vm0, %v9956_v7, 0 }
 0x16c   :  { %1053 = vmatmul.f32.gmra.mxu2 %v690_v26  ;;  %v700_v26 = vsub.f32 %v698_v57, %v699_v62 }
 0x16e   :  { %v9953_v3 = vpop.f32.mrf.mxu1  ;;  %1263 = vmatmul.f32.gmra.mxu3 %v691_v48  ;;  %v706_v48 = vsub.f32 %v428_v39, %v428_v39  ;;  %v701_v30 = vand.u32 4294901760, %v700_v26 }
 0x16f   :  { %v9958_v13 = vpop.f32.mrf.mxu0 }
 0x170   :  { %v707_v32 = vand.u32 4294901760, %v706_v48 }
 0x171   :  { %9404 = vmatmul.msk.f32.gmra.mxu1 %vm336_vm0, %v9942_v27 }
 0x172   :  { %694 = vmatmul.f32.gmra.mxu0 %v693_v23  ;;  %v431_v23 = vsel %vm336_vm0, %v9966_v50, 0  ;;  %v708_v42 = vsub.f32 %v706_v48, %v707_v32 }
 0x174   :  { %1058 = vmatmul.f32.gmra.mxu2 %v698_v57  ;;  %v714_v57 = vsub.f32 %v431_v23, %v431_v23 }
 0x176   :  { %v9968_v53 = vpop.f32.mrf.mxu1  ;;  %1269 = vmatmul.f32.gmra.mxu3 %v699_v62  ;;  %v709_v62 = vand.u32 4294901760, %v708_v42  ;;  %v715_v39 = vand.u32 4294901760, %v714_v57 }
 0x177   :  { %v9970_v55 = vpop.f32.mrf.mxu0 }
 0x178   :  { %v716_v26 = vsub.f32 %v714_v57, %v715_v39 }
 0x179   :  { %9405 = vmatmul.msk.f32.gmra.mxu1 %vm336_vm0, %v9956_v7 }
 0x17a   :  { %702 = vmatmul.f32.gmra.mxu0 %v701_v30 }
 0x17c   :  { %1063 = vmatmul.f32.gmra.mxu2 %v706_v48  ;;  %v717_v48 = vand.u32 4294901760, %v716_v26 }
 0x17e   :  { %v9976_v22 = vpop.f32.mrf.mxu1  ;;  %1275 = vmatmul.f32.gmra.mxu3 %v707_v32 }
 0x17f   :  { %v9978_v44 = vpop.f32.mrf.mxu0 }
 0x181   :  { %9406 = vmatmul.msk.f32.gmra.mxu1 %vm336_vm0, %v9966_v50 }
 0x182   :  { %710 = vmatmul.f32.gmra.mxu0 %v709_v62 }
 0x184   :  { %1068 = vmatmul.f32.gmra.mxu2 %v714_v57 }
 0x186   :  { %v9982_v7 = vpop.f32.mrf.mxu1  ;;  %1281 = vmatmul.f32.gmra.mxu3 %v715_v39 }
 0x187   :  { %v9984_v30 = vpop.f32.mrf.mxu0 }
 0x189   :  { %9439 = vmatmul.msk.f32.vlgmr.msrb.gmra.mxu1 %vm336_vm0, %v9662_v45 }
 0x18a   :  { %718 = vmatmul.f32.gmra.mxu0 %v717_v48 }
 0x18e   :  { %v9988_v32 = vpop.f32.mrf.mxu1 }
 0x18f   :  { %v9990_v23 = vpop.f32.mrf.mxu0 }
 0x191   :  { %9440 = vmatmul.msk.f32.gmra.mxu1 %vm336_vm0, %v9677_v56 }
 0x192   :  { %9407 = vmatmul.msk.f32.vlgmr.msrb.gmra.mxu0 %vm336_vm0, %v9662_v45 }
 0x196   :  { %v9996_v42 = vpop.f32.mrf.mxu1 }
 0x197   :  { %17455 = vst [vmem:[#allocation9_spill] sm:$0xff] %v9996_v42  ;;  %v9998_v57 = vpop.f32.mrf.mxu0 }
 0x199   :  { %9441 = vmatmul.msk.f32.gmra.mxu1 %vm336_vm0, %v9673_v54 }
 0x19a   :  { %9408 = vmatmul.msk.f32.gmra.mxu0 %vm336_vm0, %v9677_v56 }
 0x19e   :  { %v10004_v62 = vpop.f32.mrf.mxu1 }
 0x19f   :  { %17456 = vst [vmem:[#allocation10_spill] sm:$0xff] %v10004_v62  ;;  %v10006_v39 = vpop.f32.mrf.mxu0 }
 0x1a0   :  { %17457 = vst [vmem:[#allocation11_spill] sm:$0xff] %v10006_v39 }
 0x1a1   :  { %9442 = vmatmul.msk.f32.gmra.mxu1 %vm336_vm0, %v9688_v0 }
 0x1a2   :  { %9409 = vmatmul.msk.f32.gmra.mxu0 %vm336_vm0, %v9673_v54 }
 0x1a6   :  { %v10012_v45 = vpop.f32.mrf.mxu1 }
 0x1a7   :  { %v10014_v26 = vpop.f32.mrf.mxu0 }
 0x1a8   :  { %17458 = vst [vmem:[#allocation12_spill] sm:$0xff] %v10014_v26 }
 0x1a9   :  { %9443 = vmatmul.msk.f32.gmra.mxu1 %vm336_vm0, %v9696_v9 }
 0x1aa   :  { %9410 = vmatmul.msk.f32.gmra.mxu0 %vm336_vm0, %v9688_v0 }
 0x1ae   :  { %v10020_v56 = vpop.f32.mrf.mxu1 }
 0x1af   :  { %v10022_v48 = vpop.f32.mrf.mxu0 }
 0x1b1   :  { %9444 = vmatmul.msk.f32.gmra.mxu1 %vm336_vm0, %v9704_v16 }
 0x1b2   :  { %9411 = vmatmul.msk.f32.gmra.mxu0 %vm336_vm0, %v9696_v9 }
 0x1b6   :  { %v10028_v54 = vpop.f32.mrf.mxu1 }
 0x1b7   :  { %17459 = vst [vmem:[#allocation13_spill] sm:$0xff] %v10028_v54  ;;  %v10030_v62 = vpop.f32.mrf.mxu0 }
 0x1b9   :  { %9445 = vmatmul.msk.f32.gmra.mxu1 %vm336_vm0, %v9714_v25 }
 0x1ba   :  { %9412 = vmatmul.msk.f32.gmra.mxu0 %vm336_vm0, %v9704_v16 }
 0x1be   :  { %v10036_v0 = vpop.f32.mrf.mxu1 }
 0x1bf   :  { %17460 = vst [vmem:[#allocation14_spill] sm:$0xff] %v10036_v0  ;;  %v10038_v26 = vpop.f32.mrf.mxu0 }
 0x1c0   :  { %17461 = vst [vmem:[#allocation15_spill] sm:$0xff] %v10038_v26 }
 0x1c1   :  { %9446 = vmatmul.msk.f32.gmra.mxu1 %vm336_vm0, %v9725_v33 }
 0x1c2   :  { %9413 = vmatmul.msk.f32.gmra.mxu0 %vm336_vm0, %v9714_v25 }
 0x1c6   :  { %v10044_v9 = vpop.f32.mrf.mxu1 }
 0x1c7   :  { %17462 = vst [vmem:[#allocation16_spill] sm:$0xff] %v10044_v9  ;;  %v10046_v54 = vpop.f32.mrf.mxu0 }
 0x1c8   :  { %17463 = vst [vmem:[#allocation17_spill] sm:$0xff] %v10046_v54 }
 0x1c9   :  { %9447 = vmatmul.msk.f32.gmra.mxu1 %vm336_vm0, %v9734_v41 }
 0x1ca   :  { %9414 = vmatmul.msk.f32.gmra.mxu0 %vm336_vm0, %v9725_v33 }
 0x1ce   :  { %v10052_v16 = vpop.f32.mrf.mxu1 }
 0x1cf   :  { %17464 = vst [vmem:[#allocation18_spill] sm:$0xff] %v10052_v16  ;;  %v10054_v0 = vpop.f32.mrf.mxu0 }
 0x1d0   :  { %17465 = vst [vmem:[#allocation19_spill] sm:$0xff] %v10054_v0 }
 0x1d1   :  { %9448 = vmatmul.msk.f32.gmra.mxu1 %vm336_vm0, %v9742_v51 }
 0x1d2   :  { %9415 = vmatmul.msk.f32.gmra.mxu0 %vm336_vm0, %v9734_v41 }
 0x1d6   :  { %v10060_v25 = vpop.f32.mrf.mxu1 }
 0x1d7   :  { %17466 = vst [vmem:[#allocation20_spill] sm:$0xff] %v10060_v25  ;;  %v10062_v9 = vpop.f32.mrf.mxu0 }
 0x1d8   :  { %17467 = vst [vmem:[#allocation21_spill] sm:$0xff] %v10062_v9 }
 0x1d9   :  { %9449 = vmatmul.msk.f32.gmra.mxu1 %vm336_vm0, %v9751_v60 }
 0x1da   :  { %9416 = vmatmul.msk.f32.gmra.mxu0 %vm336_vm0, %v9742_v51 }
 0x1de   :  { %v10068_v33 = vpop.f32.mrf.mxu1 }
 0x1df   :  { %17468 = vst [vmem:[#allocation22_spill] sm:$0xff] %v10068_v33  ;;  %v10070_v16 = vpop.f32.mrf.mxu0 }
 0x1e0   :  { %17469 = vst [vmem:[#allocation23_spill] sm:$0xff] %v10070_v16 }
 0x1e1   :  { %9450 = vmatmul.msk.f32.gmra.mxu1 %vm336_vm0, %v9760_v5 }
 0x1e2   :  { %9417 = vmatmul.msk.f32.gmra.mxu0 %vm336_vm0, %v9751_v60 }
 0x1e6   :  { %v10076_v41 = vpop.f32.mrf.mxu1 }
 0x1e7   :  { %17470 = vst [vmem:[#allocation24_spill] sm:$0xff] %v10076_v41  ;;  %v10078_v25 = vpop.f32.mrf.mxu0 }
 0x1e8   :  { %17471 = vst [vmem:[#allocation25_spill] sm:$0xff] %v10078_v25 }
 0x1e9   :  { %9451 = vmatmul.msk.f32.gmra.mxu1 %vm336_vm0, %v9770_v15 }
 0x1ea   :  { %9418 = vmatmul.msk.f32.gmra.mxu0 %vm336_vm0, %v9760_v5 }
 0x1ee   :  { %v10084_v51 = vpop.f32.mrf.mxu1 }
 0x1ef   :  { %17472 = vst [vmem:[#allocation26_spill] sm:$0xff] %v10084_v51  ;;  %v10086_v33 = vpop.f32.mrf.mxu0 }
 0x1f0   :  { %17473 = vst [vmem:[#allocation27_spill] sm:$0xff] %v10086_v33 }
 0x1f1   :  { %9452 = vmatmul.msk.f32.gmra.mxu1 %vm336_vm0, %v9778_v21 }
 0x1f2   :  { %9419 = vmatmul.msk.f32.gmra.mxu0 %vm336_vm0, %v9770_v15 }
 0x1f6   :  { %v10092_v60 = vpop.f32.mrf.mxu1 }
 0x1f7   :  { %17474 = vst [vmem:[#allocation28_spill] sm:$0xff] %v10092_v60  ;;  %v10094_v16 = vpop.f32.mrf.mxu0 }
 0x1f8   :  { %17475 = vst [vmem:[#allocation29_spill] sm:$0xff] %v10094_v16 }
 0x1f9   :  { %9453 = vmatmul.msk.f32.gmra.mxu1 %vm336_vm0, %v9786_v29 }
 0x1fa   :  { %9420 = vmatmul.msk.f32.gmra.mxu0 %vm336_vm0, %v9778_v21 }
 0x1fe   :  { %v10100_v5 = vpop.f32.mrf.mxu1 }
 0x1ff   :  { %17476 = vst [vmem:[#allocation30_spill] sm:$0xff] %v10100_v5  ;;  %v10102_v25 = vpop.f32.mrf.mxu0  ;;  %v10116_v5 = vpop.f32.mrf.mxu2 }
 0x200   :  { %17477 = vst [vmem:[#allocation31_spill] sm:$0xff] %v10102_v25 }
 0x201   :  { %9454 = vmatmul.msk.f32.gmra.mxu1 %vm336_vm0, %v9794_v37 }
 0x202   :  { %9421 = vmatmul.msk.f32.gmra.mxu0 %vm336_vm0, %v9786_v29  ;;  %v10120_v29 = vpop.f32.mrf.mxu3 }
 0x206   :  { %v1464_v15 = vpop.f32.mrf.mxu1 }
 0x207   :  { %v10108_v60 = vpop.f32.mrf.mxu0  ;;  %v10127_v9 = vpop.f32.mrf.mxu2 }
 0x208   :  { %17478 = vst [vmem:[#allocation32_spill] sm:$0xff] %v10108_v60 }
 0x209   :  { %9455 = vmatmul.msk.f32.gmra.mxu1 %vm336_vm0, %v9802_v49 }
 0x20a   :  { %9422 = vmatmul.msk.f32.gmra.mxu0 %vm336_vm0, %v9794_v37  ;;  %v10131_v0 = vpop.f32.mrf.mxu3 }
 0x20e   :  { %v1468_v21 = vpop.f32.mrf.mxu1 }
 0x20f   :  { %v1315_v51 = vpop.f32.mrf.mxu0 }
 0x211   :  { %9456 = vmatmul.msk.f32.gmra.mxu1 %vm336_vm0, %v9810_v59 }
 0x212   :  { %9423 = vmatmul.msk.f32.gmra.mxu0 %vm336_vm0, %v9802_v49  ;;  %v761_v49 = vadd.f32 %v9812_v61, %v9822_v10  ;;  %v10145_v10 = vpop.f32.mrf.mxu3 }
 0x216   :  { %v1472_v25 = vpop.f32.mrf.mxu1 }
 0x217   :  { %v1319_v60 = vpop.f32.mrf.mxu0 }
 0x218   :  { %v1320_v16 = vadd.f32 %v1319_v60, %v9841_v34 }
 0x219   :  { %9457 = vmatmul.msk.f32.gmra.mxu1 %vm336_vm0, %v9820_v8 }
 0x21a   :  { %v1469_v37 = vadd.f32 %v1468_v21, %v1320_v16  ;;  %9424 = vmatmul.msk.f32.gmra.mxu0 %vm336_vm0, %v9810_v59  ;;  %v915_v59 = vadd.f32 %v9824_v11, %v761_v49  ;;  %v10139_v16 = vpop.f32.mrf.mxu2 }
 0x21c   :  { %v1097_v26 = vadd.f32 %v9826_v14, %v915_v59 }
 0x21e   :  { %v1476_v41 = vpop.f32.mrf.mxu1 }
 0x21f   :  { %v1323_v33 = vpop.f32.mrf.mxu0 }
 0x220   :  { %v1324_v54 = vadd.f32 %v1323_v33, %v9851_v58  ;;  %v1316_v58 = vadd.f32 %v1315_v51, %v1097_v26  ;;  %v10158_v26 = vpop.f32.mrf.mxu3 }
 0x221   :  { %9458 = vmatmul.msk.f32.gmra.mxu1 %vm336_vm0, %v9834_v6 }
 0x222   :  { %v1473_v34 = vadd.f32 %v1472_v25, %v1324_v54  ;;  %9425 = vmatmul.msk.f32.gmra.mxu0 %vm336_vm0, %v9820_v8  ;;  %v1465_v8 = vadd.f32 %v1464_v15, %v1316_v58  ;;  %v10151_v33 = vpop.f32.mrf.mxu2  ;;  %v1818_v58 = vrot.slane %v1469_v37, 4 }
 0x226   :  { %v1480_v60 = vpop.f32.mrf.mxu1 }
 0x227   :  { %v1327_v21 = vpop.f32.mrf.mxu0 }
 0x228   :  { %v1328_v61 = vadd.f32 %v1327_v21, %v9861_v20  ;;  %v1594_v20 = vrot.slane %v1465_v8, 4  ;;  %v9557_v21 = vmov 1983009808  }
 0x229   :  { %9459 = vmatmul.msk.f32.gmra.mxu1 %vm336_vm0, %v9844_v38 }
 0x22a   :  { %v10147_v54 = vadd.f32 %v1476_v41, %v1328_v61  ;;  %9426 = vmatmul.msk.f32.gmra.mxu0 %vm336_vm0, %v9834_v6  ;;  %v1597_v61 = vunpack.c.l.s4 %v9557_v21 }
 0x22e   :  { %v1484_v11 = vpop.f32.mrf.mxu1 }
 0x22f   :  { %v1331_v25 = vpop.f32.mrf.mxu0 }
 0x230   :  { %v1332_v14 = vadd.f32 %v1331_v25, %v9871_v46 }
 0x231   :  { %9460 = vmatmul.msk.f32.gmra.mxu1 %vm336_vm0, %v9854_v2 }
 0x232   :  { %v1481_v49 = vadd.f32 %v1480_v60, %v1332_v14  ;;  %9427 = vmatmul.msk.f32.gmra.mxu0 %vm336_vm0, %v9844_v38  ;;  %v10165_v60 = vpop.f32.mrf.mxu2 }
 0x234   :  { %v1591_v41 = vrot.slane %v1481_v49, 4  ;;  %v1595_v6 = vsel %vm1592_vm3, %v1481_v49, %v1594_v20  ;;  %v10172_v20 = vpop.f32.mrf.mxu3 }
 0x236   :  { %v1593_v51 = vsel %vm1592_vm3, %v1591_v41, %v1465_v8  ;;  %v1488_v15 = vpop.f32.mrf.mxu1  ;;  %v10170_v8 = vunpack.c.0.s8 %v1597_v61 }
 0x237   :  { %v1335_v59 = vpop.f32.mrf.mxu0 }
 0x238   :  { %v1336_v46 = vadd.f32 %v1335_v59, %v9881_v12  ;;  %17479 = vst [vmem:[#allocation33_spill] sm:$0xff] %v10170_v8  ;;  %v1603_v21 = vperm.slane %v1595_v6, %v10170_v8 }
 0x239   :  { %9461 = vmatmul.msk.f32.gmra.mxu1 %vm336_vm0, %v9864_v24 }
 0x23a   :  { %v1485_v38 = vadd.f32 %v1484_v11, %v1336_v46  ;;  %9428 = vmatmul.msk.f32.gmra.mxu0 %vm336_vm0, %v9854_v2  ;;  %v1606_v11 = vrot.slane %v1473_v34, 4  ;;  %v1599_v46 = vperm.slane %v1593_v51, %v10170_v8  ;;  %v10182_v61 = vpop.f32.mrf.mxu2 }
 0x23c   :  { %v1816_v25 = vrot.slane %v1485_v38, 4  ;;  %v1819_v14 = vsel %vm1592_vm3, %v1485_v38, %v1818_v58  ;;  %v1654_v38 = vrot.slane %v1603_v21, 4  ;;  %v10193_v51 = vpop.f32.mrf.mxu3 }
 0x23e   :  { %v1817_v12 = vsel %vm1592_vm3, %v1816_v25, %v1469_v37  ;;  %v1492_v49 = vpop.f32.mrf.mxu1 }
 0x23f   :  { %v1339_v41 = vpop.f32.mrf.mxu0 }
 0x240   :  { %v1340_v59 = vadd.f32 %v1339_v41, %v9891_v35  ;;  %v1642_v41 = vrot.slane %v1599_v46, 4 }
 0x241   :  { %9462 = vmatmul.msk.f32.gmra.mxu1 %vm336_vm0, %v9874_v52 }
 0x242   :  { %v1489_v2 = vadd.f32 %v1488_v15, %v1340_v59  ;;  %9429 = vmatmul.msk.f32.gmra.mxu0 %vm336_vm0, %v9864_v24 }
 0x244   :  { %v1604_v58 = vrot.slane %v1489_v2, 4  ;;  %v1607_v37 = vsel %vm1592_vm3, %v1489_v2, %v1606_v11  ;;  %v1827_v11 = vperm.slane %v1819_v14, %v10170_v8 }
 0x245   :  { %v1615_v35 = vperm.slane %v1607_v37, %v10170_v8  ;;  %v1830_v37 = vrot.slane %v10147_v54, 4 }
 0x246   :  { %v1605_v6 = vsel %vm1592_vm3, %v1604_v58, %v1473_v34  ;;  %v10187_v25 = vpop.f32.mrf.mxu1 }
 0x247   :  { %v1611_v15 = vperm.slane %v1605_v6, %v10170_v8  ;;  %v1652_v59 = vrot.slane %v1615_v35, 4  ;;  %v1343_v42 = vpop.f32.mrf.mxu0  ;;  %v10191_v24 = vsel %vm1592_vm3, %v1615_v35, %v1654_v38  ;;  %v1878_v6 = vrot.slane %v1827_v11, 4 }
 0x248   :  { %v1344_v39 = vadd.f32 %v1343_v42, %v9903_v4  ;;  %v1823_v4 = vperm.slane %v1817_v12, %v10170_v8 }
 0x249   :  { %v1640_v2 = vrot.slane %v1611_v15, 4  ;;  %9463 = vmatmul.msk.f32.gmra.mxu1 %vm336_vm0, %v9884_v17  ;;  %v10200_v34 = vsel %vm1592_vm3, %v1611_v15, %v1642_v41  ;;  %v10203_v58 = vsel %vm1592_vm3, %v1652_v59, %v1603_v21  ;;  %v10214_v15 = vpop.f32.mrf.mxu2 }
 0x24a   :  { %v1493_v38 = vadd.f32 %v1492_v49, %v1344_v39  ;;  %9430 = vmatmul.msk.f32.gmra.mxu0 %vm336_vm0, %v9874_v52  ;;  %v1866_v49 = vrot.slane %v1823_v4, 4 }
 0x24b   :  { %v10210_v42 = vsel %vm1592_vm3, %v1640_v2, %v1599_v46 }
 0x24c   :  { %v1828_v14 = vrot.slane %v1493_v38, 4  ;;  %v1831_v35 = vsel %vm1592_vm3, %v1493_v38, %v1830_v37 }
 0x24d   :  { %v1839_v41 = vperm.slane %v1831_v35, %v10170_v8 }
 0x24e   :  { %v1829_v21 = vsel %vm1592_vm3, %v1828_v14, %v10147_v54  ;;  %v1500_v39 = vpop.f32.mrf.mxu1  ;;  %v10230_v54 = vpop.f32.mrf.mxu3 }
 0x24f   :  { %v1835_v52 = vperm.slane %v1829_v21, %v10170_v8  ;;  %v1876_v59 = vrot.slane %v1839_v41, 4  ;;  %v1347_v12 = vpop.f32.mrf.mxu0  ;;  %v10220_v46 = vsel %vm1592_vm3, %v1839_v41, %v1878_v6 }
 0x251   :  { %v1864_v2 = vrot.slane %v1835_v52, 4  ;;  %9464 = vmatmul.msk.f32.gmra.mxu1 %vm336_vm0, %v9894_v43  ;;  %v10225_v37 = vsel %vm1592_vm3, %v1835_v52, %v1866_v49  ;;  %v10228_v38 = vsel %vm1592_vm3, %v1876_v59, %v1827_v11  ;;  %v10239_v41 = vpop.f32.mrf.mxu2 }
 0x252   :  { %17480 = vst [vmem:[#allocation34_spill] sm:$0xff] %v10228_v38  ;;  %9431 = vmatmul.msk.f32.gmra.mxu0 %vm336_vm0, %v9884_v17  ;;  %v793_v17 = vadd.f32 %v9896_v47, %v9910_v19  ;;  %v797_v47 = vadd.f32 %v9908_v18, %v9922_v36 }
 0x253   :  { %v10235_v14 = vsel %vm1592_vm3, %v1864_v2, %v1823_v4 }
 0x254   :  { %17481 = vst [vmem:[#allocation35_spill] sm:$0xff] %v10235_v14  ;;  %v955_v52 = vadd.f32 %v10116_v5, %v793_v17 }
 0x256   :  { %v10237_v35 = vpop.f32.mrf.mxu1  ;;  %v10245_v11 = vpop.f32.mrf.mxu3  ;;  %v1145_v14 = vadd.f32 %v10120_v29, %v955_v52  ;;  %v813_v29 = vadd.f32 %v9953_v3, %v9970_v55 }
 0x257   :  { %v1351_v6 = vpop.f32.mrf.mxu0 }
 0x259   :  { %9465 = vmatmul.msk.f32.gmra.mxu1 %vm336_vm0, %v9906_v40  ;;  %v10253_v4 = vpop.f32.mrf.mxu2 }
 0x25a   :  { %9432 = vmatmul.msk.f32.gmra.mxu0 %vm336_vm0, %v9894_v43  ;;  %v809_v43 = vadd.f32 %v9944_v28, %v9958_v13  ;;  %v960_v28 = vadd.f32 %v10127_v9, %v797_v47  ;;  %v980_v9 = vadd.f32 %v10182_v61, %v813_v29  ;;  %v17484_v47 = vld [vmem:[#allocation6_spill] sm:$0xff] }
 0x25c   :  { %v975_v19 = vadd.f32 %v10165_v60, %v809_v43  ;;  %v1151_v52 = vadd.f32 %v10131_v0, %v960_v28  ;;  %v17482_v60 = vld [vmem:[#allocation5_spill] sm:$0xff]  ;;  %v1175_v28 = vadd.f32 %v10193_v51, %v980_v9  ;;  %v821_v9 = vadd.f32 %v9976_v22, %v9984_v30 }
 0x25e   :  { %v10247_v21 = vpop.f32.mrf.mxu1  ;;  %v10260_v59 = vpop.f32.mrf.mxu3  ;;  %v1169_v5 = vadd.f32 %v10172_v20, %v975_v19  ;;  %v1352_v43 = vadd.f32 %v1351_v6, %v1151_v52 }
 0x25f   :  { %v1355_v49 = vpop.f32.mrf.mxu0 }
 0x260   :  { %v1501_v6 = vadd.f32 %v1500_v39, %v1352_v43  ;;  %v9558_v39 = vmov 1934713408  }
 0x261   :  { %9466 = vmatmul.msk.f32.gmra.mxu1 %vm336_vm0, %v9918_v31  ;;  %v10271_v13 = vpop.f32.mrf.mxu2 }
 0x262   :  { %9433 = vmatmul.msk.f32.gmra.mxu0 %vm336_vm0, %v9906_v40  ;;  %v1348_v40 = vadd.f32 %v1347_v12, %v1145_v14  ;;  %v801_v12 = vadd.f32 %v17482_v60, %v9934_v1  ;;  %v17483_v1 = vld [vmem:[#allocation7_spill] sm:$0xff]  ;;  %v17485_v60 = vld [vmem:[#allocation8_spill] sm:$0xff] }
 0x263   :  { %v805_v19 = vadd.f32 %v17484_v47, %v17483_v1 }
 0x264   :  { %v1497_v18 = vadd.f32 %v10187_v25, %v1348_v40  ;;  %v965_v55 = vadd.f32 %v10139_v16, %v801_v12  ;;  %v817_v40 = vadd.f32 %v9968_v53, %v9978_v44  ;;  %v1842_v44 = vrot.slane %v1501_v6, 4 }
 0x266   :  { %v1512_v2 = vpop.f32.mrf.mxu1  ;;  %v10280_v14 = vpop.f32.mrf.mxu3  ;;  %v1618_v20 = vrot.slane %v1497_v18, 4  ;;  %v1157_v16 = vadd.f32 %v10145_v10, %v965_v55  ;;  %v985_v52 = vadd.f32 %v10214_v15, %v817_v40 }
 0x267   :  { %v1359_v38 = vpop.f32.mrf.mxu0 }
 0x268   :  { %v1356_v51 = vadd.f32 %v1355_v49, %v1157_v16  ;;  %v1181_v15 = vadd.f32 %v10230_v54, %v985_v52 }
 0x269   :  { %9467 = vmatmul.msk.f32.gmra.mxu1 %vm336_vm0, %v9932_v63  ;;  %v10294_v61 = vpop.f32.mrf.mxu2 }
 0x26a   :  { %9434 = vmatmul.msk.f32.gmra.mxu0 %vm336_vm0, %v9918_v31 }
 0x26e   :  { %v1516_v36 = vpop.f32.mrf.mxu1  ;;  %v10302_v53 = vpop.f32.mrf.mxu3 }
 0x26f   :  { %v1363_v17 = vpop.f32.mrf.mxu0 }
 0x270   :  { %v1364_v31 = vadd.f32 %v1363_v17, %v1169_v5  ;;  %v970_v17 = vadd.f32 %v10151_v33, %v805_v19 }
 0x271   :  { %9468 = vmatmul.msk.f32.gmra.mxu1 %vm336_vm0, %v9942_v27 }
 0x272   :  { %v1513_v3 = vadd.f32 %v1512_v2, %v1364_v31  ;;  %9435 = vmatmul.msk.f32.gmra.mxu0 %vm336_vm0, %v9932_v63  ;;  %v1163_v33 = vadd.f32 %v10158_v26, %v970_v17  ;;  %v990_v26 = vadd.f32 %v10239_v41, %v821_v9 }
 0x274   :  { %v1616_v0 = vrot.slane %v1513_v3, 4  ;;  %v1619_v25 = vsel %vm1592_vm3, %v1513_v3, %v1618_v20  ;;  %v1505_v20 = vadd.f32 %v10237_v35, %v1356_v51  ;;  %v10315_v3 = vpop.f32.mrf.mxu2  ;;  %v1360_v55 = vadd.f32 %v1359_v38, %v1163_v33 }
 0x275   :  { %v1627_v1 = vperm.slane %v1619_v25, %v10170_v8 }
 0x276   :  { %v1617_v2 = vsel %vm1592_vm3, %v1616_v0, %v1497_v18  ;;  %v1520_v5 = vpop.f32.mrf.mxu1  ;;  %v1645_v18 = vunpack.c.l.s4 %v9558_v39  ;;  %v1630_v22 = vrot.slane %v1505_v20, 4  ;;  %v10326_v47 = vpop.f32.mrf.mxu3  ;;  %v1509_v38 = vadd.f32 %v10247_v21, %v1360_v55 }
 0x277   :  { %v1367_v63 = vpop.f32.mrf.mxu0  ;;  %v1623_v35 = vperm.slane %v1617_v2, %v10170_v8  ;;  %v1678_v40 = vrot.slane %v1627_v1, 4 }
 0x278   :  { %v1368_v29 = vadd.f32 %v1367_v63, %v1175_v28  ;;  %v10313_v43 = vunpack.c.0.s8 %v1645_v18  ;;  %v1854_v52 = vrot.slane %v1509_v38, 4 }
 0x279   :  { %9469 = vmatmul.msk.f32.gmra.mxu1 %vm336_vm0, %v17485_v60  ;;  %v1666_v17 = vrot.slane %v1623_v35, 4 }
 0x27a   :  { %v1517_v12 = vadd.f32 %v1516_v36, %v1368_v29  ;;  %9436 = vmatmul.msk.f32.gmra.mxu0 %vm336_vm0, %v9942_v27  ;;  %17486 = vst [vmem:[#allocation5_spill] sm:$0xff] %v10313_v43  ;;  %v1663_v54 = vperm.slane %v10191_v24, %v10313_v43  ;;  %v1651_v41 = vperm.slane %v10200_v34, %v10313_v43 }
 0x27b   :  { %v10339_v2 = vperm.slane %v10210_v42, %v10313_v43 }
 0x27c   :  { %v1840_v31 = vrot.slane %v1517_v12, 4  ;;  %v1843_v10 = vsel %vm1592_vm3, %v1517_v12, %v1842_v44  ;;  %v1702_v21 = vrot.slane %v1663_v54, 4  ;;  %v1694_v44 = vrot.slane %v1651_v41, 4  ;;  %v10349_v18 = vpop.f32.mrf.mxu2 }
 0x27d   :  { %17487 = vst [vmem:[#allocation7_spill] sm:$0xff] %v10339_v2  ;;  %v1851_v51 = vperm.slane %v1843_v10, %v10170_v8 }
 0x27e   :  { %v1841_v49 = vsel %vm1592_vm3, %v1840_v31, %v1501_v6  ;;  %v1524_v36 = vpop.f32.mrf.mxu1  ;;  %v1187_v6 = vadd.f32 %v10245_v11, %v990_v26 }
 0x27f   :  { %v1371_v27 = vpop.f32.mrf.mxu0  ;;  %v1847_v10 = vperm.slane %v1841_v49, %v10170_v8 }
 0x280   :  { %v1372_v0 = vadd.f32 %v1371_v27, %v1181_v15  ;;  %v1690_v27 = vrot.slane %v10339_v2, 4 }
 0x281   :  { %9470 = vmatmul.msk.f32.gmra.mxu1 %vm336_vm0, %v9966_v50 }
 0x282   :  { %v1521_v30 = vadd.f32 %v1520_v5, %v1372_v0  ;;  %9437 = vmatmul.msk.f32.gmra.mxu0 %vm336_vm0, %v17485_v60 }
 0x284   :  { %v1628_v25 = vrot.slane %v1521_v30, 4  ;;  %v1631_v19 = vsel %vm1592_vm3, %v1521_v30, %v1630_v22  ;;  %v1887_v22 = vperm.slane %v10220_v46, %v10313_v43  ;;  %v1216_v30 = vpop.f32.mrf.mxu3 }
 0x285   :  { %v1639_v28 = vperm.slane %v1631_v19, %v10170_v8 }
 0x286   :  { %v1629_v5 = vsel %vm1592_vm3, %v1628_v25, %v1505_v20  ;;  %v10335_v24 = vpop.f32.mrf.mxu1 }
 0x287   :  { %v1635_v63 = vperm.slane %v1629_v5, %v10170_v8  ;;  %v1676_v16 = vrot.slane %v1639_v28, 4  ;;  %v1375_v29 = vpop.f32.mrf.mxu0  ;;  %v1679_v34 = vsel %vm1592_vm3, %v1639_v28, %v1678_v40  ;;  %v1875_v28 = vperm.slane %v10225_v37, %v10313_v43 }
 0x288   :  { %v1376_v60 = vadd.f32 %v1375_v29, %v1187_v6  ;;  %v1687_v11 = vperm.slane %v1679_v34, %v10313_v43 }
 0x289   :  { %v1667_v12 = vsel %vm1592_vm3, %v1635_v63, %v1666_v17  ;;  %v1664_v39 = vrot.slane %v1635_v63, 4  ;;  %v10347_v42 = vsel %vm1592_vm3, %v1676_v16, %v1627_v1  ;;  %v1926_v16 = vrot.slane %v1887_v22, 4 }
 0x28a   :  { %17488 = vst [vmem:[#allocation6_spill] sm:$0xff] %v10347_v42  ;;  %v1525_v31 = vadd.f32 %v1524_v36, %v1376_v60  ;;  %9438 = vmatmul.msk.f32.gmra.mxu0 %vm336_vm0, %v9966_v50  ;;  %v1675_v33 = vperm.slane %v1667_v12, %v10313_v43  ;;  %v10355_v15 = vsel %vm1592_vm3, %v1687_v11, %v1702_v21  ;;  %v1700_v9 = vrot.slane %v1687_v11, 4  ;;  %v1019_v11 = vpop.f32.mrf.mxu2 }
 0x28b   :  { %17489 = vst [vmem:[#allocation8_spill] sm:$0xff] %v10355_v15  ;;  %v1665_v20 = vsel %vm1592_vm3, %v1664_v39, %v1623_v35  ;;  %v1902_v35 = vrot.slane %v1851_v51, 4  ;;  %v1918_v17 = vrot.slane %v1875_v28, 4  ;;  %vm2136_vm0 = vcmask 261120  }
 0x28c   :  { %v1852_v55 = vrot.slane %v1525_v31, 4  ;;  %v1855_v0 = vsel %vm1592_vm3, %v1525_v31, %v1854_v52  ;;  %v1695_v36 = vsel %vm1592_vm3, %v1675_v33, %v1694_v44  ;;  %v1692_v1 = vrot.slane %v1675_v33, 4 }
 0x28d   :  { %v1863_v50 = vperm.slane %v1855_v0, %v10170_v8  ;;  %2058 = vrot.lane.b32.xlu1 %v1695_v36, %s9559_s0  ;;  %v10365_v26 = vperm.slane %v1665_v20, %v10313_v43  ;;  %v10368_v49 = vsel %vm1592_vm3, %v1700_v9, %v1663_v54  ;;  %v1890_v54 = vrot.slane %v1847_v10, 4  ;;  %v1222_v20 = vpop.f32.mrf.mxu3 }
 0x28e   :  { %17490 = vst [vmem:[#allocation36_spill] sm:$0xff] %v10368_v49  ;;  %v1853_v25 = vsel %vm1592_vm3, %v1852_v55, %v1509_v38  ;;  %v10373_v19 = vpop.f32.mrf.mxu1  ;;  %v1693_v40 = vsel %vm1592_vm3, %v1692_v1, %v1651_v41  ;;  %v825_v0 = vadd.f32 %v9982_v7, %v9990_v23 }
 0x28f   :  { %v1859_v6 = vperm.slane %v1853_v25, %v10170_v8  ;;  %v1900_v5 = vrot.slane %v1863_v50, 4  ;;  %v1379_v21 = vpop.f32.mrf.mxu0  ;;  %2050 = vrot.lane.b32.xlu0 %v1693_v40, %s9560_s8  ;;  %v1691_v46 = vsel %vm1592_vm3, %v10365_v26, %v1690_v27  ;;  %v1903_v38 = vsel %vm1592_vm3, %v1863_v50, %v1902_v35 }
 0x290   :  { %2042 = vrot.lane.b32.xlu2 %v1691_v46, %s9561_s9  ;;  %v1911_v37 = vperm.slane %v1903_v38, %v10313_v43  ;;  %v995_v1 = vadd.f32 %v10253_v4, %v825_v0  ;;  %v841_v50 = vadd.f32 %v10012_v45, %v10022_v48  ;;  %v829_v40 = vadd.f32 %v9988_v32, %v9998_v57  ;;  %v17501_v0 = vld [vmem:[#allocation12_spill] sm:$0xff] }
 0x291   :  { %v1891_v41 = vsel %vm1592_vm3, %v1859_v6, %v1890_v54  ;;  %v1888_v63 = vrot.slane %v1859_v6, 4  ;;  %v10388_v34 = vsel %vm1592_vm3, %v1900_v5, %v1851_v51  ;;  %v845_v4 = vadd.f32 %v10020_v56, %v10030_v62  ;;  %v17497_v54 = vld [vmem:[#allocation11_spill] sm:$0xff] }
 0x292   :  { %v1899_v29 = vperm.slane %v1891_v41, %v10313_v43  ;;  %17491 = vst [vmem:[#allocation37_spill] sm:$0xff] %v10388_v34  ;;  %v10394_v60 = vsel %vm1592_vm3, %v1911_v37, %v1926_v16  ;;  %v1924_v44 = vrot.slane %v1911_v37, 4  ;;  %v1193_v25 = vadd.f32 %v10260_v59, %v995_v1  ;;  %v17498_v59 = vld [vmem:[#allocation9_spill] sm:$0xff]  ;;  %v17502_v1 = vld [vmem:[#allocation10_spill] sm:$0xff] }
 0x293   :  { %v10391_v52 = vsel %vm1592_vm3, %v1888_v63, %v1847_v10  ;;  %17493 = vst [vmem:[#allocation39_spill] sm:$0xff] %v10394_v60  ;;  %v1024_v10 = vpop.f32.mrf.mxu2  ;;  %v1015_v6 = vadd.f32 %v10349_v18, %v841_v50  ;;  %v1000_v46 = vadd.f32 %v10271_v13, %v829_v40  ;;  %v833_v38 = vadd.f32 %v17498_v59, %v17497_v54  ;;  %v2223_v59 = vld [vmem:[%s16470_s2 + $0x1e0] sm:$0xff] }
 0x294   :  { %17492 = vst [vmem:[#allocation38_spill] sm:$0xff] %v10391_v52  ;;  %v10397_v12 = vsel %vm1592_vm3, %v1899_v29, %v1918_v17  ;;  %v1916_v39 = vrot.slane %v1899_v29, 4  ;;  %v10400_v31 = vsel %vm1592_vm3, %v1924_v44, %v1887_v22  ;;  %v1380_v5 = vadd.f32 %v1379_v21, %v1193_v25  ;;  %v17500_v29 = vld [vmem:[#allocation13_spill] sm:$0xff] }
 0x295   :  { %17494 = vst [vmem:[#allocation40_spill] sm:$0xff] %v10397_v12  ;;  %v1228_v36 = vpop.f32.mrf.mxu3  ;;  %v1217_v23 = vadd.f32 %v1216_v30, %v1015_v6  ;;  %v1199_v32 = vadd.f32 %v10280_v14, %v1000_v46  ;;  %v1020_v18 = vadd.f32 %v1019_v11, %v845_v4  ;;  %v1005_v30 = vadd.f32 %v10294_v61, %v833_v38  ;;  %v17503_v4 = vld [vmem:[#allocation17_spill] sm:$0xff] }
 0x296   :  { %17495 = vst [vmem:[#allocation41_spill] sm:$0xff] %v10400_v31  ;;  %v1536_v33 = vpop.f32.mrf.mxu1  ;;  %v10403_v9 = vsel %vm1592_vm3, %v1916_v39, %v1875_v28  ;;  %v1529_v45 = vadd.f32 %v10335_v24, %v1380_v5  ;;  %v17499_v24 = vld [vmem:[#allocation15_spill] sm:$0xff]  ;;  %v837_v61 = vadd.f32 %v17502_v1, %v17501_v0 }
 0x297   :  { %17496 = vst [vmem:[#allocation42_spill] sm:$0xff] %v10403_v9  ;;  %v1383_v51 = vpop.f32.mrf.mxu0  ;;  %v1223_v56 = vadd.f32 %v1222_v20, %v1020_v18  ;;  %v849_v17 = vadd.f32 %v17500_v29, %v17499_v24  ;;  %v2179_v31 = vld [vmem:[%s16470_s2 + $0x80] sm:$0xff] }
 0x298   :  { %v1706_v13 = vrot.slane %v1529_v45, 4  ;;  %v1384_v63 = vadd.f32 %v1383_v51, %v1199_v32  ;;  %v1205_v51 = vadd.f32 %v10302_v53, %v1005_v30  ;;  %v1010_v5 = vadd.f32 %v10315_v3, %v837_v61  ;;  %v2219_v32 = vld [vmem:[%s16470_s2 + $0x1c0] sm:$0xff] }
 0x299   :  { %v1025_v40 = vadd.f32 %v1024_v10, %v849_v17  ;;  %v10454_v3 = vand.u32 4294901760, %v2223_v59  ;;  %v2207_v61 = vld [vmem:[%s16470_s2 + $0x160] sm:$0xff] }
 0x29a   :  { %v1533_v14 = vadd.f32 %v10373_v19, %v1384_v63  ;;  %v1211_v38 = vadd.f32 %v10326_v47, %v1010_v5  ;;  %v2215_v47 = vld [vmem:[%s16470_s2 + $0x1a0] sm:$0xff] }
 0x29b   :  { %v1029_v28 = vpop.f32.mrf.mxu2  ;;  %v10463_v18 = vsub.f32 %v2223_v59, %v10454_v3  ;;  %2430 = vmatpush.msrb.mxu2 %v10454_v3  ;;  %v10475_v24 = vand.u32 4294901760, %v2215_v47 }
 0x29c   :  { %v1930_v20 = vrot.slane %v1533_v14, 4 }
 0x29d   :  { %v10417_v7 = vpop.f32.mrf.mxu3  ;;  %17505 = vst [vmem:[#allocation11_spill] sm:$0xff] %v10463_v18  ;;  %v10493_v0 = vsub.f32 %v2215_v47, %v10475_v24 }
 0x29e   :  { %v10405_v27 = vpop.f32.mrf.mxu1 }
 0x29f   :  { %v1387_v55 = vpop.f32.mrf.mxu0 }
 0x2a0   :  { %v1388_v25 = vadd.f32 %v1387_v55, %v1205_v51  ;;  %v1229_v55 = vadd.f32 %v1228_v36, %v1025_v40  ;;  %v10465_v36 = vand.u32 4294901760, %v2219_v32 }
 0x2a2   :  { %v1537_v54 = vadd.f32 %v1536_v33, %v1388_v25  ;;  %2432 = vmatpush.msrb.mxu2 %v10465_v36 }
 0x2a3   :  { %v10425_v21 = vpop.f32.mrf.mxu2 }
 0x2a4   :  { %v1718_v63 = vrot.slane %v1537_v54, 4  ;;  %2434 = vmatpush.msrb.mxu2 %v10475_v24 }
 0x2a5   :  { %v10433_v44 = vpop.f32.mrf.mxu3 }
 0x2a6   :  { %v1544_v22 = vpop.f32.mrf.mxu1 }
 0x2a7   :  { %v1391_v35 = vpop.f32.mrf.mxu0 }
 0x2ab   :  { %v10441_v46 = vpop.f32.mrf.mxu2 }
 0x2ae   :  { %v1548_v48 = vpop.f32.mrf.mxu1 }
 0x2af   :  { %v1395_v41 = vpop.f32.mrf.mxu0 }
 0x2b0   :  { %v1396_v57 = vadd.f32 %v1395_v41, %v1217_v23 }
 0x2b2   :  { %v1545_v37 = vadd.f32 %v1544_v22, %v1396_v57  ;;  %v10460_v57 = vpop.f32.mrf.mxu3 }
 0x2b4   :  { %v1704_v16 = vrot.slane %v1545_v37, 4  ;;  %v10429_v62 = vsel %vm1592_vm3, %v1545_v37, %v1706_v13  ;;  %v1392_v37 = vadd.f32 %v1391_v35, %v1211_v38  ;;  %v2211_v35 = vld [vmem:[%s16470_s2 + $0x180] sm:$0xff] }
 0x2b5   :  { %v10495_v1 = vand.u32 4294901760, %v2211_v35 }
 0x2b6   :  { %v1705_v11 = vsel %vm1592_vm3, %v1704_v16, %v1529_v45  ;;  %v1552_v39 = vpop.f32.mrf.mxu1  ;;  %v17504_v45 = vld [vmem:[#allocation14_spill] sm:$0xff]  ;;  %v16482_v16 = vand.u32 4294901760, %v10463_v18 }
 0x2b7   :  { %v1399_v50 = vpop.f32.mrf.mxu0  ;;  %v853_v53 = vadd.f32 %v17504_v45, %v17503_v4  ;;  %v10479_v29 = vperm.slane %v1705_v11, %v10170_v8  ;;  %v1541_v11 = vadd.f32 %v10405_v27, %v1392_v37  ;;  %v10516_v4 = vsub.f32 %v2211_v35, %v10495_v1  ;;  %v2203_v45 = vld [vmem:[%s16470_s2 + $0x140] sm:$0xff]  ;;  %2436 = vmatpush.msrb.mxu2 %v10495_v1 }
 0x2b8   :  { %v1400_v22 = vadd.f32 %v1399_v50, %v1223_v56  ;;  %v10473_v56 = vsub.f32 %v2219_v32, %v10465_v36  ;;  %v10500_v50 = vpop.f32.mrf.mxu2  ;;  %v2199_v32 = vld [vmem:[%s16470_s2 + $0x120] sm:$0xff]  ;;  %v10547_v35 = vperm.slane %v10429_v62, %v10170_v8 }
 0x2b9   :  { %v1030_v13 = vadd.f32 %v1029_v28, %v853_v53 }
 0x2ba   :  { %v1549_v6 = vadd.f32 %v1548_v48, %v1400_v22  ;;  %17506 = vst [vmem:[#allocation9_spill] sm:$0xff] %v10473_v56 }
 0x2bb   :  { %v1235_v51 = vadd.f32 %v10417_v7, %v1030_v13  ;;  %v10508_v7 = vand.u32 4294901760, %v2207_v61  ;;  %v10539_v13 = vpop.f32.mrf.mxu3 }
 0x2bc   :  { %v1928_v23 = vrot.slane %v1549_v6, 4  ;;  %v10444_v19 = vsel %vm1592_vm3, %v1549_v6, %v1930_v20  ;;  %v1754_v20 = vrot.slane %v10479_v29, 4 }
 0x2bd   :  { %v10523_v59 = vsub.f32 %v2207_v61, %v10508_v7  ;;  %2438 = vmatpush.msrb.mxu2 %v10508_v7 }
 0x2be   :  { %v10452_v10 = vsel %vm1592_vm3, %v1928_v23, %v1533_v14  ;;  %v1556_v48 = vpop.f32.mrf.mxu1  ;;  %v2481_v14 = vsub.f32 %v10463_v18, %v16482_v16  ;;  %v16480_v23 = vand.u32 4294901760, %v10493_v0 }
 0x2bf   :  { %v1403_v41 = vpop.f32.mrf.mxu0  ;;  %v16477_v47 = vand.u32 4294901760, %v10523_v59 }
 0x2c0   :  { %v1404_v33 = vadd.f32 %v1403_v41, %v1229_v55  ;;  %v2482_v40 = vand.u32 4294901760, %v2481_v14  ;;  %v10525_v55 = vand.u32 4294901760, %v2203_v45  ;;  %v2493_v38 = vsub.f32 %v10493_v0, %v16480_v23 }
 0x2c1   :  { %v16479_v41 = vand.u32 4294901760, %v10516_v4  ;;  %v2505_v62 = vsub.f32 %v10523_v59, %v16477_v47 }
 0x2c2   :  { %v1553_v30 = vadd.f32 %v1552_v39, %v1404_v33  ;;  %v16481_v39 = vand.u32 4294901760, %v10473_v56  ;;  %2483 = vmatpush.msrb.mxu3 %v2482_v40  ;;  %2440 = vmatpush.msrb.mxu2 %v10525_v55 }
 0x2c3   :  { %v2499_v14 = vsub.f32 %v10516_v4, %v16479_v41 }
 0x2c4   :  { %v1716_v28 = vrot.slane %v1553_v30, 4  ;;  %v1719_v17 = vsel %vm1592_vm3, %v1553_v30, %v1718_v63  ;;  %v2487_v27 = vsub.f32 %v10473_v56, %v16481_v39  ;;  %v1942_v63 = vrot.slane %v1541_v11, 4 }
 0x2c5   :  { %v10543_v30 = vsub.f32 %v2203_v45, %v10525_v55 }
 0x2c6   :  { %v1717_v22 = vsel %vm1592_vm3, %v1716_v28, %v1537_v54  ;;  %v10503_v25 = vpop.f32.mrf.mxu1  ;;  %v2488_v54 = vand.u32 4294901760, %v2487_v27  ;;  %v2494_v28 = vand.u32 4294901760, %v2493_v38  ;;  %v10564_v27 = vperm.slane %v1719_v17, %v10170_v8 }
 0x2c7   :  { %v10512_v6 = vperm.slane %v1717_v22, %v10170_v8  ;;  %v1407_v5 = vpop.f32.mrf.mxu0  ;;  %v16478_v40 = vand.u32 4294901760, %v10543_v30 }
 0x2c8   :  { %v1408_v53 = vadd.f32 %v1407_v5, %v1235_v51  ;;  %2489 = vmatpush.msrb.mxu3 %v2488_v54  ;;  %v10552_v51 = vand.u32 4294901760, %v2199_v32 }
 0x2c9   :  { %v10537_v33 = vsel %vm1592_vm3, %v10512_v6, %v1754_v20  ;;  %v2500_v20 = vand.u32 4294901760, %v2499_v14  ;;  %v2511_v17 = vsub.f32 %v10543_v30, %v16478_v40 }
 0x2ca   :  { %v1557_v37 = vadd.f32 %v1556_v48, %v1408_v53  ;;  %v2195_v48 = vld [vmem:[%s16470_s2 + $0x100] sm:$0xff]  ;;  %2495 = vmatpush.msrb.mxu3 %v2494_v28  ;;  %v10567_v5 = vsub.f32 %v2199_v32, %v10552_v51  ;;  %2442 = vmatpush.msrb.mxu2 %v10552_v51  ;;  %v1752_v32 = vrot.slane %v10512_v6, 4 }
 0x2cb   :  { %v10569_v45 = vand.u32 4294901760, %v2195_v48  ;;  %v2191_v53 = vld [vmem:[%s16470_s2 + $0xe0] sm:$0xff] }
 0x2cc   :  { %v1940_v61 = vrot.slane %v1557_v37, 4  ;;  %v1943_v22 = vsel %vm1592_vm3, %v1557_v37, %v1942_v63  ;;  %v2506_v63 = vand.u32 4294901760, %v2505_v62  ;;  %v10581_v37 = vand.u32 4294901760, %v2191_v53  ;;  %2501 = vmatpush.msrb.mxu3 %v2500_v20 }
 0x2cd   :  { %v16483_v14 = vand.u32 4294901760, %v10567_v5  ;;  %v10588_v47 = vsub.f32 %v2195_v48, %v10569_v45  ;;  %2444 = vmatpush.msrb.mxu2 %v10569_v45  ;;  %v2512_v62 = vand.u32 4294901760, %v2511_v17  ;;  %v1766_v20 = vrot.slane %v10547_v35, 4 }
 0x2ce   :  { %v1941_v54 = vsel %vm1592_vm3, %v1940_v61, %v1541_v11  ;;  %v10576_v38 = vpop.f32.mrf.mxu1  ;;  %v2187_v11 = vld [vmem:[%s16470_s2 + $0xc0] sm:$0xff]  ;;  %v10594_v61 = vpop.f32.mrf.mxu2  ;;  %v10597_v40 = vsub.f32 %v2191_v53, %v10581_v37  ;;  %v10604_v48 = vperm.slane %v10452_v10, %v10170_v8  ;;  %2507 = vmatpush.msrb.mxu3 %v2506_v63  ;;  %v1764_v17 = vrot.slane %v10564_v27, 4 }
 0x2cf   :  { %v10584_v28 = vpop.f32.mrf.mxu0  ;;  %v10599_v6 = vand.u32 4294901760, %v2187_v11  ;;  %v2517_v41 = vsub.f32 %v10567_v5, %v16483_v14  ;;  %v16484_v23 = vand.u32 4294901760, %v10588_v47  ;;  %v2183_v53 = vld [vmem:[%s16470_s2 + $0xa0] sm:$0xff]  ;;  %2446 = vmatpush.msrb.mxu2 %v10581_v37  ;;  %v10630_v39 = vsel %vm1592_vm3, %v1752_v32, %v10479_v29 }
 0x2d0   :  { %v10619_v63 = vand.u32 4294901760, %v2183_v53  ;;  %2513 = vmatpush.msrb.mxu3 %v2512_v62  ;;  %v10636_v62 = vpop.f32.mrf.mxu3  ;;  %v1947_v9 = vperm.slane %v1941_v54, %v10170_v8  ;;  %v10646_v32 = vand.u32 4294901760, %v2179_v31  ;;  %v1951_v54 = vperm.slane %v1943_v22, %v10170_v8 }
 0x2d1   :  { %v10617_v10 = vsub.f32 %v2187_v11, %v10599_v6  ;;  %v2518_v16 = vand.u32 4294901760, %v2517_v41  ;;  %v2523_v14 = vsub.f32 %v10588_v47, %v16484_v23  ;;  %2448 = vmatpush.msrb.mxu2 %v10599_v6  ;;  %v10634_v11 = vsel %vm1592_vm3, %v10564_v27, %v1766_v20  ;;  %v2175_v27 = vld [vmem:[%s16470_s2 + $0x60] sm:$0xff] }
 0x2d2   :  { %17508 = vst [vmem:[#allocation13_spill] sm:$0xff] %v10634_v11  ;;  %v17509_v41 = vand.u32 4294901760, %v10597_v40  ;;  %v10643_v34 = vsub.f32 %v2183_v53, %v10619_v63  ;;  %v10656_v12 = vand.u32 4294901760, %v2175_v27  ;;  %v10665_v49 = vsub.f32 %v2179_v31, %v10646_v32 }
 0x2d3   :  { %17507 = vst [vmem:[#allocation15_spill] sm:$0xff] %v10617_v10  ;;  %v16485_v60 = vand.u32 4294901760, %v10617_v10  ;;  %2519 = vmatpush.msrb.mxu3 %v2518_v16  ;;  %v2524_v29 = vand.u32 4294901760, %v2523_v14  ;;  %2450 = vmatpush.msrb.mxu2 %v10619_v63  ;;  %v1978_v16 = vrot.slane %v10604_v48, 4  ;;  %v1939_v22 = vperm.slane %v10444_v19, %v10170_v8 }
 0x2d4   :  { %v2529_v23 = vsub.f32 %v10597_v40, %v17509_v41  ;;  %17510 = vst [vmem:[#allocation12_spill] sm:$0xff] %v10646_v32  ;;  %v17514_v15 = vand.u32 4294901760, %v10643_v34  ;;  %v10681_v31 = vsub.f32 %v2175_v27, %v10656_v12  ;;  %v1976_v2 = vrot.slane %v1947_v9, 4 }
 0x2d5   :  { %v2535_v41 = vsub.f32 %v10617_v10, %v16485_v60  ;;  %17511 = vst [vmem:[#allocation10_spill] sm:$0xff] %v10656_v12  ;;  %2525 = vmatpush.msrb.mxu3 %v2524_v29  ;;  %2452 = vmatpush.msrb.mxu2 %v10646_v32  ;;  %v10673_v60 = vsel %vm1592_vm3, %v1764_v17, %v10547_v35  ;;  %v16493_v11 = vand.u32 4294901760, %v10665_v49  ;;  %v2167_v35 = vld [vmem:[%s16470_s2 + $0x20] sm:$0xff] }
 0x2d6   :  { %v2530_v20 = vand.u32 4294901760, %v2529_v23  ;;  %v10660_v14 = vpop.f32.mrf.mxu1  ;;  %v2171_v23 = vld [vmem:[%s16470_s2 + $0x40] sm:$0xff]  ;;  %17513 = vst [vmem:[#allocation14_spill] sm:$0xff] %v10673_v60  ;;  %v2541_v29 = vsub.f32 %v10643_v34, %v17514_v15  ;;  %v10691_v19 = vsel %vm1592_vm3, %v1947_v9, %v1978_v16  ;;  %v1054_v17 = vpop.f32.mrf.mxu2  ;;  %v16496_v27 = vand.u32 4294901760, %v10681_v31 }
 0x2d7   :  { %17512 = vst [vmem:[#allocation17_spill] sm:$0xff] %v10660_v14  ;;  %v10662_v52 = vpop.f32.mrf.mxu0  ;;  %v2536_v53 = vand.u32 4294901760, %v2535_v41  ;;  %v10684_v32 = vand.u32 4294901760, %v2171_v23  ;;  %2454 = vmatpush.msrb.mxu2 %v10656_v12  ;;  %v10694_v41 = vand.u32 4294901760, %v2167_v35  ;;  %v2547_v8 = vsub.f32 %v10665_v49, %v16493_v11  ;;  %v2163_v9 = vld [vmem:[%s16470_s2] sm:$0xff] }
 0x2d8   :  { %2531 = vmatpush.msrb.mxu3 %v2530_v20  ;;  %17516 = vst [vmem:[#allocation44_spill] sm:$0xff] %v10691_v19  ;;  %v2542_v15 = vand.u32 4294901760, %v2541_v29  ;;  %v1988_v20 = vrot.slane %v1951_v54, 4  ;;  %v2553_v16 = vsub.f32 %v10681_v31, %v16496_v27  ;;  %v1990_v12 = vrot.slane %v1939_v22, 4 }
 0x2d9   :  { %17515 = vst [vmem:[#allocation43_spill] sm:$0xff] %v10684_v32  ;;  %v10700_v60 = vsub.f32 %v2171_v23, %v10684_v32  ;;  %2456 = vmatpush.msrb.mxu2 %v10684_v32  ;;  %v10710_v29 = vsub.f32 %v2167_v35, %v10694_v41  ;;  %v2548_v11 = vand.u32 4294901760, %v2547_v8  ;;  %v10718_v19 = vsel %vm1592_vm3, %v1976_v2, %v10604_v48  ;;  %v1264_v32 = vpop.f32.mrf.mxu3  ;;  %v17522_v48 = vld [vmem:[#allocation19_spill] sm:$0xff] }
 0x2da   :  { %2537 = vmatpush.msrb.mxu3 %v2536_v53  ;;  %v10712_v53 = vand.u32 4294901760, %v2163_v9  ;;  %17520 = vst [vmem:[#allocation48_spill] sm:$0xff] %v10718_v19  ;;  %v2554_v42 = vand.u32 4294901760, %v2553_v16  ;;  %v10734_v2 = vsel %vm1592_vm3, %v1988_v20, %v1939_v22  ;;  %v17523_v16 = vld [vmem:[#allocation16_spill] sm:$0xff] }
 0x2db   :  { %17517 = vst [vmem:[#allocation45_spill] sm:$0xff] %v10700_v60  ;;  %v16497_v23 = vand.u32 4294901760, %v10700_v60  ;;  %2458 = vmatpush.msrb.mxu2 %v10694_v41  ;;  %v857_v27 = vadd.f32 %v17523_v16, %v17522_v48  ;;  %v17525_v16 = vld [vmem:[#allocation27_spill] sm:$0xff] }
 0x2dc   :  { %17518 = vst [vmem:[#allocation46_spill] sm:$0xff] %v10710_v29  ;;  %2543 = vmatpush.msrb.mxu3 %v2542_v15  ;;  %v10722_v35 = vsub.f32 %v2163_v9, %v10712_v53  ;;  %v10731_v15 = vsel %vm1592_vm3, %v1951_v54, %v1990_v12  ;;  %v17524_v9 = vand.u32 4294901760, %v10710_v29 }
 0x2dd   :  { %17519 = vst [vmem:[#allocation47_spill] sm:$0xff] %v10712_v53  ;;  %v2559_v8 = vsub.f32 %v10700_v60, %v16497_v23  ;;  %2460 = vmatpush.msrb.mxu2 %v10712_v53  ;;  %v1035_v22 = vadd.f32 %v10425_v21, %v857_v27 }
 0x2de   :  { %17521 = vst [vmem:[#allocation49_spill] sm:$0xff] %v10722_v35  ;;  %2549 = vmatpush.msrb.mxu3 %v2548_v11  ;;  %v2565_v19 = vsub.f32 %v10710_v29, %v17524_v9  ;;  %v16501_v11 = vand.u32 4294901760, %v10722_v35  ;;  %v10743_v23 = vpop.f32.mrf.mxu1  ;;  %v1059_v20 = vpop.f32.mrf.mxu2  ;;  %v17526_v9 = vld [vmem:[#allocation24_spill] sm:$0xff] }
 0x2df   :  { %v10724_v14 = vpop.f32.mrf.mxu0  ;;  %2585 = vmatpush.msra.mxu2 %v10463_v18  ;;  %v2560_v53 = vand.u32 4294901760, %v2559_v8  ;;  %v873_v18 = vadd.f32 %v17526_v9, %v17525_v16  ;;  %v17527_v8 = vld [vmem:[#allocation21_spill] sm:$0xff]  ;;  %v17531_v9 = vld [vmem:[#allocation23_spill] sm:$0xff] }
 0x2e0   :  { %2555 = vmatpush.msrb.mxu3 %v2554_v42  ;;  %v2566_v12 = vand.u32 4294901760, %v2565_v19  ;;  %v2571_v54 = vsub.f32 %v10722_v35, %v16501_v11  ;;  %v1241_v19 = vadd.f32 %v10433_v44, %v1035_v22  ;;  %v17528_v11 = vld [vmem:[#allocation18_spill] sm:$0xff] }
 0x2e1   :  { %2588 = vmatpush.msra.mxu2 %v10473_v56  ;;  %v1270_v56 = vpop.f32.mrf.mxu3  ;;  %v1055_v21 = vadd.f32 %v1054_v17, %v873_v18  ;;  %v17530_v22 = vld [vmem:[#allocation26_spill] sm:$0xff] }
 0x2e2   :  { %2561 = vmatpush.msrb.mxu3 %v2560_v53  ;;  %v2572_v48 = vand.u32 4294901760, %v2571_v54  ;;  %v861_v53 = vadd.f32 %v17528_v11, %v17527_v8  ;;  %v1412_v27 = vadd.f32 %v10584_v28, %v1241_v19  ;;  %v17529_v11 = vld [vmem:[#allocation29_spill] sm:$0xff] }
 0x2e3   :  { %2591 = vmatpush.msra.mxu2 %v10493_v0  ;;  %v1265_v44 = vadd.f32 %v1264_v32, %v1055_v21 }
 0x2e4   :  { %2567 = vmatpush.msrb.mxu3 %v2566_v12  ;;  %v1040_v54 = vadd.f32 %v10441_v46, %v861_v53  ;;  %v1561_v18 = vadd.f32 %v10503_v25, %v1412_v27  ;;  %v17532_v46 = vld [vmem:[#allocation20_spill] sm:$0xff] }
 0x2e5   :  { %2594 = vmatpush.msra.mxu2 %v10516_v4  ;;  %v865_v19 = vadd.f32 %v17532_v46, %v17531_v9 }
 0x2e6   :  { %2573 = vmatpush.msrb.mxu3 %v2572_v48  ;;  %v1576_v12 = vpop.f32.mrf.mxu1  ;;  %v877_v48 = vadd.f32 %v17530_v22, %v17529_v11  ;;  %v1064_v16 = vpop.f32.mrf.mxu2  ;;  %v1247_v17 = vadd.f32 %v10460_v57, %v1040_v54  ;;  %v1730_v21 = vrot.slane %v1561_v18, 4  ;;  %v17533_v11 = vld [vmem:[#allocation25_spill] sm:$0xff]  ;;  %v17534_v57 = vld [vmem:[#allocation22_spill] sm:$0xff] }
 0x2e7   :  { %v10754_v42 = vpop.f32.mrf.mxu0  ;;  %2597 = vmatpush.msra.mxu2 %v10523_v59  ;;  %v869_v54 = vadd.f32 %v17534_v57, %v17533_v11  ;;  %v1045_v22 = vadd.f32 %v10500_v50, %v865_v19 }
 0x2e8   :  { %2643 = vmatpush.msra.mxu3 %v10454_v3  ;;  %v1060_v32 = vadd.f32 %v1059_v20, %v877_v48  ;;  %v1416_v25 = vadd.f32 %v10662_v52, %v1247_v17  ;;  %v17537_v52 = vld [vmem:[#allocation32_spill] sm:$0xff] }
 0x2e9   :  { %2600 = vmatpush.msra.mxu2 %v10543_v30  ;;  %v1276_v53 = vpop.f32.mrf.mxu3  ;;  %v1050_v50 = vadd.f32 %v10594_v61, %v869_v54 }
 0x2ea   :  { %2645 = vmatpush.msra.mxu3 %v10465_v36 }
 0x2eb   :  { %2603 = vmatpush.msra.mxu2 %v10567_v5  ;;  %v1259_v61 = vadd.f32 %v10636_v62, %v1050_v50  ;;  %v10816_v62 = vperm.slane %v10203_v58, %v10313_v43  ;;  %v17542_v58 = vld [vmem:[#allocation13_spill] sm:$0xff]  ;;  %v17543_v50 = vld [vmem:[#allocation14_spill] sm:$0xff] }
 0x2ec   :  { %2647 = vmatpush.msra.mxu3 %v10475_v24 }
 0x2ed   :  { %2606 = vmatpush.msra.mxu2 %v10588_v47 }
 0x2ee   :  { %2649 = vmatpush.msra.mxu3 %v10495_v1  ;;  %v1580_v17 = vpop.f32.mrf.mxu1  ;;  %v1069_v57 = vpop.f32.mrf.mxu2 }
 0x2ef   :  { %v1427_v28 = vpop.f32.mrf.mxu0  ;;  %2609 = vmatpush.msra.mxu2 %v10597_v40 }
 0x2f0   :  { %v1428_v8 = vadd.f32 %v1427_v28, %v1265_v44  ;;  %2651 = vmatpush.msra.mxu3 %v10508_v7  ;;  %v17535_v44 = vld [vmem:[#allocation31_spill] sm:$0xff]  ;;  %v17536_v28 = vld [vmem:[#allocation28_spill] sm:$0xff] }
 0x2f1   :  { %2612 = vmatpush.msra.mxu2 %v10617_v10  ;;  %v881_v9 = vadd.f32 %v17536_v28, %v17535_v44  ;;  %v1565_v10 = vadd.f32 %v10576_v38, %v1416_v25 }
 0x2f2   :  { %v1577_v27 = vadd.f32 %v1576_v12, %v1428_v8  ;;  %2653 = vmatpush.msra.mxu3 %v10525_v55  ;;  %v17538_v12 = vld [vmem:[#allocation30_spill] sm:$0xff]  ;;  %v1271_v8 = vadd.f32 %v1270_v56, %v1060_v32 }
 0x2f3   :  { %2615 = vmatpush.msra.mxu2 %v10643_v34  ;;  %v885_v48 = vadd.f32 %v17538_v12, %v17537_v52  ;;  %v1954_v38 = vrot.slane %v1565_v10, 4  ;;  %v17540_v12 = vld [vmem:[#allocation6_spill] sm:$0xff] }
 0x2f4   :  { %v1728_v46 = vrot.slane %v1577_v27, 4  ;;  %v1731_v20 = vsel %vm1592_vm3, %v1577_v27, %v1730_v21  ;;  %2655 = vmatpush.msra.mxu3 %v10552_v51  ;;  %v1253_v21 = vadd.f32 %v10539_v13, %v1045_v22  ;;  %v1065_v27 = vadd.f32 %v1064_v16, %v881_v9  ;;  %v1282_v13 = vpop.f32.mrf.mxu3 }
 0x2f5   :  { %2618 = vmatpush.msra.mxu2 %v10665_v49  ;;  %v1070_v56 = vadd.f32 %v1069_v57, %v885_v48  ;;  %v1688_v16 = vrot.slane %v10365_v26, 4  ;;  %v10812_v9 = vperm.slane %v10630_v39, %v10313_v43  ;;  %v17539_v26 = vld [vmem:[#allocation17_spill] sm:$0xff]  ;;  %v10822_v48 = vperm.slane %v17540_v12, %v10313_v43  ;;  %v17545_v57 = vld [vmem:[#allocation7_spill] sm:$0xff] }
 0x2f6   :  { %v1729_v11 = vsel %vm1592_vm3, %v1728_v46, %v1561_v18  ;;  %2657 = vmatpush.msra.mxu3 %v10569_v45  ;;  %v1420_v18 = vadd.f32 %v10724_v14, %v1253_v21  ;;  %v1277_v25 = vadd.f32 %v1276_v53, %v1065_v27  ;;  %v10808_v14 = vperm.slane %v10537_v33, %v10313_v43  ;;  %v2043_v46 = vpop.permute.xlu2 %2042  ;;  %v17541_v33 = vld [vmem:[#allocation12_spill] sm:$0xff]  ;;  %v1584_v39 = vpop.f32.mrf.mxu1 }
 0x2f7   :  { %v1431_v19 = vpop.f32.mrf.mxu0  ;;  %2621 = vmatpush.msra.mxu2 %v10681_v31  ;;  %v1283_v28 = vadd.f32 %v1282_v13, %v1070_v56  ;;  %v1424_v27 = vadd.f32 %v10754_v42, %v1259_v61 }
 0x2f8   :  { %v1432_v44 = vadd.f32 %v1431_v19, %v1271_v8  ;;  %2659 = vmatpush.msra.mxu3 %v10581_v37  ;;  %v1569_v53 = vadd.f32 %v17539_v26, %v1420_v18  ;;  %v10828_v8 = vperm.slane %v17542_v58, %v10313_v43  ;;  %v10832_v19 = vperm.slane %v17543_v50, %v10313_v43 }
 0x2f9   :  { %2624 = vmatpush.msra.mxu2 %v10700_v60  ;;  %v1806_v26 = vrot.slane %v10808_v14, 4 }
 0x2fa   :  { %v1581_v32 = vadd.f32 %v1580_v17, %v1432_v44  ;;  %2661 = vmatpush.msra.mxu3 %v10599_v6  ;;  %v1689_v44 = vsel %vm1592_vm3, %v1688_v16, %v17545_v57  ;;  %v1742_v58 = vrot.slane %v1569_v53, 4  ;;  %v1573_v57 = vadd.f32 %v10743_v23, %v1424_v27 }
 0x2fb   :  { %2627 = vmatpush.msra.mxu2 %v10710_v29  ;;  %v2137_v18 = vsel %vm2136_vm0, %v1689_v44, %v2043_v46  ;;  %v1814_v46 = vrot.slane %v10828_v8, 4 }
 0x2fc   :  { %v1952_v54 = vrot.slane %v1581_v32, 4  ;;  %v1955_v22 = vsel %vm1592_vm3, %v1581_v32, %v1954_v38  ;;  %2663 = vmatpush.msra.mxu3 %v10619_v63  ;;  %v17546_v38 = vld [vmem:[#allocation10_spill] sm:$0xff]  ;;  %v17547_v32 = vld [vmem:[#allocation33_spill] sm:$0xff] }
 0x2fd   :  { %2630 = vmatpush.msra.mxu2 %v10722_v35  ;;  %v1739_v13 = vperm.slane %v1731_v20, %v17547_v32  ;;  %v1735_v50 = vperm.slane %v1729_v11, %v17547_v32  ;;  %v1810_v20 = vrot.slane %v10832_v19, 4  ;;  %v17552_v35 = vld [vmem:[#allocation47_spill] sm:$0xff] }
 0x2fe   :  { %v1953_v52 = vsel %vm1592_vm3, %v1952_v54, %v1565_v10  ;;  %2665 = vmatpush.msra.mxu3 %v17541_v33  ;;  %v17544_v10 = vld [vmem:[#allocation44_spill] sm:$0xff] }
 0x2ff   :  { %v1435_v17 = vpop.f32.mrf.mxu0  ;;  %v10836_v21 = vperm.slane %v17544_v10, %v10313_v43  ;;  %v2059_v61 = vpop.permute.xlu1 %2058 }
 0x300   :  { %v1436_v56 = vadd.f32 %v1435_v17, %v1277_v25  ;;  %2667 = vmatpush.msra.mxu3 %v17546_v38  ;;  %v17548_v25 = vld [vmem:[#allocation43_spill] sm:$0xff] }
 0x301   :  { %v2051_v54 = vpop.permute.xlu0 %2050 }
 0x302   :  { %v1585_v42 = vadd.f32 %v1584_v39, %v1436_v56  ;;  %v2140_v16 = vsel %vm2139_vm4, %v2137_v18, %v2051_v54  ;;  %2669 = vmatpush.msra.mxu3 %v17548_v25  ;;  %v1790_v39 = vrot.slane %v1739_v13, 4  ;;  %v17550_v18 = vld [vmem:[#allocation48_spill] sm:$0xff] }
 0x303   :  { %v2143_v17 = vsel %vm2142_vm5, %v2140_v16, %v2059_v61  ;;  %v10861_v54 = vperm.slane %v17550_v18, %v10313_v43  ;;  %v10865_v61 = vperm.slane %v10731_v15, %v10313_v43 }
 0x304   :  { %v1740_v44 = vrot.slane %v1585_v42, 4  ;;  %v1743_v12 = vsel %vm1592_vm3, %v1585_v42, %v1742_v58  ;;  %v10855_v11 = vand.u32 4294901760, %v2143_v17  ;;  %2671 = vmatpush.msra.mxu3 %v10694_v41  ;;  %v1778_v58 = vrot.slane %v1735_v50, 4 }
 0x305   :  { %v1751_v56 = vperm.slane %v1743_v12, %v17547_v32  ;;  %v10874_v42 = vperm.slane %v10734_v2, %v10313_v43  ;;  %v1963_v12 = vperm.slane %v1955_v22, %v17547_v32  ;;  %v1959_v2 = vperm.slane %v1953_v52, %v17547_v32  ;;  %v1588_v22 = vpop.f32.mrf.mxu1 }
 0x306   :  { %17549 = vst [vmem:[#allocation19_spill] sm:$0xff] %v10855_v11  ;;  %v1741_v23 = vsel %vm1592_vm3, %v1740_v44, %v1569_v53  ;;  %v10869_v27 = vsub.f32 %v2143_v17, %v10855_v11  ;;  %2575 = vmatmul.f32.vlgmr.msrb.gmra.mxu3 %v10855_v11  ;;  %v1966_v53 = vrot.slane %v1573_v57, 4 }
 0x307   :  { %v1747_v16 = vperm.slane %v1741_v23, %v17547_v32  ;;  %v1788_v18 = vrot.slane %v1751_v56, 4  ;;  %v1439_v10 = vpop.f32.mrf.mxu0  ;;  %v1791_v15 = vsel %vm1592_vm3, %v1751_v56, %v1790_v39  ;;  %2673 = vmatpush.msra.mxu3 %v17552_v35 }
 0x308   :  { %17551 = vst [vmem:[#allocation16_spill] sm:$0xff] %v10869_v27  ;;  %v1440_v17 = vadd.f32 %v1439_v10, %v1283_v28  ;;  %v10881_v44 = vand.u32 4294901760, %v10869_v27  ;;  %v1799_v11 = vperm.slane %v1791_v15, %v10313_v43 }
 0x309   :  { %2761 = vmatpush.msrb.mxu3 %v10454_v3  ;;  %v1779_v23 = vsel %vm1592_vm3, %v1747_v16, %v1778_v58  ;;  %v1776_v29 = vrot.slane %v1747_v16, 4  ;;  %v1789_v60 = vsel %vm1592_vm3, %v1788_v18, %v1739_v13  ;;  %v2014_v3 = vrot.slane %v1963_v12, 4 }
 0x30a   :  { %17553 = vst [vmem:[#allocation27_spill] sm:$0xff] %v10881_v44  ;;  %v1589_v39 = vadd.f32 %v1588_v22, %v1440_v17  ;;  %v1787_v56 = vperm.slane %v1779_v23, %v10313_v43  ;;  %v2464_v28 = vsub.f32 %v10869_v27, %v10881_v44  ;;  %v10892_v10 = vsel %vm1592_vm3, %v1799_v11, %v1814_v46 }
 0x30b   :  { %2763 = vmatpush.msrb.mxu3 %v10465_v36  ;;  %v1777_v52 = vsel %vm1592_vm3, %v1776_v29, %v1735_v50  ;;  %v1812_v15 = vrot.slane %v1799_v11, 4  ;;  %v1795_v58 = vperm.slane %v1789_v60, %v10313_v43  ;;  %v2002_v11 = vrot.slane %v1959_v2, 4 }
 0x30c   :  { %v1964_v16 = vrot.slane %v1589_v39, 4  ;;  %v1967_v13 = vsel %vm1592_vm3, %v1589_v39, %v1966_v53  ;;  %v1807_v18 = vsel %vm1592_vm3, %v1787_v56, %v1806_v26  ;;  %v10899_v17 = vand.u32 4294901760, %v2464_v28 }
 0x30d   :  { %2765 = vmatpush.msrb.mxu3 %v10475_v24  ;;  %v1975_v46 = vperm.slane %v1967_v13, %v17547_v32  ;;  %2060 = vrot.lane.b32.xlu1 %v1807_v18, %s9559_s0  ;;  %v1804_v36 = vrot.slane %v1787_v56, 4  ;;  %v1783_v22 = vperm.slane %v1777_v52, %v10313_v43  ;;  %v1813_v29 = vsel %vm1592_vm3, %v1812_v15, %v10828_v8  ;;  %v17555_v56 = vld [vmem:[#allocation11_spill] sm:$0xff]  ;;  %v17558_v13 = vld [vmem:[#allocation9_spill] sm:$0xff] }
 0x30e   :  { %17554 = vst [vmem:[#allocation24_spill] sm:$0xff] %v10899_v17  ;;  %v1965_v60 = vsel %vm1592_vm3, %v1964_v16, %v1573_v57  ;;  %2466 = vmatmul.f32.vlgmr.msrb.gmra.mxu2 %v10899_v17  ;;  %v1808_v50 = vrot.slane %v1795_v58, 4  ;;  %v1811_v26 = vsel %vm1592_vm3, %v1795_v58, %v1810_v20  ;;  %v17556_v28 = vand.u32 4294901760, %v17555_v56 }
 0x30f   :  { %2767 = vmatpush.msrb.mxu3 %v10495_v1  ;;  %v1971_v24 = vperm.slane %v1965_v60, %v17547_v32  ;;  %v2012_v53 = vrot.slane %v1975_v46, 4  ;;  %v1805_v23 = vsel %vm1592_vm3, %v1804_v36, %v10808_v14  ;;  %v1800_v39 = vrot.slane %v1783_v22, 4 }
 0x310   :  { %2690 = vmatpush.msrb.mxu2 %v17556_v28  ;;  %2052 = vrot.lane.b32.xlu0 %v1805_v23, %s9560_s8  ;;  %v17557_v8 = vrot.slane %v10812_v9, 4  ;;  %v2015_v20 = vsel %vm1592_vm3, %v1975_v46, %v2014_v3  ;;  %v2038_v1 = vrot.slane %v10865_v61, 4  ;;  %v10925_v52 = vsel %vm1592_vm3, %v1808_v50, %v10832_v19 }
 0x311   :  { %2769 = vmatpush.msrb.mxu3 %v10508_v7  ;;  %v2003_v14 = vsel %vm1592_vm3, %v1971_v24, %v2002_v11  ;;  %v2000_v15 = vrot.slane %v1971_v24, 4  ;;  %v2023_v58 = vperm.slane %v2015_v20, %v10313_v43  ;;  %v2013_v16 = vsel %vm1592_vm3, %v2012_v53, %v1963_v12 }
 0x312   :  { %v1803_v57 = vsel %vm1592_vm3, %v1783_v22, %v17557_v8  ;;  %v17559_v18 = vand.u32 4294901760, %v17558_v13  ;;  %v2011_v3 = vperm.slane %v2003_v14, %v10313_v43  ;;  %v2026_v7 = vrot.slane %v10861_v54, 4 }
 0x313   :  { %2044 = vrot.lane.b32.xlu2 %v1803_v57, %s9561_s9  ;;  %v2019_v46 = vperm.slane %v2013_v16, %v10313_v43  ;;  %v10938_v19 = vsel %vm1592_vm3, %v1800_v39, %v10812_v9  ;;  %2771 = vmatpush.msrb.mxu3 %v10525_v55  ;;  %v2001_v36 = vsel %vm1592_vm3, %v2000_v15, %v1959_v2  ;;  %v2036_v12 = vrot.slane %v2023_v58, 4  ;;  %v17562_v2 = vld [vmem:[#allocation8_spill] sm:$0xff] }
 0x314   :  { %2694 = vmatpush.msrb.mxu2 %v17559_v18  ;;  %v10943_v22 = vsel %vm1592_vm3, %v2023_v58, %v2038_v1  ;;  %v2034_v60 = vrot.slane %v10874_v42, 4  ;;  %v17560_v50 = vand.u32 4294901760, %v10493_v0  ;;  %v17561_v11 = vrot.slane %v10836_v21, 4  ;;  %v17576_v1 = vld [vmem:[#allocation38_spill] sm:$0xff] }
 0x315   :  { %v2028_v9 = vrot.slane %v2011_v3, 4  ;;  %v2007_v53 = vperm.slane %v2001_v36, %v10313_v43  ;;  %v2032_v55 = vrot.slane %v2019_v46, 4  ;;  %2773 = vmatpush.msrb.mxu3 %v10552_v51  ;;  %2082 = vrot.lane.b32.xlu1 %v17562_v2, %s9559_s0  ;;  %v1698_v23 = vrot.slane %v10816_v62, 4 }
 0x316   :  { %2698 = vmatpush.msrb.mxu2 %v17560_v50  ;;  %v10951_v24 = vsel %vm1592_vm3, %v2011_v3, %v17561_v11  ;;  %v10960_v0 = vsel %vm1592_vm3, %v2036_v12, %v10865_v61  ;;  %v10963_v39 = vsel %vm1592_vm3, %v2019_v46, %v2034_v60  ;;  %v17563_v56 = vand.u32 4294901760, %v10516_v4  ;;  %v17565_v4 = vld [vmem:[#allocation36_spill] sm:$0xff]  ;;  %v17587_v60 = vld [vmem:[#allocation42_spill] sm:$0xff] }
 0x317   :  { %v10969_v28 = vsel %vm1592_vm3, %v2028_v9, %v10836_v21  ;;  %v10972_v51 = vsel %vm1592_vm3, %v2007_v53, %v2026_v7  ;;  %v2024_v8 = vrot.slane %v2007_v53, 4  ;;  %2775 = vmatpush.msrb.mxu3 %v10569_v45  ;;  %v10977_v61 = vsel %vm1592_vm3, %v2032_v55, %v10874_v42  ;;  %v17583_v3 = vld [vmem:[#allocation40_spill] sm:$0xff]  ;;  %v17591_v55 = vld [vmem:[#allocation46_spill] sm:$0xff] }
 0x318   :  { %2702 = vmatpush.msrb.mxu2 %v17563_v56  ;;  %v17564_v57 = vand.u32 4294901760, %v10523_v59  ;;  %2074 = vrot.lane.b32.xlu0 %v17565_v4, %s9560_s8  ;;  %v1699_v21 = vsel %vm1592_vm3, %v10822_v48, %v1698_v23  ;;  %v17566_v45 = vand.u32 4294901760, %v10543_v30  ;;  %v17567_v59 = vand.u32 4294901760, %v10567_v5  ;;  %v2351_v30 = vld [vmem:[%s16470_s2 + $0x5e0] sm:$0xff]  ;;  %v17593_v23 = vld [vmem:[#allocation49_spill] sm:$0xff] }
 0x319   :  { %2777 = vmatpush.msrb.mxu3 %v10581_v37  ;;  %v10988_v20 = vsel %vm1592_vm3, %v2024_v8, %v10861_v54  ;;  %v17568_v37 = vand.u32 4294901760, %v10588_v47  ;;  %v17569_v54 = vand.u32 4294901760, %v10597_v40  ;;  %v2347_v47 = vld [vmem:[%s16470_s2 + $0x5c0] sm:$0xff]  ;;  %v11037_v14 = vperm.slane %v17576_v1, %v10313_v43  ;;  %v17595_v8 = vld [vmem:[#allocation34_spill] sm:$0xff] }
 0x31a   :  { %2706 = vmatpush.msrb.mxu2 %v17564_v57  ;;  %v2343_v5 = vld [vmem:[%s16470_s2 + $0x5a0] sm:$0xff]  ;;  %v11024_v42 = vand.u32 4294901760, %v2347_v47  ;;  %v17578_v58 = vand.u32 4294901760, %v10643_v34  ;;  %v17584_v34 = vand.u32 4294901760, %v10665_v49  ;;  %v17592_v2 = vand.u32 4294901760, %v17591_v55  ;;  %v17596_v57 = vld [vmem:[#allocation37_spill] sm:$0xff] }
 0x31b   :  { %2066 = vrot.lane.b32.xlu2 %v1699_v21, %s9561_s9  ;;  %2779 = vmatpush.msrb.mxu3 %v10599_v6  ;;  %v17570_v40 = vld [vmem:[#allocation15_spill] sm:$0xff]  ;;  %v17594_v56 = vand.u32 4294901760, %v17593_v23  ;;  %v11112_v4 = vperm.slane %v17596_v57, %v10313_v43 }
 0x31c   :  { %2710 = vmatpush.msrb.mxu2 %v17566_v45  ;;  %v17571_v6 = vand.u32 4294901760, %v17570_v40  ;;  %17574 = vst [vmem:[#allocation18_spill] sm:$0xff] %v11024_v42  ;;  %v11048_v13 = vsub.f32 %v2347_v47, %v11024_v42  ;;  %v17597_v21 = vld [vmem:[#allocation39_spill] sm:$0xff] }
 0x31d   :  { %2781 = vmatpush.msrb.mxu3 %v10619_v63  ;;  %2084 = vrot.lane.b32.xlu1 %v10892_v10, %s9559_s0  ;;  %v17572_v63 = vld [vmem:[#allocation35_spill] sm:$0xff]  ;;  %v11026_v10 = vand.u32 4294901760, %v2343_v5 }
 0x31e   :  { %2714 = vmatpush.msrb.mxu2 %v17567_v59  ;;  %17580 = vst [vmem:[#allocation20_spill] sm:$0xff] %v11048_v13  ;;  %v16523_v36 = vand.u32 4294901760, %v11048_v13 }
 0x31f   :  { %2783 = vmatpush.msrb.mxu3 %v17541_v33  ;;  %v11020_v33 = vperm.slane %v17572_v63, %v10313_v43  ;;  %17575 = vst [vmem:[#allocation29_spill] sm:$0xff] %v11026_v10  ;;  %v11051_v18 = vsub.f32 %v2343_v5, %v11026_v10 }
 0x320   :  { %2718 = vmatpush.msrb.mxu2 %v17568_v37  ;;  %2076 = vrot.lane.b32.xlu0 %v1813_v29, %s9560_s8  ;;  %v2339_v29 = vld [vmem:[%s16470_s2 + $0x580] sm:$0xff] }
 0x321   :  { %2785 = vmatpush.msrb.mxu3 %v17546_v38  ;;  %v11022_v38 = vand.u32 4294901760, %v2351_v30  ;;  %v11039_v15 = vand.u32 4294901760, %v2339_v29  ;;  %17581 = vst [vmem:[#allocation25_spill] sm:$0xff] %v11051_v18  ;;  %v1914_v7 = vrot.slane %v11020_v33, 4  ;;  %v16522_v50 = vand.u32 4294901760, %v11051_v18  ;;  %v2327_v37 = vld [vmem:[%s16470_s2 + $0x520] sm:$0xff] }
 0x322   :  { %2722 = vmatpush.msrb.mxu2 %v17569_v54  ;;  %v2323_v54 = vld [vmem:[%s16470_s2 + $0x500] sm:$0xff] }
 0x323   :  { %2068 = vrot.lane.b32.xlu2 %v1811_v26, %s9561_s9  ;;  %17573 = vst [vmem:[#allocation21_spill] sm:$0xff] %v11022_v38  ;;  %v2335_v26 = vld [vmem:[%s16470_s2 + $0x560] sm:$0xff]  ;;  %2787 = vmatpush.msrb.mxu3 %v17548_v25  ;;  %v11044_v16 = vsub.f32 %v2351_v30, %v11022_v38  ;;  %v11065_v12 = vsub.f32 %v2339_v29, %v11039_v15 }
 0x324   :  { %2726 = vmatpush.msrb.mxu2 %v17571_v6  ;;  %17577 = vst [vmem:[#allocation26_spill] sm:$0xff] %v11039_v15  ;;  %3505 = vmatpush.msra.mxu1 %v11022_v38  ;;  %v11053_v25 = vand.u32 4294901760, %v2335_v26  ;;  %v1915_v49 = vsel %vm1592_vm3, %v11037_v14, %v1914_v7 }
 0x325   :  { %17579 = vst [vmem:[#allocation23_spill] sm:$0xff] %v11044_v16  ;;  %2789 = vmatpush.msrb.mxu3 %v10694_v41  ;;  %2106 = vrot.lane.b32.xlu1 %v17583_v3, %s9559_s0  ;;  %v16524_v46 = vand.u32 4294901760, %v11044_v16  ;;  %v17586_v41 = vand.u32 4294901760, %v10681_v31  ;;  %v16521_v31 = vand.u32 4294901760, %v11065_v12  ;;  %v2311_v3 = vld [vmem:[%s16470_s2 + $0x4a0] sm:$0xff] }
 0x326   :  { %2730 = vmatpush.msrb.mxu2 %v17578_v58  ;;  %17582 = vst [vmem:[#allocation22_spill] sm:$0xff] %v11053_v25  ;;  %3507 = vmatpush.msra.mxu1 %v11024_v42  ;;  %v11078_v11 = vsub.f32 %v2335_v26, %v11053_v25  ;;  %v2315_v58 = vld [vmem:[%s16470_s2 + $0x4c0] sm:$0xff]  ;;  %v1696_v42 = vrot.slane %v10822_v48, 4 }
 0x327   :  { %17585 = vst [vmem:[#allocation31_spill] sm:$0xff] %v11065_v12  ;;  %2791 = vmatpush.msrb.mxu3 %v17552_v35  ;;  %3434 = vmatpush.msra.mxu0 %v16524_v46  ;;  %v17589_v35 = vld [vmem:[#allocation45_spill] sm:$0xff] }
 0x328   :  { %2734 = vmatpush.msrb.mxu2 %v17584_v34  ;;  %2098 = vrot.lane.b32.xlu0 %v17587_v60, %s9560_s8  ;;  %17588 = vst [vmem:[#allocation28_spill] sm:$0xff] %v11078_v11  ;;  %v17590_v9 = vand.u32 4294901760, %v17589_v35  ;;  %v16520_v53 = vand.u32 4294901760, %v11078_v11  ;;  %v2307_v34 = vld [vmem:[%s16470_s2 + $0x480] sm:$0xff]  ;;  %v11183_v60 = vand.u32 4294901760, %v2311_v3  ;;  %v1697_v18 = vsel %vm1592_vm3, %v1696_v42, %v10816_v62 }
 0x329   :  { %3509 = vmatpush.msra.mxu1 %v11026_v10  ;;  %3438 = vmatpush.msra.mxu0 %v16523_v36  ;;  %v2303_v35 = vld [vmem:[%s16470_s2 + $0x460] sm:$0xff] }
 0x32a   :  { %2738 = vmatpush.msrb.mxu2 %v17586_v41  ;;  %v11181_v41 = vand.u32 4294901760, %v2315_v58  ;;  %17608 = vst [vmem:[#allocation10_spill] sm:$0xff] %v11183_v60 }
 0x32b   :  { %2090 = vrot.lane.b32.xlu2 %v1915_v49, %s9561_s9  ;;  %3511 = vmatpush.msra.mxu1 %v11039_v15  ;;  %v11185_v49 = vand.u32 4294901760, %v2307_v34 }
 0x32c   :  { %2742 = vmatpush.msrb.mxu2 %v17590_v9  ;;  %3442 = vmatpush.msra.mxu0 %v16522_v50  ;;  %17607 = vst [vmem:[#allocation7_spill] sm:$0xff] %v11181_v41  ;;  %v11190_v9 = vand.u32 4294901760, %v2303_v35  ;;  %v11195_v55 = vsub.f32 %v2315_v58, %v11181_v41  ;;  %v2415_v58 = vld [vmem:[%s16470_s2 + $0x7e0] sm:$0xff] }
 0x32d   :  { %2108 = vrot.lane.b32.xlu1 %v10951_v24, %s9559_s0  ;;  %3513 = vmatpush.msra.mxu1 %v11053_v25  ;;  %v11108_v24 = vperm.slane %v17595_v8, %v10313_v43  ;;  %17609 = vst [vmem:[#allocation43_spill] sm:$0xff] %v11185_v49  ;;  %v11202_v23 = vsub.f32 %v2307_v34, %v11185_v49  ;;  %v2379_v43 = vld [vmem:[%s16470_s2 + $0x6c0] sm:$0xff] }
 0x32e   :  { %2746 = vmatpush.msrb.mxu2 %v17592_v2  ;;  %3446 = vmatpush.msra.mxu0 %v16521_v31  ;;  %17610 = vst [vmem:[#allocation48_spill] sm:$0xff] %v11190_v9  ;;  %v11199_v2 = vsub.f32 %v2311_v3, %v11183_v60  ;;  %v11210_v57 = vsub.f32 %v2303_v35, %v11190_v9 }
 0x32f   :  { %v1922_v45 = vrot.slane %v11108_v24, 4  ;;  %17611 = vst [vmem:[#allocation47_spill] sm:$0xff] %v11195_v55 }
 0x330   :  { %2750 = vmatpush.msrb.mxu2 %v17594_v56  ;;  %2100 = vrot.lane.b32.xlu0 %v10969_v28, %s9560_s8  ;;  %v17598_v28 = vld [vmem:[#allocation41_spill] sm:$0xff]  ;;  %17612 = vst [vmem:[#allocation11_spill] sm:$0xff] %v11199_v2  ;;  %v16510_v56 = vand.u32 4294901760, %v11195_v55  ;;  %v16509_v8 = vand.u32 4294901760, %v11199_v2 }
 0x331   :  { %3450 = vmatpush.msra.mxu0 %v16520_v53  ;;  %v1923_v59 = vsel %vm1592_vm3, %v11112_v4, %v1922_v45  ;;  %17613 = vst [vmem:[#allocation9_spill] sm:$0xff] %v11202_v23  ;;  %v2299_v45 = vld [vmem:[%s16470_s2 + $0x440] sm:$0xff] }
 0x332   :  { %17614 = vst [vmem:[#allocation8_spill] sm:$0xff] %v11210_v57 }
 0x333   :  { %2092 = vrot.lane.b32.xlu2 %v10972_v51, %s9561_s9  ;;  %v2331_v51 = vld [vmem:[%s16470_s2 + $0x540] sm:$0xff] }
 0x334   :  { %v11137_v30 = vand.u32 4294901760, %v2331_v51 }
 0x335   :  { %2130 = vrot.lane.b32.xlu1 %v17597_v21, %s9559_s0  ;;  %v16511_v21 = vand.u32 4294901760, %v11202_v23 }
 0x336   :  { %17599 = vst [vmem:[#allocation32_spill] sm:$0xff] %v11137_v30  ;;  %v11149_v5 = vsub.f32 %v2331_v51, %v11137_v30  ;;  %3515 = vmatpush.msra.mxu1 %v11137_v30  ;;  %v16513_v51 = vand.u32 4294901760, %v11210_v57  ;;  %v2251_v57 = vld [vmem:[%s16470_s2 + $0x2c0] sm:$0xff] }
 0x337   :  { %v11549_v10 = vand.u32 4294901760, %v2251_v57 }
 0x338   :  { %2122 = vrot.lane.b32.xlu0 %v17598_v28, %s9560_s8  ;;  %17603 = vst [vmem:[#allocation12_spill] sm:$0xff] %v11149_v5  ;;  %v16519_v63 = vand.u32 4294901760, %v11149_v5  ;;  %v2295_v28 = vld [vmem:[%s16470_s2 + $0x420] sm:$0xff] }
 0x33a   :  { %3454 = vmatpush.msra.mxu0 %v16519_v63 }
 0x33b   :  { %2114 = vrot.lane.b32.xlu2 %v1923_v59, %s9561_s9  ;;  %v2291_v59 = vld [vmem:[%s16470_s2 + $0x400] sm:$0xff] }
 0x33d   :  { %2132 = vrot.lane.b32.xlu1 %v10943_v22, %s9559_s0  ;;  %v11139_v22 = vand.u32 4294901760, %v2327_v37 }
 0x33f   :  { %17600 = vst [vmem:[#allocation30_spill] sm:$0xff] %v11139_v22  ;;  %v11153_v40 = vsub.f32 %v2327_v37, %v11139_v22  ;;  %3517 = vmatpush.msra.mxu1 %v11139_v22  ;;  %v11229_v37 = vand.u32 4294901760, %v2299_v45 }
 0x340   :  { %2124 = vrot.lane.b32.xlu0 %v10960_v0, %s9560_s8  ;;  %v11141_v0 = vand.u32 4294901760, %v2323_v54 }
 0x341   :  { %17604 = vst [vmem:[#allocation13_spill] sm:$0xff] %v11153_v40  ;;  %v16517_v29 = vand.u32 4294901760, %v11153_v40  ;;  %v11241_v3 = vsub.f32 %v2299_v45, %v11229_v37 }
 0x342   :  { %17601 = vst [vmem:[#allocation17_spill] sm:$0xff] %v11141_v0  ;;  %v11156_v6 = vsub.f32 %v2323_v54, %v11141_v0  ;;  %3519 = vmatpush.msra.mxu1 %v11141_v0  ;;  %v11231_v54 = vand.u32 4294901760, %v2295_v28 }
 0x343   :  { %2116 = vrot.lane.b32.xlu2 %v10963_v39, %s9561_s9  ;;  %v2319_v39 = vld [vmem:[%s16470_s2 + $0x4e0] sm:$0xff]  ;;  %3458 = vmatpush.msra.mxu0 %v16517_v29  ;;  %17615 = vst [vmem:[#allocation36_spill] sm:$0xff] %v11229_v37  ;;  %v16514_v45 = vand.u32 4294901760, %v11241_v3 }
 0x344   :  { %v11146_v47 = vand.u32 4294901760, %v2319_v39  ;;  %17605 = vst [vmem:[#allocation14_spill] sm:$0xff] %v11156_v6  ;;  %v16516_v1 = vand.u32 4294901760, %v11156_v6  ;;  %v11245_v34 = vsub.f32 %v2295_v28, %v11231_v54  ;;  %v1912_v6 = vrot.slane %v11037_v14, 4 }
 0x345   :  { %17616 = vst [vmem:[#allocation15_spill] sm:$0xff] %v11231_v54  ;;  %v11586_v14 = vsub.f32 %v2251_v57, %v11549_v10 }
 0x346   :  { %17602 = vst [vmem:[#allocation6_spill] sm:$0xff] %v11146_v47  ;;  %v11162_v26 = vsub.f32 %v2319_v39, %v11146_v47  ;;  %3521 = vmatpush.msra.mxu1 %v11146_v47  ;;  %3462 = vmatpush.msra.mxu0 %v16516_v1  ;;  %v11233_v39 = vand.u32 4294901760, %v2291_v59  ;;  %v1913_v42 = vsel %vm1592_vm3, %v1912_v6, %v11020_v33  ;;  %v2204_v33 = vld [vmem:[%s16470_s2 + $0x148] sm:$0xff] }
 0x347   :  { %17618 = vst [vmem:[#allocation38_spill] sm:$0xff] %v11241_v3 }
 0x348   :  { %17606 = vst [vmem:[#allocation44_spill] sm:$0xff] %v11162_v26  ;;  %v16512_v7 = vand.u32 4294901760, %v11162_v26  ;;  %3523 = vmatpush.msra.mxu1 %v11181_v41  ;;  %v11248_v35 = vsub.f32 %v2291_v59, %v11233_v39 }
 0x349   :  { %17617 = vst [vmem:[#allocation35_spill] sm:$0xff] %v11233_v39 }
 0x34a   :  { %3466 = vmatpush.msra.mxu0 %v16512_v7  ;;  %3525 = vmatpush.msra.mxu1 %v11183_v60  ;;  %17619 = vst [vmem:[#allocation40_spill] sm:$0xff] %v11245_v34  ;;  %v16518_v59 = vand.u32 4294901760, %v11248_v35 }
 0x34b   :  { %17620 = vst [vmem:[#allocation42_spill] sm:$0xff] %v11248_v35 }
 0x34c   :  { %3470 = vmatpush.msra.mxu0 %v16510_v56  ;;  %3527 = vmatpush.msra.mxu1 %v11185_v49  ;;  %v11253_v56 = vand.u32 4294901760, %v2415_v58  ;;  %17676 = vst [vmem:[#allocation92_spill] sm:$0xff] %v11586_v14 }
 0x34e   :  { %3474 = vmatpush.msra.mxu0 %v16509_v8  ;;  %3529 = vmatpush.msra.mxu1 %v11190_v9  ;;  %v2411_v8 = vld [vmem:[%s16470_s2 + $0x7c0] sm:$0xff]  ;;  %17621 = vst [vmem:[#allocation45_spill] sm:$0xff] %v11253_v56  ;;  %v11267_v7 = vsub.f32 %v2415_v58, %v11253_v56 }
 0x34f   :  { %v11260_v28 = vand.u32 4294901760, %v2411_v8  ;;  %v2403_v58 = vld [vmem:[%s16470_s2 + $0x780] sm:$0xff] }
 0x350   :  { %3478 = vmatpush.msra.mxu0 %v16511_v21  ;;  %3531 = vmatpush.msra.mxu1 %v11229_v37  ;;  %v16515_v21 = vand.u32 4294901760, %v11245_v34  ;;  %17623 = vst [vmem:[#allocation49_spill] sm:$0xff] %v11267_v7  ;;  %v11290_v1 = vand.u32 4294901760, %v2403_v58  ;;  %v2267_v9 = vld [vmem:[%s16470_s2 + $0x340] sm:$0xff] }
 0x351   :  { %17622 = vst [vmem:[#allocation46_spill] sm:$0xff] %v11260_v28  ;;  %v11473_v37 = vand.u32 4294901760, %v2267_v9 }
 0x352   :  { %3482 = vmatpush.msra.mxu0 %v16513_v51  ;;  %3533 = vmatpush.msra.mxu1 %v11231_v54  ;;  %v11273_v51 = vsub.f32 %v2411_v8, %v11260_v28  ;;  %17626 = vst [vmem:[#allocation39_spill] sm:$0xff] %v11290_v1  ;;  %v11303_v53 = vsub.f32 %v2403_v58, %v11290_v1  ;;  %v2391_v58 = vld [vmem:[%s16470_s2 + $0x720] sm:$0xff] }
 0x353   :  { %v11326_v36 = vand.u32 4294901760, %v2391_v58  ;;  %v11517_v22 = vsub.f32 %v2267_v9, %v11473_v37 }
 0x354   :  { %3486 = vmatpush.msra.mxu0 %v16514_v45  ;;  %3535 = vmatpush.msra.mxu1 %v11233_v39  ;;  %17624 = vst [vmem:[#allocation34_spill] sm:$0xff] %v11273_v51  ;;  %v2407_v45 = vld [vmem:[%s16470_s2 + $0x7a0] sm:$0xff] }
 0x355   :  { %v11288_v8 = vand.u32 4294901760, %v2407_v45  ;;  %17629 = vst [vmem:[#allocation51_spill] sm:$0xff] %v11303_v53  ;;  %v17675_v11 = vand.u32 4294901760, %v11517_v22 }
 0x356   :  { %3759 = vmatpush.msrb.mxu1 %v11253_v56  ;;  %3490 = vmatpush.msra.mxu0 %v16515_v21  ;;  %v2399_v21 = vld [vmem:[%s16470_s2 + $0x760] sm:$0xff]  ;;  %17633 = vst [vmem:[#allocation55_spill] sm:$0xff] %v11326_v36 }
 0x357   :  { %17625 = vst [vmem:[#allocation37_spill] sm:$0xff] %v11288_v8  ;;  %v11292_v29 = vand.u32 4294901760, %v2399_v21  ;;  %v11299_v63 = vsub.f32 %v2407_v45, %v11288_v8  ;;  %v2375_v56 = vld [vmem:[%s16470_s2 + $0x6a0] sm:$0xff]  ;;  %v2883_v12 = vsub.f32 %v11517_v22, %v17675_v11 }
 0x358   :  { %3761 = vmatpush.msrb.mxu1 %v11260_v28  ;;  %3494 = vmatpush.msra.mxu0 %v16518_v59  ;;  %v2395_v59 = vld [vmem:[%s16470_s2 + $0x740] sm:$0xff]  ;;  %17665 = vst [vmem:[#allocation85_spill] sm:$0xff] %v11517_v22 }
 0x359   :  { %17627 = vst [vmem:[#allocation41_spill] sm:$0xff] %v11292_v29  ;;  %v11305_v31 = vand.u32 4294901760, %v2395_v59  ;;  %v11310_v50 = vsub.f32 %v2399_v21, %v11292_v29  ;;  %v2387_v21 = vld [vmem:[%s16470_s2 + $0x700] sm:$0xff] }
 0x35a   :  { %3701 = vmatpush.msrb.mxu0 %v11267_v7  ;;  %17628 = vst [vmem:[#allocation50_spill] sm:$0xff] %v11299_v63  ;;  %3763 = vmatpush.msrb.mxu1 %v11288_v8  ;;  %v11328_v46 = vand.u32 4294901760, %v2387_v21  ;;  %v11345_v8 = vand.u32 4294901760, %v2379_v43  ;;  %v2227_v22 = vld [vmem:[%s16470_s2 + $0x200] sm:$0xff] }
 0x35b   :  { %17630 = vst [vmem:[#allocation52_spill] sm:$0xff] %v11305_v31  ;;  %v11315_v45 = vsub.f32 %v2395_v59, %v11305_v31  ;;  %v2383_v59 = vld [vmem:[%s16470_s2 + $0x6e0] sm:$0xff] }
 0x35c   :  { %3704 = vmatpush.msrb.mxu0 %v11273_v51  ;;  %3765 = vmatpush.msrb.mxu1 %v11290_v1  ;;  %17631 = vst [vmem:[#allocation53_spill] sm:$0xff] %v11310_v50  ;;  %v11343_v1 = vsub.f32 %v2387_v21, %v11328_v46  ;;  %v11361_v21 = vsub.f32 %v2379_v43, %v11345_v8  ;;  %v2275_v51 = vld [vmem:[%s16470_s2 + $0x380] sm:$0xff] }
 0x35d   :  { %17632 = vst [vmem:[#allocation54_spill] sm:$0xff] %v11315_v45 }
 0x35e   :  { %3707 = vmatpush.msrb.mxu0 %v11299_v63  ;;  %3767 = vmatpush.msrb.mxu1 %v11292_v29  ;;  %17634 = vst [vmem:[#allocation56_spill] sm:$0xff] %v11328_v46  ;;  %v11339_v29 = vsub.f32 %v2391_v58, %v11326_v36  ;;  %v2287_v58 = vld [vmem:[%s16470_s2 + $0x3e0] sm:$0xff] }
 0x35f   :  { %17637 = vst [vmem:[#allocation59_spill] sm:$0xff] %v11343_v1 }
 0x360   :  { %3710 = vmatpush.msrb.mxu0 %v11303_v53  ;;  %3769 = vmatpush.msrb.mxu1 %v11305_v31  ;;  %v11336_v31 = vand.u32 4294901760, %v2383_v59  ;;  %17636 = vst [vmem:[#allocation58_spill] sm:$0xff] %v11339_v29 }
 0x361   :  { %17638 = vst [vmem:[#allocation60_spill] sm:$0xff] %v11345_v8 }
 0x362   :  { %3713 = vmatpush.msrb.mxu0 %v11310_v50  ;;  %17635 = vst [vmem:[#allocation57_spill] sm:$0xff] %v11336_v31  ;;  %3771 = vmatpush.msrb.mxu1 %v11326_v36  ;;  %v11350_v28 = vsub.f32 %v2383_v59, %v11336_v31  ;;  %v11363_v36 = vand.u32 4294901760, %v2375_v56  ;;  %v2371_v59 = vld [vmem:[%s16470_s2 + $0x680] sm:$0xff] }
 0x363   :  { %17640 = vst [vmem:[#allocation62_spill] sm:$0xff] %v11361_v21  ;;  %v2283_v50 = vld [vmem:[%s16470_s2 + $0x3c0] sm:$0xff] }
 0x364   :  { %3716 = vmatpush.msrb.mxu0 %v11315_v45  ;;  %3773 = vmatpush.msrb.mxu1 %v11328_v46  ;;  %17639 = vst [vmem:[#allocation61_spill] sm:$0xff] %v11350_v28  ;;  %v11368_v46 = vand.u32 4294901760, %v2371_v59  ;;  %v11383_v45 = vand.u32 4294901760, %v2287_v58  ;;  %v11400_v63 = vand.u32 4294901760, %v2283_v50 }
 0x365   :  { %17641 = vst [vmem:[#allocation63_spill] sm:$0xff] %v11363_v36 }
 0x366   :  { %3719 = vmatpush.msrb.mxu0 %v11339_v29  ;;  %3775 = vmatpush.msrb.mxu1 %v11336_v31  ;;  %17642 = vst [vmem:[#allocation64_spill] sm:$0xff] %v11368_v46  ;;  %v11376_v31 = vsub.f32 %v2375_v56, %v11363_v36  ;;  %v2363_v29 = vld [vmem:[%s16470_s2 + $0x640] sm:$0xff] }
 0x367   :  { %v11398_v53 = vand.u32 4294901760, %v2363_v29 }
 0x368   :  { %3722 = vmatpush.msrb.mxu0 %v11343_v1  ;;  %v2367_v1 = vld [vmem:[%s16470_s2 + $0x660] sm:$0xff]  ;;  %3777 = vmatpush.msrb.mxu1 %v11345_v8  ;;  %17643 = vst [vmem:[#allocation65_spill] sm:$0xff] %v11376_v31  ;;  %v11391_v8 = vsub.f32 %v2371_v59, %v11368_v46  ;;  %v11408_v59 = vsub.f32 %v2287_v58, %v11383_v45 }
 0x369   :  { %v11378_v43 = vand.u32 4294901760, %v2367_v1  ;;  %17646 = vst [vmem:[#allocation68_spill] sm:$0xff] %v11398_v53  ;;  %v2271_v58 = vld [vmem:[%s16470_s2 + $0x360] sm:$0xff] }
 0x36a   :  { %3725 = vmatpush.msrb.mxu0 %v11350_v28  ;;  %3779 = vmatpush.msrb.mxu1 %v11363_v36  ;;  %17645 = vst [vmem:[#allocation67_spill] sm:$0xff] %v11391_v8  ;;  %v2279_v28 = vld [vmem:[%s16470_s2 + $0x3a0] sm:$0xff] }
 0x36b   :  { %17644 = vst [vmem:[#allocation66_spill] sm:$0xff] %v11378_v43  ;;  %v11413_v7 = vand.u32 4294901760, %v2279_v28 }
 0x36c   :  { %3728 = vmatpush.msrb.mxu0 %v11361_v21  ;;  %3781 = vmatpush.msrb.mxu1 %v11368_v46  ;;  %v11405_v21 = vsub.f32 %v2367_v1, %v11378_v43  ;;  %17648 = vst [vmem:[#allocation70_spill] sm:$0xff] %v11408_v59  ;;  %v2359_v46 = vld [vmem:[%s16470_s2 + $0x620] sm:$0xff] }
 0x36d   :  { %v2045_v32 = vpop.permute.xlu2 %2044  ;;  %v11449_v49 = vsub.f32 %v2279_v28, %v11413_v7 }
 0x36e   :  { %3731 = vmatpush.msrb.mxu0 %v11376_v31  ;;  %17647 = vst [vmem:[#allocation69_spill] sm:$0xff] %v11405_v21  ;;  %3783 = vmatpush.msrb.mxu1 %v11378_v43  ;;  %v11418_v31 = vsub.f32 %v2363_v29, %v11398_v53  ;;  %v2138_v1 = vsel %vm2136_vm0, %v10938_v19, %v2045_v32  ;;  %v11434_v29 = vand.u32 4294901760, %v2275_v51  ;;  %v11438_v32 = vand.u32 4294901760, %v2359_v46 }
 0x36f   :  { %v11432_v43 = vsub.f32 %v2283_v50, %v11400_v63  ;;  %17654 = vst [vmem:[#allocation76_spill] sm:$0xff] %v11449_v49  ;;  %v17666_v25 = vand.u32 4294901760, %v11449_v49 }
 0x370   :  { %3734 = vmatpush.msrb.mxu0 %v11391_v8  ;;  %17649 = vst [vmem:[#allocation71_spill] sm:$0xff] %v11418_v31  ;;  %v2355_v8 = vld [vmem:[%s16470_s2 + $0x600] sm:$0xff]  ;;  %3785 = vmatpush.msrb.mxu1 %v11398_v53  ;;  %v11455_v53 = vsub.f32 %v2359_v46, %v11438_v32  ;;  %v11471_v46 = vsub.f32 %v2275_v51, %v11434_v29 }
 0x371   :  { %17650 = vst [vmem:[#allocation72_spill] sm:$0xff] %v11432_v43  ;;  %v11440_v19 = vand.u32 4294901760, %v2355_v8  ;;  %v2865_v23 = vsub.f32 %v11449_v49, %v17666_v25 }
 0x372   :  { %17651 = vst [vmem:[#allocation73_spill] sm:$0xff] %v11434_v29  ;;  %3737 = vmatpush.msrb.mxu0 %v11405_v21  ;;  %v11451_v21 = vand.u32 4294901760, %v2271_v58  ;;  %3787 = vmatpush.msrb.mxu1 %v11438_v32  ;;  %v17672_v2 = vand.u32 4294901760, %v11471_v46 }
 0x373   :  { %17652 = vst [vmem:[#allocation74_spill] sm:$0xff] %v11438_v32  ;;  %v2255_v32 = vld [vmem:[%s16470_s2 + $0x2e0] sm:$0xff] }
 0x374   :  { %17653 = vst [vmem:[#allocation75_spill] sm:$0xff] %v11440_v19  ;;  %3740 = vmatpush.msrb.mxu0 %v11418_v31  ;;  %3789 = vmatpush.msrb.mxu1 %v11440_v19  ;;  %v11496_v41 = vsub.f32 %v2271_v58, %v11451_v21  ;;  %v11506_v34 = vand.u32 4294901760, %v2255_v32 }
 0x375   :  { %v11393_v56 = vpop.permute.xlu2 %2066  ;;  %17655 = vst [vmem:[#allocation77_spill] sm:$0xff] %v11455_v53 }
 0x376   :  { %17658 = vst [vmem:[#allocation80_spill] sm:$0xff] %v11471_v46  ;;  %3743 = vmatpush.msrb.mxu0 %v11455_v53  ;;  %v17660_v53 = vand.u32 4294901760, %v11408_v59  ;;  %v11540_v15 = vsub.f32 %v2255_v32, %v11506_v34 }
 0x377   :  { %17661 = vst [vmem:[#allocation82_spill] sm:$0xff] %v11496_v41 }
 0x378   :  { %17670 = vst [vmem:[#allocation89_spill] sm:$0xff] %v11540_v15 }
 0x37d   :  { %v11483_v31 = vpop.permute.xlu2 %2068 }
 0x37f   :  { %v2061_v36 = vpop.permute.xlu1 %2060 }
 0x382   :  { %v2053_v39 = vpop.permute.xlu0 %2052 }
 0x383   :  { %v2141_v54 = vsel %vm2139_vm4, %v2138_v1, %v2053_v39  ;;  %v2263_v1 = vld [vmem:[%s16470_s2 + $0x320] sm:$0xff] }
 0x384   :  { %v2144_v50 = vsel %vm2142_vm5, %v2141_v54, %v2061_v36  ;;  %v2259_v36 = vld [vmem:[%s16470_s2 + $0x300] sm:$0xff]  ;;  %v11467_v54 = vsub.f32 %v2355_v8, %v11440_v19  ;;  %v2224_v8 = vld [vmem:[%s16470_s2 + $0x1e8] sm:$0xff]  ;;  %v2853_v19 = vsub.f32 %v11408_v59, %v17660_v53  ;;  %v11498_v35 = vand.u32 4294901760, %v2263_v1 }
 0x385   :  { %v11458_v39 = vand.u32 4294901760, %v2144_v50  ;;  %v11500_v47 = vand.u32 4294901760, %v2259_v36  ;;  %v11508_v0 = vand.u32 4294901760, %v2224_v8  ;;  %v17664_v53 = vand.u32 4294901760, %v11432_v43  ;;  %v2091_v40 = vpop.permute.xlu2 %2090 }
 0x386   :  { %17657 = vst [vmem:[#allocation79_spill] sm:$0xff] %v11467_v54  ;;  %3746 = vmatpush.msrb.mxu0 %v11467_v54  ;;  %v2854_v30 = vand.u32 4294901760, %v2853_v19  ;;  %v2220_v19 = vld [vmem:[%s16470_s2 + $0x1c8] sm:$0xff] }
 0x387   :  { %17656 = vst [vmem:[#allocation78_spill] sm:$0xff] %v11458_v39  ;;  %v11486_v28 = vsub.f32 %v2144_v50, %v11458_v39  ;;  %2579 = vmatmul.f32.gmra.mxu3 %v11458_v39  ;;  %v11489_v51 = vpop.permute.xlu1 %2082  ;;  %v2859_v58 = vsub.f32 %v11432_v43, %v17664_v53  ;;  %v11529_v53 = vsub.f32 %v2263_v1, %v11498_v35 }
 0x388   :  { %17663 = vst [vmem:[#allocation84_spill] sm:$0xff] %v11508_v0  ;;  %v11532_v9 = vsub.f32 %v2259_v36, %v11500_v47  ;;  %v11543_v55 = vsub.f32 %v2224_v8, %v11508_v0  ;;  %v2871_v1 = vsub.f32 %v11471_v46, %v17672_v2  ;;  %v11559_v8 = vand.u32 4294901760, %v2220_v19  ;;  %v2216_v2 = vld [vmem:[%s16470_s2 + $0x1a8] sm:$0xff] }
 0x389   :  { %17659 = vst [vmem:[#allocation81_spill] sm:$0xff] %v11486_v28  ;;  %v11504_v50 = vand.u32 4294901760, %v11486_v28  ;;  %v2860_v25 = vand.u32 4294901760, %v2859_v58  ;;  %v2866_v58 = vand.u32 4294901760, %v2865_v23  ;;  %v17674_v36 = vand.u32 4294901760, %v11496_v41 }
 0x38a   :  { %v11510_v3 = vpop.permute.xlu0 %2074  ;;  %17667 = vst [vmem:[#allocation86_spill] sm:$0xff] %v11529_v53  ;;  %v2872_v38 = vand.u32 4294901760, %v2871_v1  ;;  %v11588_v5 = vand.u32 4294901760, %v2216_v2  ;;  %v11594_v13 = vsub.f32 %v2220_v19, %v11559_v8  ;;  %v2239_v1 = vld [vmem:[%s16470_s2 + $0x260] sm:$0xff]  ;;  %v17679_v57 = vand.u32 4294901760, %v11529_v53 }
 0x38b   :  { %17662 = vst [vmem:[#allocation83_spill] sm:$0xff] %v11504_v50  ;;  %v2472_v54 = vsub.f32 %v11486_v28, %v11504_v50  ;;  %v2877_v26 = vsub.f32 %v11496_v41, %v17674_v36  ;;  %v2212_v36 = vld [vmem:[%s16470_s2 + $0x188] sm:$0xff]  ;;  %v17682_v19 = vand.u32 4294901760, %v11540_v15 }
 0x38c   :  { %17668 = vst [vmem:[#allocation87_spill] sm:$0xff] %v11532_v9  ;;  %v2889_v16 = vsub.f32 %v11529_v53, %v17679_v57  ;;  %v11607_v62 = vand.u32 4294901760, %v2212_v36  ;;  %v11629_v6 = vsub.f32 %v2216_v2, %v11588_v5 }
 0x38d   :  { %v11537_v60 = vand.u32 4294901760, %v2472_v54  ;;  %17671 = vst [vmem:[#allocation90_spill] sm:$0xff] %v11543_v55  ;;  %v2247_v54 = vld [vmem:[%s16470_s2 + $0x2a0] sm:$0xff]  ;;  %v2878_v11 = vand.u32 4294901760, %v2877_v26  ;;  %v11614_v17 = vsub.f32 %v11540_v15, %v17682_v19  ;;  %v17683_v26 = vand.u32 4294901760, %v11543_v55 }
 0x38e   :  { %17673 = vst [vmem:[#allocation91_spill] sm:$0xff] %v11559_v8  ;;  %v11575_v23 = vand.u32 4294901760, %v2247_v54  ;;  %v11631_v19 = vand.u32 4294901760, %v2239_v1  ;;  %v2151_v15 = vsel %vm2136_vm0, %v1913_v42, %v2091_v40  ;;  %v11652_v40 = vsub.f32 %v2212_v36, %v11607_v62 }
 0x38f   :  { %17669 = vst [vmem:[#allocation88_spill] sm:$0xff] %v11537_v60  ;;  %2474 = vmatmul.f32.gmra.mxu2 %v11537_v60  ;;  %2677 = vmatmul.f32.vlgmr.msra.gmra.mxu3 %v10881_v44  ;;  %v11557_v32 = vpop.permute.xlu1 %2084  ;;  %v2243_v44 = vld [vmem:[%s16470_s2 + $0x280] sm:$0xff]  ;;  %v17689_v36 = vand.u32 4294901760, %v11586_v14 }
 0x390   :  { %2855 = vmatpush.msra.mxu3 %v2854_v30  ;;  %17677 = vst [vmem:[#allocation93_spill] sm:$0xff] %v11588_v5  ;;  %v17680_v30 = vand.u32 4294901760, %v11532_v9  ;;  %v11622_v57 = vsub.f32 %v2247_v54, %v11575_v23  ;;  %v11638_v54 = vsel %vm2136_vm0, %v1697_v18, %v11393_v56  ;;  %v2890_v18 = vand.u32 4294901760, %v2889_v16  ;;  %v2200_v16 = vld [vmem:[%s16470_s2 + $0x128] sm:$0xff] }
 0x391   :  { %17678 = vst [vmem:[#allocation94_spill] sm:$0xff] %v11594_v13 }
 0x392   :  { %2861 = vmatpush.msra.mxu3 %v2860_v25  ;;  %v11580_v48 = vpop.permute.xlu0 %2076  ;;  %v11596_v25 = vand.u32 4294901760, %v2243_v44  ;;  %v2895_v60 = vsub.f32 %v11532_v9, %v17680_v30  ;;  %17681 = vst [vmem:[#allocation95_spill] sm:$0xff] %v11607_v62  ;;  %v2208_v30 = vld [vmem:[%s16470_s2 + $0x168] sm:$0xff]  ;;  %v2884_v9 = vand.u32 4294901760, %v2883_v12  ;;  %v2231_v12 = vld [vmem:[%s16470_s2 + $0x220] sm:$0xff] }
 0x393   :  { %17684 = vst [vmem:[#allocation96_spill] sm:$0xff] %v11622_v57  ;;  %v11654_v42 = vand.u32 4294901760, %v2208_v30 }
 0x394   :  { %2867 = vmatpush.msra.mxu3 %v2866_v58  ;;  %v11619_v58 = vsub.f32 %v11543_v55, %v17683_v26  ;;  %17685 = vst [vmem:[#allocation97_spill] sm:$0xff] %v11629_v6  ;;  %v2235_v26 = vld [vmem:[%s16470_s2 + $0x240] sm:$0xff]  ;;  %v11645_v2 = vsub.f32 %v2243_v44, %v11596_v25  ;;  %v2896_v56 = vand.u32 4294901760, %v2895_v60  ;;  %v2902_v44 = vand.u32 4294901760, %v11614_v17  ;;  %v2093_v55 = vpop.permute.xlu2 %2092 }
 0x395   :  { %17687 = vst [vmem:[#allocation99_spill] sm:$0xff] %v11652_v40  ;;  %v11662_v53 = vand.u32 4294901760, %v2235_v26 }
 0x396   :  { %2873 = vmatpush.msra.mxu3 %v2872_v38  ;;  %17686 = vst [vmem:[#allocation98_spill] sm:$0xff] %v11645_v2 }
 0x397   :  { %2633 = vmatmul.f32.vlgmr.msra.gmra.mxu2 %v10869_v27  ;;  %2683 = vmatmul.f32.gmra.mxu3 %v11504_v50  ;;  %v2107_v38 = vpop.permute.xlu1 %2106  ;;  %17688 = vst [vmem:[#allocation100_spill] sm:$0xff] %v11654_v42  ;;  %v3970_v50 = vand.u32 4294901760, %v11619_v58  ;;  %v11673_v58 = vsub.f32 %v2239_v1, %v11631_v19  ;;  %v11675_v27 = vand.u32 4294901760, %v2204_v33  ;;  %v2196_v1 = vld [vmem:[%s16470_s2 + $0x108] sm:$0xff] }
 0x398   :  { %2802 = vmatpush.msra.mxu2 %v11383_v45  ;;  %2879 = vmatpush.msra.mxu3 %v2878_v11  ;;  %v2907_v11 = vsub.f32 %v11586_v14, %v17689_v36  ;;  %v11685_v14 = vand.u32 4294901760, %v2231_v12  ;;  %v11719_v43 = vand.u32 4294901760, %v2196_v1 }
 0x399   :  { %17690 = vst [vmem:[#allocation101_spill] sm:$0xff] %v11673_v58 }
 0x39a   :  { %2804 = vmatpush.msra.mxu2 %v11400_v63  ;;  %2885 = vmatpush.msra.mxu3 %v2884_v9  ;;  %v2099_v60 = vpop.permute.xlu0 %2098  ;;  %17691 = vst [vmem:[#allocation102_spill] sm:$0xff] %v11675_v27  ;;  %v17692_v9 = vand.u32 4294901760, %v11594_v13 }
 0x39b   :  { %v2153_v41 = vsel %vm2139_vm4, %v2151_v15, %v2099_v60  ;;  %v11696_v60 = vsub.f32 %v2208_v30, %v11654_v42  ;;  %v17699_v30 = vand.u32 4294901760, %v11629_v6  ;;  %17701 = vst [vmem:[#allocation109_spill] sm:$0xff] %v11719_v43  ;;  %v17703_v15 = vand.u32 4294901760, %v11645_v2 }
 0x39c   :  { %v3975_v46 = vsub.f32 %v11594_v13, %v17692_v9  ;;  %v11691_v17 = vsel %vm2142_vm5, %v2153_v41, %v2107_v38  ;;  %2806 = vmatpush.msra.mxu2 %v11413_v7  ;;  %2891 = vmatpush.msra.mxu3 %v2890_v18  ;;  %v11698_v9 = vand.u32 4294901760, %v2200_v16  ;;  %v17697_v13 = vand.u32 4294901760, %v11622_v57 }
 0x39d   :  { %17693 = vst [vmem:[#allocation103_spill] sm:$0xff] %v11691_v17  ;;  %v11701_v36 = vand.u32 4294901760, %v11691_v17  ;;  %v11707_v41 = vsub.f32 %v2235_v26, %v11662_v53  ;;  %v11709_v38 = vand.u32 4294901760, %v2227_v22  ;;  %v3981_v18 = vsub.f32 %v11629_v6, %v17699_v30 }
 0x39e   :  { %17694 = vst [vmem:[#allocation104_spill] sm:$0xff] %v11696_v60  ;;  %v2913_v49 = vsub.f32 %v11622_v57, %v17697_v13  ;;  %2808 = vmatpush.msra.mxu2 %v11434_v29  ;;  %2897 = vmatpush.msra.mxu3 %v2896_v56  ;;  %v11717_v17 = vsub.f32 %v2204_v33, %v11675_v27  ;;  %v2192_v13 = vld [vmem:[%s16470_s2 + $0xe8] sm:$0xff]  ;;  %v17702_v56 = vld [vmem:[#allocation19_spill] sm:$0xff]  ;;  %v2908_v30 = vand.u32 4294901760, %v2907_v11  ;;  %v3976_v59 = vand.u32 4294901760, %v3975_v46 }
 0x39f   :  { %17695 = vst [vmem:[#allocation105_spill] sm:$0xff] %v11698_v9  ;;  %v2152_v26 = vsel %vm2136_vm0, %v10988_v20, %v2093_v55  ;;  %2638 = vmatmul.f32.gmra.mxu2 %v11486_v28  ;;  %2793 = vmatmul.f32.vlgmr.msrb.gmra.mxu3 %v17702_v56  ;;  %v2109_v57 = vpop.permute.xlu1 %2108  ;;  %v2919_v33 = vsub.f32 %v11645_v2, %v17703_v15  ;;  %v17705_v29 = vand.u32 4294901760, %v11652_v40  ;;  %v2188_v11 = vld [vmem:[%s16470_s2 + $0xc8] sm:$0xff]  ;;  %v3982_v15 = vand.u32 4294901760, %v3981_v18 }
 0x3a0   :  { %17696 = vst [vmem:[#allocation106_spill] sm:$0xff] %v11701_v36  ;;  %v11732_v6 = vsub.f32 %v2231_v12, %v11685_v14  ;;  %2810 = vmatpush.msra.mxu2 %v11451_v21  ;;  %2903 = vmatpush.msra.mxu3 %v2902_v44  ;;  %v11740_v28 = vsub.f32 %v2200_v16, %v11698_v9  ;;  %v2914_v12 = vand.u32 4294901760, %v2913_v49  ;;  %v17708_v55 = vand.u32 4294901760, %v11673_v58  ;;  %v2184_v18 = vld [vmem:[%s16470_s2 + $0xa8] sm:$0xff] }
 0x3a1   :  { %17698 = vst [vmem:[#allocation107_spill] sm:$0xff] %v11707_v41  ;;  %v3987_v20 = vsub.f32 %v11652_v40, %v17705_v29  ;;  %3496 = vmatmul.f32.vlgmr.msra.gmra.mxu0 %v11701_v36  ;;  %3537 = vmatmul.f32.vlgmr.msra.gmra.mxu1 %v11701_v36  ;;  %v11749_v44 = vsub.f32 %v2227_v22, %v11709_v38  ;;  %v11751_v29 = vand.u32 4294901760, %v2192_v13  ;;  %v16705_v40 = vand.u32 4294901760, %v11717_v17  ;;  %v2115_v36 = vpop.permute.xlu2 %2114 }
 0x3a2   :  { %17700 = vst [vmem:[#allocation108_spill] sm:$0xff] %v11717_v17  ;;  %3918 = vmatpush.msra.mxu0 %v11508_v0  ;;  %3971 = vmatpush.msra.mxu1 %v3970_v50  ;;  %v2101_v16 = vpop.permute.xlu0 %2100  ;;  %v2925_v2 = vsub.f32 %v11673_v58, %v17708_v55  ;;  %v11759_v49 = vsub.f32 %v2196_v1, %v11719_v43  ;;  %v2920_v46 = vand.u32 4294901760, %v2919_v33  ;;  %v11764_v50 = vand.u32 4294901760, %v2188_v11 }
 0x3a3   :  { %17704 = vst [vmem:[#allocation110_spill] sm:$0xff] %v11732_v6  ;;  %2812 = vmatpush.msra.mxu2 %v11473_v37  ;;  %2909 = vmatpush.msra.mxu3 %v2908_v30  ;;  %v2154_v22 = vsel %vm2139_vm4, %v2152_v26, %v2101_v16  ;;  %v3988_v55 = vand.u32 4294901760, %v3987_v20  ;;  %v17712_v30 = vand.u32 4294901760, %v11696_v60  ;;  %v2147_v16 = vsel %vm2139_vm4, %v11638_v54, %v11510_v3 }
 0x3a4   :  { %17706 = vst [vmem:[#allocation111_spill] sm:$0xff] %v11740_v28  ;;  %3920 = vmatpush.msra.mxu0 %v11559_v8  ;;  %3977 = vmatpush.msra.mxu1 %v3976_v59  ;;  %v11771_v1 = vsel %vm2142_vm5, %v2154_v22, %v2109_v57  ;;  %v17713_v59 = vand.u32 4294901760, %v11707_v41  ;;  %v11786_v22 = vsub.f32 %v2192_v13, %v11751_v29  ;;  %v2926_v3 = vand.u32 4294901760, %v2925_v2 }
 0x3a5   :  { %17707 = vst [vmem:[#allocation112_spill] sm:$0xff] %v11751_v29  ;;  %v3993_v26 = vsub.f32 %v11696_v60, %v17712_v30  ;;  %2814 = vmatpush.msra.mxu2 %v11498_v35  ;;  %2915 = vmatpush.msra.mxu3 %v2914_v12  ;;  %v2180_v30 = vld [vmem:[%s16470_s2 + $0x88] sm:$0xff]  ;;  %v3999_v54 = vsub.f32 %v11717_v17, %v16705_v40  ;;  %v11799_v20 = vand.u32 4294901760, %v11771_v1  ;;  %v17717_v13 = vand.u32 4294901760, %v11732_v6 }
 0x3a6   :  { %17709 = vst [vmem:[#allocation113_spill] sm:$0xff] %v11759_v49  ;;  %v2931_v57 = vsub.f32 %v11707_v41, %v17713_v59  ;;  %3922 = vmatpush.msra.mxu0 %v11588_v5  ;;  %3983 = vmatpush.msra.mxu1 %v3982_v15  ;;  %v11796_v59 = vand.u32 4294901760, %v2184_v18  ;;  %v11806_v2 = vsub.f32 %v2188_v11, %v11764_v50  ;;  %v17719_v15 = vrot.slane %v11112_v4, 4  ;;  %v2176_v11 = vld [vmem:[%s16470_s2 + $0x68] sm:$0xff] }
 0x3a7   :  { %17710 = vst [vmem:[#allocation114_spill] sm:$0xff] %v11764_v50  ;;  %2816 = vmatpush.msra.mxu2 %v11500_v47  ;;  %2921 = vmatpush.msra.mxu3 %v2920_v46  ;;  %v2937_v33 = vsub.f32 %v11732_v6, %v17717_v13  ;;  %v3994_v12 = vand.u32 4294901760, %v3993_v26  ;;  %v11816_v41 = vand.u32 4294901760, %v2180_v30  ;;  %v2149_v13 = vsel %vm2142_vm5, %v2147_v16, %v11489_v51 }
 0x3a8   :  { %17711 = vst [vmem:[#allocation115_spill] sm:$0xff] %v11771_v1  ;;  %v1921_v40 = vsel %vm1592_vm3, %v17719_v15, %v11108_v24  ;;  %3924 = vmatpush.msra.mxu0 %v11607_v62  ;;  %3989 = vmatpush.msra.mxu1 %v3988_v55  ;;  %v17720_v1 = vand.u32 4294901760, %v11740_v28  ;;  %v2131_v24 = vpop.permute.xlu1 %2130  ;;  %v2932_v4 = vand.u32 4294901760, %v2931_v57  ;;  %v17722_v55 = vand.u32 4294901760, %v11749_v44  ;;  %v2172_v57 = vld [vmem:[%s16470_s2 + $0x48] sm:$0xff] }
 0x3a9   :  { %17714 = vst [vmem:[#allocation116_spill] sm:$0xff] %v11786_v22  ;;  %2752 = vmatmul.f32.vlgmr.msrb.gmra.mxu2 %v17702_v56  ;;  %2797 = vmatmul.f32.gmra.mxu3 %v11458_v39  ;;  %v2157_v15 = vsel %vm2136_vm0, %v1921_v40, %v2115_v36  ;;  %v4000_v6 = vand.u32 4294901760, %v3999_v54  ;;  %v17723_v51 = vand.u32 4294901760, %v11759_v49  ;;  %v2938_v36 = vand.u32 4294901760, %v2937_v33 }
 0x3aa   :  { %17715 = vst [vmem:[#allocation117_spill] sm:$0xff] %v11796_v59  ;;  %v4005_v46 = vsub.f32 %v11740_v28, %v17720_v1  ;;  %v2943_v26 = vsub.f32 %v11749_v44, %v17722_v55  ;;  %2818 = vmatpush.msra.mxu2 %v11506_v34  ;;  %2927 = vmatpush.msra.mxu3 %v2926_v3  ;;  %v2123_v58 = vpop.permute.xlu0 %2122  ;;  %v11844_v54 = vand.u32 4294901760, %v2176_v11  ;;  %v11846_v55 = vand.u32 4294901760, %v2149_v13 }
 0x3ab   :  { %17716 = vst [vmem:[#allocation118_spill] sm:$0xff] %v11799_v20  ;;  %v4011_v16 = vsub.f32 %v11759_v49, %v17723_v51  ;;  %v11835_v28 = vsub.f32 %v2184_v18, %v11796_v59  ;;  %3500 = vmatmul.f32.gmra.mxu0 %v11799_v20  ;;  %3541 = vmatmul.f32.gmra.mxu1 %v11799_v20  ;;  %v11859_v20 = vand.u32 4294901760, %v2172_v57 }
 0x3ac   :  { %17718 = vst [vmem:[#allocation119_spill] sm:$0xff] %v11806_v2  ;;  %v2159_v40 = vsel %vm2139_vm4, %v2157_v15, %v2123_v58  ;;  %3926 = vmatpush.msra.mxu0 %v11654_v42  ;;  %3995 = vmatpush.msra.mxu1 %v3994_v12  ;;  %v4006_v51 = vand.u32 4294901760, %v4005_v46  ;;  %v11851_v1 = vsub.f32 %v2180_v30, %v11816_v41  ;;  %v2944_v33 = vand.u32 4294901760, %v2943_v26  ;;  %v2168_v12 = vld [vmem:[%s16470_s2 + $0x28] sm:$0xff] }
 0x3ad   :  { %17721 = vst [vmem:[#allocation120_spill] sm:$0xff] %v11816_v41  ;;  %v2161_v18 = vsel %vm2142_vm5, %v2159_v40, %v2131_v24  ;;  %2820 = vmatpush.msra.mxu2 %v11549_v10  ;;  %2933 = vmatpush.msra.mxu3 %v2932_v4  ;;  %v17729_v15 = vand.u32 4294901760, %v11786_v22  ;;  %v4012_v30 = vand.u32 4294901760, %v4011_v16  ;;  %v16717_v46 = vand.u32 4294901760, %v11835_v28  ;;  %v2117_v4 = vpop.permute.xlu2 %2116 }
 0x3ae   :  { %17724 = vst [vmem:[#allocation121_spill] sm:$0xff] %v11835_v28  ;;  %v11854_v58 = vand.u32 4294901760, %v2161_v18  ;;  %3928 = vmatpush.msra.mxu0 %v11675_v27  ;;  %4001 = vmatpush.msra.mxu1 %v4000_v6  ;;  %v2146_v24 = vsel %vm2136_vm0, %v10925_v52, %v11483_v31  ;;  %v17731_v26 = vand.u32 4294901760, %v11806_v2  ;;  %v2164_v6 = vld [vmem:[%s16470_s2 + $0x8] sm:$0xff]  ;;  %v11880_v16 = vsub.f32 %v2149_v13, %v11846_v55 }
 0x3af   :  { %17725 = vst [vmem:[#allocation122_spill] sm:$0xff] %v11844_v54  ;;  %v4017_v3 = vsub.f32 %v11786_v22, %v17729_v15  ;;  %2822 = vmatpush.msra.mxu2 %v11575_v23  ;;  %2939 = vmatpush.msra.mxu3 %v2938_v36  ;;  %v11874_v15 = vsub.f32 %v2176_v11, %v11844_v54  ;;  %v16718_v31 = vand.u32 4294901760, %v11851_v1  ;;  %v11886_v36 = vand.u32 4294901760, %v2168_v12 }
 0x3b0   :  { %17726 = vst [vmem:[#allocation123_spill] sm:$0xff] %v11846_v55  ;;  %v4023_v40 = vsub.f32 %v11806_v2, %v17731_v26  ;;  %v2148_v52 = vsel %vm2139_vm4, %v2146_v24, %v11580_v48  ;;  %3930 = vmatpush.msra.mxu0 %v11698_v9  ;;  %4007 = vmatpush.msra.mxu1 %v4006_v51 }
 0x3b1   :  { %17727 = vst [vmem:[#allocation124_spill] sm:$0xff] %v11851_v1  ;;  %v11889_v11 = vsub.f32 %v2161_v18, %v11854_v58  ;;  %2824 = vmatpush.msra.mxu2 %v11596_v25  ;;  %2945 = vmatpush.msra.mxu3 %v2944_v33  ;;  %v4018_v26 = vand.u32 4294901760, %v4017_v3  ;;  %v11893_v13 = vsub.f32 %v2172_v57, %v11859_v20  ;;  %v11901_v18 = vand.u32 4294901760, %v2164_v6  ;;  %v2133_v57 = vpop.permute.xlu1 %2132 }
 0x3b2   :  { %17728 = vst [vmem:[#allocation125_spill] sm:$0xff] %v11854_v58  ;;  %v2158_v48 = vsel %vm2136_vm0, %v10977_v61, %v2117_v4  ;;  %3932 = vmatpush.msra.mxu0 %v11719_v43  ;;  %4013 = vmatpush.msra.mxu1 %v4012_v30  ;;  %v2125_v51 = vpop.permute.xlu0 %2124  ;;  %v4029_v24 = vsub.f32 %v11835_v28, %v16717_v46  ;;  %v4024_v3 = vand.u32 4294901760, %v4023_v40  ;;  %v16719_v30 = vand.u32 4294901760, %v11874_v15  ;;  %v17749_v58 = vld [vmem:[#allocation70_spill] sm:$0xff] }
 0x3b3   :  { %17730 = vst [vmem:[#allocation126_spill] sm:$0xff] %v11859_v20  ;;  %v2150_v33 = vsel %vm2142_vm5, %v2148_v52, %v11557_v32  ;;  %3015 = vmatpush.msrb.mxu3 %v11383_v45  ;;  %2756 = vmatmul.f32.gmra.mxu2 %v11458_v39  ;;  %v2160_v61 = vsel %vm2139_vm4, %v2158_v48, %v2125_v51  ;;  %v11910_v4 = vand.u32 4294901760, %v11880_v16  ;;  %v11923_v40 = vand.u32 4294901760, %v11889_v11 }
 0x3b4   :  { %17732 = vst [vmem:[#allocation127_spill] sm:$0xff] %v11874_v15  ;;  %2826 = vmatpush.msra.mxu2 %v11631_v19  ;;  %2947 = vmatmul.f32.vlgmr.msra.gmra.mxu3 %v11846_v55  ;;  %v2162_v46 = vsel %vm2142_vm5, %v2160_v61, %v2133_v57  ;;  %v4035_v32 = vsub.f32 %v11851_v1, %v16718_v31  ;;  %v16724_v48 = vand.u32 4294901760, %v11893_v13  ;;  %v4030_v51 = vand.u32 4294901760, %v4029_v24  ;;  %v17746_v24 = vld [vmem:[#allocation73_spill] sm:$0xff] }
 0x3b5   :  { %17733 = vst [vmem:[#allocation128_spill] sm:$0xff] %v11880_v16  ;;  %v11919_v52 = vsub.f32 %v2168_v12, %v11886_v36  ;;  %3934 = vmatpush.msra.mxu0 %v11751_v29  ;;  %4019 = vmatpush.msra.mxu1 %v4018_v26  ;;  %v11929_v57 = vsub.f32 %v2164_v6, %v11901_v18  ;;  %v11931_v61 = vand.u32 4294901760, %v2150_v33  ;;  %v11934_v12 = vand.u32 4294901760, %v2162_v46 }
 0x3b6   :  { %17734 = vst [vmem:[#allocation129_spill] sm:$0xff] %v11886_v36  ;;  %3017 = vmatpush.msrb.mxu3 %v11400_v63  ;;  %2828 = vmatpush.msra.mxu2 %v11662_v53  ;;  %v4041_v26 = vsub.f32 %v11874_v15, %v16719_v30  ;;  %v4036_v31 = vand.u32 4294901760, %v4035_v32  ;;  %v2836_v6 = vsub.f32 %v11880_v16, %v11910_v4 }
 0x3b7   :  { %17735 = vst [vmem:[#allocation130_spill] sm:$0xff] %v11889_v11  ;;  %3749 = vmatmul.f32.vlgmr.msrb.gmra.mxu0 %v11889_v11  ;;  %4025 = vmatpush.msra.mxu1 %v4024_v3  ;;  %v4047_v3 = vsub.f32 %v11893_v13, %v16724_v48  ;;  %v11952_v32 = vsub.f32 %v2150_v33, %v11931_v61  ;;  %v17750_v33 = vand.u32 4294901760, %v11929_v57 }
 0x3b8   :  { %17736 = vst [vmem:[#allocation131_spill] sm:$0xff] %v11893_v13  ;;  %3936 = vmatpush.msra.mxu0 %v11764_v50  ;;  %3019 = vmatpush.msrb.mxu3 %v11413_v7  ;;  %v11955_v11 = vsub.f32 %v2162_v46, %v11934_v12  ;;  %v11960_v48 = vand.u32 4294901760, %v2836_v6 }
 0x3b9   :  { %17737 = vst [vmem:[#allocation132_spill] sm:$0xff] %v11901_v18  ;;  %2830 = vmatpush.msra.mxu2 %v11685_v14  ;;  %3793 = vmatmul.f32.vlgmr.msrb.gmra.mxu1 %v11923_v40  ;;  %v4048_v46 = vand.u32 4294901760, %v4047_v3  ;;  %v11977_v6 = vand.u32 4294901760, %v11952_v32 }
 0x3ba   :  { %17738 = vst [vmem:[#allocation133_spill] sm:$0xff] %v11910_v4  ;;  %3938 = vmatpush.msra.mxu0 %v11796_v59  ;;  %4031 = vmatpush.msra.mxu1 %v4030_v51  ;;  %v17748_v51 = vand.u32 4294901760, %v11919_v52 }
 0x3bb   :  { %17739 = vst [vmem:[#allocation134_spill] sm:$0xff] %v11919_v52  ;;  %3021 = vmatpush.msrb.mxu3 %v17746_v24  ;;  %2832 = vmatpush.msra.mxu2 %v11709_v38 }
 0x3bc   :  { %17740 = vst [vmem:[#allocation135_spill] sm:$0xff] %v11923_v40  ;;  %v4042_v40 = vand.u32 4294901760, %v4041_v26  ;;  %3940 = vmatpush.msra.mxu0 %v11816_v41  ;;  %4037 = vmatpush.msra.mxu1 %v4036_v31  ;;  %v4053_v30 = vsub.f32 %v11919_v52, %v17748_v51  ;;  %v4059_v26 = vsub.f32 %v11929_v57, %v17750_v33  ;;  %v11974_v31 = vand.u32 4294901760, %v11955_v11  ;;  %v17753_v51 = vld [vmem:[#allocation72_spill] sm:$0xff] }
 0x3bd   :  { %17741 = vst [vmem:[#allocation136_spill] sm:$0xff] %v11929_v57  ;;  %2957 = vmatpush.msrb.mxu2 %v17749_v58  ;;  %3023 = vmatpush.msrb.mxu3 %v11451_v21  ;;  %v17754_v33 = vld [vmem:[#allocation76_spill] sm:$0xff] }
 0x3be   :  { %17742 = vst [vmem:[#allocation137_spill] sm:$0xff] %v11931_v61  ;;  %2838 = vmatmul.f32.vlgmr.msra.gmra.mxu2 %v11960_v48  ;;  %2951 = vmatmul.f32.gmra.mxu3 %v11931_v61  ;;  %v4054_v3 = vand.u32 4294901760, %v4053_v30  ;;  %v17756_v30 = vld [vmem:[#allocation82_spill] sm:$0xff] }
 0x3bf   :  { %17743 = vst [vmem:[#allocation138_spill] sm:$0xff] %v11934_v12  ;;  %3942 = vmatpush.msra.mxu0 %v11844_v54  ;;  %4043 = vmatpush.msra.mxu1 %v4042_v40  ;;  %v2844_v40 = vsub.f32 %v11952_v32, %v11977_v6  ;;  %v17755_v12 = vld [vmem:[#allocation80_spill] sm:$0xff] }
 0x3c0   :  { %17744 = vst [vmem:[#allocation139_spill] sm:$0xff] %v11952_v32  ;;  %2960 = vmatpush.msrb.mxu2 %v17753_v51  ;;  %3025 = vmatpush.msrb.mxu3 %v11473_v37 }
 0x3c1   :  { %17745 = vst [vmem:[#allocation140_spill] sm:$0xff] %v11955_v11  ;;  %3754 = vmatmul.f32.gmra.mxu0 %v11955_v11  ;;  %4049 = vmatpush.msra.mxu1 %v4048_v46  ;;  %v11994_v46 = vand.u32 4294901760, %v2844_v40  ;;  %v17764_v40 = vld [vmem:[#allocation86_spill] sm:$0xff] }
 0x3c2   :  { %17747 = vst [vmem:[#allocation73_spill] sm:$0xff] %v11960_v48  ;;  %3944 = vmatpush.msra.mxu0 %v11859_v20  ;;  %2963 = vmatpush.msrb.mxu2 %v17754_v33  ;;  %v4060_v48 = vand.u32 4294901760, %v4059_v26  ;;  %v17758_v26 = vld [vmem:[#allocation90_spill] sm:$0xff] }
 0x3c3   :  { %17751 = vst [vmem:[#allocation70_spill] sm:$0xff] %v11974_v31  ;;  %3027 = vmatpush.msrb.mxu3 %v11498_v35  ;;  %3799 = vmatmul.f32.gmra.mxu1 %v11974_v31  ;;  %v17759_v11 = vand.u32 4294901760, %v17758_v26  ;;  %v17761_v31 = vld [vmem:[#allocation94_spill] sm:$0xff] }
 0x3c4   :  { %17752 = vst [vmem:[#allocation141_spill] sm:$0xff] %v11977_v6  ;;  %3946 = vmatpush.msra.mxu0 %v11886_v36  ;;  %4055 = vmatpush.msra.mxu1 %v4054_v3  ;;  %v17760_v3 = vld [vmem:[#allocation85_spill] sm:$0xff]  ;;  %v17762_v61 = vand.u32 4294901760, %v17761_v31 }
 0x3c5   :  { %2966 = vmatpush.msrb.mxu2 %v17755_v12  ;;  %3029 = vmatpush.msrb.mxu3 %v11500_v47  ;;  %17757 = vst [vmem:[#allocation72_spill] sm:$0xff] %v11994_v46 }
 0x3c6   :  { %3948 = vmatpush.msra.mxu0 %v11901_v18  ;;  %4061 = vmatpush.msra.mxu1 %v4060_v48  ;;  %v17763_v48 = vld [vmem:[#allocation24_spill] sm:$0xff] }
 0x3c7   :  { %2969 = vmatpush.msrb.mxu2 %v17756_v30  ;;  %3031 = vmatpush.msrb.mxu3 %v11506_v34 }
 0x3c8   :  { %4178 = vmatpush.msrb.mxu0 %v17759_v11  ;;  %4249 = vmatpush.msrb.mxu1 %v11508_v0  ;;  %v17765_v11 = vld [vmem:[#allocation97_spill] sm:$0xff] }
 0x3c9   :  { %2846 = vmatmul.f32.gmra.mxu2 %v11994_v46  ;;  %3033 = vmatpush.msrb.mxu3 %v11549_v10  ;;  %v17766_v26 = vand.u32 4294901760, %v17765_v11  ;;  %v17767_v46 = vld [vmem:[#allocation87_spill] sm:$0xff]  ;;  %v17771_v11 = vand.u32 4294901760, %v11696_v60 }
 0x3ca   :  { %2972 = vmatpush.msrb.mxu2 %v17760_v3  ;;  %4182 = vmatpush.msrb.mxu0 %v17762_v61  ;;  %v17768_v61 = vld [vmem:[#allocation99_spill] sm:$0xff] }
 0x3cb   :  { %4251 = vmatpush.msrb.mxu1 %v11559_v8  ;;  %3954 = vmatmul.f32.vlgmr.msra.gmra.mxu0 %v17763_v48  ;;  %v17769_v31 = vand.u32 4294901760, %v17768_v61  ;;  %v17770_v48 = vld [vmem:[#allocation89_spill] sm:$0xff]  ;;  %v17775_v61 = vld [vmem:[#allocation96_spill] sm:$0xff] }
 0x3cc   :  { %2975 = vmatpush.msrb.mxu2 %v17764_v40  ;;  %3035 = vmatpush.msrb.mxu3 %v11575_v23 }
 0x3cd   :  { %4186 = vmatpush.msrb.mxu0 %v17766_v26  ;;  %4253 = vmatpush.msrb.mxu1 %v11588_v5  ;;  %v17772_v26 = vld [vmem:[#allocation92_spill] sm:$0xff]  ;;  %v17773_v5 = vand.u32 4294901760, %v11717_v17 }
 0x3ce   :  { %4063 = vmatmul.f32.vlgmr.msra.gmra.mxu1 %v17702_v56  ;;  %2978 = vmatpush.msrb.mxu2 %v17767_v46 }
 0x3cf   :  { %3037 = vmatpush.msrb.mxu3 %v11596_v25  ;;  %4190 = vmatpush.msrb.mxu0 %v17769_v31  ;;  %v17774_v31 = vld [vmem:[#allocation88_spill] sm:$0xff] }
 0x3d0   :  { %4255 = vmatpush.msrb.mxu1 %v11607_v62  ;;  %2981 = vmatpush.msrb.mxu2 %v17770_v48  ;;  %v17776_v62 = vld [vmem:[#allocation111_spill] sm:$0xff] }
 0x3d1   :  { %3039 = vmatpush.msrb.mxu3 %v11631_v19  ;;  %4194 = vmatpush.msrb.mxu0 %v17771_v11  ;;  %v17777_v60 = vand.u32 4294901760, %v17776_v62  ;;  %v17778_v11 = vld [vmem:[#allocation98_spill] sm:$0xff]  ;;  %v17782_v62 = vld [vmem:[#allocation107_spill] sm:$0xff] }
 0x3d2   :  { %4257 = vmatpush.msrb.mxu1 %v11654_v42  ;;  %2984 = vmatpush.msrb.mxu2 %v17772_v26 }
 0x3d3   :  { %3041 = vmatpush.msrb.mxu3 %v11662_v53  ;;  %4198 = vmatpush.msrb.mxu0 %v17773_v5  ;;  %v17779_v5 = vand.u32 4294901760, %v11759_v49  ;;  %v17783_v49 = vand.u32 4294901760, %v11806_v2 }
 0x3d4   :  { %4259 = vmatpush.msrb.mxu1 %v11675_v27  ;;  %3962 = vmatmul.f32.gmra.mxu0 %v17774_v31  ;;  %v17780_v31 = vld [vmem:[#allocation101_spill] sm:$0xff] }
 0x3d5   :  { %2987 = vmatpush.msrb.mxu2 %v17775_v61  ;;  %3043 = vmatpush.msrb.mxu3 %v11685_v14 }
 0x3d6   :  { %4202 = vmatpush.msrb.mxu0 %v17777_v60  ;;  %4261 = vmatpush.msrb.mxu1 %v11698_v9  ;;  %v17781_v60 = vand.u32 4294901760, %v11786_v22  ;;  %v17882_v22 = vld [vmem:[#allocation9_spill] sm:$0xff] }
 0x3d7   :  { %4067 = vmatmul.f32.gmra.mxu1 %v11458_v39  ;;  %2990 = vmatpush.msrb.mxu2 %v17778_v11 }
 0x3d8   :  { %3045 = vmatpush.msrb.mxu3 %v11709_v38  ;;  %4206 = vmatpush.msrb.mxu0 %v17779_v5  ;;  %v17784_v5 = vld [vmem:[#allocation110_spill] sm:$0xff] }
 0x3d9   :  { %4263 = vmatpush.msrb.mxu1 %v11719_v43  ;;  %3049 = vmatmul.f32.vlgmr.msrb.gmra.mxu3 %v11910_v4  ;;  %v17897_v43 = vld [vmem:[#allocation38_spill] sm:$0xff] }
 0x3da   :  { %3133 = vmatpush.msra.mxu3 %v11383_v45  ;;  %2993 = vmatpush.msrb.mxu2 %v17780_v31  ;;  %v17785_v45 = vand.u32 4294901760, %v11835_v28 }
 0x3db   :  { %4210 = vmatpush.msrb.mxu0 %v17781_v60  ;;  %4265 = vmatpush.msrb.mxu1 %v11751_v29  ;;  %v2284_v60 = vld [vmem:[%s16470_s2 + $0x3c8] sm:$0xff] }
 0x3dc   :  { %3135 = vmatpush.msra.mxu3 %v11400_v63  ;;  %2996 = vmatpush.msrb.mxu2 %v17782_v62  ;;  %v17786_v63 = vand.u32 4294901760, %v11851_v1 }
 0x3dd   :  { %4214 = vmatpush.msrb.mxu0 %v17783_v49  ;;  %4267 = vmatpush.msrb.mxu1 %v11764_v50  ;;  %v17787_v49 = vand.u32 4294901760, %v17749_v58  ;;  %v17791_v58 = vand.u32 4294901760, %v11893_v13  ;;  %v17888_v50 = vld [vmem:[#allocation8_spill] sm:$0xff] }
 0x3de   :  { %3137 = vmatpush.msra.mxu3 %v11413_v7  ;;  %2999 = vmatpush.msrb.mxu2 %v17784_v5  ;;  %v2288_v7 = vld [vmem:[%s16470_s2 + $0x3e8] sm:$0xff] }
 0x3df   :  { %4218 = vmatpush.msrb.mxu0 %v17785_v45  ;;  %4269 = vmatpush.msrb.mxu1 %v11796_v59  ;;  %v17789_v45 = vand.u32 4294901760, %v17753_v51  ;;  %v12088_v51 = vand.u32 4294901760, %v2284_v60 }
 0x3e0   :  { %3139 = vmatpush.msra.mxu3 %v17746_v24  ;;  %3002 = vmatpush.msrb.mxu2 %v11749_v44  ;;  %v17788_v24 = vand.u32 4294901760, %v11874_v15 }
 0x3e1   :  { %4222 = vmatpush.msrb.mxu0 %v17786_v63  ;;  %4271 = vmatpush.msrb.mxu1 %v11816_v41  ;;  %v12077_v63 = vand.u32 4294901760, %v2288_v7  ;;  %17793 = vst [vmem:[#allocation80_spill] sm:$0xff] %v12088_v51 }
 0x3e2   :  { %3005 = vmatmul.f32.vlgmr.msrb.gmra.mxu2 %v11880_v16  ;;  %3055 = vmatmul.f32.gmra.mxu3 %v11977_v6 }
 0x3e3   :  { %3062 = vmatpush.msra.mxu2 %v17787_v49  ;;  %3141 = vmatpush.msra.mxu3 %v11451_v21  ;;  %17790 = vst [vmem:[#allocation76_spill] sm:$0xff] %v12077_v63  ;;  %v2280_v21 = vld [vmem:[%s16470_s2 + $0x3a8] sm:$0xff]  ;;  %v17792_v49 = vand.u32 4294901760, %v17754_v33  ;;  %v12100_v33 = vsub.f32 %v2288_v7, %v12077_v63  ;;  %v17801_v7 = vand.u32 4294901760, %v17756_v30 }
 0x3e4   :  { %4226 = vmatpush.msrb.mxu0 %v17788_v24  ;;  %4273 = vmatpush.msrb.mxu1 %v11844_v54  ;;  %v2276_v24 = vld [vmem:[%s16470_s2 + $0x388] sm:$0xff] }
 0x3e5   :  { %3066 = vmatpush.msra.mxu2 %v17789_v45  ;;  %3143 = vmatpush.msra.mxu3 %v11473_v37  ;;  %v17794_v37 = vand.u32 4294901760, %v11919_v52  ;;  %v17795_v45 = vand.u32 4294901760, %v17755_v12  ;;  %17796 = vst [vmem:[#allocation82_spill] sm:$0xff] %v12100_v33  ;;  %v12112_v12 = vand.u32 4294901760, %v2276_v24  ;;  %v17835_v52 = vld [vmem:[#allocation28_spill] sm:$0xff] }
 0x3e6   :  { %4230 = vmatpush.msrb.mxu0 %v17791_v58  ;;  %4275 = vmatpush.msrb.mxu1 %v11859_v20  ;;  %v17798_v58 = vand.u32 4294901760, %v11929_v57 }
 0x3e7   :  { %3070 = vmatpush.msra.mxu2 %v17792_v49  ;;  %3145 = vmatpush.msra.mxu3 %v11498_v35  ;;  %v12102_v35 = vand.u32 4294901760, %v2280_v21  ;;  %v12110_v49 = vsub.f32 %v2284_v60, %v12088_v51  ;;  %17800 = vst [vmem:[#allocation87_spill] sm:$0xff] %v12112_v12  ;;  %v2268_v60 = vld [vmem:[%s16470_s2 + $0x348] sm:$0xff] }
 0x3e8   :  { %4234 = vmatpush.msrb.mxu0 %v17794_v37  ;;  %4277 = vmatpush.msrb.mxu1 %v11886_v36  ;;  %v17803_v37 = vand.u32 4294901760, %v17760_v3  ;;  %v12144_v3 = vand.u32 4294901760, %v2268_v60 }
 0x3e9   :  { %3074 = vmatpush.msra.mxu2 %v17795_v45  ;;  %3147 = vmatpush.msra.mxu3 %v11500_v47  ;;  %17797 = vst [vmem:[#allocation85_spill] sm:$0xff] %v12102_v35  ;;  %v2272_v47 = vld [vmem:[%s16470_s2 + $0x368] sm:$0xff]  ;;  %v12136_v45 = vsub.f32 %v2276_v24, %v12112_v12  ;;  %v17808_v24 = vand.u32 4294901760, %v17767_v46 }
 0x3ea   :  { %4238 = vmatpush.msrb.mxu0 %v17798_v58  ;;  %4279 = vmatpush.msrb.mxu1 %v11901_v18  ;;  %17799 = vst [vmem:[#allocation86_spill] sm:$0xff] %v12110_v49  ;;  %v12131_v30 = vand.u32 4294901760, %v2272_v47  ;;  %v17806_v58 = vand.u32 4294901760, %v17764_v40  ;;  %v2256_v46 = vld [vmem:[%s16470_s2 + $0x2e8] sm:$0xff] }
 0x3eb   :  { %3010 = vmatmul.f32.gmra.mxu2 %v11952_v32  ;;  %3149 = vmatpush.msra.mxu3 %v11506_v34  ;;  %v12123_v34 = vsub.f32 %v2280_v21, %v12102_v35  ;;  %17805 = vst [vmem:[#allocation96_spill] sm:$0xff] %v12136_v45  ;;  %v2264_v21 = vld [vmem:[%s16470_s2 + $0x328] sm:$0xff] }
 0x3ec   :  { %3078 = vmatpush.msra.mxu2 %v17801_v7  ;;  %4240 = vmatmul.f32.vlgmr.msrb.gmra.mxu0 %v17702_v56  ;;  %17804 = vst [vmem:[#allocation92_spill] sm:$0xff] %v12131_v30  ;;  %v12155_v7 = vsub.f32 %v2272_v47, %v12131_v30  ;;  %v12157_v40 = vand.u32 4294901760, %v2264_v21 }
 0x3ed   :  { %4281 = vmatmul.f32.vlgmr.msrb.gmra.mxu1 %v17702_v56  ;;  %4445 = vmatpush.msra.mxu0 %v12100_v33  ;;  %17802 = vst [vmem:[#allocation89_spill] sm:$0xff] %v12123_v34  ;;  %v2308_v56 = vld [vmem:[%s16470_s2 + $0x488] sm:$0xff] }
 0x3ee   :  { %4503 = vmatpush.msra.mxu1 %v12077_v63  ;;  %3082 = vmatpush.msra.mxu2 %v17803_v37  ;;  %17807 = vst [vmem:[#allocation98_spill] sm:$0xff] %v12144_v3  ;;  %v12165_v37 = vsub.f32 %v2268_v60, %v12144_v3  ;;  %v2244_v63 = vld [vmem:[%s16470_s2 + $0x288] sm:$0xff] }
 0x3ef   :  { %3151 = vmatpush.msra.mxu3 %v11549_v10  ;;  %4448 = vmatpush.msra.mxu0 %v12110_v49  ;;  %v2260_v10 = vld [vmem:[%s16470_s2 + $0x308] sm:$0xff]  ;;  %17809 = vst [vmem:[#allocation101_spill] sm:$0xff] %v12155_v7 }
 0x3f0   :  { %4505 = vmatpush.msra.mxu1 %v12088_v51  ;;  %3086 = vmatpush.msra.mxu2 %v17806_v58  ;;  %17810 = vst [vmem:[#allocation107_spill] sm:$0xff] %v12157_v40  ;;  %v12167_v58 = vand.u32 4294901760, %v2260_v10 }
 0x3f1   :  { %3153 = vmatpush.msra.mxu3 %v11575_v23  ;;  %4451 = vmatpush.msra.mxu0 %v12123_v34  ;;  %v17811_v23 = vand.u32 4294901760, %v17770_v48  ;;  %17812 = vst [vmem:[#allocation110_spill] sm:$0xff] %v12165_v37  ;;  %v17815_v48 = vld [vmem:[#allocation23_spill] sm:$0xff] }
 0x3f2   :  { %4507 = vmatpush.msra.mxu1 %v12102_v35  ;;  %3090 = vmatpush.msra.mxu2 %v17808_v24  ;;  %17813 = vst [vmem:[#allocation142_spill] sm:$0xff] %v12167_v58  ;;  %v17816_v47 = vand.u32 4294901760, %v17815_v48  ;;  %v2252_v24 = vld [vmem:[%s16470_s2 + $0x2c8] sm:$0xff] }
 0x3f3   :  { %3155 = vmatpush.msra.mxu3 %v11596_v25  ;;  %4454 = vmatpush.msra.mxu0 %v12136_v45  ;;  %v12177_v25 = vsub.f32 %v2264_v21, %v12157_v40  ;;  %v12193_v21 = vsub.f32 %v2260_v10, %v12167_v58  ;;  %v17824_v10 = vld [vmem:[#allocation25_spill] sm:$0xff] }
 0x3f4   :  { %4509 = vmatpush.msra.mxu1 %v12112_v12  ;;  %3094 = vmatpush.msra.mxu2 %v17811_v23  ;;  %v3225_v60 = vsub.f32 %v17815_v48, %v17816_v47  ;;  %v12188_v23 = vand.u32 4294901760, %v2256_v46  ;;  %v17820_v12 = vld [vmem:[#allocation20_spill] sm:$0xff]  ;;  %v17825_v51 = vand.u32 4294901760, %v17824_v10 }
 0x3f5   :  { %3157 = vmatpush.msra.mxu3 %v11631_v19  ;;  %4244 = vmatmul.f32.gmra.mxu0 %v11458_v39  ;;  %17814 = vst [vmem:[#allocation143_spill] sm:$0xff] %v12177_v25  ;;  %v17817_v19 = vand.u32 4294901760, %v17772_v26  ;;  %v17821_v47 = vand.u32 4294901760, %v17820_v12  ;;  %v17822_v26 = vand.u32 4294901760, %v17775_v61  ;;  %v17826_v61 = vand.u32 4294901760, %v17778_v11 }
 0x3f6   :  { %4285 = vmatmul.f32.gmra.mxu1 %v11458_v39  ;;  %4457 = vmatpush.msra.mxu0 %v12155_v7  ;;  %17818 = vst [vmem:[#allocation23_spill] sm:$0xff] %v12188_v23 }
 0x3f7   :  { %4511 = vmatpush.msra.mxu1 %v12131_v30  ;;  %3098 = vmatpush.msra.mxu2 %v17817_v19  ;;  %17819 = vst [vmem:[#allocation144_spill] sm:$0xff] %v12193_v21  ;;  %v3231_v35 = vsub.f32 %v17820_v12, %v17821_v47  ;;  %v2248_v30 = vld [vmem:[%s16470_s2 + $0x2a8] sm:$0xff]  ;;  %v12204_v19 = vand.u32 4294901760, %v2252_v24  ;;  %v3237_v47 = vsub.f32 %v17824_v10, %v17825_v51 }
 0x3f8   :  { %3159 = vmatpush.msra.mxu3 %v11662_v53  ;;  %4460 = vmatpush.msra.mxu0 %v12165_v37  ;;  %v3226_v53 = vand.u32 4294901760, %v3225_v60  ;;  %v2352_v60 = vld [vmem:[%s16470_s2 + $0x5e8] sm:$0xff] }
 0x3f9   :  { %4513 = vmatpush.msra.mxu1 %v12144_v3  ;;  %3102 = vmatpush.msra.mxu2 %v17822_v26  ;;  %17823 = vst [vmem:[#allocation20_spill] sm:$0xff] %v12204_v19  ;;  %v12218_v26 = vsub.f32 %v2256_v46, %v12188_v23  ;;  %v3232_v51 = vand.u32 4294901760, %v3231_v35  ;;  %v17829_v3 = vld [vmem:[#allocation31_spill] sm:$0xff]  ;;  %v12233_v11 = vsub.f32 %v2252_v24, %v12204_v19  ;;  %v12235_v46 = vand.u32 4294901760, %v2244_v63  ;;  %v2348_v35 = vld [vmem:[%s16470_s2 + $0x5c8] sm:$0xff] }
 0x3fa   :  { %3161 = vmatpush.msra.mxu3 %v11685_v14  ;;  %4463 = vmatpush.msra.mxu0 %v12177_v25  ;;  %v12220_v14 = vand.u32 4294901760, %v2248_v30  ;;  %v17830_v57 = vand.u32 4294901760, %v17829_v3 }
 0x3fb   :  { %4515 = vmatpush.msra.mxu1 %v12157_v40  ;;  %3106 = vmatpush.msra.mxu2 %v17826_v61  ;;  %17827 = vst [vmem:[#allocation25_spill] sm:$0xff] %v12218_v26  ;;  %v3238_v61 = vand.u32 4294901760, %v3237_v47  ;;  %v17837_v47 = vand.u32 4294901760, %v17782_v62  ;;  %v2232_v62 = vld [vmem:[%s16470_s2 + $0x228] sm:$0xff] }
 0x3fc   :  { %17828 = vst [vmem:[#allocation145_spill] sm:$0xff] %v12220_v14  ;;  %3163 = vmatpush.msra.mxu3 %v11709_v38  ;;  %4466 = vmatpush.msra.mxu0 %v12193_v21  ;;  %v3243_v40 = vsub.f32 %v17829_v3, %v17830_v57  ;;  %v2240_v38 = vld [vmem:[%s16470_s2 + $0x268] sm:$0xff]  ;;  %v17833_v57 = vand.u32 4294901760, %v17780_v31  ;;  %v12250_v24 = vsub.f32 %v2248_v30, %v12220_v14  ;;  %v17836_v21 = vand.u32 4294901760, %v17835_v52 }
 0x3fd   :  { %4517 = vmatpush.msra.mxu1 %v12167_v58  ;;  %3165 = vmatmul.f32.vlgmr.msra.gmra.mxu3 %v11846_v55  ;;  %17831 = vst [vmem:[#allocation31_spill] sm:$0xff] %v12233_v11  ;;  %v12245_v58 = vand.u32 4294901760, %v2352_v60  ;;  %v2344_v31 = vld [vmem:[%s16470_s2 + $0x5a8] sm:$0xff]  ;;  %v12265_v30 = vand.u32 4294901760, %v2348_v35 }
 0x3fe   :  { %17832 = vst [vmem:[#allocation146_spill] sm:$0xff] %v12235_v46  ;;  %3227 = vmatpush.msrb.mxu3 %v3226_v53  ;;  %3110 = vmatpush.msra.mxu2 %v17833_v57  ;;  %v3249_v13 = vsub.f32 %v17835_v52, %v17836_v21  ;;  %v2236_v53 = vld [vmem:[%s16470_s2 + $0x248] sm:$0xff]  ;;  %v3244_v57 = vand.u32 4294901760, %v3243_v40  ;;  %v12270_v21 = vsub.f32 %v2244_v63, %v12235_v46 }
 0x3ff   :  { %4469 = vmatpush.msra.mxu0 %v12218_v26  ;;  %4519 = vmatpush.msra.mxu1 %v12188_v23  ;;  %17834 = vst [vmem:[#allocation147_spill] sm:$0xff] %v12250_v24  ;;  %v12263_v23 = vand.u32 4294901760, %v2240_v38  ;;  %v17841_v26 = vld [vmem:[#allocation12_spill] sm:$0xff]  ;;  %v12286_v63 = vsub.f32 %v2352_v60, %v12245_v58 }
 0x400   :  { %3233 = vmatpush.msrb.mxu3 %v3232_v51  ;;  %3114 = vmatpush.msra.mxu2 %v17837_v47  ;;  %17839 = vst [vmem:[#allocation148_spill] sm:$0xff] %v12265_v30  ;;  %v17842_v25 = vand.u32 4294901760, %v17841_v26  ;;  %v2340_v40 = vld [vmem:[%s16470_s2 + $0x588] sm:$0xff]  ;;  %v17843_v51 = vand.u32 4294901760, %v17784_v5  ;;  %v12283_v47 = vand.u32 4294901760, %v2236_v53 }
 0x401   :  { %17838 = vst [vmem:[#allocation28_spill] sm:$0xff] %v12263_v23  ;;  %4472 = vmatpush.msra.mxu0 %v12233_v11  ;;  %4521 = vmatpush.msra.mxu1 %v12204_v19  ;;  %v12288_v19 = vand.u32 4294901760, %v2344_v31  ;;  %v17847_v11 = vld [vmem:[#allocation13_spill] sm:$0xff]  ;;  %v2228_v5 = vld [vmem:[%s16470_s2 + $0x208] sm:$0xff]  ;;  %v12301_v60 = vsub.f32 %v2240_v38, %v12263_v23 }
 0x402   :  { %17840 = vst [vmem:[#allocation149_spill] sm:$0xff] %v12270_v21  ;;  %v3255_v15 = vsub.f32 %v17841_v26, %v17842_v25  ;;  %3239 = vmatpush.msrb.mxu3 %v3238_v61  ;;  %3118 = vmatpush.msra.mxu2 %v17843_v51  ;;  %v3250_v25 = vand.u32 4294901760, %v3249_v13  ;;  %v17848_v37 = vand.u32 4294901760, %v17847_v11  ;;  %v17849_v61 = vand.u32 4294901760, %v11749_v44 }
 0x403   :  { %17844 = vst [vmem:[#allocation12_spill] sm:$0xff] %v12283_v47  ;;  %4475 = vmatpush.msra.mxu0 %v12250_v24  ;;  %4523 = vmatpush.msra.mxu1 %v12220_v14  ;;  %v12303_v51 = vand.u32 4294901760, %v2232_v62  ;;  %v12306_v14 = vsub.f32 %v2348_v35, %v12265_v30  ;;  %v12308_v13 = vand.u32 4294901760, %v2340_v40  ;;  %v17856_v24 = vld [vmem:[#allocation137_spill] sm:$0xff]  ;;  %v12321_v35 = vsub.f32 %v2236_v53, %v12283_v47 }
 0x404   :  { %17845 = vst [vmem:[#allocation150_spill] sm:$0xff] %v12286_v63  ;;  %v3261_v18 = vsub.f32 %v17847_v11, %v17848_v37  ;;  %3245 = vmatpush.msrb.mxu3 %v3244_v57  ;;  %3122 = vmatpush.msra.mxu2 %v17849_v61  ;;  %v2336_v37 = vld [vmem:[%s16470_s2 + $0x568] sm:$0xff]  ;;  %v3256_v44 = vand.u32 4294901760, %v3255_v15  ;;  %v17854_v57 = vld [vmem:[#allocation14_spill] sm:$0xff]  ;;  %v12323_v7 = vand.u32 4294901760, %v2228_v5 }
 0x405   :  { %17846 = vst [vmem:[#allocation151_spill] sm:$0xff] %v12288_v19  ;;  %4478 = vmatpush.msra.mxu0 %v12270_v21  ;;  %4525 = vmatpush.msra.mxu1 %v12235_v46  ;;  %v17855_v61 = vand.u32 4294901760, %v17854_v57  ;;  %v12327_v21 = vsub.f32 %v2344_v31, %v12288_v19  ;;  %v2332_v15 = vld [vmem:[%s16470_s2 + $0x548] sm:$0xff]  ;;  %v17860_v46 = vld [vmem:[#allocation21_spill] sm:$0xff]  ;;  %v12336_v28 = vand.u32 4294901760, %v2336_v37  ;;  %v12341_v31 = vsub.f32 %v2232_v62, %v12303_v51 }
 0x406   :  { %17850 = vst [vmem:[#allocation13_spill] sm:$0xff] %v12301_v60  ;;  %3124 = vmatmul.f32.vlgmr.msra.gmra.mxu2 %v11846_v55  ;;  %3169 = vmatmul.f32.gmra.mxu3 %v17856_v24  ;;  %v17861_v55 = vld [vmem:[#allocation44_spill] sm:$0xff]  ;;  %v12345_v45 = vsub.f32 %v2340_v40, %v12308_v13  ;;  %v12351_v20 = vand.u32 4294901760, %v2332_v15  ;;  %v12356_v62 = vsub.f32 %v2228_v5, %v12323_v7  ;;  %v17869_v40 = vand.u32 4294901760, %v12286_v63 }
 0x407   :  { %17851 = vst [vmem:[#allocation152_spill] sm:$0xff] %v12303_v51  ;;  %v3267_v38 = vsub.f32 %v17854_v57, %v17855_v61  ;;  %3174 = vmatpush.msrb.mxu2 %v17860_v46  ;;  %3251 = vmatpush.msrb.mxu3 %v3250_v25  ;;  %v3262_v61 = vand.u32 4294901760, %v3261_v18  ;;  %v17862_v36 = vand.u32 4294901760, %v17861_v55  ;;  %v2328_v18 = vld [vmem:[%s16470_s2 + $0x528] sm:$0xff]  ;;  %v17866_v25 = vld [vmem:[#allocation18_spill] sm:$0xff]  ;;  %v12370_v5 = vsub.f32 %v2336_v37, %v12336_v28  ;;  %v17877_v37 = vld [vmem:[#allocation11_spill] sm:$0xff] }
 0x408   :  { %17852 = vst [vmem:[#allocation153_spill] sm:$0xff] %v12306_v14  ;;  %4481 = vmatpush.msra.mxu0 %v12301_v60  ;;  %4527 = vmatpush.msra.mxu1 %v12263_v23  ;;  %v4713_v1 = vsub.f32 %v12286_v63, %v17869_v40  ;;  %v12372_v34 = vand.u32 4294901760, %v2328_v18  ;;  %v17875_v40 = vand.u32 4294901760, %v12306_v14  ;;  %v17878_v39 = vand.u32 4294901760, %v17877_v37 }
 0x409   :  { %17853 = vst [vmem:[#allocation154_spill] sm:$0xff] %v12308_v13  ;;  %v3273_v53 = vsub.f32 %v17861_v55, %v17862_v36  ;;  %3176 = vmatpush.msrb.mxu2 %v17866_v25  ;;  %3257 = vmatpush.msrb.mxu3 %v3256_v44  ;;  %v3268_v36 = vand.u32 4294901760, %v3267_v38  ;;  %v2324_v44 = vld [vmem:[%s16470_s2 + $0x508] sm:$0xff]  ;;  %v17870_v38 = vld [vmem:[#allocation29_spill] sm:$0xff]  ;;  %v17887_v33 = vand.u32 4294901760, %v12345_v45 }
 0x40a   :  { %17857 = vst [vmem:[#allocation14_spill] sm:$0xff] %v12321_v35  ;;  %4484 = vmatpush.msra.mxu0 %v12321_v35  ;;  %4529 = vmatpush.msra.mxu1 %v12283_v47  ;;  %v17871_v35 = vld [vmem:[#allocation47_spill] sm:$0xff]  ;;  %v4719_v23 = vsub.f32 %v12306_v14, %v17875_v40  ;;  %v3285_v54 = vsub.f32 %v17877_v37, %v17878_v39  ;;  %v4714_v40 = vand.u32 4294901760, %v4713_v1  ;;  %v2316_v39 = vld [vmem:[%s16470_s2 + $0x4c8] sm:$0xff] }
 0x40b   :  { %17858 = vst [vmem:[#allocation155_spill] sm:$0xff] %v12323_v7  ;;  %3178 = vmatpush.msrb.mxu2 %v17870_v38  ;;  %3263 = vmatpush.msrb.mxu3 %v3262_v61  ;;  %v3274_v60 = vand.u32 4294901760, %v3273_v53  ;;  %v17872_v2 = vand.u32 4294901760, %v17871_v35  ;;  %v2320_v53 = vld [vmem:[%s16470_s2 + $0x4e8] sm:$0xff]  ;;  %v17881_v61 = vand.u32 4294901760, %v12327_v21  ;;  %v12406_v1 = vsub.f32 %v2328_v18, %v12372_v34 }
 0x40c   :  { %17859 = vst [vmem:[#allocation156_spill] sm:$0xff] %v12327_v21  ;;  %4487 = vmatpush.msra.mxu0 %v12341_v31  ;;  %4531 = vmatpush.msra.mxu1 %v12303_v51  ;;  %v12390_v51 = vand.u32 4294901760, %v2324_v44  ;;  %v4731_v59 = vsub.f32 %v12345_v45, %v17887_v33  ;;  %v3286_v18 = vand.u32 4294901760, %v3285_v54  ;;  %v17892_v33 = vld [vmem:[#allocation32_spill] sm:$0xff]  ;;  %v17893_v54 = vand.u32 4294901760, %v12370_v5 }
 0x40d   :  { %17863 = vst [vmem:[#allocation21_spill] sm:$0xff] %v12336_v28  ;;  %v3279_v47 = vsub.f32 %v17871_v35, %v17872_v2  ;;  %v17876_v2 = vld [vmem:[#allocation26_spill] sm:$0xff]  ;;  %3269 = vmatpush.msrb.mxu3 %v3268_v36  ;;  %v4725_v49 = vsub.f32 %v12327_v21, %v17881_v61  ;;  %v17883_v36 = vand.u32 4294901760, %v17882_v22 }
 0x40e   :  { %17864 = vst [vmem:[#allocation44_spill] sm:$0xff] %v12341_v31  ;;  %3180 = vmatpush.msrb.mxu2 %v17876_v2  ;;  %v12388_v31 = vsub.f32 %v2332_v15, %v12351_v20  ;;  %4490 = vmatpush.msra.mxu0 %v12356_v62  ;;  %v17886_v61 = vld [vmem:[#allocation22_spill] sm:$0xff] }
 0x40f   :  { %17865 = vst [vmem:[#allocation157_spill] sm:$0xff] %v12345_v45  ;;  %4533 = vmatpush.msra.mxu1 %v12323_v7  ;;  %v3291_v41 = vsub.f32 %v17882_v22, %v17883_v36  ;;  %3128 = vmatmul.f32.gmra.mxu2 %v17856_v24  ;;  %v3280_v15 = vand.u32 4294901760, %v3279_v47  ;;  %v12408_v7 = vand.u32 4294901760, %v2320_v53  ;;  %v4720_v36 = vand.u32 4294901760, %v4719_v23 }
 0x410   :  { %17867 = vst [vmem:[#allocation18_spill] sm:$0xff] %v12351_v20  ;;  %3275 = vmatpush.msrb.mxu3 %v3274_v60  ;;  %3182 = vmatpush.msrb.mxu2 %v17886_v61  ;;  %v17889_v24 = vand.u32 4294901760, %v17888_v50  ;;  %v2312_v60 = vld [vmem:[%s16470_s2 + $0x4a8] sm:$0xff]  ;;  %v12425_v23 = vsub.f32 %v2324_v44, %v12390_v51 }
 0x411   :  { %17868 = vst [vmem:[#allocation158_spill] sm:$0xff] %v12356_v62  ;;  %4493 = vmatmul.f32.vlgmr.msra.gmra.mxu0 %v11880_v16  ;;  %4537 = vmatmul.f32.vlgmr.msra.gmra.mxu1 %v11910_v4  ;;  %v12427_v16 = vand.u32 4294901760, %v2316_v39  ;;  %v3292_v17 = vand.u32 4294901760, %v3291_v41  ;;  %v4737_v62 = vsub.f32 %v12370_v5, %v17893_v54  ;;  %v12439_v4 = vsub.f32 %v2320_v53, %v12408_v7  ;;  %v17896_v41 = vld [vmem:[#allocation30_spill] sm:$0xff] }
 0x412   :  { %17873 = vst [vmem:[#allocation29_spill] sm:$0xff] %v12370_v5  ;;  %v3297_v47 = vsub.f32 %v17888_v50, %v17889_v24  ;;  %4662 = vmatpush.msrb.mxu0 %v12245_v58  ;;  %4715 = vmatpush.msrb.mxu1 %v4714_v40  ;;  %v4726_v24 = vand.u32 4294901760, %v4725_v49  ;;  %v12441_v40 = vand.u32 4294901760, %v2312_v60  ;;  %v4732_v49 = vand.u32 4294901760, %v4731_v59  ;;  %v2304_v59 = vld [vmem:[%s16470_s2 + $0x468] sm:$0xff] }
 0x413   :  { %17874 = vst [vmem:[#allocation47_spill] sm:$0xff] %v12372_v34  ;;  %3184 = vmatpush.msrb.mxu2 %v17892_v33  ;;  %3281 = vmatpush.msrb.mxu3 %v3280_v15  ;;  %v17898_v15 = vand.u32 4294901760, %v17897_v43  ;;  %v17899_v54 = vand.u32 4294901760, %v12388_v31  ;;  %v12453_v27 = vsub.f32 %v2316_v39, %v12427_v16  ;;  %v17905_v39 = vand.u32 4294901760, %v12406_v1 }
 0x414   :  { %17879 = vst [vmem:[#allocation26_spill] sm:$0xff] %v12388_v31  ;;  %4664 = vmatpush.msrb.mxu0 %v12265_v30  ;;  %4721 = vmatpush.msrb.mxu1 %v4720_v36  ;;  %v3298_v29 = vand.u32 4294901760, %v3297_v47  ;;  %v12455_v36 = vand.u32 4294901760, %v2308_v56  ;;  %v17902_v47 = vld [vmem:[#allocation17_spill] sm:$0xff]  ;;  %v12470_v0 = vsub.f32 %v2312_v60, %v12441_v40  ;;  %v12479_v50 = vand.u32 4294901760, %v2304_v59 }
 0x415   :  { %17880 = vst [vmem:[#allocation159_spill] sm:$0xff] %v12390_v51  ;;  %3186 = vmatpush.msrb.mxu2 %v17896_v41  ;;  %v3303_v9 = vsub.f32 %v17897_v43, %v17898_v15  ;;  %3287 = vmatpush.msrb.mxu3 %v3286_v18  ;;  %v4743_v44 = vsub.f32 %v12388_v31, %v17899_v54  ;;  %v17903_v18 = vld [vmem:[#allocation40_spill] sm:$0xff]  ;;  %v4738_v54 = vand.u32 4294901760, %v4737_v62  ;;  %v17907_v43 = vld [vmem:[#allocation6_spill] sm:$0xff]  ;;  %v17911_v60 = vand.u32 4294901760, %v12425_v23 }
 0x416   :  { %17884 = vst [vmem:[#allocation160_spill] sm:$0xff] %v12406_v1  ;;  %4666 = vmatpush.msrb.mxu0 %v12288_v19  ;;  %4727 = vmatpush.msrb.mxu1 %v4726_v24  ;;  %v17904_v15 = vand.u32 4294901760, %v17903_v18  ;;  %v4749_v53 = vsub.f32 %v12406_v1, %v17905_v39  ;;  %v2300_v24 = vld [vmem:[%s16470_s2 + $0x448] sm:$0xff]  ;;  %v17915_v22 = vand.u32 4294901760, %v12439_v4 }
 0x417   :  { %17885 = vst [vmem:[#allocation161_spill] sm:$0xff] %v12408_v7  ;;  %3188 = vmatpush.msrb.mxu2 %v17902_v47  ;;  %3293 = vmatpush.msrb.mxu3 %v3292_v17  ;;  %v3304_v17 = vand.u32 4294901760, %v3303_v9  ;;  %v4744_v39 = vand.u32 4294901760, %v4743_v44  ;;  %v4755_v8 = vsub.f32 %v12425_v23, %v17911_v60  ;;  %v2296_v9 = vld [vmem:[%s16470_s2 + $0x428] sm:$0xff]  ;;  %v17914_v44 = vld [vmem:[#allocation7_spill] sm:$0xff] }
 0x418   :  { %17890 = vst [vmem:[#allocation22_spill] sm:$0xff] %v12425_v23  ;;  %v3309_v42 = vsub.f32 %v17903_v18, %v17904_v15  ;;  %4668 = vmatpush.msrb.mxu0 %v12308_v13  ;;  %4733 = vmatpush.msrb.mxu1 %v4732_v49  ;;  %v17908_v15 = vld [vmem:[#allocation42_spill] sm:$0xff]  ;;  %v12487_v49 = vsub.f32 %v2308_v56, %v12455_v36  ;;  %v4750_v60 = vand.u32 4294901760, %v4749_v53  ;;  %v17917_v23 = vld [vmem:[#allocation103_spill] sm:$0xff] }
 0x419   :  { %17891 = vst [vmem:[#allocation162_spill] sm:$0xff] %v12427_v16  ;;  %3190 = vmatpush.msrb.mxu2 %v17907_v43  ;;  %v17909_v18 = vand.u32 4294901760, %v17908_v15  ;;  %3299 = vmatpush.msrb.mxu3 %v3298_v29  ;;  %v4761_v56 = vsub.f32 %v12439_v4, %v17915_v22  ;;  %v12510_v53 = vsub.f32 %v2304_v59, %v12479_v50  ;;  %v17921_v22 = vld [vmem:[#allocation10_spill] sm:$0xff] }
 0x41a   :  { %17894 = vst [vmem:[#allocation32_spill] sm:$0xff] %v12439_v4  ;;  %4498 = vmatmul.f32.gmra.mxu0 %v11952_v32  ;;  %4543 = vmatmul.f32.gmra.mxu1 %v11977_v6  ;;  %v3310_v29 = vand.u32 4294901760, %v3309_v42  ;;  %v17916_v6 = vld [vmem:[#allocation106_spill] sm:$0xff]  ;;  %v4756_v32 = vand.u32 4294901760, %v4755_v8  ;;  %v17922_v4 = vand.u32 4294901760, %v12453_v27  ;;  %v17926_v8 = vand.u32 4294901760, %v12470_v0 }
 0x41b   :  { %17895 = vst [vmem:[#allocation163_spill] sm:$0xff] %v12441_v40  ;;  %v3315_v62 = vsub.f32 %v17908_v15, %v17909_v18  ;;  %4670 = vmatpush.msrb.mxu0 %v12336_v28  ;;  %v12494_v18 = vand.u32 4294901760, %v2300_v24  ;;  %4739 = vmatpush.msrb.mxu1 %v4738_v54  ;;  %v2292_v15 = vld [vmem:[%s16470_s2 + $0x408] sm:$0xff]  ;;  %v12506_v1 = vsub.f32 %v17917_v23, %v17916_v6  ;;  %v12512_v54 = vand.u32 4294901760, %v2296_v9 }
 0x41c   :  { %17900 = vst [vmem:[#allocation30_spill] sm:$0xff] %v12453_v27  ;;  %3192 = vmatpush.msrb.mxu2 %v17914_v44  ;;  %3305 = vmatpush.msrb.mxu3 %v3304_v17  ;;  %v4767_v37 = vsub.f32 %v12453_v27, %v17922_v4  ;;  %v16860_v23 = vand.u32 4294901760, %v12487_v49  ;;  %v12523_v59 = vand.u32 4294901760, %v2292_v15 }
 0x41d   :  { %17901 = vst [vmem:[#allocation164_spill] sm:$0xff] %v12455_v36  ;;  %4672 = vmatpush.msrb.mxu0 %v12351_v20  ;;  %v3316_v42 = vand.u32 4294901760, %v3315_v62  ;;  %4745 = vmatpush.msrb.mxu1 %v4744_v39  ;;  %v12521_v17 = vsub.f32 %v2300_v24, %v12494_v18  ;;  %v17925_v62 = vld [vmem:[#allocation43_spill] sm:$0xff]  ;;  %v4762_v39 = vand.u32 4294901760, %v4761_v56  ;;  %v4773_v20 = vsub.f32 %v12470_v0, %v17926_v8  ;;  %v17929_v8 = vld [vmem:[#allocation48_spill] sm:$0xff] }
 0x41e   :  { %17906 = vst [vmem:[#allocation17_spill] sm:$0xff] %v12470_v0  ;;  %3194 = vmatpush.msrb.mxu2 %v17921_v22  ;;  %3311 = vmatpush.msrb.mxu3 %v3310_v29  ;;  %v12530_v4 = vand.u32 4294901760, %v12506_v1  ;;  %v16865_v29 = vand.u32 4294901760, %v12510_v53  ;;  %v12535_v24 = vsub.f32 %v2296_v9, %v12512_v54  ;;  %v4779_v56 = vsub.f32 %v12487_v49, %v16860_v23 }
 0x41f   :  { %17910 = vst [vmem:[#allocation6_spill] sm:$0xff] %v12479_v50  ;;  %4674 = vmatpush.msrb.mxu0 %v12372_v34  ;;  %4751 = vmatpush.msrb.mxu1 %v4750_v60  ;;  %v4768_v60 = vand.u32 4294901760, %v4767_v37  ;;  %v12545_v0 = vsub.f32 %v2292_v15, %v12523_v59  ;;  %v17931_v37 = vld [vmem:[#allocation36_spill] sm:$0xff]  ;;  %v17933_v15 = vld [vmem:[#allocation115_spill] sm:$0xff] }
 0x420   :  { %17912 = vst [vmem:[#allocation165_spill] sm:$0xff] %v12487_v49  ;;  %3196 = vmatpush.msrb.mxu2 %v17925_v62  ;;  %3317 = vmatpush.msrb.mxu3 %v3316_v42  ;;  %v3208_v9 = vsub.f32 %v12506_v1, %v12530_v4  ;;  %v17932_v42 = vld [vmem:[#allocation118_spill] sm:$0xff] }
 0x421   :  { %17913 = vst [vmem:[#allocation166_spill] sm:$0xff] %v12494_v18  ;;  %4676 = vmatpush.msrb.mxu0 %v12390_v51  ;;  %4757 = vmatpush.msrb.mxu1 %v4756_v32  ;;  %v4774_v32 = vand.u32 4294901760, %v4773_v20  ;;  %v12558_v49 = vsub.f32 %v17933_v15, %v17932_v42  ;;  %v4780_v20 = vand.u32 4294901760, %v4779_v56  ;;  %v17937_v15 = vld [vmem:[#allocation35_spill] sm:$0xff] }
 0x422   :  { %17918 = vst [vmem:[#allocation7_spill] sm:$0xff] %v12506_v1  ;;  %3319 = vmatmul.f32.vlgmr.msrb.gmra.mxu3 %v17916_v6  ;;  %3198 = vmatpush.msrb.mxu2 %v17929_v8  ;;  %v12570_v23 = vand.u32 4294901760, %v3208_v9 }
 0x423   :  { %17919 = vst [vmem:[#allocation103_spill] sm:$0xff] %v12510_v53  ;;  %3387 = vmatpush.msra.mxu3 %v17860_v46  ;;  %4678 = vmatpush.msrb.mxu0 %v12408_v7  ;;  %v4785_v46 = vsub.f32 %v12510_v53, %v16865_v29  ;;  %v16874_v29 = vand.u32 4294901760, %v12545_v0 }
 0x424   :  { %17920 = vst [vmem:[#allocation167_spill] sm:$0xff] %v12512_v54  ;;  %4763 = vmatpush.msrb.mxu1 %v4762_v39  ;;  %3200 = vmatpush.msrb.mxu2 %v17931_v37  ;;  %v17936_v39 = vand.u32 4294901760, %v12521_v17 }
 0x425   :  { %17923 = vst [vmem:[#allocation10_spill] sm:$0xff] %v12521_v17  ;;  %3389 = vmatpush.msra.mxu3 %v17866_v25  ;;  %4680 = vmatpush.msrb.mxu0 %v12427_v16  ;;  %v17935_v25 = vld [vmem:[#allocation15_spill] sm:$0xff] }
 0x426   :  { %17924 = vst [vmem:[#allocation168_spill] sm:$0xff] %v12523_v59  ;;  %4769 = vmatpush.msrb.mxu1 %v4768_v60  ;;  %3202 = vmatpush.msrb.mxu2 %v17935_v25  ;;  %v4791_v1 = vsub.f32 %v12521_v17, %v17936_v39  ;;  %v4786_v60 = vand.u32 4294901760, %v4785_v46  ;;  %v12577_v39 = vand.u32 4294901760, %v12558_v49 }
 0x427   :  { %17927 = vst [vmem:[#allocation43_spill] sm:$0xff] %v12530_v4  ;;  %3391 = vmatpush.msra.mxu3 %v17870_v38  ;;  %4682 = vmatpush.msrb.mxu0 %v12441_v40  ;;  %v17939_v38 = vand.u32 4294901760, %v12535_v24 }
 0x428   :  { %17928 = vst [vmem:[#allocation169_spill] sm:$0xff] %v12535_v24  ;;  %4775 = vmatpush.msrb.mxu1 %v4774_v32  ;;  %3204 = vmatpush.msrb.mxu2 %v17937_v15  ;;  %v4803_v32 = vsub.f32 %v12545_v0, %v16874_v29  ;;  %v3216_v46 = vsub.f32 %v12558_v49, %v12577_v39  ;;  %v17981_v29 = vld [vmem:[#allocation65_spill] sm:$0xff] }
 0x429   :  { %17930 = vst [vmem:[#allocation48_spill] sm:$0xff] %v12545_v0  ;;  %3393 = vmatpush.msra.mxu3 %v17876_v2  ;;  %v4797_v56 = vsub.f32 %v12535_v24, %v17939_v38  ;;  %4684 = vmatpush.msrb.mxu0 %v12455_v36  ;;  %v4792_v2 = vand.u32 4294901760, %v4791_v1 }
 0x42a   :  { %17934 = vst [vmem:[#allocation36_spill] sm:$0xff] %v12558_v49  ;;  %4781 = vmatpush.msrb.mxu1 %v4780_v20  ;;  %3210 = vmatmul.f32.vlgmr.msrb.gmra.mxu2 %v12570_v23  ;;  %v4804_v1 = vand.u32 4294901760, %v4803_v32  ;;  %v17953_v20 = vld [vmem:[#allocation11_spill] sm:$0xff] }
 0x42b   :  { %17938 = vst [vmem:[#allocation115_spill] sm:$0xff] %v12570_v23  ;;  %3323 = vmatmul.f32.gmra.mxu3 %v17932_v42  ;;  %3329 = vmatpush.msra.mxu2 %v17815_v48  ;;  %v4798_v9 = vand.u32 4294901760, %v4797_v56  ;;  %v17942_v48 = vand.u32 4294901760, %v12286_v63  ;;  %v17956_v56 = vld [vmem:[#allocation9_spill] sm:$0xff] }
 0x42c   :  { %17940 = vst [vmem:[#allocation15_spill] sm:$0xff] %v12577_v39  ;;  %3395 = vmatpush.msra.mxu3 %v17886_v61  ;;  %4686 = vmatpush.msrb.mxu0 %v12479_v50 }
 0x42d   :  { %4787 = vmatpush.msrb.mxu1 %v4786_v60  ;;  %3332 = vmatpush.msra.mxu2 %v17820_v12  ;;  %v12597_v12 = vand.u32 4294901760, %v3216_v46  ;;  %v17954_v60 = vld [vmem:[#allocation160_spill] sm:$0xff] }
 0x42e   :  { %3397 = vmatpush.msra.mxu3 %v17892_v33  ;;  %4688 = vmatpush.msrb.mxu0 %v12494_v18  ;;  %v17955_v38 = vand.u32 4294901760, %v17954_v60 }
 0x42f   :  { %4793 = vmatpush.msrb.mxu1 %v4792_v2  ;;  %3335 = vmatpush.msra.mxu2 %v17824_v10  ;;  %17941 = vst [vmem:[#allocation35_spill] sm:$0xff] %v12597_v12  ;;  %v17957_v2 = vld [vmem:[#allocation53_spill] sm:$0xff] }
 0x430   :  { %3399 = vmatpush.msra.mxu3 %v17896_v41  ;;  %4690 = vmatpush.msrb.mxu0 %v12512_v54  ;;  %v17949_v41 = vld [vmem:[#allocation50_spill] sm:$0xff]  ;;  %v16866_v32 = vand.u32 4294901760, %v17957_v2 }
 0x431   :  { %4799 = vmatpush.msrb.mxu1 %v4798_v9  ;;  %3338 = vmatpush.msra.mxu2 %v17829_v3  ;;  %v17943_v3 = vand.u32 4294901760, %v12306_v14  ;;  %v17958_v9 = vld [vmem:[#allocation22_spill] sm:$0xff] }
 0x432   :  { %3401 = vmatpush.msra.mxu3 %v17902_v47  ;;  %4692 = vmatpush.msrb.mxu0 %v12523_v59  ;;  %v16869_v47 = vand.u32 4294901760, %v17949_v41  ;;  %v17959_v46 = vand.u32 4294901760, %v17958_v9 }
 0x433   :  { %4805 = vmatpush.msrb.mxu1 %v4804_v1  ;;  %3218 = vmatmul.f32.gmra.mxu2 %v12597_v12 }
 0x434   :  { %3403 = vmatpush.msra.mxu3 %v17907_v43  ;;  %3341 = vmatpush.msra.mxu2 %v17835_v52  ;;  %v17944_v43 = vand.u32 4294901760, %v12327_v21  ;;  %v17945_v52 = vld [vmem:[#allocation49_spill] sm:$0xff] }
 0x435   :  { %4698 = vmatmul.f32.vlgmr.msrb.gmra.mxu0 %v12570_v23  ;;  %4807 = vmatmul.f32.vlgmr.msrb.gmra.mxu1 %v17916_v6  ;;  %v16873_v10 = vand.u32 4294901760, %v17945_v52  ;;  %v18038_v23 = vld [vmem:[#allocation74_spill] sm:$0xff] }
 0x436   :  { %4922 = vmatpush.msra.mxu0 %v17942_v48  ;;  %4993 = vmatpush.msra.mxu1 %v12245_v58  ;;  %v17960_v48 = vld [vmem:[#allocation54_spill] sm:$0xff] }
 0x437   :  { %3344 = vmatpush.msra.mxu2 %v17841_v26  ;;  %3405 = vmatpush.msra.mxu3 %v17914_v44  ;;  %v17946_v26 = vand.u32 4294901760, %v12345_v45  ;;  %v3597_v33 = vsub.f32 %v17945_v52, %v16873_v10  ;;  %v17979_v10 = vld [vmem:[#allocation46_spill] sm:$0xff] }
 0x438   :  { %4926 = vmatpush.msra.mxu0 %v17943_v3  ;;  %4995 = vmatpush.msra.mxu1 %v12265_v30  ;;  %v16868_v3 = vand.u32 4294901760, %v17960_v48 }
 0x439   :  { %3347 = vmatpush.msra.mxu2 %v17847_v11  ;;  %3407 = vmatpush.msra.mxu3 %v17921_v22  ;;  %v17947_v11 = vld [vmem:[#allocation34_spill] sm:$0xff]  ;;  %v17951_v22 = vld [vmem:[#allocation51_spill] sm:$0xff] }
 0x43a   :  { %4930 = vmatpush.msra.mxu0 %v17944_v43  ;;  %4997 = vmatpush.msra.mxu1 %v12288_v19  ;;  %v16872_v61 = vand.u32 4294901760, %v17947_v11  ;;  %v17961_v43 = vld [vmem:[#allocation8_spill] sm:$0xff] }
 0x43b   :  { %3350 = vmatpush.msra.mxu2 %v17854_v57  ;;  %3409 = vmatpush.msra.mxu3 %v17925_v62  ;;  %v17948_v57 = vand.u32 4294901760, %v12370_v5  ;;  %v16867_v62 = vand.u32 4294901760, %v17951_v22 }
 0x43c   :  { %4934 = vmatpush.msra.mxu0 %v17946_v26  ;;  %4999 = vmatpush.msra.mxu1 %v12308_v13  ;;  %v3603_v44 = vsub.f32 %v17947_v11, %v16872_v61  ;;  %v2412_v61 = vld [vmem:[%s16470_s2 + $0x7c8] sm:$0xff] }
 0x43d   :  { %3353 = vmatpush.msra.mxu2 %v17861_v55  ;;  %3411 = vmatpush.msra.mxu3 %v17929_v8  ;;  %v17950_v55 = vand.u32 4294901760, %v12388_v31  ;;  %v17952_v8 = vld [vmem:[#allocation18_spill] sm:$0xff]  ;;  %v3615_v1 = vsub.f32 %v17951_v22, %v16867_v62  ;;  %v18034_v31 = vld [vmem:[#allocation68_spill] sm:$0xff] }
 0x43e   :  { %4706 = vmatmul.f32.gmra.mxu0 %v12597_v12  ;;  %4811 = vmatmul.f32.gmra.mxu1 %v17932_v42  ;;  %v17972_v62 = vld [vmem:[#allocation42_spill] sm:$0xff]  ;;  %v18003_v12 = vld [vmem:[#allocation77_spill] sm:$0xff]  ;;  %v18239_v13 = vld [vmem:[#allocation12_spill] sm:$0xff] }
 0x43f   :  { %4938 = vmatpush.msra.mxu0 %v17948_v57  ;;  %5001 = vmatpush.msra.mxu1 %v12336_v28  ;;  %v17962_v57 = vld [vmem:[#allocation32_spill] sm:$0xff] }
 0x440   :  { %3356 = vmatpush.msra.mxu2 %v17871_v35  ;;  %3413 = vmatpush.msra.mxu3 %v17931_v37  ;;  %v3598_v35 = vand.u32 4294901760, %v3597_v33  ;;  %v3609_v37 = vsub.f32 %v17949_v41, %v16869_v47  ;;  %v3621_v33 = vsub.f32 %v17957_v2, %v16866_v32 }
 0x441   :  { %4942 = vmatpush.msra.mxu0 %v17950_v55  ;;  %5003 = vmatpush.msra.mxu1 %v17952_v8  ;;  %v17964_v55 = vld [vmem:[#allocation58_spill] sm:$0xff] }
 0x442   :  { %3359 = vmatpush.msra.mxu2 %v17953_v20  ;;  %3415 = vmatpush.msra.mxu3 %v17935_v25  ;;  %v3604_v25 = vand.u32 4294901760, %v3603_v44  ;;  %v3610_v26 = vand.u32 4294901760, %v3609_v37  ;;  %v16870_v44 = vand.u32 4294901760, %v17964_v55  ;;  %v17965_v20 = vld [vmem:[#allocation38_spill] sm:$0xff]  ;;  %v3627_v37 = vsub.f32 %v17960_v48, %v16868_v3  ;;  %v17973_v3 = vld [vmem:[#allocation165_spill] sm:$0xff] }
 0x443   :  { %4946 = vmatpush.msra.mxu0 %v17955_v38  ;;  %5005 = vmatpush.msra.mxu1 %v12372_v34  ;;  %v3616_v38 = vand.u32 4294901760, %v3615_v1  ;;  %v17974_v47 = vand.u32 4294901760, %v17973_v3  ;;  %v17988_v3 = vld [vmem:[#allocation39_spill] sm:$0xff] }
 0x444   :  { %3362 = vmatpush.msra.mxu2 %v17956_v56  ;;  %3417 = vmatpush.msra.mxu3 %v17937_v15  ;;  %v17963_v15 = vand.u32 4294901760, %v17962_v57  ;;  %v17967_v56 = vld [vmem:[#allocation59_spill] sm:$0xff]  ;;  %v3633_v1 = vsub.f32 %v17964_v55, %v16870_v44  ;;  %v17983_v44 = vld [vmem:[#allocation37_spill] sm:$0xff] }
 0x445   :  { %4950 = vmatpush.msra.mxu0 %v17959_v46  ;;  %5007 = vmatpush.msra.mxu1 %v12390_v51  ;;  %v16871_v46 = vand.u32 4294901760, %v17967_v56 }
 0x446   :  { %3421 = vmatmul.f32.vlgmr.msra.gmra.mxu3 %v12530_v4  ;;  %3365 = vmatpush.msra.mxu2 %v17961_v43  ;;  %v17968_v43 = vld [vmem:[#allocation40_spill] sm:$0xff] }
 0x447   :  { %3599 = vmatpush.msrb.mxu3 %v3598_v35  ;;  %4954 = vmatpush.msra.mxu0 %v17963_v15  ;;  %v17966_v35 = vand.u32 4294901760, %v12453_v27  ;;  %v17969_v15 = vld [vmem:[#allocation17_spill] sm:$0xff]  ;;  %v18001_v27 = vld [vmem:[#allocation52_spill] sm:$0xff] }
 0x448   :  { %5009 = vmatpush.msra.mxu1 %v12408_v7  ;;  %3368 = vmatpush.msra.mxu2 %v17965_v20  ;;  %v17970_v32 = vand.u32 4294901760, %v17969_v15  ;;  %v17971_v20 = vld [vmem:[#allocation61_spill] sm:$0xff]  ;;  %v2356_v7 = vld [vmem:[%s16470_s2 + $0x608] sm:$0xff] }
 0x449   :  { %3605 = vmatpush.msrb.mxu3 %v3604_v25  ;;  %4958 = vmatpush.msra.mxu0 %v17966_v35  ;;  %v3622_v25 = vand.u32 4294901760, %v3621_v33  ;;  %v16877_v35 = vand.u32 4294901760, %v17971_v20  ;;  %v17975_v33 = vld [vmem:[#allocation7_spill] sm:$0xff] }
 0x44a   :  { %5011 = vmatpush.msra.mxu1 %v12427_v16  ;;  %3371 = vmatpush.msra.mxu2 %v17968_v43  ;;  %v17976_v43 = vld [vmem:[#allocation45_spill] sm:$0xff]  ;;  %v2364_v16 = vld [vmem:[%s16470_s2 + $0x648] sm:$0xff] }
 0x44b   :  { %3611 = vmatpush.msrb.mxu3 %v3610_v26  ;;  %4962 = vmatpush.msra.mxu0 %v17970_v32  ;;  %v3628_v26 = vand.u32 4294901760, %v3627_v37  ;;  %v3639_v32 = vsub.f32 %v17967_v56, %v16871_v46  ;;  %v17977_v37 = vld [vmem:[#allocation62_spill] sm:$0xff]  ;;  %v17978_v46 = vand.u32 4294901760, %v12510_v53  ;;  %v12725_v53 = vand.u32 4294901760, %v2412_v61 }
 0x44c   :  { %5013 = vmatpush.msra.mxu1 %v12441_v40  ;;  %3374 = vmatpush.msra.mxu2 %v17972_v62  ;;  %v3634_v62 = vand.u32 4294901760, %v3633_v1  ;;  %v12909_v5 = vand.u32 4294901760, %v2364_v16 }
 0x44d   :  { %3617 = vmatpush.msrb.mxu3 %v3616_v38  ;;  %4966 = vmatpush.msra.mxu0 %v17974_v47  ;;  %v2416_v38 = vld [vmem:[%s16470_s2 + $0x7e8] sm:$0xff]  ;;  %v3645_v47 = vsub.f32 %v17971_v20, %v16877_v35  ;;  %v17982_v35 = vand.u32 4294901760, %v12521_v17  ;;  %17985 = vst [vmem:[#allocation34_spill] sm:$0xff] %v12725_v53 }
 0x44e   :  { %5015 = vmatpush.msra.mxu1 %v12455_v36  ;;  %3377 = vmatmul.f32.vlgmr.msra.gmra.mxu2 %v17975_v33  ;;  %v12712_v1 = vand.u32 4294901760, %v2416_v38  ;;  %v2404_v17 = vld [vmem:[%s16470_s2 + $0x788] sm:$0xff] }
 0x44f   :  { %3427 = vmatmul.f32.gmra.mxu3 %v12577_v39  ;;  %3546 = vmatpush.msrb.mxu2 %v17976_v43  ;;  %v3646_v33 = vand.u32 4294901760, %v3645_v47  ;;  %v17986_v39 = vld [vmem:[#allocation67_spill] sm:$0xff]  ;;  %v17990_v47 = vand.u32 4294901760, %v17981_v29 }
 0x450   :  { %3623 = vmatpush.msrb.mxu3 %v3622_v25  ;;  %4970 = vmatpush.msra.mxu0 %v17978_v46  ;;  %v3640_v25 = vand.u32 4294901760, %v3639_v32  ;;  %17980 = vst [vmem:[#allocation49_spill] sm:$0xff] %v12712_v1  ;;  %v2408_v46 = vld [vmem:[%s16470_s2 + $0x7a8] sm:$0xff]  ;;  %v17995_v15 = vand.u32 4294901760, %v17986_v39 }
 0x451   :  { %5017 = vmatpush.msra.mxu1 %v12479_v50  ;;  %3548 = vmatpush.msrb.mxu2 %v17979_v10  ;;  %v12741_v4 = vand.u32 4294901760, %v2408_v46 }
 0x452   :  { %3629 = vmatpush.msrb.mxu3 %v3628_v26  ;;  %4974 = vmatpush.msra.mxu0 %v17982_v35  ;;  %v17984_v26 = vand.u32 4294901760, %v17977_v37  ;;  %v17987_v35 = vand.u32 4294901760, %v12535_v24  ;;  %v17992_v24 = vld [vmem:[#allocation69_spill] sm:$0xff] }
 0x453   :  { %5019 = vmatpush.msra.mxu1 %v12494_v18  ;;  %3550 = vmatpush.msrb.mxu2 %v17983_v44  ;;  %17991 = vst [vmem:[#allocation51_spill] sm:$0xff] %v12741_v4  ;;  %v12754_v18 = vand.u32 4294901760, %v2404_v17 }
 0x454   :  { %3635 = vmatpush.msrb.mxu3 %v3634_v62  ;;  %v3651_v32 = vsub.f32 %v17977_v37, %v17984_v26  ;;  %4978 = vmatpush.msra.mxu0 %v17987_v35  ;;  %v12736_v62 = vsub.f32 %v2416_v38, %v12712_v1  ;;  %v3657_v26 = vsub.f32 %v17981_v29, %v17990_v47  ;;  %v2400_v35 = vld [vmem:[%s16470_s2 + $0x768] sm:$0xff] }
 0x455   :  { %5021 = vmatpush.msra.mxu1 %v12512_v54  ;;  %3552 = vmatpush.msrb.mxu2 %v17988_v3  ;;  %v17993_v54 = vand.u32 4294901760, %v12545_v0  ;;  %v12749_v38 = vsub.f32 %v2412_v61, %v12725_v53  ;;  %v3663_v47 = vsub.f32 %v17986_v39, %v17995_v15  ;;  %17996 = vst [vmem:[#allocation9_spill] sm:$0xff] %v12754_v18  ;;  %v18000_v15 = vand.u32 4294901760, %v17992_v24 }
 0x456   :  { %3641 = vmatpush.msrb.mxu3 %v3640_v25  ;;  %17989 = vst [vmem:[#allocation50_spill] sm:$0xff] %v12736_v62  ;;  %3382 = vmatmul.f32.gmra.mxu2 %v12558_v49  ;;  %v3652_v25 = vand.u32 4294901760, %v3651_v32  ;;  %v17998_v49 = vld [vmem:[#allocation71_spill] sm:$0xff]  ;;  %v3658_v61 = vand.u32 4294901760, %v3657_v26  ;;  %v12765_v32 = vsub.f32 %v2408_v46, %v12741_v4  ;;  %v12780_v26 = vsub.f32 %v2404_v17, %v12754_v18 }
 0x457   :  { %4982 = vmatpush.msra.mxu0 %v17993_v54  ;;  %5023 = vmatpush.msra.mxu1 %v12523_v59  ;;  %17994 = vst [vmem:[#allocation11_spill] sm:$0xff] %v12749_v38  ;;  %v17997_v54 = vld [vmem:[#allocation41_spill] sm:$0xff]  ;;  %v3669_v0 = vsub.f32 %v17992_v24, %v18000_v15  ;;  %v2396_v59 = vld [vmem:[%s16470_s2 + $0x748] sm:$0xff]  ;;  %v3664_v46 = vand.u32 4294901760, %v3663_v47  ;;  %v18006_v57 = vand.u32 4294901760, %v17998_v49 }
 0x458   :  { %3647 = vmatpush.msrb.mxu3 %v3646_v33  ;;  %3554 = vmatpush.msrb.mxu2 %v17997_v54  ;;  %17999 = vst [vmem:[#allocation53_spill] sm:$0xff] %v12765_v32  ;;  %v12775_v33 = vand.u32 4294901760, %v2400_v35  ;;  %v2392_v15 = vld [vmem:[%s16470_s2 + $0x728] sm:$0xff]  ;;  %v12790_v50 = vand.u32 4294901760, %v2396_v59 }
 0x459   :  { %4984 = vmatmul.f32.vlgmr.msra.gmra.mxu0 %v17916_v6  ;;  %5025 = vmatmul.f32.vlgmr.msra.gmra.mxu1 %v17916_v6  ;;  %18004 = vst [vmem:[#allocation8_spill] sm:$0xff] %v12780_v26  ;;  %v3675_v36 = vsub.f32 %v17998_v49, %v18006_v57  ;;  %v3670_v17 = vand.u32 4294901760, %v3669_v0  ;;  %v2388_v47 = vld [vmem:[%s16470_s2 + $0x708] sm:$0xff]  ;;  %v18011_v57 = vand.u32 4294901760, %v18003_v12  ;;  %v18013_v0 = vld [vmem:[#allocation57_spill] sm:$0xff] }
 0x45a   :  { %5189 = vmatpush.msrb.mxu0 %v12736_v62  ;;  %5247 = vmatpush.msrb.mxu1 %v12712_v1  ;;  %18002 = vst [vmem:[#allocation54_spill] sm:$0xff] %v12775_v33  ;;  %v18005_v1 = vld [vmem:[#allocation55_spill] sm:$0xff]  ;;  %v12800_v62 = vsub.f32 %v2400_v35, %v12775_v33  ;;  %v12816_v40 = vand.u32 4294901760, %v2388_v47  ;;  %v2360_v6 = vld [vmem:[%s16470_s2 + $0x628] sm:$0xff] }
 0x45b   :  { %3556 = vmatpush.msrb.mxu2 %v18001_v27  ;;  %3653 = vmatpush.msrb.mxu3 %v3652_v25  ;;  %18007 = vst [vmem:[#allocation58_spill] sm:$0xff] %v12790_v50  ;;  %v18008_v25 = vld [vmem:[#allocation79_spill] sm:$0xff]  ;;  %v3681_v9 = vsub.f32 %v18003_v12, %v18011_v57  ;;  %v2380_v57 = vld [vmem:[%s16470_s2 + $0x6c8] sm:$0xff] }
 0x45c   :  { %5192 = vmatpush.msrb.mxu0 %v12749_v38  ;;  %5249 = vmatpush.msrb.mxu1 %v12725_v53  ;;  %v18009_v53 = vld [vmem:[#allocation56_spill] sm:$0xff]  ;;  %18010 = vst [vmem:[#allocation38_spill] sm:$0xff] %v12800_v62  ;;  %v12805_v38 = vand.u32 4294901760, %v2392_v15  ;;  %v18015_v35 = vand.u32 4294901760, %v18008_v25 }
 0x45d   :  { %3558 = vmatpush.msrb.mxu2 %v18005_v1  ;;  %3659 = vmatpush.msrb.mxu3 %v3658_v61  ;;  %v3676_v61 = vand.u32 4294901760, %v3675_v36  ;;  %18016 = vst [vmem:[#allocation61_spill] sm:$0xff] %v12816_v40  ;;  %v3682_v36 = vand.u32 4294901760, %v3681_v9  ;;  %v2376_v9 = vld [vmem:[%s16470_s2 + $0x6a8] sm:$0xff] }
 0x45e   :  { %5195 = vmatpush.msrb.mxu0 %v12765_v32  ;;  %5251 = vmatpush.msrb.mxu1 %v12741_v4  ;;  %18012 = vst [vmem:[#allocation59_spill] sm:$0xff] %v12805_v38  ;;  %v12811_v4 = vsub.f32 %v2396_v59, %v12790_v50  ;;  %v3687_v32 = vsub.f32 %v18008_v25, %v18015_v35  ;;  %v18018_v35 = vld [vmem:[#allocation60_spill] sm:$0xff] }
 0x45f   :  { %3560 = vmatpush.msrb.mxu2 %v18009_v53  ;;  %3665 = vmatpush.msrb.mxu3 %v3664_v46  ;;  %v2384_v46 = vld [vmem:[%s16470_s2 + $0x6e8] sm:$0xff]  ;;  %v12825_v59 = vsub.f32 %v2392_v15, %v12805_v38  ;;  %v18021_v15 = vld [vmem:[#allocation63_spill] sm:$0xff]  ;;  %18039 = vst [vmem:[#allocation55_spill] sm:$0xff] %v12909_v5 }
 0x460   :  { %5198 = vmatpush.msrb.mxu0 %v12780_v26  ;;  %5253 = vmatpush.msrb.mxu1 %v12754_v18  ;;  %18014 = vst [vmem:[#allocation40_spill] sm:$0xff] %v12811_v4  ;;  %v12832_v18 = vand.u32 4294901760, %v2384_v46  ;;  %v2221_v26 = vld [vmem:[%s16470_s2 + $0x1d0] sm:$0xff] }
 0x461   :  { %3562 = vmatpush.msrb.mxu2 %v18013_v0  ;;  %3671 = vmatpush.msrb.mxu3 %v3670_v17  ;;  %18017 = vst [vmem:[#allocation42_spill] sm:$0xff] %v12825_v59  ;;  %v3688_v17 = vand.u32 4294901760, %v3687_v32  ;;  %v2372_v32 = vld [vmem:[%s16470_s2 + $0x688] sm:$0xff] }
 0x462   :  { %4988 = vmatmul.f32.gmra.mxu0 %v17932_v42  ;;  %5029 = vmatmul.f32.gmra.mxu1 %v17932_v42  ;;  %18019 = vst [vmem:[#allocation45_spill] sm:$0xff] %v12832_v18  ;;  %v18033_v42 = vld [vmem:[#allocation130_spill] sm:$0xff] }
 0x463   :  { %5201 = vmatpush.msrb.mxu0 %v12800_v62  ;;  %5255 = vmatpush.msrb.mxu1 %v12775_v33  ;;  %v12836_v62 = vsub.f32 %v2388_v47, %v12816_v40  ;;  %v12843_v33 = vand.u32 4294901760, %v2380_v57  ;;  %v18023_v47 = vld [vmem:[#allocation64_spill] sm:$0xff] }
 0x464   :  { %3564 = vmatpush.msrb.mxu2 %v18018_v35  ;;  %3677 = vmatpush.msrb.mxu3 %v3676_v61  ;;  %v12852_v61 = vsub.f32 %v2384_v46, %v12832_v18  ;;  %v2368_v46 = vld [vmem:[%s16470_s2 + $0x668] sm:$0xff] }
 0x465   :  { %5204 = vmatpush.msrb.mxu0 %v12811_v4  ;;  %18020 = vst [vmem:[#allocation62_spill] sm:$0xff] %v12836_v62  ;;  %5257 = vmatpush.msrb.mxu1 %v12790_v50  ;;  %v12854_v4 = vand.u32 4294901760, %v2376_v9  ;;  %v2225_v50 = vld [vmem:[%s16470_s2 + $0x1f0] sm:$0xff] }
 0x466   :  { %3566 = vmatpush.msrb.mxu2 %v18021_v15  ;;  %18022 = vst [vmem:[#allocation46_spill] sm:$0xff] %v12843_v33  ;;  %3683 = vmatpush.msrb.mxu3 %v3682_v36  ;;  %v18026_v36 = vld [vmem:[#allocation125_spill] sm:$0xff] }
 0x467   :  { %5207 = vmatpush.msrb.mxu0 %v12825_v59  ;;  %5259 = vmatpush.msrb.mxu1 %v12805_v38  ;;  %18024 = vst [vmem:[#allocation65_spill] sm:$0xff] %v12852_v61  ;;  %v12863_v38 = vsub.f32 %v2380_v57, %v12843_v33  ;;  %v12865_v59 = vand.u32 4294901760, %v2372_v32  ;;  %v12880_v57 = vsub.f32 %v2376_v9, %v12854_v4 }
 0x468   :  { %3568 = vmatpush.msrb.mxu2 %v18023_v47  ;;  %18025 = vst [vmem:[#allocation37_spill] sm:$0xff] %v12854_v4  ;;  %3689 = vmatpush.msrb.mxu3 %v3688_v17  ;;  %v18029_v17 = vld [vmem:[#allocation66_spill] sm:$0xff] }
 0x469   :  { %5210 = vmatpush.msrb.mxu0 %v12836_v62  ;;  %5261 = vmatpush.msrb.mxu1 %v12816_v40  ;;  %18027 = vst [vmem:[#allocation67_spill] sm:$0xff] %v12863_v38  ;;  %v12875_v40 = vand.u32 4294901760, %v2225_v50  ;;  %v18032_v62 = vld [vmem:[#allocation135_spill] sm:$0xff]  ;;  %v12899_v9 = vsub.f32 %v2372_v32, %v12865_v59 }
 0x46a   :  { %3691 = vmatmul.f32.vlgmr.msrb.gmra.mxu3 %v18026_v36  ;;  %18028 = vst [vmem:[#allocation39_spill] sm:$0xff] %v12865_v59  ;;  %3570 = vmatpush.msrb.mxu2 %v18029_v17  ;;  %v3580_v60 = vsub.f32 %v18033_v42, %v18032_v62 }
 0x46b   :  { %3877 = vmatpush.msra.mxu3 %v17976_v43  ;;  %18030 = vst [vmem:[#allocation69_spill] sm:$0xff] %v12875_v40  ;;  %5213 = vmatpush.msrb.mxu0 %v12852_v61  ;;  %v2217_v43 = vld [vmem:[%s16470_s2 + $0x1b0] sm:$0xff]  ;;  %v12892_v61 = vand.u32 4294901760, %v2368_v46 }
 0x46c   :  { %5263 = vmatpush.msrb.mxu1 %v12832_v18  ;;  %18031 = vst [vmem:[#allocation41_spill] sm:$0xff] %v12880_v57  ;;  %3572 = vmatpush.msrb.mxu2 %v18034_v31  ;;  %v12894_v18 = vand.u32 4294901760, %v2221_v26  ;;  %v12918_v32 = vand.u32 4294901760, %v3580_v60  ;;  %v2209_v60 = vld [vmem:[%s16470_s2 + $0x170] sm:$0xff] }
 0x46d   :  { %3879 = vmatpush.msra.mxu3 %v17979_v10  ;;  %18035 = vst [vmem:[#allocation71_spill] sm:$0xff] %v12892_v61  ;;  %5216 = vmatpush.msrb.mxu0 %v12863_v38  ;;  %v2213_v10 = vld [vmem:[%s16470_s2 + $0x190] sm:$0xff]  ;;  %v12912_v38 = vsub.f32 %v2225_v50, %v12875_v40  ;;  %v12926_v51 = vsub.f32 %v2368_v46, %v12892_v61  ;;  %v12928_v50 = vand.u32 4294901760, %v2360_v6 }
 0x46e   :  { %18036 = vst [vmem:[#allocation52_spill] sm:$0xff] %v12894_v18  ;;  %5265 = vmatpush.msrb.mxu1 %v12843_v33  ;;  %3574 = vmatpush.msrb.mxu2 %v18038_v23  ;;  %v12914_v33 = vand.u32 4294901760, %v2217_v43  ;;  %v12931_v45 = vsub.f32 %v2221_v26, %v12894_v18  ;;  %v12943_v46 = vsub.f32 %v2364_v16, %v12909_v5 }
 0x46f   :  { %18037 = vst [vmem:[#allocation77_spill] sm:$0xff] %v12899_v9  ;;  %3881 = vmatpush.msra.mxu3 %v17983_v44  ;;  %5219 = vmatpush.msrb.mxu0 %v12880_v57  ;;  %v18043_v44 = vld [vmem:[#allocation75_spill] sm:$0xff]  ;;  %v12933_v57 = vand.u32 4294901760, %v2213_v10  ;;  %v12962_v16 = vsub.f32 %v2360_v6, %v12928_v50 }
 0x470   :  { %18040 = vst [vmem:[#allocation79_spill] sm:$0xff] %v12912_v38  ;;  %5267 = vmatpush.msrb.mxu1 %v12854_v4  ;;  %3576 = vmatpush.msrb.mxu2 %v18043_v44  ;;  %v12945_v4 = vand.u32 4294901760, %v2356_v7  ;;  %v12949_v34 = vsub.f32 %v2217_v43, %v12914_v33 }
 0x471   :  { %18041 = vst [vmem:[#allocation56_spill] sm:$0xff] %v12914_v33  ;;  %3883 = vmatpush.msra.mxu3 %v17988_v3  ;;  %5222 = vmatpush.msrb.mxu0 %v12899_v9  ;;  %v18048_v3 = vld [vmem:[#allocation138_spill] sm:$0xff]  ;;  %v2205_v9 = vld [vmem:[%s16470_s2 + $0x150] sm:$0xff]  ;;  %v12966_v26 = vsub.f32 %v2213_v10, %v12933_v57  ;;  %v18061_v10 = vand.u32 4294901760, %v12912_v38 }
 0x472   :  { %18042 = vst [vmem:[#allocation57_spill] sm:$0xff] %v12918_v32  ;;  %5269 = vmatpush.msrb.mxu1 %v12865_v59  ;;  %3582 = vmatmul.f32.vlgmr.msrb.gmra.mxu2 %v12918_v32  ;;  %v18052_v59 = vand.u32 4294901760, %v17945_v52  ;;  %v12957_v32 = vand.u32 4294901760, %v2209_v60  ;;  %v2201_v52 = vld [vmem:[%s16470_s2 + $0x130] sm:$0xff]  ;;  %v12976_v21 = vand.u32 4294901760, %v2205_v9  ;;  %v12981_v6 = vsub.f32 %v2356_v7, %v12945_v4 }
 0x473   :  { %18044 = vst [vmem:[#allocation60_spill] sm:$0xff] %v12926_v51  ;;  %3695 = vmatmul.f32.gmra.mxu3 %v18048_v3  ;;  %5225 = vmatpush.msrb.mxu0 %v12926_v51  ;;  %v18058_v51 = vld [vmem:[#allocation140_spill] sm:$0xff]  ;;  %v5457_v43 = vsub.f32 %v12912_v38, %v18061_v10  ;;  %v12996_v7 = vand.u32 4294901760, %v2201_v52  ;;  %v18065_v10 = vand.u32 4294901760, %v12931_v45 }
 0x474   :  { %18045 = vst [vmem:[#allocation63_spill] sm:$0xff] %v12928_v50  ;;  %3806 = vmatpush.msra.mxu2 %v18052_v59  ;;  %3885 = vmatpush.msra.mxu3 %v17997_v54  ;;  %v18056_v54 = vand.u32 4294901760, %v17947_v11  ;;  %v18057_v59 = vld [vmem:[#allocation70_spill] sm:$0xff] }
 0x475   :  { %18046 = vst [vmem:[#allocation64_spill] sm:$0xff] %v12931_v45  ;;  %5271 = vmatpush.msrb.mxu1 %v12892_v61  ;;  %v3588_v61 = vsub.f32 %v18058_v51, %v18057_v59  ;;  %5228 = vmatpush.msrb.mxu0 %v12943_v46  ;;  %v5463_v11 = vsub.f32 %v12931_v45, %v18065_v10  ;;  %v5458_v10 = vand.u32 4294901760, %v5457_v43  ;;  %v18073_v43 = vand.u32 4294901760, %v17957_v2 }
 0x476   :  { %18047 = vst [vmem:[#allocation66_spill] sm:$0xff] %v12933_v57  ;;  %3810 = vmatpush.msra.mxu2 %v18056_v54  ;;  %3887 = vmatpush.msra.mxu3 %v18001_v27  ;;  %v2197_v27 = vld [vmem:[%s16470_s2 + $0x110] sm:$0xff]  ;;  %v18062_v54 = vand.u32 4294901760, %v17949_v41 }
 0x477   :  { %18049 = vst [vmem:[#allocation68_spill] sm:$0xff] %v12943_v46  ;;  %5273 = vmatpush.msrb.mxu1 %v12909_v5  ;;  %v12994_v5 = vsub.f32 %v2209_v60, %v12957_v32  ;;  %5231 = vmatpush.msrb.mxu0 %v12962_v16  ;;  %v2193_v41 = vld [vmem:[%s16470_s2 + $0xf0] sm:$0xff]  ;;  %v13010_v60 = vand.u32 4294901760, %v3588_v61  ;;  %v18070_v46 = vand.u32 4294901760, %v12949_v34  ;;  %v13029_v61 = vsub.f32 %v2201_v52, %v12996_v7 }
 0x478   :  { %18050 = vst [vmem:[#allocation74_spill] sm:$0xff] %v12945_v4  ;;  %3814 = vmatpush.msra.mxu2 %v18062_v54  ;;  %3889 = vmatpush.msra.mxu3 %v18005_v1  ;;  %v18066_v1 = vand.u32 4294901760, %v17951_v22  ;;  %v13013_v54 = vsub.f32 %v2205_v9, %v12976_v21  ;;  %v13031_v9 = vand.u32 4294901760, %v2193_v41  ;;  %v2181_v22 = vld [vmem:[%s16470_s2 + $0x90] sm:$0xff] }
 0x479   :  { %18051 = vst [vmem:[#allocation75_spill] sm:$0xff] %v12949_v34  ;;  %5275 = vmatpush.msrb.mxu1 %v12928_v50  ;;  %v13015_v50 = vand.u32 4294901760, %v2197_v27  ;;  %5234 = vmatpush.msrb.mxu0 %v12981_v6  ;;  %v18078_v52 = vand.u32 4294901760, %v12994_v5 }
 0x47a   :  { %18053 = vst [vmem:[#allocation170_spill] sm:$0xff] %v12957_v32  ;;  %3818 = vmatpush.msra.mxu2 %v18066_v1  ;;  %3891 = vmatpush.msra.mxu3 %v18009_v53  ;;  %v2189_v53 = vld [vmem:[%s16470_s2 + $0xd0] sm:$0xff]  ;;  %v18074_v1 = vand.u32 4294901760, %v12966_v26 }
 0x47b   :  { %18054 = vst [vmem:[#allocation171_spill] sm:$0xff] %v12962_v16  ;;  %5277 = vmatpush.msrb.mxu1 %v12945_v4  ;;  %v5469_v16 = vsub.f32 %v12949_v34, %v18070_v46  ;;  %3590 = vmatmul.f32.gmra.mxu2 %v13010_v60  ;;  %v5464_v46 = vand.u32 4294901760, %v5463_v11  ;;  %v13046_v2 = vsub.f32 %v2197_v27, %v13015_v50  ;;  %v18077_v11 = vand.u32 4294901760, %v17960_v48 }
 0x47c   :  { %18055 = vst [vmem:[#allocation172_spill] sm:$0xff] %v12966_v26  ;;  %3893 = vmatpush.msra.mxu3 %v18013_v0  ;;  %3822 = vmatpush.msra.mxu2 %v18073_v43  ;;  %v5475_v4 = vsub.f32 %v12966_v26, %v18074_v1  ;;  %v2185_v0 = vld [vmem:[%s16470_s2 + $0xb0] sm:$0xff]  ;;  %v13048_v43 = vand.u32 4294901760, %v2189_v53  ;;  %v5481_v27 = vsub.f32 %v12994_v5, %v18078_v52 }
 0x47d   :  { %18059 = vst [vmem:[#allocation173_spill] sm:$0xff] %v12976_v21  ;;  %5237 = vmatmul.f32.vlgmr.msrb.gmra.mxu0 %v18033_v42  ;;  %5281 = vmatmul.f32.vlgmr.msrb.gmra.mxu1 %v18032_v62  ;;  %v5470_v1 = vand.u32 4294901760, %v5469_v16  ;;  %v13064_v48 = vand.u32 4294901760, %v2185_v0  ;;  %v18081_v16 = vand.u32 4294901760, %v17964_v55  ;;  %v13077_v42 = vand.u32 4294901760, %v2181_v22  ;;  %v2177_v55 = vld [vmem:[%s16470_s2 + $0x70] sm:$0xff] }
 0x47e   :  { %18060 = vst [vmem:[#allocation174_spill] sm:$0xff] %v12981_v6  ;;  %5406 = vmatpush.msra.mxu0 %v12875_v40  ;;  %5459 = vmatpush.msra.mxu1 %v5458_v10  ;;  %v13062_v10 = vsub.f32 %v2193_v41, %v13031_v9  ;;  %v13075_v41 = vsub.f32 %v2189_v53, %v13048_v43  ;;  %v18086_v53 = vand.u32 4294901760, %v13029_v61 }
 0x47f   :  { %18063 = vst [vmem:[#allocation175_spill] sm:$0xff] %v12994_v5  ;;  %3826 = vmatpush.msra.mxu2 %v18077_v11  ;;  %3895 = vmatpush.msra.mxu3 %v18018_v35  ;;  %v5476_v11 = vand.u32 4294901760, %v5475_v4  ;;  %v18082_v35 = vand.u32 4294901760, %v13013_v54  ;;  %v13082_v4 = vpop.f32.mrf.mxu2  ;;  %v13093_v62 = vsub.f32 %v2185_v0, %v13064_v48 }
 0x480   :  { %18064 = vst [vmem:[#allocation176_spill] sm:$0xff] %v12996_v7  ;;  %5408 = vmatpush.msra.mxu0 %v12894_v18  ;;  %5465 = vmatpush.msra.mxu1 %v5464_v46  ;;  %v5482_v46 = vand.u32 4294901760, %v5481_v27 }
 0x481   :  { %18067 = vst [vmem:[#allocation177_spill] sm:$0xff] %v13010_v60  ;;  %3830 = vmatpush.msra.mxu2 %v18081_v16  ;;  %3897 = vmatpush.msra.mxu3 %v18021_v15  ;;  %v5487_v52 = vsub.f32 %v13013_v54, %v18082_v35  ;;  %v18085_v15 = vand.u32 4294901760, %v17967_v56  ;;  %v5493_v16 = vsub.f32 %v13029_v61, %v18086_v53  ;;  %v18088_v56 = vand.u32 4294901760, %v17971_v20  ;;  %v2169_v20 = vld [vmem:[%s16470_s2 + $0x30] sm:$0xff] }
 0x482   :  { %18068 = vst [vmem:[#allocation178_spill] sm:$0xff] %v13013_v54  ;;  %5410 = vmatpush.msra.mxu0 %v12914_v33  ;;  %5471 = vmatpush.msra.mxu1 %v5470_v1  ;;  %v2173_v1 = vld [vmem:[%s16470_s2 + $0x50] sm:$0xff]  ;;  %v13109_v35 = vsub.f32 %v2181_v22, %v13077_v42 }
 0x483   :  { %18069 = vst [vmem:[#allocation179_spill] sm:$0xff] %v13015_v50  ;;  %3834 = vmatpush.msra.mxu2 %v18085_v15  ;;  %3899 = vmatpush.msra.mxu3 %v18023_v47  ;;  %v13100_v47 = vand.u32 4294901760, %v2177_v55  ;;  %v5488_v27 = vand.u32 4294901760, %v5487_v52  ;;  %v18090_v15 = vand.u32 4294901760, %v13046_v2  ;;  %v5494_v52 = vand.u32 4294901760, %v5493_v16  ;;  %v2165_v53 = vld [vmem:[%s16470_s2 + $0x10] sm:$0xff] }
 0x484   :  { %18071 = vst [vmem:[#allocation180_spill] sm:$0xff] %v13029_v61  ;;  %5412 = vmatpush.msra.mxu0 %v12933_v57  ;;  %5477 = vmatpush.msra.mxu1 %v5476_v11  ;;  %v18093_v11 = vand.u32 4294901760, %v17977_v37  ;;  %v18097_v16 = vand.u32 4294901760, %v17981_v29  ;;  %v18101_v29 = vand.u32 4294901760, %v17986_v39 }
 0x485   :  { %18072 = vst [vmem:[#allocation181_spill] sm:$0xff] %v13031_v9  ;;  %3838 = vmatpush.msra.mxu2 %v18088_v56  ;;  %3901 = vmatpush.msra.mxu3 %v18029_v17  ;;  %v5499_v0 = vsub.f32 %v13046_v2, %v18090_v15  ;;  %v13116_v17 = vand.u32 4294901760, %v2173_v1  ;;  %v18094_v56 = vand.u32 4294901760, %v13062_v10  ;;  %v13132_v37 = vsub.f32 %v2177_v55, %v13100_v47 }
 0x486   :  { %18075 = vst [vmem:[#allocation182_spill] sm:$0xff] %v13046_v2  ;;  %5242 = vmatmul.f32.gmra.mxu0 %v18058_v51  ;;  %5287 = vmatmul.f32.gmra.mxu1 %v18057_v59  ;;  %v13127_v59 = vpop.f32.mrf.mxu3  ;;  %v16981_v51 = vand.u32 4294901760, %v13109_v35  ;;  %v13149_v55 = vand.u32 4294901760, %v2165_v53 }
 0x487   :  { %18076 = vst [vmem:[#allocation183_spill] sm:$0xff] %v13048_v43  ;;  %5414 = vmatpush.msra.mxu0 %v12957_v32  ;;  %5483 = vmatpush.msra.mxu1 %v5482_v46  ;;  %v5505_v22 = vsub.f32 %v13062_v10, %v18094_v56  ;;  %v13134_v46 = vand.u32 4294901760, %v2169_v20  ;;  %v18098_v56 = vand.u32 4294901760, %v13075_v41  ;;  %v13142_v60 = vpop.f32.mrf.mxu2 }
 0x488   :  { %18079 = vst [vmem:[#allocation184_spill] sm:$0xff] %v13062_v10  ;;  %3842 = vmatpush.msra.mxu2 %v18093_v11  ;;  %3903 = vmatpush.msra.mxu3 %v18034_v31  ;;  %v5500_v11 = vand.u32 4294901760, %v5499_v0  ;;  %v13147_v31 = vsub.f32 %v2173_v1, %v13116_v17  ;;  %v18102_v0 = vand.u32 4294901760, %v13093_v62  ;;  %v5523_v39 = vsub.f32 %v13109_v35, %v16981_v51  ;;  %v18139_v51 = vld [vmem:[#allocation88_spill] sm:$0xff] }
 0x489   :  { %18080 = vst [vmem:[#allocation185_spill] sm:$0xff] %v13064_v48  ;;  %5416 = vmatpush.msra.mxu0 %v12976_v21  ;;  %5489 = vmatpush.msra.mxu1 %v5488_v27  ;;  %v5511_v15 = vsub.f32 %v13075_v41, %v18098_v56  ;;  %v5506_v27 = vand.u32 4294901760, %v5505_v22  ;;  %v13160_v1 = vsub.f32 %v2169_v20, %v13134_v46  ;;  %v18104_v22 = vld [vmem:[#allocation84_spill] sm:$0xff]  ;;  %v18105_v56 = vand.u32 4294901760, %v17992_v24 }
 0x48a   :  { %18083 = vst [vmem:[#allocation186_spill] sm:$0xff] %v13075_v41  ;;  %3846 = vmatpush.msra.mxu2 %v18097_v16  ;;  %3905 = vmatpush.msra.mxu3 %v18038_v23  ;;  %v5517_v16 = vsub.f32 %v13093_v62, %v18102_v0  ;;  %v16980_v23 = vand.u32 4294901760, %v13132_v37  ;;  %v18108_v0 = vand.u32 4294901760, %v17998_v49 }
 0x48b   :  { %18084 = vst [vmem:[#allocation187_spill] sm:$0xff] %v13077_v42  ;;  %5418 = vmatpush.msra.mxu0 %v12996_v7  ;;  %5495 = vmatpush.msra.mxu1 %v5494_v52  ;;  %v5512_v52 = vand.u32 4294901760, %v5511_v15  ;;  %v18107_v15 = vld [vmem:[#allocation91_spill] sm:$0xff] }
 0x48c   :  { %18087 = vst [vmem:[#allocation188_spill] sm:$0xff] %v13093_v62  ;;  %3850 = vmatpush.msra.mxu2 %v18101_v29  ;;  %3907 = vmatpush.msra.mxu3 %v18043_v44  ;;  %v16979_v44 = vand.u32 4294901760, %v13147_v31  ;;  %v13171_v29 = vsub.f32 %v2165_v53, %v13149_v55  ;;  %v5518_v20 = vand.u32 4294901760, %v5517_v16  ;;  %v5529_v24 = vsub.f32 %v13132_v37, %v16980_v23  ;;  %v18145_v23 = vld [vmem:[#allocation126_spill] sm:$0xff] }
 0x48d   :  { %18089 = vst [vmem:[#allocation189_spill] sm:$0xff] %v13100_v47  ;;  %5420 = vmatpush.msra.mxu0 %v13015_v50  ;;  %5501 = vmatpush.msra.mxu1 %v5500_v11  ;;  %v5524_v53 = vand.u32 4294901760, %v5523_v39 }
 0x48e   :  { %18091 = vst [vmem:[#allocation190_spill] sm:$0xff] %v13109_v35  ;;  %3909 = vmatmul.f32.vlgmr.msra.gmra.mxu3 %v18026_v36  ;;  %3854 = vmatpush.msra.mxu2 %v18105_v56  ;;  %v13174_v11 = vpop.f32.mrf.mxu3  ;;  %v18109_v56 = vld [vmem:[#allocation93_spill] sm:$0xff]  ;;  %v5535_v49 = vsub.f32 %v13147_v31, %v16979_v44  ;;  %v16978_v16 = vand.u32 4294901760, %v13171_v29  ;;  %v5530_v39 = vand.u32 4294901760, %v5529_v24 }
 0x48f   :  { %18092 = vst [vmem:[#allocation191_spill] sm:$0xff] %v13116_v17  ;;  %4131 = vmatpush.msrb.mxu3 %v18104_v22  ;;  %5422 = vmatpush.msra.mxu0 %v13031_v9  ;;  %v16977_v22 = vand.u32 4294901760, %v13160_v1 }
 0x490   :  { %18095 = vst [vmem:[#allocation192_spill] sm:$0xff] %v13132_v37  ;;  %5507 = vmatpush.msra.mxu1 %v5506_v27  ;;  %3858 = vmatpush.msra.mxu2 %v18108_v0  ;;  %v18110_v27 = vand.u32 4294901760, %v18003_v12  ;;  %v18111_v0 = vld [vmem:[#allocation95_spill] sm:$0xff] }
 0x491   :  { %18096 = vst [vmem:[#allocation193_spill] sm:$0xff] %v13134_v46  ;;  %4133 = vmatpush.msrb.mxu3 %v18107_v15  ;;  %5424 = vmatpush.msra.mxu0 %v13048_v43  ;;  %v13192_v15 = vpop.f32.mrf.mxu2  ;;  %v5541_v12 = vsub.f32 %v13160_v1, %v16977_v22  ;;  %v18117_v22 = vld [vmem:[#allocation97_spill] sm:$0xff] }
 0x492   :  { %18099 = vst [vmem:[#allocation194_spill] sm:$0xff] %v13147_v31  ;;  %5513 = vmatpush.msra.mxu1 %v5512_v52  ;;  %3862 = vmatpush.msra.mxu2 %v18110_v27  ;;  %v18112_v52 = vand.u32 4294901760, %v18008_v25  ;;  %v18113_v27 = vld [vmem:[#allocation90_spill] sm:$0xff]  ;;  %v18114_v25 = vld [vmem:[#allocation100_spill] sm:$0xff] }
 0x493   :  { %18100 = vst [vmem:[#allocation195_spill] sm:$0xff] %v13149_v55  ;;  %4135 = vmatpush.msrb.mxu3 %v18109_v56  ;;  %5426 = vmatpush.msra.mxu0 %v13064_v48  ;;  %v5547_v56 = vsub.f32 %v13171_v29, %v16978_v16  ;;  %v5542_v24 = vand.u32 4294901760, %v5541_v12  ;;  %v18118_v16 = vld [vmem:[#allocation105_spill] sm:$0xff] }
 0x494   :  { %18103 = vst [vmem:[#allocation196_spill] sm:$0xff] %v13160_v1  ;;  %5519 = vmatpush.msra.mxu1 %v5518_v20  ;;  %3866 = vmatpush.msra.mxu2 %v18112_v52  ;;  %v5536_v20 = vand.u32 4294901760, %v5535_v49 }
 0x495   :  { %18106 = vst [vmem:[#allocation84_spill] sm:$0xff] %v13171_v29  ;;  %4137 = vmatpush.msrb.mxu3 %v18111_v0  ;;  %5428 = vmatpush.msra.mxu0 %v13077_v42  ;;  %v18115_v0 = vld [vmem:[#allocation94_spill] sm:$0xff]  ;;  %v5548_v49 = vand.u32 4294901760, %v5547_v56  ;;  %v18122_v56 = vld [vmem:[#allocation104_spill] sm:$0xff] }
 0x496   :  { %5525 = vmatpush.msra.mxu1 %v5524_v53  ;;  %3868 = vmatmul.f32.vlgmr.msra.gmra.mxu2 %v18026_v36  ;;  %v18116_v53 = vld [vmem:[#allocation102_spill] sm:$0xff]  ;;  %v13211_v52 = vpop.f32.mrf.mxu3  ;;  %v2265_v36 = vld [vmem:[%s16470_s2 + $0x330] sm:$0xff] }
 0x497   :  { %3913 = vmatmul.f32.gmra.mxu3 %v18048_v3  ;;  %4073 = vmatpush.msrb.mxu2 %v18113_v27  ;;  %v18119_v27 = vld [vmem:[#allocation99_spill] sm:$0xff] }
 0x498   :  { %4139 = vmatpush.msrb.mxu3 %v18114_v25  ;;  %5430 = vmatpush.msra.mxu0 %v13100_v47  ;;  %v18125_v25 = vand.u32 4294901760, %v12912_v38 }
 0x499   :  { %5531 = vmatpush.msra.mxu1 %v5530_v39  ;;  %4076 = vmatpush.msrb.mxu2 %v18115_v0  ;;  %v18120_v39 = vld [vmem:[#allocation109_spill] sm:$0xff]  ;;  %v13219_v12 = vpop.f32.mrf.mxu2  ;;  %v18127_v0 = vld [vmem:[#allocation114_spill] sm:$0xff] }
 0x49a   :  { %4141 = vmatpush.msrb.mxu3 %v18116_v53  ;;  %5432 = vmatpush.msra.mxu0 %v13116_v17  ;;  %v18128_v53 = vand.u32 4294901760, %v12931_v45  ;;  %v18150_v45 = vld [vmem:[#allocation129_spill] sm:$0xff] }
 0x49b   :  { %5537 = vmatpush.msra.mxu1 %v5536_v20  ;;  %4079 = vmatpush.msrb.mxu2 %v18117_v22  ;;  %v18121_v20 = vld [vmem:[#allocation112_spill] sm:$0xff] }
 0x49c   :  { %4143 = vmatpush.msrb.mxu3 %v18118_v16  ;;  %5434 = vmatpush.msra.mxu0 %v13134_v46  ;;  %v18123_v22 = vld [vmem:[#allocation24_spill] sm:$0xff]  ;;  %v18124_v16 = vld [vmem:[#allocation19_spill] sm:$0xff] }
 0x49d   :  { %5543 = vmatpush.msra.mxu1 %v5542_v24  ;;  %4082 = vmatpush.msrb.mxu2 %v18119_v27  ;;  %v18126_v24 = vld [vmem:[#allocation108_spill] sm:$0xff]  ;;  %v18129_v27 = vld [vmem:[#allocation111_spill] sm:$0xff] }
 0x49e   :  { %4145 = vmatpush.msrb.mxu3 %v18120_v39  ;;  %5436 = vmatpush.msra.mxu0 %v13149_v55  ;;  %v18130_v39 = vld [vmem:[#allocation117_spill] sm:$0xff] }
 0x49f   :  { %5549 = vmatpush.msra.mxu1 %v5548_v49  ;;  %3872 = vmatmul.f32.gmra.mxu2 %v18048_v3  ;;  %v13234_v49 = vpop.f32.mrf.mxu3 }
 0x4a0   :  { %4147 = vmatpush.msrb.mxu3 %v18121_v20  ;;  %4085 = vmatpush.msrb.mxu2 %v18122_v56  ;;  %v18131_v20 = vand.u32 4294901760, %v12949_v34  ;;  %v18132_v56 = vld [vmem:[#allocation113_spill] sm:$0xff] }
 0x4a1   :  { %5442 = vmatmul.f32.vlgmr.msra.gmra.mxu0 %v18123_v22  ;;  %5551 = vmatmul.f32.vlgmr.msra.gmra.mxu1 %v18124_v16  ;;  %v13247_v44 = vpop.f32.mrf.mxu2  ;;  %v18143_v22 = vld [vmem:[#allocation89_spill] sm:$0xff] }
 0x4a2   :  { %5666 = vmatpush.msrb.mxu0 %v18125_v25  ;;  %5737 = vmatpush.msrb.mxu1 %v12875_v40  ;;  %v18133_v25 = vld [vmem:[#allocation82_spill] sm:$0xff]  ;;  %v18154_v34 = vld [vmem:[#allocation101_spill] sm:$0xff] }
 0x4a3   :  { %4088 = vmatpush.msrb.mxu2 %v18126_v24  ;;  %4149 = vmatpush.msrb.mxu3 %v18127_v0  ;;  %v18134_v0 = vld [vmem:[#allocation120_spill] sm:$0xff]  ;;  %v18141_v24 = vand.u32 4294901760, %v12994_v5 }
 0x4a4   :  { %5670 = vmatpush.msrb.mxu0 %v18128_v53  ;;  %5739 = vmatpush.msrb.mxu1 %v12894_v18  ;;  %v18135_v53 = vand.u32 4294901760, %v12966_v26 }
 0x4a5   :  { %4091 = vmatpush.msrb.mxu2 %v18129_v27  ;;  %4151 = vmatpush.msrb.mxu3 %v18130_v39  ;;  %v18136_v27 = vld [vmem:[#allocation116_spill] sm:$0xff]  ;;  %v18137_v39 = vld [vmem:[#allocation86_spill] sm:$0xff] }
 0x4a6   :  { %5674 = vmatpush.msrb.mxu0 %v18131_v20  ;;  %5741 = vmatpush.msrb.mxu1 %v12914_v33  ;;  %v18138_v20 = vld [vmem:[#allocation122_spill] sm:$0xff]  ;;  %v18196_v33 = vld [vmem:[#allocation81_spill] sm:$0xff] }
 0x4a7   :  { %4094 = vmatpush.msrb.mxu2 %v18132_v56  ;;  %4153 = vmatpush.msrb.mxu3 %v18134_v0  ;;  %v18140_v56 = vld [vmem:[#allocation78_spill] sm:$0xff]  ;;  %v18142_v0 = vand.u32 4294901760, %v18133_v25  ;;  %v13272_v26 = vpop.f32.mrf.mxu3 }
 0x4a8   :  { %5678 = vmatpush.msrb.mxu0 %v18135_v53  ;;  %5743 = vmatpush.msrb.mxu1 %v12933_v57 }
 0x4a9   :  { %4097 = vmatpush.msrb.mxu2 %v18136_v27  ;;  %4155 = vmatpush.msrb.mxu3 %v18138_v20  ;;  %v4341_v53 = vsub.f32 %v18133_v25, %v18142_v0  ;;  %v18144_v27 = vld [vmem:[#allocation119_spill] sm:$0xff]  ;;  %v18146_v20 = vand.u32 4294901760, %v13013_v54  ;;  %v18149_v0 = vld [vmem:[#allocation121_spill] sm:$0xff]  ;;  %v13292_v38 = vpop.f32.mrf.mxu2 }
 0x4aa   :  { %5450 = vmatmul.f32.gmra.mxu0 %v18139_v51  ;;  %5555 = vmatmul.f32.gmra.mxu1 %v18140_v56  ;;  %v18147_v51 = vand.u32 4294901760, %v18137_v39 }
 0x4ab   :  { %5682 = vmatpush.msrb.mxu0 %v18141_v24  ;;  %5745 = vmatpush.msrb.mxu1 %v12957_v32  ;;  %v18148_v24 = vld [vmem:[#allocation96_spill] sm:$0xff] }
 0x4ac   :  { %4100 = vmatpush.msrb.mxu2 %v18144_v27  ;;  %4157 = vmatpush.msrb.mxu3 %v18145_v23  ;;  %v4347_v5 = vsub.f32 %v18137_v39, %v18147_v51  ;;  %v18151_v27 = vand.u32 4294901760, %v13029_v61  ;;  %v4342_v23 = vand.u32 4294901760, %v4341_v53  ;;  %v18153_v51 = vld [vmem:[#allocation124_spill] sm:$0xff]  ;;  %v18157_v61 = vand.u32 4294901760, %v18148_v24 }
 0x4ad   :  { %5686 = vmatpush.msrb.mxu0 %v18146_v20  ;;  %5747 = vmatpush.msrb.mxu1 %v12976_v21  ;;  %v18152_v20 = vand.u32 4294901760, %v18143_v22  ;;  %v18155_v32 = vld [vmem:[#allocation132_spill] sm:$0xff]  ;;  %v18161_v21 = vand.u32 4294901760, %v13062_v10 }
 0x4ae   :  { %4103 = vmatpush.msrb.mxu2 %v18149_v0  ;;  %4159 = vmatpush.msrb.mxu3 %v18150_v45  ;;  %v18156_v0 = vand.u32 4294901760, %v13046_v2  ;;  %v4348_v45 = vand.u32 4294901760, %v4347_v5  ;;  %v4359_v53 = vsub.f32 %v18148_v24, %v18157_v61  ;;  %v18162_v5 = vand.u32 4294901760, %v18154_v34 }
 0x4af   :  { %5690 = vmatpush.msrb.mxu0 %v18151_v27  ;;  %v4353_v54 = vsub.f32 %v18143_v22, %v18152_v20  ;;  %5749 = vmatpush.msrb.mxu1 %v12996_v7  ;;  %v18158_v27 = vld [vmem:[#allocation27_spill] sm:$0xff]  ;;  %v18159_v20 = vld [vmem:[#allocation110_spill] sm:$0xff] }
 0x4b0   :  { %4106 = vmatpush.msrb.mxu2 %v18153_v51  ;;  %4161 = vmatpush.msrb.mxu3 %v18155_v32  ;;  %v18160_v51 = vld [vmem:[#allocation127_spill] sm:$0xff]  ;;  %v4365_v61 = vsub.f32 %v18154_v34, %v18162_v5  ;;  %v4360_v7 = vand.u32 4294901760, %v4359_v53  ;;  %v18169_v5 = vand.u32 4294901760, %v13093_v62  ;;  %v18183_v62 = vand.u32 4294901760, %v13147_v31  ;;  %v2277_v31 = vld [vmem:[%s16470_s2 + $0x390] sm:$0xff] }
 0x4b1   :  { %5694 = vmatpush.msrb.mxu0 %v18156_v0  ;;  %5751 = vmatpush.msrb.mxu1 %v13015_v50  ;;  %v4354_v32 = vand.u32 4294901760, %v4353_v54  ;;  %v18163_v0 = vld [vmem:[#allocation143_spill] sm:$0xff]  ;;  %v18166_v54 = vand.u32 4294901760, %v18159_v20  ;;  %v13390_v40 = vand.u32 4294901760, %v2277_v31 }
 0x4b2   :  { %4165 = vmatmul.f32.vlgmr.msrb.gmra.mxu3 %v18158_v27  ;;  %4109 = vmatpush.msrb.mxu2 %v18160_v51  ;;  %v16996_v2 = vand.u32 4294901760, %v18163_v0  ;;  %v18164_v27 = vld [vmem:[#allocation131_spill] sm:$0xff]  ;;  %v18167_v51 = vld [vmem:[#allocation144_spill] sm:$0xff] }
 0x4b3   :  { %4343 = vmatpush.msra.mxu3 %v4342_v23  ;;  %5698 = vmatpush.msrb.mxu0 %v18161_v21  ;;  %v18165_v23 = vand.u32 4294901760, %v13075_v41  ;;  %v4371_v21 = vsub.f32 %v18159_v20, %v18166_v54  ;;  %v17000_v10 = vand.u32 4294901760, %v18167_v51  ;;  %v13318_v41 = vpop.f32.mrf.mxu3  ;;  %v18172_v54 = vld [vmem:[#allocation136_spill] sm:$0xff]  ;;  %18199 = vst [vmem:[#allocation97_spill] sm:$0xff] %v13390_v40 }
 0x4b4   :  { %5753 = vmatpush.msrb.mxu1 %v13031_v9  ;;  %4112 = vmatpush.msrb.mxu2 %v18164_v27  ;;  %v18168_v9 = vld [vmem:[#allocation134_spill] sm:$0xff]  ;;  %v4377_v53 = vsub.f32 %v18163_v0, %v16996_v2  ;;  %v18170_v27 = vld [vmem:[#allocation25_spill] sm:$0xff]  ;;  %18171 = vst [vmem:[#allocation91_spill] sm:$0xff] %v13318_v41  ;;  %v18175_v2 = vld [vmem:[#allocation83_spill] sm:$0xff] }
 0x4b5   :  { %4349 = vmatpush.msra.mxu3 %v4348_v45  ;;  %5702 = vmatpush.msrb.mxu0 %v18165_v23  ;;  %v4366_v45 = vand.u32 4294901760, %v4365_v61  ;;  %v4383_v61 = vsub.f32 %v18167_v51, %v17000_v10  ;;  %v18176_v23 = vld [vmem:[#allocation76_spill] sm:$0xff]  ;;  %v18179_v10 = vand.u32 4294901760, %v13132_v37  ;;  %v18184_v37 = vld [vmem:[#allocation85_spill] sm:$0xff] }
 0x4b6   :  { %5755 = vmatpush.msrb.mxu1 %v13048_v43  ;;  %4115 = vmatpush.msrb.mxu2 %v18168_v9  ;;  %v4372_v9 = vand.u32 4294901760, %v4371_v21 }
 0x4b7   :  { %4355 = vmatpush.msra.mxu3 %v4354_v32  ;;  %5706 = vmatpush.msrb.mxu0 %v18169_v5  ;;  %v18173_v32 = vand.u32 4294901760, %v13109_v35  ;;  %v18174_v5 = vld [vmem:[#allocation16_spill] sm:$0xff]  ;;  %v18178_v35 = vld [vmem:[#allocation31_spill] sm:$0xff] }
 0x4b8   :  { %5757 = vmatpush.msrb.mxu1 %v13064_v48  ;;  %4118 = vmatpush.msrb.mxu2 %v18172_v54  ;;  %v4378_v54 = vand.u32 4294901760, %v4377_v53  ;;  %v18187_v48 = vld [vmem:[#allocation149_spill] sm:$0xff] }
 0x4b9   :  { %4361 = vmatpush.msra.mxu3 %v4360_v7  ;;  %5710 = vmatpush.msrb.mxu0 %v18173_v32  ;;  %v2289_v7 = vld [vmem:[%s16470_s2 + $0x3f0] sm:$0xff]  ;;  %v18177_v32 = vand.u32 4294901760, %v18170_v27 }
 0x4ba   :  { %5759 = vmatpush.msrb.mxu1 %v13077_v42  ;;  %4121 = vmatmul.f32.vlgmr.msrb.gmra.mxu2 %v18174_v5  ;;  %v13337_v42 = vpop.f32.mrf.mxu2  ;;  %v18180_v5 = vld [vmem:[#allocation80_spill] sm:$0xff]  ;;  %v13346_v53 = vand.u32 4294901760, %v2289_v7 }
 0x4bb   :  { %4171 = vmatmul.f32.gmra.mxu3 %v18175_v2  ;;  %4290 = vmatpush.msra.mxu2 %v18176_v23  ;;  %v4389_v21 = vsub.f32 %v18170_v27, %v18177_v32  ;;  %v2285_v2 = vld [vmem:[%s16470_s2 + $0x3d0] sm:$0xff]  ;;  %v18182_v32 = vld [vmem:[#allocation147_spill] sm:$0xff]  ;;  %v13378_v57 = vpop.f32.mrf.mxu3 }
 0x4bc   :  { %4367 = vmatpush.msra.mxu3 %v4366_v45  ;;  %5714 = vmatpush.msrb.mxu0 %v18179_v10  ;;  %v4384_v45 = vand.u32 4294901760, %v4383_v61  ;;  %18181 = vst [vmem:[#allocation93_spill] sm:$0xff] %v13346_v53  ;;  %v2281_v10 = vld [vmem:[%s16470_s2 + $0x3b0] sm:$0xff]  ;;  %v13359_v43 = vand.u32 4294901760, %v2285_v2 }
 0x4bd   :  { %5761 = vmatpush.msrb.mxu1 %v13100_v47  ;;  %4292 = vmatpush.msra.mxu2 %v18180_v5  ;;  %v4390_v47 = vand.u32 4294901760, %v4389_v21  ;;  %v18191_v21 = vand.u32 4294901760, %v18182_v32  ;;  %v13375_v50 = vand.u32 4294901760, %v2281_v10  ;;  %18194 = vst [vmem:[#allocation94_spill] sm:$0xff] %v13378_v57 }
 0x4be   :  { %4373 = vmatpush.msra.mxu3 %v4372_v9  ;;  %5718 = vmatpush.msrb.mxu0 %v18183_v62  ;;  %v18185_v9 = vand.u32 4294901760, %v18178_v35  ;;  %18186 = vst [vmem:[#allocation95_spill] sm:$0xff] %v13359_v43  ;;  %v18188_v62 = vand.u32 4294901760, %v13160_v1  ;;  %v18193_v1 = vld [vmem:[#allocation13_spill] sm:$0xff] }
 0x4bf   :  { %5763 = vmatpush.msrb.mxu1 %v13116_v17  ;;  %4294 = vmatpush.msra.mxu2 %v18184_v37  ;;  %v18189_v17 = vld [vmem:[#allocation87_spill] sm:$0xff]  ;;  %18192 = vst [vmem:[#allocation100_spill] sm:$0xff] %v13375_v50 }
 0x4c0   :  { %4379 = vmatpush.msra.mxu3 %v4378_v54  ;;  %v4395_v61 = vsub.f32 %v18178_v35, %v18185_v9  ;;  %5722 = vmatpush.msrb.mxu0 %v18188_v62  ;;  %v13370_v54 = vsub.f32 %v2289_v7, %v13346_v53  ;;  %v4401_v9 = vsub.f32 %v18182_v32, %v18191_v21  ;;  %v18198_v21 = vand.u32 4294901760, %v18187_v48  ;;  %v2273_v62 = vld [vmem:[%s16470_s2 + $0x370] sm:$0xff] }
 0x4c1   :  { %5765 = vmatpush.msrb.mxu1 %v13134_v46  ;;  %4296 = vmatpush.msra.mxu2 %v18189_v17  ;;  %v18195_v46 = vand.u32 4294901760, %v13171_v29 }
 0x4c2   :  { %4385 = vmatpush.msra.mxu3 %v4384_v45  ;;  %18190 = vst [vmem:[#allocation90_spill] sm:$0xff] %v13370_v54  ;;  %4126 = vmatmul.f32.gmra.mxu2 %v18196_v33  ;;  %v4396_v7 = vand.u32 4294901760, %v4395_v61  ;;  %v13385_v45 = vsub.f32 %v2285_v2, %v13359_v43  ;;  %v4407_v18 = vsub.f32 %v18187_v48, %v18198_v21  ;;  %v18201_v33 = vld [vmem:[#allocation14_spill] sm:$0xff]  ;;  %v4402_v2 = vand.u32 4294901760, %v4401_v9  ;;  %v13409_v3 = vpop.f32.mrf.mxu2  ;;  %v18207_v9 = vld [vmem:[#allocation44_spill] sm:$0xff] }
 0x4c3   :  { %5726 = vmatpush.msrb.mxu0 %v18195_v46  ;;  %5767 = vmatpush.msrb.mxu1 %v13149_v55  ;;  %v18200_v46 = vld [vmem:[#allocation92_spill] sm:$0xff]  ;;  %v13401_v61 = vsub.f32 %v2281_v10, %v13375_v50  ;;  %v18203_v21 = vand.u32 4294901760, %v18193_v1  ;;  %v2269_v55 = vld [vmem:[%s16470_s2 + $0x350] sm:$0xff]  ;;  %18204 = vst [vmem:[#allocation99_spill] sm:$0xff] %v13409_v3  ;;  %v18210_v6 = vand.u32 4294901760, %v18201_v33 }
 0x4c4   :  { %4391 = vmatpush.msra.mxu3 %v4390_v47  ;;  %18197 = vst [vmem:[#allocation102_spill] sm:$0xff] %v13385_v45  ;;  %4298 = vmatpush.msra.mxu2 %v18200_v46  ;;  %v18205_v47 = vld [vmem:[#allocation98_spill] sm:$0xff]  ;;  %v4408_v10 = vand.u32 4294901760, %v4407_v18  ;;  %v2233_v3 = vld [vmem:[%s16470_s2 + $0x230] sm:$0xff] }
 0x4c5   :  { %5728 = vmatmul.f32.vlgmr.msrb.gmra.mxu0 %v18124_v16  ;;  %5769 = vmatmul.f32.vlgmr.msrb.gmra.mxu1 %v18124_v16  ;;  %18202 = vst [vmem:[#allocation105_spill] sm:$0xff] %v13401_v61  ;;  %v4413_v29 = vsub.f32 %v18193_v1, %v18203_v21  ;;  %v13413_v16 = vand.u32 4294901760, %v2273_v62  ;;  %v13418_v21 = vsub.f32 %v2277_v31, %v13390_v40  ;;  %v2261_v31 = vld [vmem:[%s16470_s2 + $0x310] sm:$0xff] }
 0x4c6   :  { %5933 = vmatpush.msra.mxu0 %v13370_v54  ;;  %5991 = vmatpush.msra.mxu1 %v13346_v53  ;;  %v18209_v53 = vld [vmem:[#allocation107_spill] sm:$0xff]  ;;  %v4419_v8 = vsub.f32 %v18201_v33, %v18210_v6  ;;  %v13428_v54 = vand.u32 4294901760, %v2269_v55  ;;  %v18215_v6 = vand.u32 4294901760, %v18207_v9 }
 0x4c7   :  { %4300 = vmatpush.msra.mxu2 %v18205_v47  ;;  %18206 = vst [vmem:[#allocation109_spill] sm:$0xff] %v13413_v16  ;;  %4397 = vmatpush.msra.mxu3 %v4396_v7  ;;  %v18212_v7 = vld [vmem:[#allocation158_spill] sm:$0xff]  ;;  %v4414_v18 = vand.u32 4294901760, %v4413_v29  ;;  %v13438_v14 = vsub.f32 %v2273_v62, %v13413_v16  ;;  %v13446_v29 = vpop.f32.mrf.mxu3 }
 0x4c8   :  { %5936 = vmatpush.msra.mxu0 %v13385_v45  ;;  %18208 = vst [vmem:[#allocation112_spill] sm:$0xff] %v13418_v21  ;;  %5993 = vmatpush.msra.mxu1 %v13359_v43  ;;  %v18213_v43 = vld [vmem:[#allocation142_spill] sm:$0xff]  ;;  %v4425_v28 = vsub.f32 %v18207_v9, %v18215_v6  ;;  %v13443_v45 = vand.u32 4294901760, %v2265_v36  ;;  %v18220_v62 = vand.u32 4294901760, %v18212_v7  ;;  %v13456_v6 = vand.u32 4294901760, %v2261_v31 }
 0x4c9   :  { %4302 = vmatpush.msra.mxu2 %v18209_v53  ;;  %18211 = vst [vmem:[#allocation104_spill] sm:$0xff] %v13428_v54  ;;  %4403 = vmatpush.msra.mxu3 %v4402_v2  ;;  %v18218_v2 = vld [vmem:[#allocation23_spill] sm:$0xff] }
 0x4ca   :  { %5939 = vmatpush.msra.mxu0 %v13401_v61  ;;  %5995 = vmatpush.msra.mxu1 %v13375_v50  ;;  %18214 = vst [vmem:[#allocation108_spill] sm:$0xff] %v13438_v14  ;;  %v4420_v50 = vand.u32 4294901760, %v4419_v8  ;;  %v13451_v61 = vsub.f32 %v2269_v55, %v13428_v54  ;;  %v4431_v63 = vsub.f32 %v18212_v7, %v18220_v62  ;;  %v4426_v8 = vand.u32 4294901760, %v4425_v28  ;;  %v2253_v62 = vld [vmem:[%s16470_s2 + $0x2d0] sm:$0xff] }
 0x4cb   :  { %4304 = vmatpush.msra.mxu2 %v18213_v43  ;;  %18216 = vst [vmem:[#allocation114_spill] sm:$0xff] %v13443_v45  ;;  %4409 = vmatpush.msra.mxu3 %v4408_v10  ;;  %v2257_v10 = vld [vmem:[%s16470_s2 + $0x2f0] sm:$0xff]  ;;  %v13467_v55 = vsub.f32 %v2265_v36, %v13443_v45 }
 0x4cc   :  { %5942 = vmatpush.msra.mxu0 %v13418_v21  ;;  %18217 = vst [vmem:[#allocation111_spill] sm:$0xff] %v13446_v29  ;;  %5997 = vmatpush.msra.mxu1 %v13390_v40  ;;  %v13462_v40 = vpop.f32.mrf.mxu2  ;;  %v18224_v21 = vld [vmem:[#allocation20_spill] sm:$0xff]  ;;  %v2249_v28 = vld [vmem:[%s16470_s2 + $0x2b0] sm:$0xff] }
 0x4cd   :  { %4306 = vmatpush.msra.mxu2 %v18218_v2  ;;  %18219 = vst [vmem:[#allocation117_spill] sm:$0xff] %v13451_v61  ;;  %4415 = vmatpush.msra.mxu3 %v4414_v18  ;;  %v13474_v18 = vand.u32 4294901760, %v2257_v10  ;;  %v18227_v36 = vld [vmem:[#allocation145_spill] sm:$0xff] }
 0x4ce   :  { %18221 = vst [vmem:[#allocation113_spill] sm:$0xff] %v13456_v6  ;;  %5732 = vmatmul.f32.gmra.mxu0 %v18140_v56  ;;  %5773 = vmatmul.f32.gmra.mxu1 %v18140_v56  ;;  %v4432_v56 = vand.u32 4294901760, %v4431_v63  ;;  %v2245_v63 = vld [vmem:[%s16470_s2 + $0x290] sm:$0xff] }
 0x4cf   :  { %18222 = vst [vmem:[#allocation82_spill] sm:$0xff] %v13462_v40  ;;  %5945 = vmatpush.msra.mxu0 %v13438_v14  ;;  %5999 = vmatpush.msra.mxu1 %v13413_v16  ;;  %v13478_v14 = vsub.f32 %v2261_v31, %v13456_v6  ;;  %v13485_v16 = vand.u32 4294901760, %v2253_v62  ;;  %v13494_v31 = vsub.f32 %v2257_v10, %v13474_v18  ;;  %v13509_v10 = vand.u32 4294901760, %v2245_v63  ;;  %v2241_v29 = vld [vmem:[%s16470_s2 + $0x270] sm:$0xff] }
 0x4d0   :  { %18223 = vst [vmem:[#allocation120_spill] sm:$0xff] %v13467_v55  ;;  %4308 = vmatpush.msra.mxu2 %v18224_v21  ;;  %4421 = vmatpush.msra.mxu3 %v4420_v50  ;;  %v18229_v50 = vld [vmem:[#allocation146_spill] sm:$0xff]  ;;  %v2345_v7 = vld [vmem:[%s16470_s2 + $0x5b0] sm:$0xff]  ;;  %v13570_v40 = vand.u32 4294901760, %v2233_v3 }
 0x4d1   :  { %18225 = vst [vmem:[#allocation116_spill] sm:$0xff] %v13474_v18  ;;  %5948 = vmatpush.msra.mxu0 %v13451_v61  ;;  %6001 = vmatpush.msra.mxu1 %v13428_v54  ;;  %v13496_v61 = vand.u32 4294901760, %v2249_v28  ;;  %v2353_v54 = vld [vmem:[%s16470_s2 + $0x5f0] sm:$0xff] }
 0x4d2   :  { %18226 = vst [vmem:[#allocation86_spill] sm:$0xff] %v13478_v14  ;;  %4310 = vmatpush.msra.mxu2 %v18227_v36  ;;  %4427 = vmatpush.msra.mxu3 %v4426_v8  ;;  %v13501_v8 = vpop.f32.mrf.mxu3 }
 0x4d3   :  { %18228 = vst [vmem:[#allocation122_spill] sm:$0xff] %v13485_v16  ;;  %5951 = vmatpush.msra.mxu0 %v13467_v55  ;;  %6003 = vmatpush.msra.mxu1 %v13443_v45  ;;  %v18233_v55 = vld [vmem:[#allocation123_spill] sm:$0xff]  ;;  %v13507_v45 = vsub.f32 %v2253_v62, %v13485_v16  ;;  %v13524_v62 = vsub.f32 %v2249_v28, %v13496_v61 }
 0x4d4   :  { %4312 = vmatpush.msra.mxu2 %v18229_v50  ;;  %18230 = vst [vmem:[#allocation89_spill] sm:$0xff] %v13494_v31  ;;  %4433 = vmatpush.msra.mxu3 %v4432_v56  ;;  %v18236_v56 = vld [vmem:[#allocation28_spill] sm:$0xff]  ;;  %v13543_v28 = vsub.f32 %v2245_v63, %v13509_v10  ;;  %v2229_v63 = vld [vmem:[%s16470_s2 + $0x210] sm:$0xff] }
 0x4d5   :  { %18231 = vst [vmem:[#allocation119_spill] sm:$0xff] %v13496_v61  ;;  %5954 = vmatpush.msra.mxu0 %v13478_v14  ;;  %6005 = vmatpush.msra.mxu1 %v13456_v6  ;;  %v13519_v6 = vand.u32 4294901760, %v2353_v54  ;;  %v2237_v14 = vld [vmem:[%s16470_s2 + $0x250] sm:$0xff] }
 0x4d6   :  { %18232 = vst [vmem:[#allocation126_spill] sm:$0xff] %v13501_v8  ;;  %4435 = vmatmul.f32.vlgmr.msra.gmra.mxu3 %v18233_v55  ;;  %v2349_v8 = vld [vmem:[%s16470_s2 + $0x5d0] sm:$0xff]  ;;  %4314 = vmatpush.msra.mxu2 %v18236_v56  ;;  %v13553_v9 = vand.u32 4294901760, %v2237_v14 }
 0x4d7   :  { %18234 = vst [vmem:[#allocation96_spill] sm:$0xff] %v13507_v45  ;;  %4621 = vmatpush.msrb.mxu3 %v18176_v23  ;;  %5957 = vmatpush.msra.mxu0 %v13494_v31  ;;  %v13532_v23 = vpop.f32.mrf.mxu2  ;;  %v13536_v31 = vand.u32 4294901760, %v2241_v29 }
 0x4d8   :  { %18235 = vst [vmem:[#allocation121_spill] sm:$0xff] %v13509_v10  ;;  %6007 = vmatpush.msra.mxu1 %v13474_v18  ;;  %4316 = vmatpush.msra.mxu2 %v18239_v13  ;;  %v13538_v18 = vand.u32 4294901760, %v2349_v8  ;;  %v13587_v33 = vsub.f32 %v2237_v14, %v13553_v9 }
 0x4d9   :  { %18237 = vst [vmem:[#allocation129_spill] sm:$0xff] %v13524_v62  ;;  %4623 = vmatpush.msrb.mxu3 %v18180_v5  ;;  %5960 = vmatpush.msra.mxu0 %v13507_v45  ;;  %v2341_v5 = vld [vmem:[%s16470_s2 + $0x590] sm:$0xff]  ;;  %v13556_v45 = vsub.f32 %v2353_v54, %v13519_v6  ;;  %v13568_v19 = vsub.f32 %v2241_v29, %v13536_v31 }
 0x4da   :  { %18238 = vst [vmem:[#allocation124_spill] sm:$0xff] %v13532_v23  ;;  %6009 = vmatpush.msra.mxu1 %v13485_v16  ;;  %v18243_v23 = vld [vmem:[#allocation152_spill] sm:$0xff]  ;;  %v13558_v16 = vand.u32 4294901760, %v2345_v7  ;;  %v13573_v54 = vsub.f32 %v2349_v8, %v13538_v18  ;;  %v13575_v41 = vand.u32 4294901760, %v2341_v5  ;;  %v18254_v29 = vld [vmem:[#allocation137_spill] sm:$0xff]  ;;  %v13589_v8 = vand.u32 4294901760, %v2229_v63 }
 0x4db   :  { %18240 = vst [vmem:[#allocation101_spill] sm:$0xff] %v13536_v31  ;;  %4625 = vmatpush.msrb.mxu3 %v18184_v37  ;;  %4318 = vmatpush.msra.mxu2 %v18243_v23  ;;  %v18247_v37 = vld [vmem:[#allocation155_spill] sm:$0xff] }
 0x4dc   :  { %18241 = vst [vmem:[#allocation132_spill] sm:$0xff] %v13538_v18  ;;  %5963 = vmatpush.msra.mxu0 %v13524_v62  ;;  %6011 = vmatpush.msra.mxu1 %v13496_v61  ;;  %v2337_v61 = vld [vmem:[%s16470_s2 + $0x570] sm:$0xff]  ;;  %v13593_v57 = vsub.f32 %v2345_v7, %v13558_v16  ;;  %v13613_v7 = vsub.f32 %v2233_v3, %v13570_v40 }
 0x4dd   :  { %18242 = vst [vmem:[#allocation110_spill] sm:$0xff] %v13543_v28  ;;  %4627 = vmatpush.msrb.mxu3 %v18189_v17  ;;  %4320 = vmatpush.msra.mxu2 %v18247_v37  ;;  %v13582_v17 = vpop.f32.mrf.mxu3  ;;  %v18253_v62 = vld [vmem:[#allocation73_spill] sm:$0xff]  ;;  %v13606_v14 = vand.u32 4294901760, %v2337_v61  ;;  %v13631_v3 = vsub.f32 %v2229_v63, %v13589_v8 }
 0x4de   :  { %18244 = vst [vmem:[#allocation127_spill] sm:$0xff] %v13553_v9  ;;  %5966 = vmatpush.msra.mxu0 %v13543_v28  ;;  %6013 = vmatpush.msra.mxu1 %v13509_v10  ;;  %v2333_v10 = vld [vmem:[%s16470_s2 + $0x550] sm:$0xff]  ;;  %v18258_v28 = vand.u32 4294901760, %v18133_v25 }
 0x4df   :  { %18245 = vst [vmem:[#allocation143_spill] sm:$0xff] %v13556_v45  ;;  %4326 = vmatmul.f32.vlgmr.msra.gmra.mxu2 %v18253_v62  ;;  %4439 = vmatmul.f32.gmra.mxu3 %v18254_v29  ;;  %v13601_v62 = vld [vmem:[%s16471_s3] sm:$0xf]  ;;  %v13608_v30 = vpop.f32.mrf.mxu2  ;;  %v13617_v29 = vsub.f32 %v2341_v5, %v13575_v41  ;;  %v2329_v25 = vld [vmem:[%s16470_s2 + $0x530] sm:$0xff]  ;;  %v18265_v5 = vand.u32 4294901760, %v13556_v45 }
 0x4e0   :  { %18246 = vst [vmem:[#allocation131_spill] sm:$0xff] %v13558_v16  ;;  %4550 = vmatpush.msrb.mxu2 %v18258_v28  ;;  %4629 = vmatpush.msrb.mxu3 %v18200_v46  ;;  %v18262_v46 = vand.u32 4294901760, %v18137_v39  ;;  %v13625_v28 = vand.u32 4294901760, %v2333_v10  ;;  %v13646_v63 = vand.u32 4294901760, %v2329_v25 }
 0x4e1   :  { %18248 = vst [vmem:[#allocation144_spill] sm:$0xff] %v13568_v19  ;;  %5969 = vmatpush.msra.mxu0 %v13568_v19  ;;  %6015 = vmatpush.msra.mxu1 %v13536_v31  ;;  %v13644_v31 = vsub.f32 %v2337_v61, %v13606_v14 }
 0x4e2   :  { %18249 = vst [vmem:[#allocation134_spill] sm:$0xff] %v13570_v40  ;;  %4554 = vmatpush.msrb.mxu2 %v18262_v46  ;;  %4631 = vmatpush.msrb.mxu3 %v18205_v47  ;;  %v2325_v47 = vld [vmem:[%s16470_s2 + $0x510] sm:$0xff]  ;;  %v18266_v46 = vand.u32 4294901760, %v18143_v22  ;;  %v13661_v61 = vsub.f32 %v2333_v10, %v13625_v28 }
 0x4e3   :  { %18250 = vst [vmem:[#allocation25_spill] sm:$0xff] %v13573_v54  ;;  %5972 = vmatpush.msra.mxu0 %v13587_v33  ;;  %6017 = vmatpush.msra.mxu1 %v13553_v9  ;;  %v2321_v22 = vld [vmem:[%s16470_s2 + $0x4f0] sm:$0xff] }
 0x4e4   :  { %18251 = vst [vmem:[#allocation136_spill] sm:$0xff] %v13575_v41  ;;  %4558 = vmatpush.msrb.mxu2 %v18266_v46  ;;  %4633 = vmatpush.msrb.mxu3 %v18209_v53  ;;  %v18270_v53 = vand.u32 4294901760, %v18148_v24  ;;  %v13663_v46 = vand.u32 4294901760, %v2325_v47  ;;  %v18274_v24 = vand.u32 4294901760, %v13593_v57  ;;  %v2317_v10 = vld [vmem:[%s16470_s2 + $0x4d0] sm:$0xff] }
 0x4e5   :  { %18252 = vst [vmem:[#allocation76_spill] sm:$0xff] %v13582_v17  ;;  %v6201_v17 = vsub.f32 %v13556_v45, %v18265_v5  ;;  %5975 = vmatpush.msra.mxu0 %v13613_v7  ;;  %6019 = vmatpush.msra.mxu1 %v13570_v40  ;;  %v18269_v5 = vand.u32 4294901760, %v13573_v54  ;;  %v18273_v40 = vperm.slane %v13601_v62, 0 }
 0x4e6   :  { %18255 = vst [vmem:[#allocation31_spill] sm:$0xff] %v13587_v33  ;;  %4562 = vmatpush.msrb.mxu2 %v18270_v53  ;;  %4635 = vmatpush.msrb.mxu3 %v18213_v43  ;;  %v6213_v43 = vsub.f32 %v13593_v57, %v18274_v24  ;;  %v18275_v53 = vld [vmem:[#allocation72_spill] sm:$0xff]  ;;  %v18280_v33 = vand.u32 4294901760, %v13617_v29 }
 0x4e7   :  { %18256 = vst [vmem:[#allocation80_spill] sm:$0xff] %v13589_v8  ;;  %v6207_v39 = vsub.f32 %v13573_v54, %v18269_v5  ;;  %v2468_v5 = vadd.f32 %v13082_v4, %v18273_v40  ;;  %5978 = vmatpush.msra.mxu0 %v13631_v3  ;;  %6021 = vmatpush.msra.mxu1 %v13589_v8  ;;  %v6202_v9 = vand.u32 4294901760, %v6201_v17  ;;  %v18278_v17 = vand.u32 4294901760, %v18154_v34  ;;  %v18279_v8 = vld [vmem:[#allocation128_spill] sm:$0xff]  ;;  %v18281_v40 = vld [vmem:[#allocation133_spill] sm:$0xff] }
 0x4e8   :  { %18257 = vst [vmem:[#allocation147_spill] sm:$0xff] %v13593_v57  ;;  %4334 = vmatmul.f32.gmra.mxu2 %v18275_v53  ;;  %4637 = vmatpush.msrb.mxu3 %v18218_v2  ;;  %v13682_v4 = vsub.f32 %v2329_v25, %v13646_v63  ;;  %v6219_v19 = vsub.f32 %v13617_v29, %v18280_v33  ;;  %v2313_v2 = vld [vmem:[%s16470_s2 + $0x4b0] sm:$0xff]  ;;  %v18284_v33 = vand.u32 4294901760, %v18159_v20  ;;  %v6214_v53 = vand.u32 4294901760, %v6213_v43 }
 0x4e9   :  { %18259 = vst [vmem:[#allocation85_spill] sm:$0xff] %v13606_v14  ;;  %4566 = vmatpush.msrb.mxu2 %v18278_v17  ;;  %5981 = vmatmul.f32.vlgmr.msra.gmra.mxu0 %v18279_v8  ;;  %v6208_v24 = vand.u32 4294901760, %v6207_v39  ;;  %v13699_v34 = vsub.f32 %v2325_v47, %v13663_v46  ;;  %v13701_v17 = vand.u32 4294901760, %v2317_v10  ;;  %v2577_v39 = vadd.f32 %v13127_v59, %v2468_v5  ;;  %v13704_v8 = vpop.f32.mrf.mxu2 }
 0x4ea   :  { %18260 = vst [vmem:[#allocation149_spill] sm:$0xff] %v13613_v7  ;;  %v13668_v7 = vpop.f32.mrf.mxu3  ;;  %6025 = vmatmul.f32.vlgmr.msra.gmra.mxu1 %v18281_v40  ;;  %6150 = vmatpush.msrb.mxu0 %v13519_v6  ;;  %v2309_v40 = vld [vmem:[%s16470_s2 + $0x490] sm:$0xff]  ;;  %v18285_v47 = vand.u32 4294901760, %v13644_v31  ;;  %v13720_v20 = vand.u32 4294901760, %v2313_v2  ;;  %v18288_v43 = vand.u32 4294901760, %v18163_v0 }
 0x4eb   :  { %18261 = vst [vmem:[#allocation87_spill] sm:$0xff] %v13617_v29  ;;  %6203 = vmatpush.msrb.mxu1 %v6202_v9  ;;  %4570 = vmatpush.msrb.mxu2 %v18284_v33  ;;  %v2635_v5 = vadd.f32 %v13192_v15, %v2577_v39  ;;  %v18289_v33 = vand.u32 4294901760, %v13661_v61  ;;  %v13732_v59 = vsub.f32 %v2317_v10, %v13701_v17  ;;  %v2305_v15 = vld [vmem:[%s16470_s2 + $0x470] sm:$0xff] }
 0x4ec   :  { %18263 = vst [vmem:[#allocation13_spill] sm:$0xff] %v13625_v28  ;;  %4639 = vmatpush.msrb.mxu3 %v18224_v21  ;;  %6152 = vmatpush.msrb.mxu0 %v13538_v18  ;;  %v6225_v25 = vsub.f32 %v13644_v31, %v18285_v47  ;;  %v6220_v21 = vand.u32 4294901760, %v6219_v19  ;;  %v18292_v19 = vperm.slane %v13601_v62, 0 }
 0x4ed   :  { %18264 = vst [vmem:[#allocation92_spill] sm:$0xff] %v13631_v3  ;;  %v13684_v3 = vand.u32 4294901760, %v2321_v22  ;;  %6209 = vmatpush.msrb.mxu1 %v6208_v24  ;;  %4574 = vmatpush.msrb.mxu2 %v18288_v43  ;;  %v6231_v47 = vsub.f32 %v13661_v61, %v18289_v33  ;;  %v18294_v24 = vand.u32 4294901760, %v13682_v4  ;;  %v13751_v33 = vsub.f32 %v2313_v2, %v13720_v20 }
 0x4ee   :  { %18267 = vst [vmem:[#allocation98_spill] sm:$0xff] %v13644_v31  ;;  %4641 = vmatpush.msrb.mxu3 %v18227_v36  ;;  %6154 = vmatpush.msrb.mxu0 %v13558_v16  ;;  %v13734_v31 = vand.u32 4294901760, %v2309_v40  ;;  %v2476_v0 = vadd.f32 %v13142_v60, %v18292_v19  ;;  %v18293_v36 = vand.u32 4294901760, %v18167_v51  ;;  %v6226_v10 = vand.u32 4294901760, %v6225_v25  ;;  %v2301_v60 = vld [vmem:[%s16470_s2 + $0x450] sm:$0xff]  ;;  %v18298_v25 = vld [vmem:[#allocation139_spill] sm:$0xff] }
 0x4ef   :  { %18268 = vst [vmem:[#allocation107_spill] sm:$0xff] %v13646_v63  ;;  %v13718_v9 = vsub.f32 %v2321_v22, %v13684_v3  ;;  %v17097_v22 = vand.u32 4294901760, %v13699_v34  ;;  %6215 = vmatpush.msrb.mxu1 %v6214_v53  ;;  %v6237_v39 = vsub.f32 %v13682_v4, %v18294_v24  ;;  %v2679_v51 = vadd.f32 %v13211_v52, %v2635_v5 }
 0x4f0   :  { %18271 = vst [vmem:[#allocation142_spill] sm:$0xff] %v13661_v61  ;;  %4578 = vmatpush.msrb.mxu2 %v18293_v36  ;;  %4643 = vmatpush.msrb.mxu3 %v18229_v50  ;;  %v18296_v50 = vand.u32 4294901760, %v18170_v27  ;;  %v13761_v53 = vand.u32 4294901760, %v2305_v15  ;;  %v6232_v2 = vand.u32 4294901760, %v6231_v47  ;;  %v17105_v36 = vand.u32 4294901760, %v13732_v59  ;;  %v2297_v27 = vld [vmem:[%s16470_s2 + $0x430] sm:$0xff] }
 0x4f1   :  { %18272 = vst [vmem:[#allocation23_spill] sm:$0xff] %v13663_v46  ;;  %6156 = vmatpush.msrb.mxu0 %v13575_v41  ;;  %v17107_v43 = vand.u32 4294901760, %v13718_v9  ;;  %6221 = vmatpush.msrb.mxu1 %v6220_v21  ;;  %v6243_v19 = vsub.f32 %v13699_v34, %v17097_v22  ;;  %v13770_v52 = vsub.f32 %v2309_v40, %v13734_v31  ;;  %v13777_v21 = vpop.f32.mrf.mxu2  ;;  %v18300_v47 = vld [vmem:[#allocation141_spill] sm:$0xff]  ;;  %v13781_v24 = vand.u32 4294901760, %v2301_v60 }
 0x4f2   :  { %18276 = vst [vmem:[#allocation20_spill] sm:$0xff] %v13682_v4  ;;  %v13757_v62 = vpop.f32.mrf.mxu3  ;;  %4582 = vmatpush.msrb.mxu2 %v18296_v50  ;;  %4645 = vmatpush.msrb.mxu3 %v18236_v56  ;;  %v2581_v5 = vadd.f32 %v13174_v11, %v2476_v0  ;;  %v2754_v56 = vadd.f32 %v13247_v44, %v2679_v51  ;;  %v18302_v40 = vand.u32 4294901760, %v18178_v35  ;;  %v6238_v50 = vand.u32 4294901760, %v6237_v39  ;;  %v2293_v44 = vld [vmem:[%s16470_s2 + $0x410] sm:$0xff] }
 0x4f3   :  { %18277 = vst [vmem:[#allocation145_spill] sm:$0xff] %v13684_v3  ;;  %5986 = vmatmul.f32.gmra.mxu0 %v18298_v25  ;;  %6031 = vmatmul.f32.gmra.mxu1 %v18300_v47  ;;  %v6249_v22 = vsub.f32 %v13718_v9, %v17107_v43  ;;  %v17103_v11 = vand.u32 4294901760, %v13751_v33  ;;  %v13796_v35 = vsub.f32 %v2305_v15, %v13761_v53  ;;  %v18305_v39 = vand.u32 4294901760, %v18182_v32 }
 0x4f4   :  { %18282 = vst [vmem:[#allocation146_spill] sm:$0xff] %v13699_v34  ;;  %6158 = vmatpush.msrb.mxu0 %v13606_v14  ;;  %6227 = vmatpush.msrb.mxu1 %v6226_v10  ;;  %v2640_v0 = vadd.f32 %v13219_v12, %v2581_v5  ;;  %v13798_v10 = vand.u32 4294901760, %v2297_v27  ;;  %v6244_v51 = vand.u32 4294901760, %v6243_v19  ;;  %v17101_v12 = vand.u32 4294901760, %v13770_v52 }
 0x4f5   :  { %18283 = vst [vmem:[#allocation123_spill] sm:$0xff] %v13701_v17  ;;  %4586 = vmatpush.msrb.mxu2 %v18302_v40  ;;  %4647 = vmatpush.msrb.mxu3 %v18239_v13  ;;  %v6255_v40 = vsub.f32 %v13732_v59, %v17105_v36  ;;  %v2795_v13 = vadd.f32 %v13272_v26, %v2754_v56  ;;  %v18308_v32 = vand.u32 4294901760, %v18187_v48  ;;  %v6250_v19 = vand.u32 4294901760, %v6249_v22  ;;  %v18366_v36 = vld [vmem:[#allocation167_spill] sm:$0xff] }
 0x4f6   :  { %18286 = vst [vmem:[#allocation28_spill] sm:$0xff] %v13718_v9  ;;  %6160 = vmatpush.msrb.mxu0 %v13625_v28  ;;  %6233 = vmatpush.msrb.mxu1 %v6232_v2  ;;  %v13810_v15 = vsub.f32 %v2301_v60, %v13781_v24  ;;  %v13812_v2 = vand.u32 4294901760, %v2293_v44  ;;  %v6261_v5 = vsub.f32 %v13751_v33, %v17103_v11  ;;  %v17098_v60 = vand.u32 4294901760, %v13796_v35  ;;  %v18370_v11 = vld [vmem:[#allocation168_spill] sm:$0xff] }
 0x4f7   :  { %18287 = vst [vmem:[#allocation12_spill] sm:$0xff] %v13720_v20  ;;  %4590 = vmatpush.msrb.mxu2 %v18305_v39  ;;  %4649 = vmatpush.msrb.mxu3 %v18243_v23  ;;  %v2685_v26 = vadd.f32 %v13234_v49, %v2640_v0  ;;  %v2840_v23 = vadd.f32 %v13337_v42, %v2795_v13  ;;  %v6256_v22 = vand.u32 4294901760, %v6255_v40  ;;  %v18312_v39 = vld [vmem:[#allocation94_spill] sm:$0xff]  ;;  %v18313_v13 = vld [vmem:[#allocation148_spill] sm:$0xff] }
 0x4f8   :  { %18290 = vst [vmem:[#allocation152_spill] sm:$0xff] %v13732_v59  ;;  %6162 = vmatpush.msrb.mxu0 %v13646_v63  ;;  %6239 = vmatpush.msrb.mxu1 %v6238_v50  ;;  %v13827_v48 = vsub.f32 %v2297_v27, %v13798_v10  ;;  %v6267_v49 = vsub.f32 %v13770_v52, %v17101_v12  ;;  %v17100_v50 = vand.u32 4294901760, %v13810_v15  ;;  %v6262_v0 = vand.u32 4294901760, %v6261_v5 }
 0x4f9   :  { %18291 = vst [vmem:[#allocation155_spill] sm:$0xff] %v13734_v31  ;;  %4594 = vmatpush.msrb.mxu2 %v18308_v32  ;;  %4651 = vmatpush.msrb.mxu3 %v18247_v37  ;;  %v2758_v42 = vadd.f32 %v13292_v38, %v2685_v26  ;;  %v18310_v37 = vand.u32 4294901760, %v18193_v1  ;;  %v13839_v27 = vsub.f32 %v2293_v44, %v13812_v2  ;;  %v13843_v40 = vpop.f32.mrf.mxu2  ;;  %v18314_v38 = vld [vmem:[#allocation14_spill] sm:$0xff] }
 0x4fa   :  { %18295 = vst [vmem:[#allocation197_spill] sm:$0xff] %v13751_v33  ;;  %v13821_v56 = vpop.f32.mrf.mxu3  ;;  %6164 = vmatpush.msrb.mxu0 %v13663_v46  ;;  %6245 = vmatpush.msrb.mxu1 %v6244_v51  ;;  %v2949_v51 = vadd.f32 %v18312_v39, %v2840_v23  ;;  %v6273_v1 = vsub.f32 %v13796_v35, %v17098_v60  ;;  %v17099_v44 = vand.u32 4294901760, %v13827_v48  ;;  %v6268_v32 = vand.u32 4294901760, %v6267_v49  ;;  %v18317_v26 = vld [vmem:[#allocation82_spill] sm:$0xff]  ;;  %v18319_v39 = vld [vmem:[#allocation44_spill] sm:$0xff] }
 0x4fb   :  { %18297 = vst [vmem:[#allocation198_spill] sm:$0xff] %v13761_v53  ;;  %4653 = vmatmul.f32.vlgmr.msrb.gmra.mxu3 %v18233_v55  ;;  %4598 = vmatpush.msrb.mxu2 %v18310_v37  ;;  %v18318_v37 = vld [vmem:[#allocation151_spill] sm:$0xff]  ;;  %v18322_v60 = vld [vmem:[#allocation154_spill] sm:$0xff] }
 0x4fc   :  { %18299 = vst [vmem:[#allocation139_spill] sm:$0xff] %v13770_v52  ;;  %4875 = vmatpush.msra.mxu3 %v12245_v58  ;;  %6166 = vmatpush.msrb.mxu0 %v13684_v3  ;;  %v18315_v58 = vand.u32 4294901760, %v18314_v38  ;;  %v3007_v23 = vadd.f32 %v18317_v26, %v2949_v51  ;;  %v6279_v38 = vsub.f32 %v13810_v15, %v17100_v50  ;;  %v18332_v50 = vld [vmem:[#allocation124_spill] sm:$0xff] }
 0x4fd   :  { %18301 = vst [vmem:[#allocation141_spill] sm:$0xff] %v13781_v24  ;;  %6251 = vmatpush.msrb.mxu1 %v6250_v19  ;;  %v18316_v19 = vld [vmem:[#allocation91_spill] sm:$0xff]  ;;  %v6285_v26 = vsub.f32 %v13827_v48, %v17099_v44  ;;  %v18330_v44 = vld [vmem:[#allocation153_spill] sm:$0xff] }
 0x4fe   :  { %18303 = vst [vmem:[#allocation199_spill] sm:$0xff] %v13796_v35  ;;  %4877 = vmatpush.msra.mxu3 %v18313_v13  ;;  %4602 = vmatpush.msrb.mxu2 %v18315_v58  ;;  %v2799_v5 = vadd.f32 %v18316_v19, %v2758_v42  ;;  %v18320_v13 = vand.u32 4294901760, %v18319_v39  ;;  %v17102_v58 = vand.u32 4294901760, %v13839_v27  ;;  %v18323_v42 = vld [vmem:[#allocation158_spill] sm:$0xff]  ;;  %v6274_v19 = vand.u32 4294901760, %v6273_v1 }
 0x4ff   :  { %18304 = vst [vmem:[#allocation200_spill] sm:$0xff] %v13798_v10  ;;  %6168 = vmatpush.msrb.mxu0 %v13701_v17  ;;  %6257 = vmatpush.msrb.mxu1 %v6256_v22  ;;  %v18321_v22 = vld [vmem:[#allocation99_spill] sm:$0xff]  ;;  %v18324_v51 = vand.u32 4294901760, %v18323_v42 }
 0x500   :  { %18306 = vst [vmem:[#allocation201_spill] sm:$0xff] %v13810_v15  ;;  %4879 = vmatpush.msra.mxu3 %v18318_v37  ;;  %4606 = vmatpush.msrb.mxu2 %v18320_v13  ;;  %v2848_v49 = vadd.f32 %v18321_v22, %v2799_v5  ;;  %v18325_v37 = vld [vmem:[#allocation126_spill] sm:$0xff]  ;;  %v6291_v1 = vsub.f32 %v13839_v27, %v17102_v58  ;;  %v18328_v22 = vld [vmem:[#allocation21_spill] sm:$0xff]  ;;  %v18329_v42 = vld [vmem:[#allocation111_spill] sm:$0xff] }
 0x501   :  { %18307 = vst [vmem:[#allocation202_spill] sm:$0xff] %v13812_v2  ;;  %6170 = vmatpush.msrb.mxu0 %v13720_v20  ;;  %6263 = vmatpush.msrb.mxu1 %v6262_v0  ;;  %v3051_v39 = vadd.f32 %v18325_v37, %v3007_v23  ;;  %v18326_v0 = vld [vmem:[#allocation137_spill] sm:$0xff]  ;;  %v18327_v5 = vld [vmem:[#allocation150_spill] sm:$0xff]  ;;  %v3378_v23 = vpop.f32.mrf.mxu2  ;;  %v6286_v37 = vand.u32 4294901760, %v6285_v26  ;;  %v18337_v26 = vld [vmem:[#allocation76_spill] sm:$0xff] }
 0x502   :  { %18309 = vst [vmem:[#allocation203_spill] sm:$0xff] %v13827_v48  ;;  %4881 = vmatpush.msra.mxu3 %v18322_v60  ;;  %4610 = vmatpush.msrb.mxu2 %v18324_v51  ;;  %v13872_v13 = vpop.f32.mrf.mxu3  ;;  %v6280_v60 = vand.u32 4294901760, %v6279_v38  ;;  %v2953_v51 = vadd.f32 %v18329_v42, %v2848_v49  ;;  %v18331_v38 = vld [vmem:[#allocation18_spill] sm:$0xff]  ;;  %v18334_v49 = vld [vmem:[#allocation47_spill] sm:$0xff] }
 0x503   :  { %18311 = vst [vmem:[#allocation204_spill] sm:$0xff] %v13839_v27  ;;  %6172 = vmatpush.msrb.mxu0 %v13734_v31  ;;  %6269 = vmatpush.msrb.mxu1 %v6268_v32  ;;  %v3126_v32 = vadd.f32 %v13608_v30, %v3051_v39  ;;  %v18362_v58 = vld [vmem:[#allocation166_spill] sm:$0xff] }
 0x504   :  { %4612 = vmatmul.f32.vlgmr.msrb.gmra.mxu2 %v18233_v55  ;;  %4657 = vmatmul.f32.gmra.mxu3 %v18326_v0  ;;  %v3012_v12 = vadd.f32 %v18332_v50, %v2953_v51  ;;  %v18340_v51 = vld [vmem:[#allocation115_spill] sm:$0xff] }
 0x505   :  { %4817 = vmatpush.msra.mxu2 %v18327_v5  ;;  %4883 = vmatpush.msra.mxu3 %v18328_v22  ;;  %v6292_v5 = vand.u32 4294901760, %v6291_v1  ;;  %v18333_v22 = vld [vmem:[#allocation156_spill] sm:$0xff]  ;;  %v3167_v30 = vadd.f32 %v13668_v7, %v3126_v32  ;;  %v18339_v1 = vld [vmem:[#allocation29_spill] sm:$0xff]  ;;  %v18341_v32 = vld [vmem:[#allocation106_spill] sm:$0xff] }
 0x506   :  { %6174 = vmatpush.msrb.mxu0 %v13761_v53  ;;  %6275 = vmatpush.msrb.mxu1 %v6274_v19  ;;  %v18335_v19 = vld [vmem:[#allocation157_spill] sm:$0xff]  ;;  %v3057_v39 = vadd.f32 %v18337_v26, %v3012_v12  ;;  %v18342_v12 = vand.u32 4294901760, %v13556_v45  ;;  %v2234_v45 = vld [vmem:[%s16470_s2 + $0x238] sm:$0xff] }
 0x507   :  { %4820 = vmatpush.msra.mxu2 %v18330_v44  ;;  %4885 = vmatpush.msra.mxu3 %v18331_v38  ;;  %v18336_v44 = vld [vmem:[#allocation159_spill] sm:$0xff]  ;;  %v3212_v50 = vadd.f32 %v13777_v21, %v3167_v30  ;;  %v18343_v38 = vld [vmem:[#allocation26_spill] sm:$0xff]  ;;  %v18346_v30 = vld [vmem:[#allocation160_spill] sm:$0xff] }
 0x508   :  { %6176 = vmatpush.msrb.mxu0 %v13781_v24  ;;  %6281 = vmatpush.msrb.mxu1 %v6280_v60  ;;  %v18338_v60 = vld [vmem:[#allocation161_spill] sm:$0xff]  ;;  %v3130_v7 = vadd.f32 %v13704_v8, %v3057_v39  ;;  %v18345_v8 = vand.u32 4294901760, %v13573_v54  ;;  %v18349_v39 = vld [vmem:[#allocation22_spill] sm:$0xff] }
 0x509   :  { %4823 = vmatpush.msra.mxu2 %v18333_v22  ;;  %4887 = vmatpush.msra.mxu3 %v18334_v49  ;;  %v3321_v21 = vadd.f32 %v13821_v56, %v3212_v50  ;;  %v18348_v56 = vand.u32 4294901760, %v13593_v57  ;;  %v18350_v50 = vld [vmem:[#allocation50_spill] sm:$0xff] }
 0x50a   :  { %6178 = vmatpush.msrb.mxu0 %v13798_v10  ;;  %6287 = vmatpush.msrb.mxu1 %v6286_v37  ;;  %v3422_v42 = vpop.f32.mrf.mxu3  ;;  %v3383_v37 = vpop.f32.mrf.mxu2  ;;  %v3171_v22 = vadd.f32 %v13757_v62, %v3130_v7  ;;  %v18351_v62 = vld [vmem:[#allocation164_spill] sm:$0xff]  ;;  %v18465_v57 = vld [vmem:[#allocation138_spill] sm:$0xff] }
 0x50b   :  { %4826 = vmatpush.msra.mxu2 %v18335_v19  ;;  %4889 = vmatpush.msra.mxu3 %v18336_v44  ;;  %v3379_v49 = vadd.f32 %v3378_v23, %v3321_v21  ;;  %v3497_v19 = vpop.f32.mrf.mxu0  ;;  %v18347_v44 = vld [vmem:[#allocation163_spill] sm:$0xff]  ;;  %v18352_v23 = vand.u32 4294901760, %v13617_v29  ;;  %v18459_v29 = vld [vmem:[#allocation74_spill] sm:$0xff] }
 0x50c   :  { %6180 = vmatpush.msrb.mxu0 %v13812_v2  ;;  %6293 = vmatpush.msrb.mxu1 %v6292_v5  ;;  %v18344_v5 = vld [vmem:[#allocation162_spill] sm:$0xff]  ;;  %v3220_v26 = vadd.f32 %v13843_v40, %v3171_v22  ;;  %v18354_v21 = vld [vmem:[#allocation11_spill] sm:$0xff] }
 0x50d   :  { %4616 = vmatmul.f32.gmra.mxu2 %v18326_v0  ;;  %4891 = vmatpush.msra.mxu3 %v18338_v60  ;;  %v17104_v60 = vand.u32 4294901760, %v18350_v50  ;;  %v3423_v7 = vadd.f32 %v3422_v42, %v3379_v49  ;;  %v18355_v40 = vld [vmem:[#allocation6_spill] sm:$0xff]  ;;  %v18360_v49 = vld [vmem:[#allocation53_spill] sm:$0xff] }
 0x50e   :  { %4829 = vmatpush.msra.mxu2 %v18339_v1  ;;  %6186 = vmatmul.f32.vlgmr.msrb.gmra.mxu0 %v18340_v51  ;;  %v3325_v22 = vadd.f32 %v13872_v13, %v3220_v26  ;;  %v18363_v13 = vand.u32 4294901760, %v13661_v61 }
 0x50f   :  { %6295 = vmatmul.f32.vlgmr.msrb.gmra.mxu1 %v18341_v32  ;;  %6410 = vmatpush.msra.mxu0 %v18342_v12  ;;  %v18353_v12 = vld [vmem:[#allocation32_spill] sm:$0xff]  ;;  %v5085_v42 = vsub.f32 %v18350_v50, %v17104_v60  ;;  %v18365_v60 = vld [vmem:[#allocation17_spill] sm:$0xff] }
 0x510   :  { %6481 = vmatpush.msra.mxu1 %v13519_v6  ;;  %4832 = vmatpush.msra.mxu2 %v18343_v38  ;;  %v17106_v38 = vand.u32 4294901760, %v18354_v21 }
 0x511   :  { %4893 = vmatpush.msra.mxu3 %v18344_v5  ;;  %6414 = vmatpush.msra.mxu0 %v18345_v8  ;;  %v18356_v5 = vld [vmem:[#allocation35_spill] sm:$0xff]  ;;  %v3538_v8 = vpop.f32.mrf.mxu1 }
 0x512   :  { %6483 = vmatpush.msra.mxu1 %v13538_v18  ;;  %4835 = vmatpush.msra.mxu2 %v18346_v30  ;;  %v3428_v1 = vpop.f32.mrf.mxu3  ;;  %v3583_v30 = vpop.f32.mrf.mxu2  ;;  %v5091_v26 = vsub.f32 %v18354_v21, %v17106_v38 }
 0x513   :  { %4895 = vmatpush.msra.mxu3 %v18347_v44  ;;  %6418 = vmatpush.msra.mxu0 %v18348_v56  ;;  %v18357_v44 = vld [vmem:[#allocation118_spill] sm:$0xff] }
 0x514   :  { %6485 = vmatpush.msra.mxu1 %v13558_v16  ;;  %4838 = vmatpush.msra.mxu2 %v18349_v39  ;;  %v18358_v56 = vld [vmem:[#allocation98_spill] sm:$0xff] }
 0x515   :  { %4897 = vmatpush.msra.mxu3 %v18351_v62  ;;  %6422 = vmatpush.msra.mxu0 %v18352_v23  ;;  %v18359_v39 = vand.u32 4294901760, %v18358_v56  ;;  %v17108_v62 = vand.u32 4294901760, %v18360_v49  ;;  %v18361_v23 = vld [vmem:[#allocation30_spill] sm:$0xff] }
 0x516   :  { %6487 = vmatpush.msra.mxu1 %v13575_v41  ;;  %4841 = vmatpush.msra.mxu2 %v18353_v12  ;;  %v3384_v12 = vadd.f32 %v3383_v37, %v3325_v22  ;;  %v18367_v37 = vand.u32 4294901760, %v13682_v4  ;;  %v18368_v22 = vld [vmem:[#allocation165_spill] sm:$0xff] }
 0x517   :  { %4899 = vmatpush.msra.mxu3 %v18355_v40  ;;  %6194 = vmatmul.f32.gmra.mxu0 %v18356_v5  ;;  %v3498_v40 = vadd.f32 %v3497_v19, %v3423_v7  ;;  %v5086_v19 = vand.u32 4294901760, %v5085_v42  ;;  %v3501_v7 = vpop.f32.mrf.mxu0  ;;  %v5092_v42 = vand.u32 4294901760, %v5091_v26  ;;  %v18373_v5 = vld [vmem:[#allocation43_spill] sm:$0xff]  ;;  %v18378_v26 = vld [vmem:[#allocation42_spill] sm:$0xff] }
 0x518   :  { %6299 = vmatmul.f32.gmra.mxu1 %v18357_v44  ;;  %6426 = vmatpush.msra.mxu0 %v18359_v39  ;;  %v18364_v39 = vld [vmem:[#allocation8_spill] sm:$0xff]  ;;  %v3429_v38 = vadd.f32 %v3428_v1, %v3384_v12  ;;  %v18375_v1 = vld [vmem:[#allocation103_spill] sm:$0xff] }
 0x519   :  { %6489 = vmatpush.msra.mxu1 %v13606_v14  ;;  %4844 = vmatpush.msra.mxu2 %v18361_v23  ;;  %v18369_v23 = vld [vmem:[#allocation38_spill] sm:$0xff] }
 0x51a   :  { %4901 = vmatpush.msra.mxu3 %v18362_v58  ;;  %6430 = vmatpush.msra.mxu0 %v18363_v13  ;;  %v5097_v58 = vsub.f32 %v18360_v49, %v17108_v62  ;;  %v3692_v43 = vpop.f32.mrf.mxu3  ;;  %v18377_v12 = vand.u32 4294901760, %v18369_v23 }
 0x51b   :  { %6491 = vmatpush.msra.mxu1 %v13625_v28  ;;  %4847 = vmatpush.msra.mxu2 %v18365_v60  ;;  %v3539_v60 = vadd.f32 %v3538_v8, %v3498_v40 }
 0x51c   :  { %4903 = vmatpush.msra.mxu3 %v18366_v36  ;;  %6434 = vmatpush.msra.mxu0 %v18367_v37  ;;  %v18371_v36 = vand.u32 4294901760, %v13699_v34  ;;  %v18372_v37 = vand.u32 4294901760, %v18364_v39  ;;  %v5098_v8 = vand.u32 4294901760, %v5097_v58  ;;  %v5109_v40 = vsub.f32 %v18369_v23, %v18377_v12  ;;  %v3591_v34 = vpop.f32.mrf.mxu2 }
 0x51d   :  { %6493 = vmatpush.msra.mxu1 %v13646_v63  ;;  %4850 = vmatpush.msra.mxu2 %v18368_v22  ;;  %v18374_v22 = vld [vmem:[#allocation40_spill] sm:$0xff]  ;;  %v3584_v13 = vadd.f32 %v3583_v30, %v3539_v60  ;;  %v18379_v30 = vld [vmem:[#allocation10_spill] sm:$0xff]  ;;  %v18380_v58 = vand.u32 4294901760, %v13732_v59 }
 0x51e   :  { %4905 = vmatpush.msra.mxu3 %v18370_v11  ;;  %6438 = vmatpush.msra.mxu0 %v18371_v36  ;;  %v5103_v62 = vsub.f32 %v18364_v39, %v18372_v37  ;;  %v17112_v4 = vand.u32 4294901760, %v18374_v22  ;;  %v18376_v11 = vand.u32 4294901760, %v13718_v9  ;;  %v3542_v37 = vpop.f32.mrf.mxu1  ;;  %v18382_v36 = vld [vmem:[#allocation169_spill] sm:$0xff] }
 0x51f   :  { %6495 = vmatpush.msra.mxu1 %v13663_v46  ;;  %4909 = vmatmul.f32.vlgmr.msra.gmra.mxu3 %v18373_v5  ;;  %v3502_v5 = vadd.f32 %v3501_v7, %v3429_v38  ;;  %v3693_v12 = vadd.f32 %v3692_v43, %v3584_v13  ;;  %v3750_v38 = vpop.f32.mrf.mxu0  ;;  %v18383_v7 = vand.u32 4294901760, %v13751_v33  ;;  %v18387_v43 = vand.u32 4294901760, %v13770_v52  ;;  %v18389_v33 = vld [vmem:[#allocation7_spill] sm:$0xff]  ;;  %v2357_v46 = vld [vmem:[%s16470_s2 + $0x610] sm:$0xff] }
 0x520   :  { %5087 = vmatpush.msrb.mxu3 %v5086_v19  ;;  %4853 = vmatpush.msra.mxu2 %v18375_v1  ;;  %v5104_v19 = vand.u32 4294901760, %v5103_v62  ;;  %v5115_v60 = vsub.f32 %v18374_v22, %v17112_v4  ;;  %v18381_v1 = vld [vmem:[#allocation62_spill] sm:$0xff]  ;;  %v5110_v62 = vand.u32 4294901760, %v5109_v40  ;;  %v18397_v52 = vand.u32 4294901760, %v13810_v15 }
 0x521   :  { %6442 = vmatpush.msra.mxu0 %v18376_v11  ;;  %6497 = vmatpush.msra.mxu1 %v13684_v3  ;;  %v3543_v4 = vadd.f32 %v3542_v37, %v3502_v5  ;;  %v18386_v11 = vld [vmem:[#allocation48_spill] sm:$0xff]  ;;  %v3751_v5 = vadd.f32 %v3750_v38, %v3693_v12  ;;  %v2417_v37 = vld [vmem:[%s16470_s2 + $0x7f0] sm:$0xff] }
 0x522   :  { %5093 = vmatpush.msrb.mxu3 %v5092_v42  ;;  %4856 = vmatpush.msra.mxu2 %v18379_v30  ;;  %v18384_v42 = vand.u32 4294901760, %v18378_v26  ;;  %v5116_v13 = vand.u32 4294901760, %v5115_v60  ;;  %v2413_v38 = vld [vmem:[%s16470_s2 + $0x7d0] sm:$0xff] }
 0x523   :  { %6446 = vmatpush.msra.mxu0 %v18380_v58  ;;  %6499 = vmatpush.msra.mxu1 %v13701_v17  ;;  %v18385_v58 = vld [vmem:[#allocation65_spill] sm:$0xff] }
 0x524   :  { %5099 = vmatpush.msrb.mxu3 %v5098_v8  ;;  %4859 = vmatpush.msra.mxu2 %v18382_v36  ;;  %v5121_v30 = vsub.f32 %v18378_v26, %v18384_v42  ;;  %v17114_v59 = vand.u32 4294901760, %v18385_v58  ;;  %v18388_v8 = vand.u32 4294901760, %v18381_v1  ;;  %v3696_v36 = vpop.f32.mrf.mxu3  ;;  %v18390_v42 = vld [vmem:[#allocation15_spill] sm:$0xff]  ;;  %v3869_v12 = vpop.f32.mrf.mxu2 }
 0x525   :  { %6450 = vmatpush.msra.mxu0 %v18383_v7  ;;  %6501 = vmatpush.msra.mxu1 %v13720_v20  ;;  %v3592_v7 = vadd.f32 %v3591_v34, %v3543_v4  ;;  %v18393_v34 = vand.u32 4294901760, %v13796_v35  ;;  %v2409_v35 = vld [vmem:[%s16470_s2 + $0x7b0] sm:$0xff] }
 0x526   :  { %5105 = vmatpush.msrb.mxu3 %v5104_v19  ;;  %4862 = vmatpush.msra.mxu2 %v18386_v11  ;;  %v5127_v40 = vsub.f32 %v18381_v1, %v18388_v8  ;;  %v18391_v19 = vld [vmem:[#allocation49_spill] sm:$0xff]  ;;  %v5122_v11 = vand.u32 4294901760, %v5121_v30  ;;  %v5133_v60 = vsub.f32 %v18385_v58, %v17114_v59  ;;  %v3794_v4 = vpop.f32.mrf.mxu1  ;;  %v14014_v30 = vand.u32 4294901760, %v2417_v37 }
 0x527   :  { %6454 = vmatpush.msra.mxu0 %v18387_v43  ;;  %6503 = vmatpush.msra.mxu1 %v13734_v31  ;;  %v18392_v43 = vld [vmem:[#allocation67_spill] sm:$0xff]  ;;  %v18396_v59 = vld [vmem:[#allocation41_spill] sm:$0xff]  ;;  %v3697_v8 = vadd.f32 %v3696_v36, %v3592_v7  ;;  %v18409_v31 = vld [vmem:[#allocation36_spill] sm:$0xff] }
 0x528   :  { %4865 = vmatmul.f32.vlgmr.msra.gmra.mxu2 %v18389_v33  ;;  %4915 = vmatmul.f32.gmra.mxu3 %v18390_v42  ;;  %v18394_v42 = vld [vmem:[#allocation34_spill] sm:$0xff]  ;;  %18395 = vst [vmem:[#allocation94_spill] sm:$0xff] %v14014_v30  ;;  %v14027_v33 = vand.u32 4294901760, %v2413_v38  ;;  %v18401_v36 = vld [vmem:[#allocation77_spill] sm:$0xff]  ;;  %v18405_v15 = vand.u32 4294901760, %v18396_v59 }
 0x529   :  { %5034 = vmatpush.msrb.mxu2 %v18391_v19  ;;  %5111 = vmatpush.msrb.mxu3 %v5110_v62  ;;  %v5128_v62 = vand.u32 4294901760, %v5127_v40  ;;  %v18399_v40 = vand.u32 4294901760, %v18392_v43 }
 0x52a   :  { %6458 = vmatpush.msra.mxu0 %v18393_v34  ;;  %6505 = vmatpush.msra.mxu1 %v13761_v53  ;;  %v3795_v34 = vadd.f32 %v3794_v4, %v3751_v5  ;;  %v18398_v53 = vld [vmem:[#allocation51_spill] sm:$0xff]  ;;  %18400 = vst [vmem:[#allocation148_spill] sm:$0xff] %v14027_v33  ;;  %v2405_v4 = vld [vmem:[%s16470_s2 + $0x790] sm:$0xff]  ;;  %v5145_v7 = vsub.f32 %v18396_v59, %v18405_v15  ;;  %v18411_v15 = vand.u32 4294901760, %v18401_v36 }
 0x52b   :  { %5036 = vmatpush.msrb.mxu2 %v18394_v42  ;;  %5117 = vmatpush.msrb.mxu3 %v5116_v13  ;;  %v5134_v13 = vand.u32 4294901760, %v5133_v60  ;;  %v5139_v9 = vsub.f32 %v18392_v43, %v18399_v40  ;;  %v18403_v60 = vld [vmem:[#allocation9_spill] sm:$0xff]  ;;  %v14038_v40 = vsub.f32 %v2417_v37, %v14014_v30  ;;  %v14056_v17 = vand.u32 4294901760, %v2405_v4 }
 0x52c   :  { %6462 = vmatpush.msra.mxu0 %v18397_v52  ;;  %6507 = vmatpush.msra.mxu1 %v13781_v24  ;;  %v18402_v52 = vand.u32 4294901760, %v13827_v48  ;;  %v3870_v5 = vadd.f32 %v3869_v12, %v3795_v34  ;;  %v14043_v48 = vand.u32 4294901760, %v2409_v35  ;;  %v3910_v12 = vpop.f32.mrf.mxu3  ;;  %v18408_v34 = vand.u32 4294901760, %v13839_v27  ;;  %v18413_v27 = vld [vmem:[#allocation54_spill] sm:$0xff] }
 0x52d   :  { %5038 = vmatpush.msrb.mxu2 %v18398_v53  ;;  %5123 = vmatpush.msrb.mxu3 %v5122_v11  ;;  %v3755_v11 = vpop.f32.mrf.mxu0  ;;  %18404 = vst [vmem:[#allocation14_spill] sm:$0xff] %v14038_v40  ;;  %v5140_v37 = vand.u32 4294901760, %v5139_v9  ;;  %v5151_v20 = vsub.f32 %v18401_v36, %v18411_v15  ;;  %v18417_v9 = vld [vmem:[#allocation58_spill] sm:$0xff] }
 0x52e   :  { %6466 = vmatpush.msra.mxu0 %v18402_v52  ;;  %6509 = vmatpush.msra.mxu1 %v13798_v10  ;;  %18406 = vst [vmem:[#allocation91_spill] sm:$0xff] %v14043_v48  ;;  %v18407_v52 = vld [vmem:[#allocation60_spill] sm:$0xff]  ;;  %v3756_v24 = vadd.f32 %v3755_v11, %v3697_v8  ;;  %v3911_v10 = vadd.f32 %v3910_v12, %v3870_v5  ;;  %v2397_v5 = vld [vmem:[%s16470_s2 + $0x750] sm:$0xff]  ;;  %v3800_v12 = vpop.f32.mrf.mxu1 }
 0x52f   :  { %5040 = vmatpush.msrb.mxu2 %v18403_v60  ;;  %5129 = vmatpush.msrb.mxu3 %v5128_v62  ;;  %v14051_v62 = vsub.f32 %v2413_v38, %v14027_v33  ;;  %18412 = vst [vmem:[#allocation151_spill] sm:$0xff] %v14056_v17  ;;  %v18414_v8 = vld [vmem:[#allocation68_spill] sm:$0xff]  ;;  %v5146_v38 = vand.u32 4294901760, %v5145_v7  ;;  %v18416_v11 = vand.u32 4294901760, %v18407_v52  ;;  %v18419_v7 = vld [vmem:[#allocation171_spill] sm:$0xff]  ;;  %v14089_v56 = vand.u32 4294901760, %v2397_v5 }
 0x530   :  { %6470 = vmatpush.msra.mxu0 %v18408_v34  ;;  %6511 = vmatpush.msra.mxu1 %v13812_v2  ;;  %v2401_v34 = vld [vmem:[%s16470_s2 + $0x770] sm:$0xff]  ;;  %v3801_v61 = vadd.f32 %v3800_v12, %v3756_v24  ;;  %9512 = vtanh.f32 %v3911_v10 }
 0x531   :  { %4870 = vmatmul.f32.gmra.mxu2 %v18409_v31  ;;  %5135 = vmatpush.msrb.mxu3 %v5134_v13  ;;  %18410 = vst [vmem:[#allocation82_spill] sm:$0xff] %v14051_v62  ;;  %v14067_v13 = vsub.f32 %v2409_v35, %v14043_v48  ;;  %v5157_v15 = vsub.f32 %v18407_v52, %v18416_v11  ;;  %v3873_v31 = vpop.f32.mrf.mxu2  ;;  %v14077_v2 = vand.u32 4294901760, %v2401_v34  ;;  %v5152_v35 = vand.u32 4294901760, %v5151_v20  ;;  %v18424_v20 = vld [vmem:[#allocation174_spill] sm:$0xff] }
 0x532   :  { %5042 = vmatpush.msrb.mxu2 %v18413_v27  ;;  %6472 = vmatmul.f32.vlgmr.msra.gmra.mxu0 %v18341_v32  ;;  %v14082_v11 = vsub.f32 %v2405_v4, %v14056_v17  ;;  %18423 = vst [vmem:[#allocation158_spill] sm:$0xff] %v14089_v56  ;;  %v3874_v24 = vadd.f32 %v3873_v31, %v3801_v61  ;;  %v18425_v4 = vld [vmem:[#allocation61_spill] sm:$0xff] }
 0x533   :  { %6513 = vmatmul.f32.vlgmr.msra.gmra.mxu1 %v18341_v32  ;;  %6677 = vmatpush.msrb.mxu0 %v14038_v40  ;;  %18415 = vst [vmem:[#allocation44_spill] sm:$0xff] %v14067_v13  ;;  %v18421_v32 = vld [vmem:[#allocation59_spill] sm:$0xff]  ;;  %v5158_v10 = vand.u32 4294901760, %v5157_v15  ;;  %v14099_v12 = vsub.f32 %v2401_v34, %v14077_v2  ;;  %v2389_v40 = vld [vmem:[%s16470_s2 + $0x710] sm:$0xff]  ;;  %v14113_v15 = vsub.f32 %v2397_v5, %v14089_v56 }
 0x534   :  { %6735 = vmatpush.msrb.mxu1 %v14014_v30  ;;  %5044 = vmatpush.msrb.mxu2 %v18417_v9  ;;  %18418 = vst [vmem:[#allocation99_spill] sm:$0xff] %v14077_v2  ;;  %v18422_v30 = vand.u32 4294901760, %v18414_v8  ;;  %v3914_v61 = vpop.f32.mrf.mxu3  ;;  %v2381_v5 = vld [vmem:[%s16470_s2 + $0x6d0] sm:$0xff] }
 0x535   :  { %5141 = vmatpush.msrb.mxu3 %v5140_v37  ;;  %6680 = vmatpush.msrb.mxu0 %v14051_v62  ;;  %18420 = vst [vmem:[#allocation154_spill] sm:$0xff] %v14082_v11  ;;  %v2393_v37 = vld [vmem:[%s16470_s2 + $0x730] sm:$0xff]  ;;  %v18455_v62 = vld [vmem:[#allocation63_spill] sm:$0xff] }
 0x536   :  { %6737 = vmatpush.msrb.mxu1 %v14027_v33  ;;  %5046 = vmatpush.msrb.mxu2 %v18421_v32  ;;  %v5163_v51 = vsub.f32 %v18414_v8, %v18422_v30  ;;  %18426 = vst [vmem:[#allocation126_spill] sm:$0xff] %v14099_v12  ;;  %v18427_v30 = vand.u32 4294901760, %v18419_v7  ;;  %v14108_v31 = vand.u32 4294901760, %v2393_v37 }
 0x537   :  { %5147 = vmatpush.msrb.mxu3 %v5146_v38  ;;  %6683 = vmatpush.msrb.mxu0 %v14067_v13  ;;  %v18429_v38 = vld [vmem:[#allocation45_spill] sm:$0xff]  ;;  %18430 = vst [vmem:[#allocation21_spill] sm:$0xff] %v14113_v15  ;;  %v14122_v13 = vand.u32 4294901760, %v2389_v40 }
 0x538   :  { %6739 = vmatpush.msrb.mxu1 %v14043_v48  ;;  %5048 = vmatpush.msrb.mxu2 %v18425_v4  ;;  %v5169_v33 = vsub.f32 %v18419_v7, %v18427_v30  ;;  %18428 = vst [vmem:[#allocation150_spill] sm:$0xff] %v14108_v31  ;;  %v5164_v34 = vand.u32 4294901760, %v5163_v51  ;;  %v18431_v30 = vand.u32 4294901760, %v18424_v20 }
 0x539   :  { %5153 = vmatpush.msrb.mxu3 %v5152_v35  ;;  %6686 = vmatpush.msrb.mxu0 %v14082_v11  ;;  %v2385_v35 = vld [vmem:[%s16470_s2 + $0x6f0] sm:$0xff]  ;;  %v3915_v11 = vadd.f32 %v3914_v61, %v3874_v24  ;;  %18432 = vst [vmem:[#allocation111_spill] sm:$0xff] %v14122_v13  ;;  %v14134_v24 = vsub.f32 %v2393_v37, %v14108_v31 }
 0x53a   :  { %6741 = vmatpush.msrb.mxu1 %v14056_v17  ;;  %5050 = vmatpush.msrb.mxu2 %v18429_v38  ;;  %v5175_v48 = vsub.f32 %v18424_v20, %v18431_v30  ;;  %v14124_v17 = vpop.eup %9512  ;;  %v5170_v51 = vand.u32 4294901760, %v5169_v33  ;;  %v18434_v30 = vld [vmem:[#allocation46_spill] sm:$0xff]  ;;  %v14143_v33 = vsub.f32 %v2389_v40, %v14122_v13  ;;  %v2377_v37 = vld [vmem:[%s16470_s2 + $0x6b0] sm:$0xff] }
 0x53b   :  { %5159 = vmatpush.msrb.mxu3 %v5158_v10  ;;  %6476 = vmatmul.f32.gmra.mxu0 %v18357_v44  ;;  %18433 = vst [vmem:[#allocation153_spill] sm:$0xff] %v14124_v17  ;;  %v14136_v10 = vand.u32 4294901760, %v2385_v35  ;;  %9514 = vtanh.f32 %v3915_v11  ;;  %v2373_v40 = vld [vmem:[%s16470_s2 + $0x690] sm:$0xff]  ;;  %v18441_v11 = vld [vmem:[#allocation39_spill] sm:$0xff] }
 0x53c   :  { %6517 = vmatmul.f32.gmra.mxu1 %v18357_v44  ;;  %6689 = vmatpush.msrb.mxu0 %v14099_v12  ;;  %18435 = vst [vmem:[#allocation18_spill] sm:$0xff] %v14134_v24  ;;  %v5176_v61 = vand.u32 4294901760, %v5175_v48  ;;  %v18439_v12 = vld [vmem:[#allocation37_spill] sm:$0xff] }
 0x53d   :  { %6743 = vmatpush.msrb.mxu1 %v14077_v2  ;;  %5052 = vmatpush.msrb.mxu2 %v18434_v30  ;;  %18436 = vst [vmem:[#allocation124_spill] sm:$0xff] %v14136_v10  ;;  %v14145_v2 = vand.u32 4294901760, %v2381_v5  ;;  %v14154_v48 = vsub.f32 %v2385_v35, %v14136_v10  ;;  %v2226_v35 = vld [vmem:[%s16470_s2 + $0x1f8] sm:$0xff] }
 0x53e   :  { %5165 = vmatpush.msrb.mxu3 %v5164_v34  ;;  %6692 = vmatpush.msrb.mxu0 %v14113_v15  ;;  %18437 = vst [vmem:[#allocation156_spill] sm:$0xff] %v14143_v33  ;;  %v14160_v34 = vand.u32 4294901760, %v2377_v37  ;;  %v2365_v15 = vld [vmem:[%s16470_s2 + $0x650] sm:$0xff]  ;;  %v14192_v44 = vand.u32 4294901760, %v2226_v35 }
 0x53f   :  { %6745 = vmatpush.msrb.mxu1 %v14089_v56  ;;  %8403 = vrot.lane.b32.xlu1 %v14124_v17, %s9561_s9  ;;  %18438 = vst [vmem:[#allocation47_spill] sm:$0xff] %v14145_v2  ;;  %v18444_v17 = vld [vmem:[#allocation125_spill] sm:$0xff]  ;;  %v14172_v56 = vand.u32 4294901760, %v2373_v40 }
 0x540   :  { %5054 = vmatpush.msrb.mxu2 %v18439_v12  ;;  %5171 = vmatpush.msrb.mxu3 %v5170_v51  ;;  %18440 = vst [vmem:[#allocation157_spill] sm:$0xff] %v14154_v48  ;;  %v14165_v51 = vsub.f32 %v2381_v5, %v14145_v2  ;;  %v2222_v5 = vld [vmem:[%s16470_s2 + $0x1d8] sm:$0xff] }
 0x541   :  { %6695 = vmatpush.msrb.mxu0 %v14134_v24  ;;  %6747 = vmatpush.msrb.mxu1 %v14108_v31  ;;  %18442 = vst [vmem:[#allocation159_spill] sm:$0xff] %v14160_v34  ;;  %v18445_v31 = vld [vmem:[#allocation71_spill] sm:$0xff]  ;;  %v14187_v24 = vsub.f32 %v2377_v37, %v14160_v34  ;;  %v14205_v37 = vsub.f32 %v2373_v40, %v14172_v56 }
 0x542   :  { %5056 = vmatpush.msrb.mxu2 %v18441_v11  ;;  %5177 = vmatpush.msrb.mxu3 %v5176_v61  ;;  %18443 = vst [vmem:[#allocation76_spill] sm:$0xff] %v14165_v51  ;;  %v2369_v61 = vld [vmem:[%s16470_s2 + $0x670] sm:$0xff]  ;;  %v14223_v40 = vsub.f32 %v2226_v35, %v14192_v44 }
 0x543   :  { %6698 = vmatpush.msrb.mxu0 %v14143_v33  ;;  %6749 = vmatpush.msrb.mxu1 %v14122_v13  ;;  %18446 = vst [vmem:[#allocation161_spill] sm:$0xff] %v14172_v56  ;;  %v14177_v33 = vpop.eup %9514  ;;  %v18448_v13 = vld [vmem:[#allocation55_spill] sm:$0xff] }
 0x544   :  { %5179 = vmatmul.f32.vlgmr.msrb.gmra.mxu3 %v18444_v17  ;;  %5058 = vmatpush.msrb.mxu2 %v18445_v31  ;;  %18447 = vst [vmem:[#allocation29_spill] sm:$0xff] %v14177_v33 }
 0x545   :  { %5365 = vmatpush.msra.mxu3 %v18391_v19  ;;  %6701 = vmatpush.msrb.mxu0 %v14154_v48  ;;  %18449 = vst [vmem:[#allocation26_spill] sm:$0xff] %v14187_v24  ;;  %v14196_v19 = vand.u32 4294901760, %v2369_v61  ;;  %v14207_v48 = vand.u32 4294901760, %v2222_v5 }
 0x546   :  { %6751 = vmatpush.msrb.mxu1 %v14136_v10  ;;  %5060 = vmatpush.msrb.mxu2 %v18448_v13  ;;  %18450 = vst [vmem:[#allocation162_spill] sm:$0xff] %v14192_v44  ;;  %v2218_v10 = vld [vmem:[%s16470_s2 + $0x1b8] sm:$0xff] }
 0x547   :  { %5367 = vmatpush.msra.mxu3 %v18394_v42  ;;  %6704 = vmatpush.msrb.mxu0 %v14165_v51  ;;  %18451 = vst [vmem:[#allocation160_spill] sm:$0xff] %v14196_v19  ;;  %v14212_v42 = vand.u32 4294901760, %v2365_v15  ;;  %v2361_v51 = vld [vmem:[%s16470_s2 + $0x630] sm:$0xff]  ;;  %v14230_v3 = vsub.f32 %v2369_v61, %v14196_v19  ;;  %v14240_v35 = vsub.f32 %v2222_v5, %v14207_v48  ;;  %v14255_v5 = vand.u32 4294901760, %v2357_v46 }
 0x548   :  { %6753 = vmatpush.msrb.mxu1 %v14145_v2  ;;  %8393 = vrot.lane.b32.xlu1 %v14177_v33, %s9559_s0  ;;  %18452 = vst [vmem:[#allocation163_spill] sm:$0xff] %v14205_v37  ;;  %v2214_v2 = vld [vmem:[%s16470_s2 + $0x198] sm:$0xff]  ;;  %v18463_v61 = vld [vmem:[#allocation57_spill] sm:$0xff] }
 0x549   :  { %18453 = vst [vmem:[#allocation22_spill] sm:$0xff] %v14207_v48  ;;  %5369 = vmatpush.msra.mxu3 %v18398_v53  ;;  %8405 = vrot.lane.b32.xlu2 %v14177_v33, %s9561_s9  ;;  %v14225_v53 = vand.u32 4294901760, %v2218_v10  ;;  %v14242_v63 = vand.u32 4294901760, %v2214_v2 }
 0x54a   :  { %18454 = vst [vmem:[#allocation50_spill] sm:$0xff] %v14212_v42  ;;  %5062 = vmatpush.msrb.mxu2 %v18455_v62  ;;  %6707 = vmatpush.msrb.mxu0 %v14187_v24  ;;  %v14237_v24 = vand.u32 4294901760, %v2361_v51 }
 0x54b   :  { %18456 = vst [vmem:[#allocation164_spill] sm:$0xff] %v14223_v40  ;;  %6755 = vmatpush.msrb.mxu1 %v14160_v34  ;;  %5371 = vmatpush.msra.mxu3 %v18403_v60  ;;  %v2210_v60 = vld [vmem:[%s16470_s2 + $0x178] sm:$0xff]  ;;  %v14250_v34 = vsub.f32 %v2365_v15, %v14212_v42  ;;  %v14259_v54 = vsub.f32 %v2218_v10, %v14225_v53 }
 0x54c   :  { %18457 = vst [vmem:[#allocation32_spill] sm:$0xff] %v14225_v53  ;;  %5064 = vmatpush.msrb.mxu2 %v18459_v29  ;;  %6710 = vmatpush.msrb.mxu0 %v14205_v37  ;;  %v18466_v37 = vand.u32 4294901760, %v18350_v50  ;;  %v14266_v15 = vand.u32 4294901760, %v2210_v60  ;;  %v18470_v50 = vand.u32 4294901760, %v18354_v21  ;;  %v14276_v28 = vsub.f32 %v2214_v2, %v14242_v63 }
 0x54d   :  { %18458 = vst [vmem:[#allocation11_spill] sm:$0xff] %v14230_v3  ;;  %6757 = vmatpush.msrb.mxu1 %v14172_v56  ;;  %5070 = vmatmul.f32.vlgmr.msrb.gmra.mxu2 %v18463_v61  ;;  %v2206_v56 = vld [vmem:[%s16470_s2 + $0x158] sm:$0xff]  ;;  %v18474_v21 = vand.u32 4294901760, %v18360_v49  ;;  %v18476_v2 = vand.u32 4294901760, %v14223_v40  ;;  %v18483_v10 = vand.u32 4294901760, %v14259_v54 }
 0x54e   :  { %18460 = vst [vmem:[#allocation6_spill] sm:$0xff] %v14237_v24  ;;  %5183 = vmatmul.f32.gmra.mxu3 %v18465_v57  ;;  %5294 = vmatpush.msra.mxu2 %v18466_v37  ;;  %v14272_v37 = vsub.f32 %v2361_v51, %v14237_v24  ;;  %v14283_v61 = vand.u32 4294901760, %v2206_v56  ;;  %v14289_v51 = vsub.f32 %v2357_v46, %v14255_v5 }
 0x54f   :  { %18461 = vst [vmem:[#allocation53_spill] sm:$0xff] %v14240_v35  ;;  %5373 = vmatpush.msra.mxu3 %v18413_v27  ;;  %6713 = vmatpush.msrb.mxu0 %v14230_v3  ;;  %v2202_v27 = vld [vmem:[%s16470_s2 + $0x138] sm:$0xff]  ;;  %v14302_v49 = vsub.f32 %v2210_v60, %v14266_v15 }
 0x550   :  { %18462 = vst [vmem:[#allocation30_spill] sm:$0xff] %v14242_v63  ;;  %6759 = vmatpush.msrb.mxu1 %v14196_v19  ;;  %5298 = vmatpush.msra.mxu2 %v18470_v50  ;;  %v6945_v50 = vsub.f32 %v14223_v40, %v18476_v2  ;;  %v14304_v46 = vand.u32 4294901760, %v2202_v27  ;;  %v14319_v60 = vsub.f32 %v2206_v56, %v14283_v61  ;;  %v18490_v56 = vld [vmem:[#allocation135_spill] sm:$0xff]  ;;  %v2346_v3 = vld [vmem:[%s16470_s2 + $0x5b8] sm:$0xff] }
 0x551   :  { %18464 = vst [vmem:[#allocation166_spill] sm:$0xff] %v14250_v34  ;;  %5375 = vmatpush.msra.mxu3 %v18417_v9  ;;  %6716 = vmatpush.msrb.mxu0 %v14250_v34  ;;  %v2198_v9 = vld [vmem:[%s16470_s2 + $0x118] sm:$0xff] }
 0x552   :  { %18467 = vst [vmem:[#allocation8_spill] sm:$0xff] %v14255_v5  ;;  %6761 = vmatpush.msrb.mxu1 %v14212_v42  ;;  %5302 = vmatpush.msra.mxu2 %v18474_v21  ;;  %v18479_v21 = vand.u32 4294901760, %v14240_v35  ;;  %v14321_v42 = vand.u32 4294901760, %v2198_v9  ;;  %v2238_v34 = vld [vmem:[%s16470_s2 + $0x258] sm:$0xff] }
 0x553   :  { %18468 = vst [vmem:[#allocation17_spill] sm:$0xff] %v14259_v54  ;;  %5377 = vmatpush.msra.mxu3 %v18421_v32  ;;  %8399 = vrot.lane.b32.xlu2 %v14177_v33, %s9560_s8  ;;  %v2194_v32 = vld [vmem:[%s16470_s2 + $0xf8] sm:$0xff]  ;;  %v18480_v33 = vand.u32 4294901760, %v18364_v39  ;;  %v14843_v41 = vand.u32 4294901760, %v2238_v34 }
 0x554   :  { %18469 = vst [vmem:[#allocation167_spill] sm:$0xff] %v14266_v15  ;;  %6719 = vmatpush.msrb.mxu0 %v14272_v37  ;;  %6763 = vmatpush.msrb.mxu1 %v14237_v24  ;;  %v6951_v2 = vsub.f32 %v14240_v35, %v18479_v21  ;;  %v6946_v21 = vand.u32 4294901760, %v6945_v50  ;;  %v6957_v24 = vsub.f32 %v14259_v54, %v18483_v10  ;;  %v2190_v39 = vld [vmem:[%s16470_s2 + $0xd8] sm:$0xff]  ;;  %v14337_v19 = vand.u32 4294901760, %v2194_v32 }
 0x555   :  { %18471 = vst [vmem:[#allocation165_spill] sm:$0xff] %v14272_v37  ;;  %5306 = vmatpush.msra.mxu2 %v18480_v33  ;;  %5379 = vmatpush.msra.mxu3 %v18425_v4  ;;  %v18484_v33 = vld [vmem:[#allocation177_spill] sm:$0xff]  ;;  %v14335_v4 = vsub.f32 %v2202_v27, %v14304_v46  ;;  %v18487_v50 = vand.u32 4294901760, %v18369_v23  ;;  %v14352_v23 = vsub.f32 %v2198_v9, %v14321_v42  ;;  %v18494_v27 = vand.u32 4294901760, %v14302_v49 }
 0x556   :  { %18472 = vst [vmem:[#allocation38_spill] sm:$0xff] %v14276_v28  ;;  %6722 = vmatpush.msrb.mxu0 %v14289_v51  ;;  %6765 = vmatpush.msrb.mxu1 %v14255_v5  ;;  %v18488_v5 = vld [vmem:[#allocation130_spill] sm:$0xff]  ;;  %v6952_v10 = vand.u32 4294901760, %v6951_v2  ;;  %v18493_v2 = vand.u32 4294901760, %v18374_v22 }
 0x557   :  { %18473 = vst [vmem:[#allocation168_spill] sm:$0xff] %v14283_v61  ;;  %5078 = vmatmul.f32.gmra.mxu2 %v18484_v33  ;;  %5381 = vmatpush.msra.mxu3 %v18429_v38  ;;  %v2186_v38 = vld [vmem:[%s16470_s2 + $0xb8] sm:$0xff]  ;;  %v6969_v9 = vsub.f32 %v14302_v49, %v18494_v27 }
 0x558   :  { %18475 = vst [vmem:[#allocation40_spill] sm:$0xff] %v14289_v51  ;;  %5310 = vmatpush.msra.mxu2 %v18487_v50  ;;  %6725 = vmatmul.f32.vlgmr.msrb.gmra.mxu0 %v18488_v5  ;;  %v18489_v51 = vand.u32 4294901760, %v14276_v28  ;;  %v14354_v50 = vand.u32 4294901760, %v2190_v39  ;;  %v2182_v5 = vld [vmem:[%s16470_s2 + $0x98] sm:$0xff]  ;;  %v14370_v22 = vand.u32 4294901760, %v2186_v38 }
 0x559   :  { %18477 = vst [vmem:[#allocation103_spill] sm:$0xff] %v14302_v49  ;;  %6769 = vmatmul.f32.vlgmr.msrb.gmra.mxu1 %v18490_v56  ;;  %6894 = vmatpush.msra.mxu0 %v14192_v44  ;;  %v17202_v56 = vand.u32 4294901760, %v14352_v23  ;;  %v14383_v33 = vand.u32 4294901760, %v2182_v5 }
 0x55a   :  { %18478 = vst [vmem:[#allocation42_spill] sm:$0xff] %v14304_v46  ;;  %v6963_v37 = vsub.f32 %v14276_v28, %v18489_v51  ;;  %6947 = vmatpush.msra.mxu1 %v6946_v21  ;;  %5314 = vmatpush.msra.mxu2 %v18493_v2  ;;  %v6958_v51 = vand.u32 4294901760, %v6957_v24  ;;  %v14368_v21 = vsub.f32 %v2194_v32, %v14337_v19  ;;  %v18497_v24 = vand.u32 4294901760, %v18378_v26  ;;  %v2178_v26 = vld [vmem:[%s16470_s2 + $0x78] sm:$0xff] }
 0x55b   :  { %18481 = vst [vmem:[#allocation10_spill] sm:$0xff] %v14319_v60  ;;  %5383 = vmatpush.msra.mxu3 %v18434_v30  ;;  %6896 = vmatpush.msra.mxu0 %v14207_v48  ;;  %v18498_v30 = vand.u32 4294901760, %v14319_v60  ;;  %v14381_v32 = vsub.f32 %v2190_v39, %v14354_v50 }
 0x55c   :  { %18482 = vst [vmem:[#allocation62_spill] sm:$0xff] %v14321_v42  ;;  %6953 = vmatpush.msra.mxu1 %v6952_v10  ;;  %5318 = vmatpush.msra.mxu2 %v18497_v24  ;;  %v6964_v2 = vand.u32 4294901760, %v6963_v37  ;;  %v6970_v37 = vand.u32 4294901760, %v6969_v9  ;;  %v18502_v10 = vand.u32 4294901760, %v14335_v4  ;;  %v18506_v9 = vld [vmem:[#allocation140_spill] sm:$0xff]  ;;  %v14413_v24 = vsub.f32 %v2182_v5, %v14383_v33 }
 0x55d   :  { %18485 = vst [vmem:[#allocation169_spill] sm:$0xff] %v14335_v4  ;;  %5385 = vmatpush.msra.mxu3 %v18439_v12  ;;  %6898 = vmatpush.msra.mxu0 %v14225_v53  ;;  %v6975_v27 = vsub.f32 %v14319_v60, %v18498_v30  ;;  %v18501_v12 = vand.u32 4294901760, %v18381_v1  ;;  %v14397_v30 = vsub.f32 %v2186_v38, %v14370_v22  ;;  %v18504_v1 = vand.u32 4294901760, %v18385_v58  ;;  %v2170_v58 = vld [vmem:[%s16470_s2 + $0x38] sm:$0xff] }
 0x55e   :  { %18486 = vst [vmem:[#allocation65_spill] sm:$0xff] %v14337_v19  ;;  %6959 = vmatpush.msra.mxu1 %v6958_v51  ;;  %v6981_v39 = vsub.f32 %v14335_v4, %v18502_v10  ;;  %v2174_v51 = vld [vmem:[%s16470_s2 + $0x58] sm:$0xff]  ;;  %v6987_v38 = vsub.f32 %v14352_v23, %v17202_v56  ;;  %v18511_v56 = vand.u32 4294901760, %v14368_v21 }
 0x55f   :  { %18491 = vst [vmem:[#allocation48_spill] sm:$0xff] %v14352_v23  ;;  %5322 = vmatpush.msra.mxu2 %v18501_v12  ;;  %5387 = vmatpush.msra.mxu3 %v18441_v11  ;;  %v14404_v11 = vand.u32 4294901760, %v2178_v26  ;;  %v6976_v12 = vand.u32 4294901760, %v6975_v27  ;;  %v18510_v27 = vand.u32 4294901760, %v18392_v43  ;;  %v14436_v43 = vand.u32 4294901760, %v2170_v58 }
 0x560   :  { %18492 = vst [vmem:[#allocation49_spill] sm:$0xff] %v14354_v50  ;;  %6900 = vmatpush.msra.mxu0 %v14242_v63  ;;  %6965 = vmatpush.msra.mxu1 %v6964_v2  ;;  %v18508_v2 = vld [vmem:[#allocation70_spill] sm:$0xff]  ;;  %v6993_v5 = vsub.f32 %v14368_v21, %v18511_v56  ;;  %v6988_v56 = vand.u32 4294901760, %v6987_v38  ;;  %v18519_v38 = vand.u32 4294901760, %v14397_v30 }
 0x561   :  { %18495 = vst [vmem:[#allocation67_spill] sm:$0xff] %v14368_v21  ;;  %5326 = vmatpush.msra.mxu2 %v18504_v1  ;;  %5389 = vmatpush.msra.mxu3 %v18445_v31  ;;  %v14420_v31 = vand.u32 4294901760, %v2174_v51  ;;  %v6982_v1 = vand.u32 4294901760, %v6981_v39  ;;  %v18514_v39 = vand.u32 4294901760, %v18396_v59  ;;  %v18518_v59 = vand.u32 4294901760, %v18401_v36 }
 0x562   :  { %18496 = vst [vmem:[#allocation34_spill] sm:$0xff] %v14370_v22  ;;  %6730 = vmatmul.f32.gmra.mxu0 %v18506_v9  ;;  %6775 = vmatmul.f32.gmra.mxu1 %v18508_v2  ;;  %v2166_v9 = vld [vmem:[%s16470_s2 + $0x18] sm:$0xff]  ;;  %v17207_v2 = vand.u32 4294901760, %v14413_v24 }
 0x563   :  { %18499 = vst [vmem:[#allocation41_spill] sm:$0xff] %v14381_v32  ;;  %6902 = vmatpush.msra.mxu0 %v14266_v15  ;;  %6971 = vmatpush.msra.mxu1 %v6970_v37  ;;  %v14434_v37 = vsub.f32 %v2178_v26, %v14404_v11  ;;  %v14449_v26 = vand.u32 4294901760, %v2166_v9 }
 0x564   :  { %18500 = vst [vmem:[#allocation51_spill] sm:$0xff] %v14383_v33  ;;  %5330 = vmatpush.msra.mxu2 %v18510_v27  ;;  %5391 = vmatpush.msra.mxu3 %v18448_v13  ;;  %v18515_v27 = vand.u32 4294901760, %v14381_v32  ;;  %v14447_v13 = vsub.f32 %v2174_v51, %v14420_v31  ;;  %v14460_v51 = vsub.f32 %v2170_v58, %v14436_v43 }
 0x565   :  { %18503 = vst [vmem:[#allocation77_spill] sm:$0xff] %v14397_v30  ;;  %6904 = vmatpush.msra.mxu0 %v14283_v61  ;;  %6977 = vmatpush.msra.mxu1 %v6976_v12  ;;  %v6994_v12 = vand.u32 4294901760, %v6993_v5  ;;  %v7011_v36 = vsub.f32 %v14413_v24, %v17207_v2  ;;  %v18521_v5 = vld [vmem:[#allocation69_spill] sm:$0xff] }
 0x566   :  { %18505 = vst [vmem:[#allocation9_spill] sm:$0xff] %v14404_v11  ;;  %5334 = vmatpush.msra.mxu2 %v18514_v39  ;;  %v6999_v10 = vsub.f32 %v14381_v32, %v18515_v27  ;;  %5393 = vmatpush.msra.mxu3 %v18455_v62  ;;  %v7005_v39 = vsub.f32 %v14397_v30, %v18519_v38  ;;  %v17206_v62 = vand.u32 4294901760, %v14434_v37  ;;  %v18522_v27 = vand.u32 4294901760, %v18407_v52 }
 0x567   :  { %18507 = vst [vmem:[#allocation60_spill] sm:$0xff] %v14413_v24  ;;  %6906 = vmatpush.msra.mxu0 %v14304_v46  ;;  %6983 = vmatpush.msra.mxu1 %v6982_v1  ;;  %v17204_v52 = vand.u32 4294901760, %v14460_v51 }
 0x568   :  { %18509 = vst [vmem:[#allocation54_spill] sm:$0xff] %v14420_v31  ;;  %5338 = vmatpush.msra.mxu2 %v18518_v59  ;;  %5395 = vmatpush.msra.mxu3 %v18459_v29  ;;  %v7000_v1 = vand.u32 4294901760, %v6999_v10  ;;  %v17205_v29 = vand.u32 4294901760, %v14447_v13  ;;  %v14471_v59 = vsub.f32 %v2166_v9, %v14449_v26  ;;  %v7006_v58 = vand.u32 4294901760, %v7005_v39 }
 0x569   :  { %18512 = vst [vmem:[#allocation68_spill] sm:$0xff] %v14434_v37  ;;  %6908 = vmatpush.msra.mxu0 %v14321_v42  ;;  %6989 = vmatpush.msra.mxu1 %v6988_v56  ;;  %v18524_v56 = vld [vmem:[#allocation52_spill] sm:$0xff]  ;;  %v18525_v10 = vand.u32 4294901760, %v18414_v8  ;;  %v7017_v38 = vsub.f32 %v14434_v37, %v17206_v62  ;;  %v7012_v9 = vand.u32 4294901760, %v7011_v36  ;;  %v18560_v62 = vld [vmem:[#allocation186_spill] sm:$0xff] }
 0x56a   :  { %18513 = vst [vmem:[#allocation58_spill] sm:$0xff] %v14436_v43  ;;  %5397 = vmatmul.f32.vlgmr.msra.gmra.mxu3 %v18444_v17  ;;  %5342 = vmatpush.msra.mxu2 %v18522_v27  ;;  %v7023_v8 = vsub.f32 %v14447_v13, %v17205_v29  ;;  %v17203_v39 = vand.u32 4294901760, %v14471_v59  ;;  %v18528_v27 = vld [vmem:[#allocation66_spill] sm:$0xff]  ;;  %v18565_v29 = vld [vmem:[#allocation193_spill] sm:$0xff] }
 0x56b   :  { %18516 = vst [vmem:[#allocation171_spill] sm:$0xff] %v14447_v13  ;;  %5619 = vmatpush.msrb.mxu3 %v18521_v5  ;;  %6910 = vmatpush.msra.mxu0 %v14337_v19  ;;  %v18526_v5 = vld [vmem:[#allocation56_spill] sm:$0xff] }
 0x56c   :  { %18517 = vst [vmem:[#allocation59_spill] sm:$0xff] %v14449_v26  ;;  %6995 = vmatpush.msra.mxu1 %v6994_v12  ;;  %5346 = vmatpush.msra.mxu2 %v18525_v10  ;;  %v18527_v12 = vand.u32 4294901760, %v18419_v7  ;;  %v7029_v7 = vsub.f32 %v14460_v51, %v17204_v52  ;;  %v7024_v36 = vand.u32 4294901760, %v7023_v8  ;;  %v18530_v10 = vld [vmem:[#allocation79_spill] sm:$0xff]  ;;  %v18557_v52 = vld [vmem:[#allocation78_spill] sm:$0xff] }
 0x56d   :  { %18520 = vst [vmem:[#allocation174_spill] sm:$0xff] %v14460_v51  ;;  %5621 = vmatpush.msrb.mxu3 %v18524_v56  ;;  %6912 = vmatpush.msra.mxu0 %v14354_v50  ;;  %v18529_v56 = vand.u32 4294901760, %v18424_v20  ;;  %v18531_v20 = vld [vmem:[#allocation170_spill] sm:$0xff]  ;;  %v18534_v8 = vld [vmem:[#allocation75_spill] sm:$0xff] }
 0x56e   :  { %18523 = vst [vmem:[#allocation61_spill] sm:$0xff] %v14471_v59  ;;  %7001 = vmatpush.msra.mxu1 %v7000_v1  ;;  %5350 = vmatpush.msra.mxu2 %v18527_v12  ;;  %v7018_v1 = vand.u32 4294901760, %v7017_v38  ;;  %v7030_v38 = vand.u32 4294901760, %v7029_v7  ;;  %v18538_v7 = vld [vmem:[#allocation181_spill] sm:$0xff] }
 0x56f   :  { %5623 = vmatpush.msrb.mxu3 %v18526_v5  ;;  %6914 = vmatpush.msra.mxu0 %v14370_v22  ;;  %v18532_v5 = vld [vmem:[#allocation64_spill] sm:$0xff] }
 0x570   :  { %7007 = vmatpush.msra.mxu1 %v7006_v58  ;;  %5354 = vmatpush.msra.mxu2 %v18529_v56  ;;  %v7035_v58 = vsub.f32 %v14471_v59, %v17203_v39  ;;  %v18536_v56 = vld [vmem:[#allocation172_spill] sm:$0xff] }
 0x571   :  { %5625 = vmatpush.msrb.mxu3 %v18528_v27  ;;  %6916 = vmatpush.msra.mxu0 %v14383_v33  ;;  %v18535_v27 = vld [vmem:[#allocation176_spill] sm:$0xff] }
 0x572   :  { %7013 = vmatpush.msra.mxu1 %v7012_v9  ;;  %5356 = vmatmul.f32.vlgmr.msra.gmra.mxu2 %v18444_v17  ;;  %v18533_v9 = vld [vmem:[#allocation173_spill] sm:$0xff]  ;;  %v7036_v12 = vand.u32 4294901760, %v7035_v58  ;;  %v18539_v58 = vld [vmem:[#allocation175_spill] sm:$0xff]  ;;  %v18556_v39 = vld [vmem:[#allocation88_spill] sm:$0xff] }
 0x573   :  { %5401 = vmatmul.f32.gmra.mxu3 %v18465_v57  ;;  %5561 = vmatpush.msrb.mxu2 %v18530_v10  ;;  %v18537_v10 = vld [vmem:[#allocation179_spill] sm:$0xff] }
 0x574   :  { %5627 = vmatpush.msrb.mxu3 %v18531_v20  ;;  %6918 = vmatpush.msra.mxu0 %v14404_v11  ;;  %v18540_v20 = vld [vmem:[#allocation24_spill] sm:$0xff] }
 0x575   :  { %7019 = vmatpush.msra.mxu1 %v7018_v1  ;;  %5564 = vmatpush.msrb.mxu2 %v18532_v5  ;;  %v14514_v1 = vpop.f32.mrf.mxu0  ;;  %v18542_v5 = vand.u32 4294901760, %v14223_v40  ;;  %v18615_v40 = vld [vmem:[#allocation104_spill] sm:$0xff] }
 0x576   :  { %5629 = vmatpush.msrb.mxu3 %v18533_v9  ;;  %6920 = vmatpush.msra.mxu0 %v14420_v31  ;;  %v18543_v9 = vld [vmem:[#allocation178_spill] sm:$0xff] }
 0x577   :  { %7025 = vmatpush.msra.mxu1 %v7024_v36  ;;  %5567 = vmatpush.msrb.mxu2 %v18534_v8  ;;  %v14518_v36 = vpop.f32.mrf.mxu1  ;;  %v18545_v8 = vand.u32 4294901760, %v14240_v35 }
 0x578   :  { %5631 = vmatpush.msrb.mxu3 %v18535_v27  ;;  %6922 = vmatpush.msra.mxu0 %v14436_v43  ;;  %v18546_v27 = vld [vmem:[#allocation180_spill] sm:$0xff] }
 0x579   :  { %7031 = vmatpush.msra.mxu1 %v7030_v38  ;;  %5570 = vmatpush.msrb.mxu2 %v18536_v56  ;;  %v18541_v38 = vld [vmem:[#allocation19_spill] sm:$0xff]  ;;  %v18547_v56 = vld [vmem:[#allocation185_spill] sm:$0xff]  ;;  %18649 = vst [vmem:[#allocation180_spill] sm:$0xff] %v14843_v41 }
 0x57a   :  { %5633 = vmatpush.msrb.mxu3 %v18537_v10  ;;  %6924 = vmatpush.msra.mxu0 %v14449_v26  ;;  %v18548_v10 = vand.u32 4294901760, %v14259_v54  ;;  %v18570_v54 = vld [vmem:[#allocation195_spill] sm:$0xff] }
 0x57b   :  { %7037 = vmatpush.msra.mxu1 %v7036_v12  ;;  %5360 = vmatmul.f32.gmra.mxu2 %v18465_v57  ;;  %v18544_v12 = vld [vmem:[#allocation183_spill] sm:$0xff] }
 0x57c   :  { %5635 = vmatpush.msrb.mxu3 %v18538_v7  ;;  %5573 = vmatpush.msrb.mxu2 %v18539_v58  ;;  %v18549_v7 = vld [vmem:[#allocation182_spill] sm:$0xff] }
 0x57d   :  { %6930 = vmatmul.f32.vlgmr.msra.gmra.mxu0 %v18540_v20  ;;  %7039 = vmatmul.f32.vlgmr.msra.gmra.mxu1 %v18541_v38  ;;  %v18550_v58 = vld [vmem:[#allocation90_spill] sm:$0xff] }
 0x57e   :  { %7154 = vmatpush.msrb.mxu0 %v18542_v5  ;;  %7225 = vmatpush.msrb.mxu1 %v14192_v44  ;;  %v17209_v20 = vand.u32 4294901760, %v18550_v58  ;;  %v18551_v5 = vld [vmem:[#allocation187_spill] sm:$0xff] }
 0x57f   :  { %5576 = vmatpush.msrb.mxu2 %v18543_v9  ;;  %5637 = vmatpush.msrb.mxu3 %v18544_v12  ;;  %v18552_v9 = vand.u32 4294901760, %v14276_v28  ;;  %v18553_v12 = vld [vmem:[#allocation184_spill] sm:$0xff]  ;;  %v18566_v28 = vand.u32 4294901760, %v14335_v4 }
 0x580   :  { %7158 = vmatpush.msrb.mxu0 %v18545_v8  ;;  %7227 = vmatpush.msrb.mxu1 %v14207_v48  ;;  %v18554_v8 = vld [vmem:[#allocation102_spill] sm:$0xff] }
 0x581   :  { %5579 = vmatpush.msrb.mxu2 %v18546_v27  ;;  %5639 = vmatpush.msrb.mxu3 %v18547_v56  ;;  %v17212_v27 = vand.u32 4294901760, %v18554_v8  ;;  %v14544_v56 = vpop.f32.mrf.mxu0 }
 0x582   :  { %7162 = vmatpush.msrb.mxu0 %v18548_v10  ;;  %7229 = vmatpush.msrb.mxu1 %v14225_v53  ;;  %v18555_v10 = vld [vmem:[#allocation189_spill] sm:$0xff] }
 0x583   :  { %5582 = vmatpush.msrb.mxu2 %v18549_v7  ;;  %5641 = vmatpush.msrb.mxu3 %v18551_v5  ;;  %v14548_v7 = vpop.f32.mrf.mxu1  ;;  %v18558_v5 = vand.u32 4294901760, %v14302_v49  ;;  %v5835_v2 = vsub.f32 %v18554_v8, %v17212_v27  ;;  %v18569_v27 = vld [vmem:[#allocation108_spill] sm:$0xff] }
 0x584   :  { %7166 = vmatpush.msrb.mxu0 %v18552_v9  ;;  %7231 = vmatpush.msrb.mxu1 %v14242_v63  ;;  %v5829_v9 = vsub.f32 %v18550_v58, %v17209_v20  ;;  %v18564_v20 = vld [vmem:[#allocation188_spill] sm:$0xff] }
 0x585   :  { %5585 = vmatpush.msrb.mxu2 %v18553_v12  ;;  %5643 = vmatpush.msrb.mxu3 %v18555_v10  ;;  %v18559_v12 = vld [vmem:[#allocation105_spill] sm:$0xff]  ;;  %v18561_v10 = vld [vmem:[#allocation191_spill] sm:$0xff] }
 0x586   :  { %6938 = vmatmul.f32.gmra.mxu0 %v18556_v39  ;;  %7043 = vmatmul.f32.gmra.mxu1 %v18557_v52  ;;  %v18562_v39 = vand.u32 4294901760, %v14319_v60  ;;  %v18568_v60 = vld [vmem:[#allocation190_spill] sm:$0xff] }
 0x587   :  { %7170 = vmatpush.msrb.mxu0 %v18558_v5  ;;  %7233 = vmatpush.msrb.mxu1 %v14266_v15  ;;  %v18563_v5 = vld [vmem:[#allocation112_spill] sm:$0xff]  ;;  %v2270_v15 = vld [vmem:[%s16470_s2 + $0x358] sm:$0xff] }
 0x588   :  { %5588 = vmatpush.msrb.mxu2 %v18560_v62  ;;  %5645 = vmatpush.msrb.mxu3 %v18561_v10  ;;  %v5830_v62 = vand.u32 4294901760, %v5829_v9  ;;  %v18567_v10 = vand.u32 4294901760, %v18559_v12  ;;  %v18572_v4 = vand.u32 4294901760, %v18563_v5  ;;  %v18573_v9 = vld [vmem:[#allocation27_spill] sm:$0xff] }
 0x589   :  { %7174 = vmatpush.msrb.mxu0 %v18562_v39  ;;  %7235 = vmatpush.msrb.mxu1 %v14283_v61 }
 0x58a   :  { %5591 = vmatpush.msrb.mxu2 %v18564_v20  ;;  %5647 = vmatpush.msrb.mxu3 %v18565_v29  ;;  %v5841_v39 = vsub.f32 %v18559_v12, %v18567_v10  ;;  %v18571_v20 = vand.u32 4294901760, %v14352_v23  ;;  %v5836_v29 = vand.u32 4294901760, %v5835_v2  ;;  %v18574_v10 = vld [vmem:[#allocation117_spill] sm:$0xff]  ;;  %v18577_v2 = vand.u32 4294901760, %v18569_v27 }
 0x58b   :  { %7178 = vmatpush.msrb.mxu0 %v18566_v28  ;;  %7237 = vmatpush.msrb.mxu1 %v14304_v46  ;;  %v5847_v28 = vsub.f32 %v18563_v5, %v18572_v4  ;;  %v17220_v46 = vand.u32 4294901760, %v18574_v10  ;;  %v18578_v4 = vld [vmem:[#allocation120_spill] sm:$0xff] }
 0x58c   :  { %5594 = vmatpush.msrb.mxu2 %v18568_v60  ;;  %5649 = vmatpush.msrb.mxu3 %v18570_v54  ;;  %v18575_v60 = vld [vmem:[#allocation192_spill] sm:$0xff]  ;;  %v5842_v49 = vand.u32 4294901760, %v5841_v39  ;;  %v18576_v54 = vand.u32 4294901760, %v14368_v21  ;;  %v17221_v23 = vand.u32 4294901760, %v18578_v4 }
 0x58d   :  { %7182 = vmatpush.msrb.mxu0 %v18571_v20  ;;  %7239 = vmatpush.msrb.mxu1 %v14321_v42  ;;  %v5853_v20 = vsub.f32 %v18569_v27, %v18577_v2  ;;  %v18579_v42 = vld [vmem:[#allocation194_spill] sm:$0xff]  ;;  %v5859_v39 = vsub.f32 %v18574_v10, %v17220_v46  ;;  %v18582_v21 = vld [vmem:[#allocation196_spill] sm:$0xff]  ;;  %v18583_v2 = vand.u32 4294901760, %v14397_v30  ;;  %v18586_v46 = vand.u32 4294901760, %v14413_v24  ;;  %v18594_v30 = vld [vmem:[#allocation129_spill] sm:$0xff] }
 0x58e   :  { %5653 = vmatmul.f32.vlgmr.msrb.gmra.mxu3 %v18573_v9  ;;  %5597 = vmatpush.msrb.mxu2 %v18575_v60  ;;  %v5848_v9 = vand.u32 4294901760, %v5847_v28  ;;  %v18581_v60 = vld [vmem:[#allocation86_spill] sm:$0xff]  ;;  %v18584_v28 = vld [vmem:[#allocation89_spill] sm:$0xff]  ;;  %v18596_v24 = vld [vmem:[#allocation100_spill] sm:$0xff] }
 0x58f   :  { %5831 = vmatpush.msra.mxu3 %v5830_v62  ;;  %7186 = vmatpush.msrb.mxu0 %v18576_v54  ;;  %v18580_v62 = vand.u32 4294901760, %v14381_v32  ;;  %v17223_v54 = vand.u32 4294901760, %v18581_v60  ;;  %v18585_v32 = vld [vmem:[#allocation84_spill] sm:$0xff] }
 0x590   :  { %7241 = vmatpush.msrb.mxu1 %v14337_v19  ;;  %5600 = vmatpush.msrb.mxu2 %v18579_v42  ;;  %v5854_v42 = vand.u32 4294901760, %v5853_v20  ;;  %v18587_v20 = vld [vmem:[#allocation16_spill] sm:$0xff]  ;;  %v18607_v19 = vld [vmem:[#allocation81_spill] sm:$0xff] }
 0x591   :  { %5837 = vmatpush.msra.mxu3 %v5836_v29  ;;  %7190 = vmatpush.msrb.mxu0 %v18580_v62  ;;  %v5865_v29 = vsub.f32 %v18578_v4, %v17221_v23  ;;  %v17226_v62 = vand.u32 4294901760, %v18584_v28  ;;  %v18589_v23 = vld [vmem:[#allocation93_spill] sm:$0xff] }
 0x592   :  { %7243 = vmatpush.msrb.mxu1 %v14354_v50  ;;  %5603 = vmatpush.msrb.mxu2 %v18582_v21  ;;  %v5871_v21 = vsub.f32 %v18581_v60, %v17223_v54  ;;  %v18591_v54 = vand.u32 4294901760, %v14434_v37  ;;  %v14669_v50 = vpop.f32.mrf.mxu0 }
 0x593   :  { %5843 = vmatpush.msra.mxu3 %v5842_v49  ;;  %7194 = vmatpush.msrb.mxu0 %v18583_v2  ;;  %v5860_v49 = vand.u32 4294901760, %v5859_v39  ;;  %v18588_v2 = vld [vmem:[#allocation83_spill] sm:$0xff]  ;;  %v18590_v39 = vld [vmem:[#allocation96_spill] sm:$0xff] }
 0x594   :  { %7245 = vmatpush.msrb.mxu1 %v14370_v22  ;;  %5606 = vmatpush.msrb.mxu2 %v18585_v32  ;;  %v5866_v32 = vand.u32 4294901760, %v5865_v29 }
 0x595   :  { %5849 = vmatpush.msra.mxu3 %v5848_v9  ;;  %7198 = vmatpush.msrb.mxu0 %v18586_v46  ;;  %v2290_v9 = vld [vmem:[%s16470_s2 + $0x3f8] sm:$0xff]  ;;  %v5877_v46 = vsub.f32 %v18584_v28, %v17226_v62  ;;  %v18595_v62 = vand.u32 4294901760, %v14447_v13 }
 0x596   :  { %7247 = vmatpush.msrb.mxu1 %v14383_v33  ;;  %5609 = vmatmul.f32.vlgmr.msrb.gmra.mxu2 %v18587_v20  ;;  %v18592_v20 = vld [vmem:[#allocation95_spill] sm:$0xff]  ;;  %v14634_v29 = vand.u32 4294901760, %v2290_v9  ;;  %v18599_v33 = vld [vmem:[#allocation110_spill] sm:$0xff] }
 0x597   :  { %5659 = vmatmul.f32.gmra.mxu3 %v18588_v2  ;;  %5778 = vmatpush.msra.mxu2 %v18589_v23  ;;  %v2286_v2 = vld [vmem:[%s16470_s2 + $0x3d8] sm:$0xff]  ;;  %v5878_v37 = vand.u32 4294901760, %v5877_v46  ;;  %v18603_v46 = vand.u32 4294901760, %v18594_v30 }
 0x598   :  { %5855 = vmatpush.msra.mxu3 %v5854_v42  ;;  %7202 = vmatpush.msrb.mxu0 %v18591_v54  ;;  %v5872_v42 = vand.u32 4294901760, %v5871_v21  ;;  %18593 = vst [vmem:[#allocation45_spill] sm:$0xff] %v14634_v29  ;;  %v2282_v54 = vld [vmem:[%s16470_s2 + $0x3b8] sm:$0xff] }
 0x599   :  { %7249 = vmatpush.msrb.mxu1 %v14404_v11  ;;  %5780 = vmatpush.msra.mxu2 %v18592_v20  ;;  %v14647_v11 = vand.u32 4294901760, %v2286_v2  ;;  %v2278_v13 = vld [vmem:[%s16470_s2 + $0x398] sm:$0xff]  ;;  %v14663_v22 = vand.u32 4294901760, %v2282_v54 }
 0x59a   :  { %5861 = vmatpush.msra.mxu3 %v5860_v49  ;;  %7206 = vmatpush.msrb.mxu0 %v18595_v62  ;;  %v18597_v49 = vand.u32 4294901760, %v18590_v39  ;;  %v18600_v62 = vand.u32 4294901760, %v14460_v51  ;;  %v18605_v51 = vld [vmem:[#allocation144_spill] sm:$0xff]  ;;  %v14678_v35 = vand.u32 4294901760, %v2278_v13 }
 0x59b   :  { %7251 = vmatpush.msrb.mxu1 %v14420_v31  ;;  %5782 = vmatpush.msra.mxu2 %v18596_v24  ;;  %18598 = vst [vmem:[#allocation46_spill] sm:$0xff] %v14647_v11  ;;  %v18601_v31 = vld [vmem:[#allocation97_spill] sm:$0xff] }
 0x59c   :  { %5867 = vmatpush.msra.mxu3 %v5866_v32  ;;  %v5883_v21 = vsub.f32 %v18590_v39, %v18597_v49  ;;  %7210 = vmatpush.msrb.mxu0 %v18600_v62  ;;  %v14658_v32 = vsub.f32 %v2290_v9, %v14634_v29  ;;  %v5889_v49 = vsub.f32 %v18594_v30, %v18603_v46  ;;  %v18609_v46 = vand.u32 4294901760, %v18599_v33  ;;  %v14683_v62 = vpop.f32.mrf.mxu1 }
 0x59d   :  { %7253 = vmatpush.msrb.mxu1 %v14436_v43  ;;  %5784 = vmatpush.msra.mxu2 %v18601_v31  ;;  %18604 = vst [vmem:[#allocation39_spill] sm:$0xff] %v14663_v22  ;;  %v18606_v43 = vand.u32 4294901760, %v14471_v59  ;;  %v18611_v59 = vld [vmem:[#allocation109_spill] sm:$0xff] }
 0x59e   :  { %5873 = vmatpush.msra.mxu3 %v5872_v42  ;;  %18602 = vst [vmem:[#allocation37_spill] sm:$0xff] %v14658_v32  ;;  %5614 = vmatmul.f32.gmra.mxu2 %v18607_v19  ;;  %v5884_v9 = vand.u32 4294901760, %v5883_v21  ;;  %v14673_v42 = vsub.f32 %v2286_v2, %v14647_v11  ;;  %v5895_v61 = vsub.f32 %v18599_v33, %v18609_v46  ;;  %v5890_v2 = vand.u32 4294901760, %v5889_v49 }
 0x59f   :  { %7214 = vmatpush.msrb.mxu0 %v18606_v43  ;;  %7255 = vmatpush.msrb.mxu1 %v14449_v26  ;;  %18610 = vst [vmem:[#allocation55_spill] sm:$0xff] %v14678_v35  ;;  %v2274_v43 = vld [vmem:[%s16470_s2 + $0x378] sm:$0xff]  ;;  %v14691_v46 = vsub.f32 %v2282_v54, %v14663_v22  ;;  %v18614_v19 = vand.u32 4294901760, %v18605_v51  ;;  %v14706_v49 = vsub.f32 %v2278_v13, %v14678_v35 }
 0x5a0   :  { %5879 = vmatpush.msra.mxu3 %v5878_v37  ;;  %18608 = vst [vmem:[#allocation71_spill] sm:$0xff] %v14673_v42  ;;  %5786 = vmatpush.msra.mxu2 %v18611_v59  ;;  %v18612_v37 = vld [vmem:[#allocation31_spill] sm:$0xff]  ;;  %v14701_v21 = vand.u32 4294901760, %v2274_v43  ;;  %v5896_v54 = vand.u32 4294901760, %v5895_v61  ;;  %v2262_v13 = vld [vmem:[%s16470_s2 + $0x318] sm:$0xff] }
 0x5a1   :  { %7216 = vmatmul.f32.vlgmr.msrb.gmra.mxu0 %v18541_v38  ;;  %7257 = vmatmul.f32.vlgmr.msrb.gmra.mxu1 %v18541_v38  ;;  %18613 = vst [vmem:[#allocation63_spill] sm:$0xff] %v14691_v46  ;;  %v5901_v26 = vsub.f32 %v18605_v51, %v18614_v19  ;;  %v18617_v38 = vld [vmem:[#allocation149_spill] sm:$0xff]  ;;  %v2266_v19 = vld [vmem:[%s16470_s2 + $0x338] sm:$0xff]  ;;  %v18620_v63 = vand.u32 4294901760, %v18612_v37  ;;  %v14742_v57 = vand.u32 4294901760, %v2262_v13 }
 0x5a2   :  { %7421 = vmatpush.msra.mxu0 %v14658_v32  ;;  %7479 = vmatpush.msra.mxu1 %v14634_v29  ;;  %18616 = vst [vmem:[#allocation74_spill] sm:$0xff] %v14701_v21  ;;  %v18619_v29 = vld [vmem:[#allocation114_spill] sm:$0xff]  ;;  %v14716_v32 = vand.u32 4294901760, %v2270_v15  ;;  %v14726_v48 = vsub.f32 %v2274_v43, %v14701_v21 }
 0x5a3   :  { %5788 = vmatpush.msra.mxu2 %v18615_v40  ;;  %5885 = vmatpush.msra.mxu3 %v5884_v9  ;;  %18618 = vst [vmem:[#allocation69_spill] sm:$0xff] %v14706_v49  ;;  %v5907_v53 = vsub.f32 %v18612_v37, %v18620_v63  ;;  %v18622_v9 = vld [vmem:[#allocation92_spill] sm:$0xff]  ;;  %v5902_v61 = vand.u32 4294901760, %v5901_v26  ;;  %v18625_v63 = vand.u32 4294901760, %v18617_v38  ;;  %v14866_v37 = vand.u32 4294901760, %v2234_v45 }
 0x5a4   :  { %7424 = vmatpush.msra.mxu0 %v14673_v42  ;;  %7481 = vmatpush.msra.mxu1 %v14647_v11  ;;  %18621 = vst [vmem:[#allocation52_spill] sm:$0xff] %v14716_v32  ;;  %v18623_v11 = vld [vmem:[#allocation113_spill] sm:$0xff]  ;;  %v14731_v42 = vand.u32 4294901760, %v2266_v19  ;;  %v18627_v26 = vld [vmem:[#allocation116_spill] sm:$0xff]  ;;  %v18629_v43 = vand.u32 4294901760, %v18622_v9 }
 0x5a5   :  { %5790 = vmatpush.msra.mxu2 %v18619_v29  ;;  %5891 = vmatpush.msra.mxu3 %v5890_v2  ;;  %18624 = vst [vmem:[#allocation56_spill] sm:$0xff] %v14726_v48  ;;  %v5913_v44 = vsub.f32 %v18617_v38, %v18625_v63  ;;  %v5908_v2 = vand.u32 4294901760, %v5907_v53  ;;  %v14747_v63 = vpop.f32.mrf.mxu0 }
 0x5a6   :  { %7427 = vmatpush.msra.mxu0 %v14691_v46  ;;  %7483 = vmatpush.msra.mxu1 %v14663_v22  ;;  %18626 = vst [vmem:[#allocation66_spill] sm:$0xff] %v14731_v42  ;;  %v14737_v22 = vsub.f32 %v2270_v15, %v14716_v32  ;;  %v5919_v46 = vsub.f32 %v18622_v9, %v18629_v43  ;;  %v2254_v43 = vld [vmem:[%s16470_s2 + $0x2d8] sm:$0xff] }
 0x5a7   :  { %5792 = vmatpush.msra.mxu2 %v18623_v11  ;;  %5897 = vmatpush.msra.mxu3 %v5896_v54  ;;  %18630 = vst [vmem:[#allocation170_spill] sm:$0xff] %v14742_v57  ;;  %v2258_v54 = vld [vmem:[%s16470_s2 + $0x2f8] sm:$0xff]  ;;  %v5914_v53 = vand.u32 4294901760, %v5913_v44  ;;  %v14755_v15 = vsub.f32 %v2266_v19, %v14731_v42  ;;  %v14768_v44 = vsub.f32 %v2262_v13, %v14742_v57  ;;  %v18638_v13 = vld [vmem:[#allocation121_spill] sm:$0xff] }
 0x5a8   :  { %7430 = vmatpush.msra.mxu0 %v14706_v49  ;;  %7485 = vmatpush.msra.mxu1 %v14678_v35  ;;  %18628 = vst [vmem:[#allocation79_spill] sm:$0xff] %v14737_v22  ;;  %v14750_v35 = vpop.f32.mrf.mxu1  ;;  %v14760_v49 = vpop.f32.mrf.mxu2  ;;  %v14764_v17 = vand.u32 4294901760, %v2258_v54  ;;  %v2250_v19 = vld [vmem:[%s16470_s2 + $0x2b8] sm:$0xff] }
 0x5a9   :  { %5794 = vmatpush.msra.mxu2 %v18627_v26  ;;  %5903 = vmatpush.msra.mxu3 %v5902_v61  ;;  %18631 = vst [vmem:[#allocation64_spill] sm:$0xff] %v14750_v35  ;;  %v18633_v61 = vld [vmem:[#allocation122_spill] sm:$0xff] }
 0x5aa   :  { %7220 = vmatmul.f32.gmra.mxu0 %v18557_v52  ;;  %7261 = vmatmul.f32.gmra.mxu1 %v18557_v52  ;;  %18632 = vst [vmem:[#allocation173_spill] sm:$0xff] %v14755_v15  ;;  %v5920_v52 = vand.u32 4294901760, %v5919_v46  ;;  %v2246_v46 = vld [vmem:[%s16470_s2 + $0x298] sm:$0xff] }
 0x5ab   :  { %7433 = vmatpush.msra.mxu0 %v14726_v48  ;;  %7487 = vmatpush.msra.mxu1 %v14701_v21  ;;  %18634 = vst [vmem:[#allocation75_spill] sm:$0xff] %v14764_v17  ;;  %v18636_v48 = vld [vmem:[#allocation119_spill] sm:$0xff]  ;;  %v14775_v21 = vand.u32 4294901760, %v2254_v43  ;;  %v18648_v9 = vld [vmem:[#allocation134_spill] sm:$0xff] }
 0x5ac   :  { %5796 = vmatpush.msra.mxu2 %v18633_v61  ;;  %5909 = vmatpush.msra.mxu3 %v5908_v2  ;;  %18635 = vst [vmem:[#allocation176_spill] sm:$0xff] %v14768_v44  ;;  %v14784_v2 = vsub.f32 %v2258_v54, %v14764_v17  ;;  %v14799_v54 = vand.u32 4294901760, %v2246_v46 }
 0x5ad   :  { %7436 = vmatpush.msra.mxu0 %v14737_v22  ;;  %7489 = vmatpush.msra.mxu1 %v14716_v32  ;;  %18637 = vst [vmem:[#allocation172_spill] sm:$0xff] %v14775_v21  ;;  %v14786_v22 = vand.u32 4294901760, %v2250_v19  ;;  %v2354_v32 = vld [vmem:[%s16470_s2 + $0x5f8] sm:$0xff] }
 0x5ae   :  { %5798 = vmatpush.msra.mxu2 %v18636_v48  ;;  %5915 = vmatpush.msra.mxu3 %v5914_v53  ;;  %18639 = vst [vmem:[#allocation179_spill] sm:$0xff] %v14784_v2  ;;  %v14792_v53 = vpop.f32.mrf.mxu3 }
 0x5af   :  { %7439 = vmatpush.msra.mxu0 %v14755_v15  ;;  %7491 = vmatpush.msra.mxu1 %v14731_v42  ;;  %18640 = vst [vmem:[#allocation181_spill] sm:$0xff] %v14786_v22  ;;  %v14797_v42 = vsub.f32 %v2254_v43, %v14775_v21  ;;  %v2242_v15 = vld [vmem:[%s16470_s2 + $0x278] sm:$0xff]  ;;  %v14814_v43 = vsub.f32 %v2250_v19, %v14786_v22 }
 0x5b0   :  { %5800 = vmatpush.msra.mxu2 %v18638_v13  ;;  %5921 = vmatpush.msra.mxu3 %v5920_v52  ;;  %18642 = vst [vmem:[#allocation24_spill] sm:$0xff] %v14799_v54  ;;  %v2350_v52 = vld [vmem:[%s16470_s2 + $0x5d8] sm:$0xff]  ;;  %v14824_v14 = vand.u32 4294901760, %v2242_v15  ;;  %v14833_v19 = vsub.f32 %v2246_v46, %v14799_v54  ;;  %v14853_v46 = vld [vmem:[%s16471_s3] sm:$0xf] }
 0x5b1   :  { %7442 = vmatpush.msra.mxu0 %v14768_v44  ;;  %7493 = vmatpush.msra.mxu1 %v14742_v57  ;;  %18641 = vst [vmem:[#allocation175_spill] sm:$0xff] %v14797_v42  ;;  %v18643_v44 = vld [vmem:[#allocation101_spill] sm:$0xff]  ;;  %v14809_v57 = vand.u32 4294901760, %v2354_v32 }
 0x5b2   :  { %5923 = vmatmul.f32.vlgmr.msra.gmra.mxu3 %v18233_v55  ;;  %5802 = vmatpush.msra.mxu2 %v18643_v44  ;;  %18644 = vst [vmem:[#allocation19_spill] sm:$0xff] %v14814_v43  ;;  %v14864_v16 = vsub.f32 %v2242_v15, %v14824_v14  ;;  %v14881_v15 = vsub.f32 %v2238_v34, %v14843_v41 }
 0x5b3   :  { %6109 = vmatpush.msrb.mxu3 %v18589_v23  ;;  %7445 = vmatpush.msra.mxu0 %v14784_v2  ;;  %v18645_v23 = vld [vmem:[#allocation127_spill] sm:$0xff]  ;;  %18646 = vst [vmem:[#allocation178_spill] sm:$0xff] %v14824_v14  ;;  %v14826_v2 = vand.u32 4294901760, %v2350_v52 }
 0x5b4   :  { %7495 = vmatpush.msra.mxu1 %v14764_v17  ;;  %5804 = vmatpush.msra.mxu2 %v18645_v23  ;;  %v14828_v17 = vpop.f32.mrf.mxu2  ;;  %18647 = vst [vmem:[#allocation183_spill] sm:$0xff] %v14833_v19 }
 0x5b5   :  { %6111 = vmatpush.msrb.mxu3 %v18592_v20  ;;  %7448 = vmatpush.msra.mxu0 %v14797_v42  ;;  %v2342_v20 = vld [vmem:[%s16470_s2 + $0x598] sm:$0xff]  ;;  %v14846_v42 = vsub.f32 %v2354_v32, %v14809_v57  ;;  %v18650_v32 = vld [vmem:[#allocation80_spill] sm:$0xff]  ;;  %18651 = vst [vmem:[#allocation185_spill] sm:$0xff] %v14864_v16  ;;  %v14869_v18 = vsub.f32 %v2350_v52, %v14826_v2 }
 0x5b6   :  { %7497 = vmatpush.msra.mxu1 %v14775_v21  ;;  %5806 = vmatpush.msra.mxu2 %v18648_v9  ;;  %v14848_v21 = vand.u32 4294901760, %v2346_v3  ;;  %18652 = vst [vmem:[#allocation182_spill] sm:$0xff] %v14866_v37  ;;  %v14871_v38 = vand.u32 4294901760, %v2342_v20  ;;  %v14892_v51 = vpop.f32.mrf.mxu3 }
 0x5b7   :  { %6113 = vmatpush.msrb.mxu3 %v18596_v24  ;;  %7451 = vmatpush.msra.mxu0 %v14814_v43  ;;  %v2230_v24 = vld [vmem:[%s16470_s2 + $0x218] sm:$0xff]  ;;  %18654 = vst [vmem:[#allocation90_spill] sm:$0xff] %v14881_v15 }
 0x5b8   :  { %7499 = vmatpush.msra.mxu1 %v14786_v22  ;;  %5808 = vmatpush.msra.mxu2 %v18650_v32  ;;  %v2338_v22 = vld [vmem:[%s16470_s2 + $0x578] sm:$0xff]  ;;  %v14883_v43 = vand.u32 4294901760, %v2230_v24  ;;  %v14887_v35 = vsub.f32 %v2346_v3, %v14848_v21  ;;  %v14905_v3 = vsub.f32 %v2234_v45, %v14866_v37 }
 0x5b9   :  { %6115 = vmatpush.msrb.mxu3 %v18601_v31  ;;  %7454 = vmatpush.msra.mxu0 %v14833_v19  ;;  %v18653_v31 = vld [vmem:[#allocation73_spill] sm:$0xff]  ;;  %v2334_v19 = vld [vmem:[%s16470_s2 + $0x558] sm:$0xff]  ;;  %v14897_v34 = vand.u32 4294901760, %v2338_v22 }
 0x5ba   :  { %7501 = vmatpush.msra.mxu1 %v14799_v54  ;;  %5814 = vmatmul.f32.vlgmr.msra.gmra.mxu2 %v18653_v31  ;;  %18655 = vst [vmem:[#allocation187_spill] sm:$0xff] %v14883_v43  ;;  %v18656_v31 = vand.u32 4294901760, %v18550_v58  ;;  %v18657_v54 = vperm.slane %v14853_v46, 1  ;;  %v14909_v58 = vsub.f32 %v2342_v20, %v14871_v38  ;;  %v14924_v45 = vsub.f32 %v2230_v24, %v14883_v43 }
 0x5bb   :  { %5927 = vmatmul.f32.gmra.mxu3 %v18326_v0  ;;  %7457 = vmatpush.msra.mxu0 %v14864_v16  ;;  %18658 = vst [vmem:[#allocation184_spill] sm:$0xff] %v14905_v3  ;;  %v18662_v20 = vand.u32 4294901760, %v14846_v42  ;;  %v18679_v16 = vand.u32 4294901760, %v18574_v10 }
 0x5bc   :  { %6038 = vmatpush.msrb.mxu2 %v18656_v31  ;;  %6117 = vmatpush.msrb.mxu3 %v18611_v59  ;;  %v3956_v52 = vadd.f32 %v14514_v1, %v18657_v54  ;;  %18659 = vst [vmem:[#allocation102_spill] sm:$0xff] %v14909_v58  ;;  %v2330_v59 = vld [vmem:[%s16470_s2 + $0x538] sm:$0xff]  ;;  %v14914_v31 = vpop.f32.mrf.mxu2  ;;  %v18660_v1 = vand.u32 4294901760, %v18554_v8  ;;  %v14919_v54 = vand.u32 4294901760, %v2334_v19 }
 0x5bd   :  { %7503 = vmatpush.msra.mxu1 %v14824_v14  ;;  %7460 = vmatpush.msra.mxu0 %v14881_v15  ;;  %18661 = vst [vmem:[#allocation189_spill] sm:$0xff] %v14924_v45  ;;  %v7689_v0 = vsub.f32 %v14846_v42, %v18662_v20  ;;  %v2326_v8 = vld [vmem:[%s16470_s2 + $0x518] sm:$0xff]  ;;  %v14939_v24 = vand.u32 4294901760, %v2330_v59  ;;  %v18665_v20 = vand.u32 4294901760, %v14869_v18  ;;  %v18674_v15 = vand.u32 4294901760, %v14909_v58 }
 0x5be   :  { %6042 = vmatpush.msrb.mxu2 %v18660_v1  ;;  %6119 = vmatpush.msrb.mxu3 %v18615_v40  ;;  %v18663_v40 = vand.u32 4294901760, %v18559_v12  ;;  %v14937_v1 = vsub.f32 %v2338_v22, %v14897_v34  ;;  %v18666_v22 = vand.u32 4294901760, %v18563_v5  ;;  %v18668_v12 = vand.u32 4294901760, %v14887_v35  ;;  %v14968_v5 = vpop.f32.mrf.mxu0 }
 0x5bf   :  { %7505 = vmatpush.msra.mxu1 %v14843_v41  ;;  %v4065_v41 = vadd.f32 %v14518_v36, %v3956_v52  ;;  %7463 = vmatpush.msra.mxu0 %v14905_v3  ;;  %v7695_v14 = vsub.f32 %v14869_v18, %v18665_v20  ;;  %v14955_v36 = vsub.f32 %v2334_v19, %v14919_v54  ;;  %v14957_v52 = vand.u32 4294901760, %v2326_v8  ;;  %v14970_v19 = vpop.f32.mrf.mxu3 }
 0x5c0   :  { %6046 = vmatpush.msrb.mxu2 %v18663_v40  ;;  %6121 = vmatpush.msrb.mxu3 %v18619_v29  ;;  %18664 = vst [vmem:[#allocation88_spill] sm:$0xff] %v14937_v1  ;;  %v2322_v29 = vld [vmem:[%s16470_s2 + $0x4f8] sm:$0xff]  ;;  %v7690_v20 = vand.u32 4294901760, %v7689_v0  ;;  %v14976_v0 = vsub.f32 %v2330_v59, %v14939_v24  ;;  %v18675_v59 = vld [vmem:[#allocation133_spill] sm:$0xff] }
 0x5c1   :  { %7507 = vmatpush.msra.mxu1 %v14866_v37  ;;  %18667 = vst [vmem:[#allocation78_spill] sm:$0xff] %v14955_v36  ;;  %v4123_v40 = vadd.f32 %v14760_v49, %v4065_v41  ;;  %7466 = vmatpush.msra.mxu0 %v14924_v45  ;;  %v7701_v37 = vsub.f32 %v14887_v35, %v18668_v12  ;;  %v14978_v49 = vand.u32 4294901760, %v2322_v29  ;;  %v14980_v12 = vpop.f32.mrf.mxu1  ;;  %v18673_v45 = vld [vmem:[#allocation128_spill] sm:$0xff]  ;;  %v7696_v3 = vand.u32 4294901760, %v7695_v14  ;;  %v2310_v41 = vld [vmem:[%s16470_s2 + $0x498] sm:$0xff] }
 0x5c2   :  { %6050 = vmatpush.msrb.mxu2 %v18666_v22  ;;  %6123 = vmatpush.msrb.mxu3 %v18623_v11  ;;  %v2318_v11 = vld [vmem:[%s16470_s2 + $0x4d8] sm:$0xff]  ;;  %v18669_v22 = vld [vmem:[#allocation72_spill] sm:$0xff]  ;;  %18670 = vst [vmem:[#allocation105_spill] sm:$0xff] %v14976_v0  ;;  %v18678_v14 = vperm.slane %v14853_v46, 1  ;;  %v18680_v46 = vand.u32 4294901760, %v14937_v1 }
 0x5c3   :  { %7509 = vmatpush.msra.mxu1 %v14883_v43  ;;  %5822 = vmatmul.f32.gmra.mxu2 %v18669_v22  ;;  %18671 = vst [vmem:[#allocation186_spill] sm:$0xff] %v14978_v49  ;;  %v18672_v43 = vand.u32 4294901760, %v18569_v27  ;;  %v7707_v22 = vsub.f32 %v14909_v58, %v18674_v15  ;;  %v14995_v27 = vsub.f32 %v2326_v8, %v14957_v52 }
 0x5c4   :  { %6125 = vmatpush.msrb.mxu3 %v18627_v26  ;;  %7469 = vmatmul.f32.vlgmr.msra.gmra.mxu0 %v18673_v45  ;;  %v2314_v26 = vld [vmem:[%s16470_s2 + $0x4b8] sm:$0xff]  ;;  %v3964_v45 = vadd.f32 %v14544_v56, %v18678_v14  ;;  %v4167_v15 = vadd.f32 %v14792_v53, %v4123_v40  ;;  %v15008_v58 = vpop.f32.mrf.mxu2  ;;  %v7713_v56 = vsub.f32 %v14937_v1, %v18680_v46  ;;  %v7724_v53 = vand.u32 4294901760, %v14976_v0 }
 0x5c5   :  { %6054 = vmatpush.msrb.mxu2 %v18672_v43  ;;  %7513 = vmatmul.f32.vlgmr.msra.gmra.mxu1 %v18675_v59  ;;  %18676 = vst [vmem:[#allocation191_spill] sm:$0xff] %v14995_v27  ;;  %v14997_v43 = vand.u32 4294901760, %v2318_v11  ;;  %v7702_v59 = vand.u32 4294901760, %v7701_v37  ;;  %v15017_v10 = vsub.f32 %v2322_v29, %v14978_v49  ;;  %v18683_v37 = vand.u32 4294901760, %v18578_v4  ;;  %v2306_v4 = vld [vmem:[%s16470_s2 + $0x478] sm:$0xff] }
 0x5c6   :  { %7638 = vmatpush.msrb.mxu0 %v14809_v57  ;;  %7691 = vmatpush.msrb.mxu1 %v7690_v20  ;;  %v7708_v8 = vand.u32 4294901760, %v7707_v22  ;;  %v7730_v20 = vand.u32 4294901760, %v14995_v27  ;;  %v15032_v14 = vand.u32 4294901760, %v2310_v41  ;;  %v18687_v22 = vand.u32 4294901760, %v18581_v60 }
 0x5c7   :  { %18677 = vst [vmem:[#allocation112_spill] sm:$0xff] %v14997_v43  ;;  %6058 = vmatpush.msrb.mxu2 %v18679_v16  ;;  %6127 = vmatpush.msrb.mxu3 %v18633_v61  ;;  %v15019_v16 = vand.u32 4294901760, %v2314_v26  ;;  %v18684_v61 = vand.u32 4294901760, %v14955_v36  ;;  %v15030_v29 = vsub.f32 %v2318_v11, %v14997_v43  ;;  %v7714_v11 = vand.u32 4294901760, %v7713_v56  ;;  %v2298_v56 = vld [vmem:[%s16470_s2 + $0x438] sm:$0xff] }
 0x5c8   :  { %7640 = vmatpush.msrb.mxu0 %v14826_v2  ;;  %18681 = vst [vmem:[#allocation188_spill] sm:$0xff] %v15017_v10  ;;  %7697 = vmatpush.msrb.mxu1 %v7696_v3  ;;  %v4069_v3 = vadd.f32 %v14548_v7, %v3964_v45  ;;  %v7725_v46 = vsub.f32 %v14976_v0, %v7724_v53  ;;  %v18689_v60 = vand.u32 4294901760, %v18584_v28  ;;  %v15058_v45 = vpop.f32.mrf.mxu0 }
 0x5c9   :  { %18682 = vst [vmem:[#allocation193_spill] sm:$0xff] %v15019_v16  ;;  %6062 = vmatpush.msrb.mxu2 %v18683_v37  ;;  %6129 = vmatpush.msrb.mxu3 %v18636_v48  ;;  %v7719_v40 = vsub.f32 %v14955_v36, %v18684_v61  ;;  %v4242_v48 = vadd.f32 %v14669_v50, %v4167_v15  ;;  %v7736_v37 = vand.u32 4294901760, %v15017_v10  ;;  %v2302_v50 = vld [vmem:[%s16470_s2 + $0x458] sm:$0xff]  ;;  %v15060_v15 = vpop.f32.mrf.mxu3 }
 0x5ca   :  { %7642 = vmatpush.msrb.mxu0 %v14848_v21  ;;  %18685 = vst [vmem:[#allocation190_spill] sm:$0xff] %v15030_v29  ;;  %7703 = vmatpush.msrb.mxu1 %v7702_v59  ;;  %v15048_v61 = vsub.f32 %v2314_v26, %v15019_v16  ;;  %v4128_v7 = vadd.f32 %v14828_v17, %v4069_v3  ;;  %v17335_v17 = vand.u32 4294901760, %v15030_v29  ;;  %v7726_v3 = vand.u32 4294901760, %v7725_v46 }
 0x5cb   :  { %18686 = vst [vmem:[#allocation108_spill] sm:$0xff] %v15032_v14  ;;  %6066 = vmatpush.msrb.mxu2 %v18687_v22  ;;  %6131 = vmatpush.msrb.mxu3 %v18638_v13  ;;  %v15056_v13 = vand.u32 4294901760, %v2306_v4  ;;  %v7720_v26 = vand.u32 4294901760, %v7719_v40  ;;  %v7731_v59 = vsub.f32 %v14995_v27, %v7730_v20  ;;  %v15069_v28 = vsub.f32 %v2310_v41, %v15032_v14 }
 0x5cc   :  { %7644 = vmatpush.msrb.mxu0 %v14871_v38  ;;  %18688 = vst [vmem:[#allocation195_spill] sm:$0xff] %v15048_v61  ;;  %7709 = vmatpush.msrb.mxu1 %v7708_v8  ;;  %v15074_v8 = vpop.f32.mrf.mxu1  ;;  %v15081_v40 = vpop.f32.mrf.mxu2  ;;  %v18693_v41 = vand.u32 4294901760, %v18590_v39  ;;  %v7737_v22 = vsub.f32 %v15017_v10, %v7736_v37  ;;  %v18696_v46 = vand.u32 4294901760, %v18594_v30  ;;  %v18699_v30 = vand.u32 4294901760, %v18599_v33 }
 0x5cd   :  { %6070 = vmatpush.msrb.mxu2 %v18689_v60  ;;  %18690 = vst [vmem:[#allocation117_spill] sm:$0xff] %v15056_v13  ;;  %6133 = vmatpush.msrb.mxu3 %v18643_v44  ;;  %v4283_v44 = vadd.f32 %v14683_v62, %v4242_v48  ;;  %v17334_v60 = vand.u32 4294901760, %v15048_v61  ;;  %v4173_v62 = vadd.f32 %v14892_v51, %v4128_v7 }
 0x5ce   :  { %7474 = vmatmul.f32.gmra.mxu0 %v18298_v25  ;;  %18691 = vst [vmem:[#allocation192_spill] sm:$0xff] %v15069_v28  ;;  %7519 = vmatmul.f32.gmra.mxu1 %v18300_v47  ;;  %v15079_v25 = vand.u32 4294901760, %v2302_v50  ;;  %v2294_v47 = vld [vmem:[%s16470_s2 + $0x418] sm:$0xff]  ;;  %v15097_v39 = vsub.f32 %v2306_v4, %v15056_v13  ;;  %v7743_v51 = vsub.f32 %v15030_v29, %v17335_v17  ;;  %v7738_v7 = vand.u32 4294901760, %v7737_v22  ;;  %v18751_v17 = vld [vmem:[#allocation200_spill] sm:$0xff] }
 0x5cf   :  { %7646 = vmatpush.msrb.mxu0 %v14897_v34  ;;  %7715 = vmatpush.msrb.mxu1 %v7714_v11  ;;  %v4328_v48 = vadd.f32 %v14914_v31, %v4283_v44  ;;  %v15099_v11 = vand.u32 4294901760, %v2298_v56  ;;  %v17333_v31 = vand.u32 4294901760, %v15069_v28  ;;  %v15112_v4 = vand.u32 4294901760, %v2294_v47 }
 0x5d0   :  { %18692 = vst [vmem:[#allocation120_spill] sm:$0xff] %v15079_v25  ;;  %6074 = vmatpush.msrb.mxu2 %v18693_v41  ;;  %6135 = vmatpush.msrb.mxu3 %v18645_v23  ;;  %v7732_v41 = vand.u32 4294901760, %v7731_v59  ;;  %v15110_v23 = vsub.f32 %v2302_v50, %v15079_v25  ;;  %v17332_v50 = vand.u32 4294901760, %v15097_v39 }
 0x5d1   :  { %7648 = vmatpush.msrb.mxu0 %v14919_v54  ;;  %18694 = vst [vmem:[#allocation194_spill] sm:$0xff] %v15097_v39  ;;  %7721 = vmatpush.msrb.mxu1 %v7720_v26  ;;  %v7749_v26 = vsub.f32 %v15048_v61, %v17334_v60  ;;  %v4437_v59 = vadd.f32 %v14970_v19, %v4328_v48  ;;  %v4654_v33 = vpop.f32.mrf.mxu3  ;;  %v18704_v48 = vld [vmem:[#allocation64_spill] sm:$0xff] }
 0x5d2   :  { %18695 = vst [vmem:[#allocation86_spill] sm:$0xff] %v15099_v11  ;;  %6078 = vmatpush.msrb.mxu2 %v18696_v46  ;;  %6137 = vmatpush.msrb.mxu3 %v18648_v9  ;;  %v4246_v9 = vadd.f32 %v14747_v63, %v4173_v62  ;;  %v15125_v44 = vsub.f32 %v2298_v56, %v15099_v11  ;;  %v18701_v63 = vld [vmem:[#allocation144_spill] sm:$0xff]  ;;  %v17330_v22 = vand.u32 4294901760, %v15110_v23 }
 0x5d3   :  { %7650 = vmatpush.msrb.mxu0 %v14939_v24  ;;  %18697 = vst [vmem:[#allocation196_spill] sm:$0xff] %v15110_v23  ;;  %7727 = vmatpush.msrb.mxu1 %v7726_v3  ;;  %v7744_v3 = vand.u32 4294901760, %v7743_v51  ;;  %v7755_v19 = vsub.f32 %v15069_v28, %v17333_v31  ;;  %v15136_v62 = vsub.f32 %v2294_v47, %v15112_v4  ;;  %v7750_v56 = vand.u32 4294901760, %v7749_v26  ;;  %v18705_v51 = vld [vmem:[#allocation132_spill] sm:$0xff]  ;;  %v18750_v31 = vld [vmem:[#allocation197_spill] sm:$0xff] }
 0x5d4   :  { %18698 = vst [vmem:[#allocation89_spill] sm:$0xff] %v15112_v4  ;;  %6082 = vmatpush.msrb.mxu2 %v18699_v30  ;;  %6139 = vmatpush.msrb.mxu3 %v18650_v32  ;;  %v18702_v32 = vand.u32 4294901760, %v18701_v63  ;;  %v4287_v46 = vadd.f32 %v18704_v48, %v4246_v9  ;;  %v18706_v30 = vld [vmem:[#allocation31_spill] sm:$0xff]  ;;  %v7761_v63 = vsub.f32 %v15097_v39, %v17332_v50  ;;  %v17329_v47 = vand.u32 4294901760, %v15125_v44 }
 0x5d5   :  { %7652 = vmatpush.msrb.mxu0 %v14957_v52  ;;  %18700 = vst [vmem:[#allocation84_spill] sm:$0xff] %v15125_v44  ;;  %7733 = vmatpush.msrb.mxu1 %v7732_v41  ;;  %v4495_v41 = vadd.f32 %v14968_v5, %v4437_v59  ;;  %v18708_v9 = vld [vmem:[#allocation131_spill] sm:$0xff]  ;;  %v18709_v5 = vld [vmem:[#allocation149_spill] sm:$0xff]  ;;  %v7767_v48 = vsub.f32 %v15110_v23, %v17330_v22  ;;  %v18748_v22 = vand.u32 4294901760, %v14955_v36  ;;  %v18929_v36 = vld [vmem:[#allocation182_spill] sm:$0xff] }
 0x5d6   :  { %6141 = vmatmul.f32.vlgmr.msrb.gmra.mxu3 %v18233_v55  ;;  %6086 = vmatpush.msrb.mxu2 %v18702_v32  ;;  %18703 = vst [vmem:[#allocation93_spill] sm:$0xff] %v15136_v62  ;;  %v4617_v32 = vpop.f32.mrf.mxu2  ;;  %v4336_v26 = vadd.f32 %v15008_v58, %v4287_v46  ;;  %v18710_v59 = vand.u32 4294901760, %v18709_v5  ;;  %v7762_v46 = vand.u32 4294901760, %v7761_v63 }
 0x5d7   :  { %6363 = vmatpush.msra.mxu3 %v13519_v6  ;;  %7654 = vmatpush.msrb.mxu0 %v14978_v49  ;;  %v18707_v6 = vand.u32 4294901760, %v18706_v30  ;;  %v4539_v30 = vadd.f32 %v14980_v12, %v4495_v41  ;;  %v18714_v12 = vld [vmem:[#allocation137_spill] sm:$0xff]  ;;  %v7768_v41 = vand.u32 4294901760, %v7767_v48 }
 0x5d8   :  { %7739 = vmatpush.msrb.mxu1 %v7738_v7  ;;  %v7756_v7 = vand.u32 4294901760, %v7755_v19  ;;  %v18712_v19 = vld [vmem:[#allocation92_spill] sm:$0xff]  ;;  %v4441_v5 = vadd.f32 %v15060_v15, %v4336_v26  ;;  %v18717_v26 = vld [vmem:[#allocation25_spill] sm:$0xff] }
 0x5d9   :  { %6365 = vmatpush.msra.mxu3 %v18705_v51  ;;  %6090 = vmatpush.msrb.mxu2 %v18707_v6  ;;  %v17328_v51 = vand.u32 4294901760, %v15136_v62  ;;  %v18713_v58 = vand.u32 4294901760, %v18712_v19  ;;  %v7773_v6 = vsub.f32 %v15125_v44, %v17329_v47  ;;  %v18716_v19 = vld [vmem:[#allocation85_spill] sm:$0xff] }
 0x5da   :  { %7656 = vmatpush.msrb.mxu0 %v14997_v43  ;;  %7745 = vmatpush.msrb.mxu1 %v7744_v3  ;;  %v18711_v3 = vld [vmem:[#allocation136_spill] sm:$0xff] }
 0x5db   :  { %6367 = vmatpush.msra.mxu3 %v18708_v9  ;;  %6094 = vmatpush.msrb.mxu2 %v18710_v59  ;;  %v4699_v9 = vpop.f32.mrf.mxu0  ;;  %v7779_v63 = vsub.f32 %v15136_v62, %v17328_v51  ;;  %v4658_v59 = vpop.f32.mrf.mxu3  ;;  %v7774_v15 = vand.u32 4294901760, %v7773_v6  ;;  %v18722_v6 = vld [vmem:[#allocation23_spill] sm:$0xff] }
 0x5dc   :  { %7658 = vmatpush.msrb.mxu0 %v15019_v16  ;;  %7751 = vmatpush.msrb.mxu1 %v7750_v56  ;;  %v4614_v56 = vadd.f32 %v15081_v40, %v4539_v30  ;;  %v18718_v30 = vld [vmem:[#allocation13_spill] sm:$0xff] }
 0x5dd   :  { %6369 = vmatpush.msra.mxu3 %v18711_v3  ;;  %6098 = vmatpush.msrb.mxu2 %v18713_v58  ;;  %v18715_v3 = vld [vmem:[#allocation143_spill] sm:$0xff]  ;;  %v4500_v58 = vadd.f32 %v15058_v45, %v4441_v5  ;;  %v7780_v51 = vand.u32 4294901760, %v7779_v63  ;;  %v18724_v63 = vld [vmem:[#allocation98_spill] sm:$0xff] }
 0x5de   :  { %7660 = vmatpush.msrb.mxu0 %v15032_v14  ;;  %7757 = vmatpush.msrb.mxu1 %v7756_v7  ;;  %v4808_v7 = vpop.f32.mrf.mxu1  ;;  %v4866_v40 = vpop.f32.mrf.mxu2  ;;  %v4655_v48 = vadd.f32 %v4654_v33, %v4614_v56  ;;  %v18723_v56 = vld [vmem:[#allocation145_spill] sm:$0xff] }
 0x5df   :  { %6100 = vmatmul.f32.vlgmr.msrb.gmra.mxu2 %v18233_v55  ;;  %6145 = vmatmul.f32.gmra.mxu3 %v18714_v12 }
 0x5e0   :  { %6305 = vmatpush.msra.mxu2 %v18715_v3  ;;  %6371 = vmatpush.msra.mxu3 %v18716_v19  ;;  %v18719_v3 = vld [vmem:[#allocation147_spill] sm:$0xff]  ;;  %v4700_v33 = vadd.f32 %v4699_v9, %v4655_v48 }
 0x5e1   :  { %7662 = vmatpush.msrb.mxu0 %v15056_v13  ;;  %7763 = vmatpush.msrb.mxu1 %v7762_v46  ;;  %v18720_v19 = vld [vmem:[#allocation107_spill] sm:$0xff] }
 0x5e2   :  { %6308 = vmatpush.msra.mxu2 %v18717_v26  ;;  %6373 = vmatpush.msra.mxu3 %v18718_v30  ;;  %v18721_v46 = vld [vmem:[#allocation87_spill] sm:$0xff]  ;;  %v4545_v26 = vadd.f32 %v15074_v8, %v4500_v58  ;;  %v18726_v30 = vld [vmem:[#allocation106_spill] sm:$0xff]  ;;  %v4809_v8 = vadd.f32 %v4808_v7, %v4700_v33  ;;  %v18733_v7 = vand.u32 4294901760, %v14887_v35 }
 0x5e3   :  { %7664 = vmatpush.msrb.mxu0 %v15079_v25  ;;  %7769 = vmatpush.msrb.mxu1 %v7768_v41  ;;  %v4707_v45 = vpop.f32.mrf.mxu0  ;;  %v4910_v5 = vpop.f32.mrf.mxu3  ;;  %v18729_v58 = vld [vmem:[#allocation123_spill] sm:$0xff]  ;;  %v18734_v33 = vld [vmem:[#allocation146_spill] sm:$0xff] }
 0x5e4   :  { %6311 = vmatpush.msra.mxu2 %v18719_v3  ;;  %6375 = vmatpush.msra.mxu3 %v18720_v19  ;;  %v4618_v41 = vadd.f32 %v4617_v32, %v4545_v26  ;;  %v18727_v3 = vand.u32 4294901760, %v14846_v42  ;;  %v18730_v32 = vand.u32 4294901760, %v14869_v18  ;;  %v18732_v26 = vld [vmem:[#allocation12_spill] sm:$0xff] }
 0x5e5   :  { %7666 = vmatpush.msrb.mxu0 %v15099_v11  ;;  %7775 = vmatpush.msrb.mxu1 %v7774_v15  ;;  %v18725_v15 = vld [vmem:[#allocation115_spill] sm:$0xff] }
 0x5e6   :  { %6314 = vmatpush.msra.mxu2 %v18721_v46  ;;  %6377 = vmatpush.msra.mxu3 %v18722_v6  ;;  %v4812_v9 = vpop.f32.mrf.mxu1  ;;  %v4871_v48 = vpop.f32.mrf.mxu2  ;;  %v4659_v19 = vadd.f32 %v4658_v59, %v4618_v41  ;;  %v4867_v46 = vadd.f32 %v4866_v40, %v4809_v8  ;;  %v18731_v6 = vld [vmem:[#allocation20_spill] sm:$0xff]  ;;  %v18737_v59 = vld [vmem:[#allocation102_spill] sm:$0xff] }
 0x5e7   :  { %7668 = vmatpush.msrb.mxu0 %v15112_v4  ;;  %7781 = vmatpush.msrb.mxu1 %v7780_v51  ;;  %v18728_v51 = vld [vmem:[#allocation142_spill] sm:$0xff]  ;;  %v18738_v40 = vand.u32 4294901760, %v18737_v59 }
 0x5e8   :  { %6104 = vmatmul.f32.gmra.mxu2 %v18714_v12  ;;  %6379 = vmatpush.msra.mxu3 %v18723_v56  ;;  %v18735_v56 = vld [vmem:[#allocation14_spill] sm:$0xff]  ;;  %v4911_v41 = vadd.f32 %v4910_v5, %v4867_v46  ;;  %v4708_v8 = vadd.f32 %v4707_v45, %v4659_v19  ;;  %v18745_v5 = vld [vmem:[#allocation44_spill] sm:$0xff] }
 0x5e9   :  { %6317 = vmatpush.msra.mxu2 %v18724_v63  ;;  %7674 = vmatmul.f32.vlgmr.msrb.gmra.mxu0 %v18725_v15  ;;  %v17331_v63 = vand.u32 4294901760, %v18735_v56  ;;  %v17336_v19 = vand.u32 4294901760, %v18745_v5 }
 0x5ea   :  { %7783 = vmatmul.f32.vlgmr.msrb.gmra.mxu1 %v18726_v30  ;;  %7898 = vmatpush.msra.mxu0 %v18727_v3  ;;  %v18736_v3 = vld [vmem:[#allocation155_spill] sm:$0xff] }
 0x5eb   :  { %7969 = vmatpush.msra.mxu1 %v14809_v57  ;;  %6320 = vmatpush.msra.mxu2 %v18728_v51  ;;  %v4985_v15 = vpop.f32.mrf.mxu0  ;;  %v18739_v51 = vld [vmem:[#allocation28_spill] sm:$0xff]  ;;  %v6573_v45 = vsub.f32 %v18735_v56, %v17331_v63  ;;  %v18749_v63 = vld [vmem:[#allocation154_spill] sm:$0xff] }
 0x5ec   :  { %6381 = vmatpush.msra.mxu3 %v18729_v58  ;;  %7902 = vmatpush.msra.mxu0 %v18730_v32  ;;  %v18740_v58 = vld [vmem:[#allocation82_spill] sm:$0xff]  ;;  %v4986_v47 = vadd.f32 %v4985_v15, %v4911_v41  ;;  %v17337_v50 = vand.u32 4294901760, %v18749_v63  ;;  %v18752_v15 = vld [vmem:[#allocation139_spill] sm:$0xff] }
 0x5ed   :  { %7971 = vmatpush.msra.mxu1 %v14826_v2  ;;  %6323 = vmatpush.msra.mxu2 %v18731_v6  ;;  %v17338_v32 = vand.u32 4294901760, %v18740_v58  ;;  %v4916_v6 = vpop.f32.mrf.mxu3  ;;  %v18753_v41 = vld [vmem:[#allocation126_spill] sm:$0xff] }
 0x5ee   :  { %6383 = vmatpush.msra.mxu3 %v18732_v26  ;;  %7906 = vmatpush.msra.mxu0 %v18733_v7  ;;  %v18741_v26 = vld [vmem:[#allocation198_spill] sm:$0xff]  ;;  %v18742_v7 = vld [vmem:[#allocation35_spill] sm:$0xff]  ;;  %v5026_v46 = vpop.f32.mrf.mxu1 }
 0x5ef   :  { %7973 = vmatpush.msra.mxu1 %v14848_v21  ;;  %6326 = vmatpush.msra.mxu2 %v18734_v33  ;;  %v18743_v33 = vld [vmem:[#allocation118_spill] sm:$0xff] }
 0x5f0   :  { %6385 = vmatpush.msra.mxu3 %v18736_v3  ;;  %7910 = vmatpush.msra.mxu0 %v18738_v40  ;;  %v18744_v3 = vand.u32 4294901760, %v14937_v1  ;;  %v5071_v40 = vpop.f32.mrf.mxu2 }
 0x5f1   :  { %7975 = vmatpush.msra.mxu1 %v14871_v38  ;;  %6329 = vmatpush.msra.mxu2 %v18739_v51  ;;  %v18746_v51 = vld [vmem:[#allocation152_spill] sm:$0xff] }
 0x5f2   :  { %6387 = vmatpush.msra.mxu3 %v18741_v26  ;;  %7682 = vmatmul.f32.gmra.mxu0 %v18742_v7  ;;  %v4813_v26 = vadd.f32 %v4812_v9, %v4708_v8  ;;  %v18747_v7 = vld [vmem:[#allocation141_spill] sm:$0xff]  ;;  %v6574_v9 = vand.u32 4294901760, %v6573_v45  ;;  %v17339_v8 = vand.u32 4294901760, %v18753_v41  ;;  %v18755_v45 = vld [vmem:[#allocation43_spill] sm:$0xff] }
 0x5f3   :  { %7787 = vmatmul.f32.gmra.mxu1 %v18743_v33  ;;  %7914 = vmatpush.msra.mxu0 %v18744_v3  ;;  %v6579_v3 = vsub.f32 %v18740_v58, %v17338_v32  ;;  %v18759_v32 = vld [vmem:[#allocation201_spill] sm:$0xff] }
 0x5f4   :  { %7977 = vmatpush.msra.mxu1 %v14897_v34  ;;  %6332 = vmatpush.msra.mxu2 %v18746_v51  ;;  %v4872_v60 = vadd.f32 %v4871_v48, %v4813_v26  ;;  %v5027_v51 = vadd.f32 %v5026_v46, %v4986_v47  ;;  %v18756_v26 = vld [vmem:[#allocation21_spill] sm:$0xff]  ;;  %v18757_v46 = vld [vmem:[#allocation199_spill] sm:$0xff] }
 0x5f5   :  { %6389 = vmatpush.msra.mxu3 %v18747_v7  ;;  %7918 = vmatpush.msra.mxu0 %v18748_v22  ;;  %v6585_v22 = vsub.f32 %v18745_v5, %v17336_v19  ;;  %v18754_v7 = vld [vmem:[#allocation202_spill] sm:$0xff]  ;;  %v5180_v48 = vpop.f32.mrf.mxu3 }
 0x5f6   :  { %7979 = vmatpush.msra.mxu1 %v14919_v54  ;;  %6335 = vmatpush.msra.mxu2 %v18750_v31  ;;  %v4989_v31 = vpop.f32.mrf.mxu0  ;;  %v4917_v19 = vadd.f32 %v4916_v6, %v4872_v60  ;;  %v5072_v47 = vadd.f32 %v5071_v40, %v5027_v51  ;;  %v5030_v6 = vpop.f32.mrf.mxu1 }
 0x5f7   :  { %6391 = vmatpush.msra.mxu3 %v18751_v17  ;;  %7922 = vmatpush.msra.mxu0 %v7724_v53  ;;  %v6580_v17 = vand.u32 4294901760, %v6579_v3  ;;  %v6591_v53 = vsub.f32 %v18749_v63, %v17337_v50  ;;  %v18758_v3 = vld [vmem:[#allocation18_spill] sm:$0xff] }
 0x5f8   :  { %7981 = vmatpush.msra.mxu1 %v14939_v24  ;;  %6338 = vmatpush.msra.mxu2 %v18752_v15  ;;  %v17341_v15 = vand.u32 4294901760, %v18756_v26  ;;  %v17342_v50 = vand.u32 4294901760, %v18758_v3  ;;  %v5079_v40 = vpop.f32.mrf.mxu2 }
 0x5f9   :  { %6393 = vmatpush.msra.mxu3 %v18754_v7  ;;  %7926 = vmatpush.msra.mxu0 %v7730_v20  ;;  %v6586_v7 = vand.u32 4294901760, %v6585_v22  ;;  %v6597_v20 = vsub.f32 %v18753_v41, %v17339_v8  ;;  %v6592_v60 = vand.u32 4294901760, %v6591_v53  ;;  %v18761_v22 = vld [vmem:[#allocation156_spill] sm:$0xff]  ;;  %v4990_v8 = vadd.f32 %v4989_v31, %v4917_v19 }
 0x5fa   :  { %7983 = vmatpush.msra.mxu1 %v14957_v52  ;;  %6397 = vmatmul.f32.vlgmr.msra.gmra.mxu3 %v18755_v45  ;;  %v17343_v51 = vand.u32 4294901760, %v18761_v22  ;;  %v18764_v45 = vld [vmem:[#allocation157_spill] sm:$0xff]  ;;  %v18766_v19 = vand.u32 4294901760, %v15069_v28 }
 0x5fb   :  { %6575 = vmatpush.msrb.mxu3 %v6574_v9  ;;  %6341 = vmatpush.msra.mxu2 %v18757_v46  ;;  %v18760_v9 = vand.u32 4294901760, %v15030_v29  ;;  %v5181_v46 = vadd.f32 %v5180_v48, %v5072_v47  ;;  %v6598_v53 = vand.u32 4294901760, %v6597_v20  ;;  %v17345_v29 = vand.u32 4294901760, %v18764_v45  ;;  %v18767_v20 = vld [vmem:[#allocation7_spill] sm:$0xff] }
 0x5fc   :  { %7930 = vmatpush.msra.mxu0 %v7736_v37  ;;  %7985 = vmatpush.msra.mxu1 %v14978_v49  ;;  %v6603_v37 = vsub.f32 %v18756_v26, %v17341_v15  ;;  %v18765_v15 = vld [vmem:[#allocation204_spill] sm:$0xff]  ;;  %v6615_v47 = vsub.f32 %v18761_v22, %v17343_v51  ;;  %v18931_v49 = vld [vmem:[#allocation73_spill] sm:$0xff] }
 0x5fd   :  { %6581 = vmatpush.msrb.mxu3 %v6580_v17  ;;  %6344 = vmatpush.msra.mxu2 %v18759_v32  ;;  %v18762_v17 = vld [vmem:[#allocation203_spill] sm:$0xff]  ;;  %v18763_v32 = vand.u32 4294901760, %v15048_v61  ;;  %v18770_v51 = vld [vmem:[#allocation76_spill] sm:$0xff] }
 0x5fe   :  { %7934 = vmatpush.msra.mxu0 %v18760_v9  ;;  %7987 = vmatpush.msra.mxu1 %v14997_v43  ;;  %v6609_v9 = vsub.f32 %v18758_v3, %v17342_v50  ;;  %v5238_v48 = vpop.f32.mrf.mxu0  ;;  %v6604_v31 = vand.u32 4294901760, %v6603_v37  ;;  %v18769_v50 = vld [vmem:[#allocation94_spill] sm:$0xff]  ;;  %v6621_v37 = vsub.f32 %v18764_v45, %v17345_v29 }
 0x5ff   :  { %6587 = vmatpush.msrb.mxu3 %v6586_v7  ;;  %6347 = vmatpush.msra.mxu2 %v18762_v17  ;;  %v5031_v7 = vadd.f32 %v5030_v6, %v4990_v8  ;;  %v18768_v17 = vld [vmem:[#allocation15_spill] sm:$0xff]  ;;  %v18774_v29 = vld [vmem:[#allocation26_spill] sm:$0xff] }
 0x600   :  { %7938 = vmatpush.msra.mxu0 %v18763_v32  ;;  %7989 = vmatpush.msra.mxu1 %v15019_v16  ;;  %v5239_v32 = vadd.f32 %v5238_v48, %v5181_v46  ;;  %v2414_v46 = vld [vmem:[%s16470_s2 + $0x7d8] sm:$0xff]  ;;  %v5282_v48 = vpop.f32.mrf.mxu1  ;;  %v18779_v8 = vld [vmem:[#allocation163_spill] sm:$0xff] }
 0x601   :  { %6593 = vmatpush.msrb.mxu3 %v6592_v60  ;;  %6350 = vmatpush.msra.mxu2 %v18765_v15  ;;  %v2418_v15 = vld [vmem:[%s16470_s2 + $0x7f8] sm:$0xff]  ;;  %v5184_v60 = vpop.f32.mrf.mxu3  ;;  %v5080_v6 = vadd.f32 %v5079_v40, %v5031_v7  ;;  %v18775_v40 = vand.u32 4294901760, %v15110_v23 }
 0x602   :  { %7942 = vmatpush.msra.mxu0 %v18766_v19  ;;  %7991 = vmatpush.msra.mxu1 %v15032_v14  ;;  %v6610_v19 = vand.u32 4294901760, %v6609_v9  ;;  %v5357_v9 = vpop.f32.mrf.mxu2  ;;  %v15299_v28 = vand.u32 4294901760, %v2418_v15  ;;  %v5283_v7 = vadd.f32 %v5282_v48, %v5239_v32 }
 0x603   :  { %6353 = vmatmul.f32.vlgmr.msra.gmra.mxu2 %v18767_v20  ;;  %6403 = vmatmul.f32.gmra.mxu3 %v18768_v17  ;;  %v18771_v20 = vand.u32 4294901760, %v15097_v39  ;;  %v18772_v17 = vld [vmem:[#allocation148_spill] sm:$0xff]  ;;  %v18776_v39 = vld [vmem:[#allocation91_spill] sm:$0xff] }
 0x604   :  { %6522 = vmatpush.msrb.mxu2 %v18769_v50  ;;  %6599 = vmatpush.msrb.mxu3 %v6598_v53  ;;  %v6616_v53 = vand.u32 4294901760, %v6615_v47  ;;  %18773 = vst [vmem:[#allocation96_spill] sm:$0xff] %v15299_v28  ;;  %v18777_v47 = vand.u32 4294901760, %v18770_v51  ;;  %v5358_v32 = vadd.f32 %v5357_v9, %v5283_v7  ;;  %v15323_v48 = vsub.f32 %v2418_v15, %v15299_v28 }
 0x605   :  { %7946 = vmatpush.msra.mxu0 %v18771_v20  ;;  %7993 = vmatpush.msra.mxu1 %v15056_v13  ;;  %v2410_v20 = vld [vmem:[%s16470_s2 + $0x7b8] sm:$0xff]  ;;  %v15312_v13 = vand.u32 4294901760, %v2414_v46  ;;  %v18786_v9 = vand.u32 4294901760, %v15136_v62  ;;  %v18791_v62 = vld [vmem:[#allocation99_spill] sm:$0xff] }
 0x606   :  { %6524 = vmatpush.msrb.mxu2 %v18772_v17  ;;  %6605 = vmatpush.msrb.mxu3 %v6604_v31  ;;  %v6622_v31 = vand.u32 4294901760, %v6621_v37  ;;  %v6627_v61 = vsub.f32 %v18770_v51, %v18777_v47  ;;  %v18781_v37 = vld [vmem:[#allocation151_spill] sm:$0xff]  ;;  %18782 = vst [vmem:[#allocation129_spill] sm:$0xff] %v15323_v48  ;;  %v18783_v47 = vand.u32 4294901760, %v18774_v29  ;;  %v5243_v7 = vpop.f32.mrf.mxu0 }
 0x607   :  { %7950 = vmatpush.msra.mxu0 %v18775_v40  ;;  %7995 = vmatpush.msra.mxu1 %v15079_v25  ;;  %18778 = vst [vmem:[#allocation95_spill] sm:$0xff] %v15312_v13  ;;  %v5185_v40 = vadd.f32 %v5184_v60, %v5080_v6  ;;  %v18780_v25 = vand.u32 4294901760, %v15125_v44  ;;  %v15328_v6 = vand.u32 4294901760, %v2410_v20 }
 0x608   :  { %6526 = vmatpush.msrb.mxu2 %v18776_v39  ;;  %6611 = vmatpush.msrb.mxu3 %v6610_v19  ;;  %v2406_v19 = vld [vmem:[%s16470_s2 + $0x798] sm:$0xff]  ;;  %v6633_v60 = vsub.f32 %v18774_v29, %v18783_v47  ;;  %v6628_v15 = vand.u32 4294901760, %v6627_v61  ;;  %v18789_v47 = vand.u32 4294901760, %v18779_v8 }
 0x609   :  { %7954 = vmatpush.msra.mxu0 %v18780_v25  ;;  %7997 = vmatpush.msra.mxu1 %v15099_v11  ;;  %18784 = vst [vmem:[#allocation100_spill] sm:$0xff] %v15328_v6  ;;  %v18785_v25 = vld [vmem:[#allocation11_spill] sm:$0xff]  ;;  %v5398_v44 = vpop.f32.mrf.mxu3  ;;  %v18787_v11 = vld [vmem:[#allocation36_spill] sm:$0xff]  ;;  %v15341_v14 = vand.u32 4294901760, %v2406_v19  ;;  %v18792_v61 = vld [vmem:[#allocation166_spill] sm:$0xff] }
 0x60a   :  { %6528 = vmatpush.msrb.mxu2 %v18781_v37  ;;  %6617 = vmatpush.msrb.mxu3 %v6616_v53  ;;  %v15336_v53 = vsub.f32 %v2414_v46, %v15312_v13  ;;  %v6639_v10 = vsub.f32 %v18779_v8, %v18789_v47  ;;  %v5399_v23 = vadd.f32 %v5398_v44, %v5358_v32  ;;  %v6634_v46 = vand.u32 4294901760, %v6633_v60  ;;  %v2398_v44 = vld [vmem:[%s16470_s2 + $0x758] sm:$0xff] }
 0x60b   :  { %7958 = vmatpush.msra.mxu0 %v18786_v9  ;;  %7999 = vmatpush.msra.mxu1 %v15112_v4  ;;  %18790 = vst [vmem:[#allocation97_spill] sm:$0xff] %v15341_v14  ;;  %v2402_v9 = vld [vmem:[%s16470_s2 + $0x778] sm:$0xff]  ;;  %v15352_v47 = vsub.f32 %v2410_v20, %v15328_v6  ;;  %v18794_v4 = vand.u32 4294901760, %v18785_v25  ;;  %v15366_v60 = vsub.f32 %v2406_v19, %v15341_v14  ;;  %v18800_v16 = vand.u32 4294901760, %v18792_v61 }
 0x60c   :  { %6358 = vmatmul.f32.gmra.mxu2 %v18787_v11  ;;  %6623 = vmatpush.msrb.mxu3 %v6622_v31  ;;  %18788 = vst [vmem:[#allocation110_spill] sm:$0xff] %v15336_v53  ;;  %v5244_v31 = vadd.f32 %v5243_v7, %v5185_v40  ;;  %v18795_v40 = vld [vmem:[#allocation158_spill] sm:$0xff]  ;;  %v15362_v32 = vand.u32 4294901760, %v2402_v9  ;;  %v6640_v20 = vand.u32 4294901760, %v6639_v10  ;;  %v5361_v7 = vpop.f32.mrf.mxu2  ;;  %9516 = vtanh.f32 %v5399_v23  ;;  %v18802_v23 = vld [vmem:[#allocation40_spill] sm:$0xff] }
 0x60d   :  { %6530 = vmatpush.msrb.mxu2 %v18791_v62  ;;  %7960 = vmatmul.f32.vlgmr.msra.gmra.mxu0 %v18726_v30  ;;  %18793 = vst [vmem:[#allocation109_spill] sm:$0xff] %v15352_v47  ;;  %v6645_v27 = vsub.f32 %v18785_v25, %v18794_v4  ;;  %v18798_v4 = vld [vmem:[#allocation165_spill] sm:$0xff]  ;;  %v6651_v0 = vsub.f32 %v18792_v61, %v18800_v16  ;;  %v2394_v10 = vld [vmem:[%s16470_s2 + $0x738] sm:$0xff] }
 0x60e   :  { %8001 = vmatmul.f32.vlgmr.msra.gmra.mxu1 %v18726_v30  ;;  %8165 = vmatpush.msrb.mxu0 %v15323_v48  ;;  %18796 = vst [vmem:[#allocation104_spill] sm:$0xff] %v15362_v32  ;;  %v5288_v30 = vpop.f32.mrf.mxu1  ;;  %v18799_v48 = vld [vmem:[#allocation150_spill] sm:$0xff]  ;;  %v15393_v11 = vand.u32 4294901760, %v2394_v10 }
 0x60f   :  { %8223 = vmatpush.msrb.mxu1 %v15299_v28  ;;  %6532 = vmatpush.msrb.mxu2 %v18795_v40  ;;  %18797 = vst [vmem:[#allocation114_spill] sm:$0xff] %v15366_v60  ;;  %v5289_v28 = vadd.f32 %v5288_v30, %v5244_v31  ;;  %v6646_v19 = vand.u32 4294901760, %v6645_v27  ;;  %v15384_v30 = vsub.f32 %v2402_v9, %v15362_v32  ;;  %v2390_v16 = vld [vmem:[%s16470_s2 + $0x718] sm:$0xff] }
 0x610   :  { %6629 = vmatpush.msrb.mxu3 %v6628_v15  ;;  %8168 = vmatpush.msrb.mxu0 %v15336_v53  ;;  %v15374_v15 = vand.u32 4294901760, %v2398_v44  ;;  %18806 = vst [vmem:[#allocation122_spill] sm:$0xff] %v15393_v11  ;;  %v2382_v53 = vld [vmem:[%s16470_s2 + $0x6d8] sm:$0xff] }
 0x611   :  { %8225 = vmatpush.msrb.mxu1 %v15312_v13  ;;  %6534 = vmatpush.msrb.mxu2 %v18799_v48  ;;  %v18803_v13 = vld [vmem:[#allocation111_spill] sm:$0xff]  ;;  %v5362_v31 = vadd.f32 %v5361_v7, %v5289_v28  ;;  %18804 = vst [vmem:[#allocation116_spill] sm:$0xff] %v15384_v30  ;;  %v6652_v28 = vand.u32 4294901760, %v6651_v0  ;;  %v5402_v7 = vpop.f32.mrf.mxu3 }
 0x612   :  { %18801 = vst [vmem:[#allocation113_spill] sm:$0xff] %v15374_v15  ;;  %6635 = vmatpush.msrb.mxu3 %v6634_v46  ;;  %8171 = vmatpush.msrb.mxu0 %v15352_v47  ;;  %v18805_v46 = vand.u32 4294901760, %v18798_v4  ;;  %v15398_v9 = vsub.f32 %v2398_v44, %v15374_v15  ;;  %v15404_v47 = vand.u32 4294901760, %v2390_v16  ;;  %v18812_v44 = vld [vmem:[#allocation47_spill] sm:$0xff] }
 0x613   :  { %8227 = vmatpush.msrb.mxu1 %v15328_v6  ;;  %6536 = vmatpush.msrb.mxu2 %v18803_v13  ;;  %v18807_v6 = vld [vmem:[#allocation124_spill] sm:$0xff]  ;;  %v5403_v0 = vadd.f32 %v5402_v7, %v5362_v31  ;;  %v2378_v7 = vld [vmem:[%s16470_s2 + $0x6b8] sm:$0xff] }
 0x614   :  { %6641 = vmatpush.msrb.mxu3 %v6640_v20  ;;  %8174 = vmatpush.msrb.mxu0 %v15366_v60  ;;  %v6657_v27 = vsub.f32 %v18798_v4, %v18805_v46  ;;  %18808 = vst [vmem:[#allocation119_spill] sm:$0xff] %v15398_v9  ;;  %v18809_v20 = vand.u32 4294901760, %v18802_v23  ;;  %v2386_v46 = vld [vmem:[%s16470_s2 + $0x6f8] sm:$0xff] }
 0x615   :  { %8229 = vmatpush.msrb.mxu1 %v15341_v14  ;;  %6538 = vmatpush.msrb.mxu2 %v18807_v6  ;;  %18810 = vst [vmem:[#allocation121_spill] sm:$0xff] %v15404_v47  ;;  %v15409_v14 = vpop.eup %9516  ;;  %v15422_v31 = vand.u32 4294901760, %v2386_v46  ;;  %9518 = vtanh.f32 %v5403_v0  ;;  %v2374_v0 = vld [vmem:[%s16470_s2 + $0x698] sm:$0xff] }
 0x616   :  { %6647 = vmatpush.msrb.mxu3 %v6646_v19  ;;  %7964 = vmatmul.f32.gmra.mxu0 %v18743_v33  ;;  %v6663_v60 = vsub.f32 %v18802_v23, %v18809_v20  ;;  %18811 = vst [vmem:[#allocation101_spill] sm:$0xff] %v15409_v14  ;;  %v6658_v19 = vand.u32 4294901760, %v6657_v27  ;;  %v15416_v20 = vsub.f32 %v2394_v10, %v15393_v11  ;;  %v18816_v10 = vld [vmem:[#allocation159_spill] sm:$0xff] }
 0x617   :  { %8005 = vmatmul.f32.gmra.mxu1 %v18743_v33  ;;  %8177 = vmatpush.msrb.mxu0 %v15384_v30  ;;  %18814 = vst [vmem:[#allocation134_spill] sm:$0xff] %v15422_v31  ;;  %v15428_v27 = vsub.f32 %v2390_v16, %v15404_v47  ;;  %v15442_v16 = vsub.f32 %v2386_v46, %v15422_v31  ;;  %v18823_v46 = vld [vmem:[#allocation160_spill] sm:$0xff] }
 0x618   :  { %8231 = vmatpush.msrb.mxu1 %v15362_v32  ;;  %6540 = vmatpush.msrb.mxu2 %v18812_v44  ;;  %18813 = vst [vmem:[#allocation127_spill] sm:$0xff] %v15416_v20  ;;  %v6664_v33 = vand.u32 4294901760, %v6663_v60  ;;  %v18818_v60 = vld [vmem:[#allocation161_spill] sm:$0xff] }
 0x619   :  { %6653 = vmatpush.msrb.mxu3 %v6652_v28  ;;  %8180 = vmatpush.msrb.mxu0 %v15398_v9  ;;  %18815 = vst [vmem:[#allocation80_spill] sm:$0xff] %v15428_v27  ;;  %v15433_v28 = vand.u32 4294901760, %v2382_v53 }
 0x61a   :  { %8233 = vmatpush.msrb.mxu1 %v15374_v15  ;;  %8417 = vrot.lane.b32.xlu1 %v15409_v14, %s9560_s8  ;;  %18819 = vst [vmem:[#allocation133_spill] sm:$0xff] %v15442_v16  ;;  %v15457_v15 = vand.u32 4294901760, %v2374_v0 }
 0x61b   :  { %8423 = vrot.lane.b32.xlu2 %v15409_v14, %s9561_s9  ;;  %6542 = vmatpush.msrb.mxu2 %v18816_v10  ;;  %18817 = vst [vmem:[#allocation128_spill] sm:$0xff] %v15433_v28  ;;  %v15448_v14 = vand.u32 4294901760, %v2378_v7  ;;  %v15462_v32 = vpop.eup %9518 }
 0x61c   :  { %6659 = vmatpush.msrb.mxu3 %v6658_v19  ;;  %8183 = vmatpush.msrb.mxu0 %v15416_v20  ;;  %v18821_v19 = vld [vmem:[#allocation125_spill] sm:$0xff]  ;;  %18824 = vst [vmem:[#allocation132_spill] sm:$0xff] %v15457_v15 }
 0x61d   :  { %8235 = vmatpush.msrb.mxu1 %v15393_v11  ;;  %6544 = vmatpush.msrb.mxu2 %v18818_v60  ;;  %18820 = vst [vmem:[#allocation144_spill] sm:$0xff] %v15448_v14  ;;  %v15453_v11 = vsub.f32 %v2382_v53, %v15433_v28  ;;  %v18826_v53 = vld [vmem:[#allocation50_spill] sm:$0xff] }
 0x61e   :  { %6665 = vmatpush.msrb.mxu3 %v6664_v33  ;;  %8186 = vmatpush.msrb.mxu0 %v15428_v27  ;;  %v2370_v33 = vld [vmem:[%s16470_s2 + $0x678] sm:$0xff]  ;;  %18825 = vst [vmem:[#allocation31_spill] sm:$0xff] %v15462_v32 }
 0x61f   :  { %8237 = vmatpush.msrb.mxu1 %v15404_v47  ;;  %6667 = vmatmul.f32.vlgmr.msrb.gmra.mxu3 %v18821_v19  ;;  %18822 = vst [vmem:[#allocation64_spill] sm:$0xff] %v15453_v11  ;;  %v2366_v47 = vld [vmem:[%s16470_s2 + $0x658] sm:$0xff]  ;;  %v15476_v27 = vand.u32 4294901760, %v2370_v33 }
 0x620   :  { %6853 = vmatpush.msra.mxu3 %v18769_v50  ;;  %6546 = vmatpush.msrb.mxu2 %v18823_v46  ;;  %v15469_v50 = vsub.f32 %v2378_v7, %v15448_v14  ;;  %v2362_v7 = vld [vmem:[%s16470_s2 + $0x638] sm:$0xff] }
 0x621   :  { %8189 = vmatpush.msrb.mxu0 %v15442_v16  ;;  %8239 = vmatpush.msrb.mxu1 %v15422_v31  ;;  %18828 = vst [vmem:[#allocation149_spill] sm:$0xff] %v15476_v27  ;;  %v18830_v31 = vld [vmem:[#allocation6_spill] sm:$0xff]  ;;  %v15502_v16 = vand.u32 4294901760, %v2362_v7 }
 0x622   :  { %6855 = vmatpush.msra.mxu3 %v18772_v17  ;;  %6548 = vmatpush.msrb.mxu2 %v18826_v53  ;;  %18827 = vst [vmem:[#allocation131_spill] sm:$0xff] %v15469_v50  ;;  %v15482_v17 = vsub.f32 %v2374_v0, %v15457_v15  ;;  %v18832_v0 = vld [vmem:[#allocation8_spill] sm:$0xff] }
 0x623   :  { %8192 = vmatpush.msrb.mxu0 %v15453_v11  ;;  %8241 = vmatpush.msrb.mxu1 %v15433_v28  ;;  %v15490_v28 = vand.u32 4294901760, %v2366_v47  ;;  %v15500_v11 = vsub.f32 %v2370_v33, %v15476_v27  ;;  %18834 = vst [vmem:[#allocation143_spill] sm:$0xff] %v15502_v16  ;;  %v15519_v33 = vsub.f32 %v2362_v7, %v15502_v16  ;;  %v18869_v7 = vld [vmem:[#allocation168_spill] sm:$0xff] }
 0x624   :  { %6857 = vmatpush.msra.mxu3 %v18776_v39  ;;  %8425 = vrot.lane.b32.xlu0 %v15462_v32, %s9561_s9  ;;  %18829 = vst [vmem:[#allocation136_spill] sm:$0xff] %v15482_v17  ;;  %v2358_v39 = vld [vmem:[%s16470_s2 + $0x618] sm:$0xff] }
 0x625   :  { %8419 = vrot.lane.b32.xlu2 %v15462_v32, %s9560_s8  ;;  %6550 = vmatpush.msrb.mxu2 %v18830_v31  ;;  %18831 = vst [vmem:[#allocation92_spill] sm:$0xff] %v15490_v28  ;;  %v15509_v20 = vsub.f32 %v2366_v47, %v15490_v28  ;;  %v15511_v9 = vand.u32 4294901760, %v2358_v39  ;;  %v18847_v47 = vld [vmem:[#allocation130_spill] sm:$0xff] }
 0x626   :  { %8195 = vmatpush.msrb.mxu0 %v15469_v50  ;;  %8243 = vmatpush.msrb.mxu1 %v15448_v14  ;;  %18833 = vst [vmem:[#allocation137_spill] sm:$0xff] %v15500_v11  ;;  %v18835_v50 = vld [vmem:[#allocation57_spill] sm:$0xff]  ;;  %v18836_v14 = vld [vmem:[#allocation138_spill] sm:$0xff] }
 0x627   :  { %6859 = vmatpush.msra.mxu3 %v18781_v37  ;;  %6552 = vmatpush.msrb.mxu2 %v18832_v0  ;;  %18837 = vst [vmem:[#allocation85_spill] sm:$0xff] %v15509_v20  ;;  %v18839_v37 = vand.u32 4294901760, %v18735_v56  ;;  %v15527_v56 = vsub.f32 %v2358_v39, %v15511_v9  ;;  %v18870_v39 = vld [vmem:[#allocation17_spill] sm:$0xff] }
 0x628   :  { %8198 = vmatpush.msrb.mxu0 %v15482_v17  ;;  %8245 = vmatpush.msrb.mxu1 %v15457_v15  ;;  %18838 = vst [vmem:[#allocation25_spill] sm:$0xff] %v15511_v9  ;;  %v18920_v15 = vld [vmem:[#allocation66_spill] sm:$0xff]  ;;  %v18925_v17 = vld [vmem:[#allocation181_spill] sm:$0xff] }
 0x629   :  { %6558 = vmatmul.f32.vlgmr.msrb.gmra.mxu2 %v18835_v50  ;;  %6671 = vmatmul.f32.gmra.mxu3 %v18836_v14  ;;  %18840 = vst [vmem:[#allocation13_spill] sm:$0xff] %v15519_v33  ;;  %v18841_v50 = vand.u32 4294901760, %v18740_v58  ;;  %v18844_v58 = vand.u32 4294901760, %v18749_v63  ;;  %v18849_v63 = vand.u32 4294901760, %v18756_v26  ;;  %v18854_v26 = vld [vmem:[#allocation70_spill] sm:$0xff] }
 0x62a   :  { %6782 = vmatpush.msra.mxu2 %v18839_v37  ;;  %6861 = vmatpush.msra.mxu3 %v18791_v62  ;;  %18842 = vst [vmem:[#allocation147_spill] sm:$0xff] %v15527_v56  ;;  %v18843_v62 = vand.u32 4294901760, %v18745_v5  ;;  %v18845_v5 = vld [vmem:[#allocation177_spill] sm:$0xff]  ;;  %v18874_v37 = vld [vmem:[#allocation103_spill] sm:$0xff] }
 0x62b   :  { %8201 = vmatpush.msrb.mxu0 %v15500_v11  ;;  %8247 = vmatpush.msrb.mxu1 %v15476_v27  ;;  %v18919_v27 = vld [vmem:[#allocation189_spill] sm:$0xff]  ;;  %v18923_v11 = vld [vmem:[#allocation172_spill] sm:$0xff] }
 0x62c   :  { %6786 = vmatpush.msra.mxu2 %v18841_v50  ;;  %6863 = vmatpush.msra.mxu3 %v18795_v40  ;;  %v18848_v40 = vld [vmem:[#allocation135_spill] sm:$0xff]  ;;  %v18851_v50 = vand.u32 4294901760, %v18761_v22  ;;  %v18857_v22 = vand.u32 4294901760, %v18779_v8  ;;  %v18864_v8 = vld [vmem:[#allocation30_spill] sm:$0xff] }
 0x62d   :  { %8204 = vmatpush.msrb.mxu0 %v15509_v20  ;;  %8249 = vmatpush.msrb.mxu1 %v15490_v28  ;;  %v18918_v28 = vld [vmem:[#allocation52_spill] sm:$0xff] }
 0x62e   :  { %6790 = vmatpush.msra.mxu2 %v18843_v62  ;;  %6865 = vmatpush.msra.mxu3 %v18799_v48  ;;  %v18846_v48 = vand.u32 4294901760, %v18753_v41  ;;  %v18852_v41 = vand.u32 4294901760, %v18764_v45  ;;  %v18858_v45 = vld [vmem:[#allocation162_spill] sm:$0xff]  ;;  %v18875_v62 = vld [vmem:[#allocation65_spill] sm:$0xff] }
 0x62f   :  { %8413 = vrot.lane.b32.xlu0 %v15462_v32, %s9559_s0  ;;  %8207 = vmatpush.msrb.mxu0 %v15519_v33 }
 0x630   :  { %8251 = vmatpush.msrb.mxu1 %v15502_v16  ;;  %6794 = vmatpush.msra.mxu2 %v18844_v58  ;;  %v18876_v58 = vld [vmem:[#allocation10_spill] sm:$0xff] }
 0x631   :  { %6867 = vmatpush.msra.mxu3 %v18803_v13  ;;  %8210 = vmatpush.msrb.mxu0 %v15527_v56  ;;  %v18850_v13 = vand.u32 4294901760, %v18758_v3  ;;  %v18856_v3 = vand.u32 4294901760, %v18774_v29  ;;  %v18862_v29 = vld [vmem:[#allocation32_spill] sm:$0xff]  ;;  %v18921_v56 = vld [vmem:[#allocation170_spill] sm:$0xff] }
 0x632   :  { %8253 = vmatpush.msrb.mxu1 %v15511_v9  ;;  %6566 = vmatmul.f32.gmra.mxu2 %v18845_v5  ;;  %v18915_v5 = vld [vmem:[#allocation81_spill] sm:$0xff] }
 0x633   :  { %6798 = vmatpush.msra.mxu2 %v18846_v48  ;;  %6869 = vmatpush.msra.mxu3 %v18807_v6  ;;  %v18853_v6 = vld [vmem:[#allocation140_spill] sm:$0xff]  ;;  %v18877_v48 = vld [vmem:[#allocation49_spill] sm:$0xff] }
 0x634   :  { %8213 = vmatmul.f32.vlgmr.msrb.gmra.mxu0 %v18847_v47  ;;  %8257 = vmatmul.f32.vlgmr.msrb.gmra.mxu1 %v18848_v40  ;;  %v18878_v47 = vld [vmem:[#allocation169_spill] sm:$0xff]  ;;  %v18879_v40 = vld [vmem:[#allocation34_spill] sm:$0xff] }
 0x635   :  { %6802 = vmatpush.msra.mxu2 %v18849_v63  ;;  %6871 = vmatpush.msra.mxu3 %v18812_v44  ;;  %v18855_v44 = vand.u32 4294901760, %v18770_v51  ;;  %v18860_v51 = vld [vmem:[#allocation22_spill] sm:$0xff]  ;;  %v18880_v63 = vld [vmem:[#allocation37_spill] sm:$0xff] }
 0x637   :  { %6806 = vmatpush.msra.mxu2 %v18850_v13  ;;  %6873 = vmatpush.msra.mxu3 %v18816_v10  ;;  %v18859_v10 = vand.u32 4294901760, %v18785_v25  ;;  %v18866_v25 = vld [vmem:[#allocation164_spill] sm:$0xff]  ;;  %v17412_v13 = vand.u32 4294901760, %v18880_v63 }
 0x639   :  { %6810 = vmatpush.msra.mxu2 %v18851_v50  ;;  %6875 = vmatpush.msra.mxu3 %v18818_v60  ;;  %v18861_v60 = vand.u32 4294901760, %v18792_v61  ;;  %v18868_v61 = vld [vmem:[#allocation53_spill] sm:$0xff]  ;;  %v18881_v50 = vld [vmem:[#allocation48_spill] sm:$0xff] }
 0x63b   :  { %6814 = vmatpush.msra.mxu2 %v18852_v41  ;;  %6877 = vmatpush.msra.mxu3 %v18823_v46  ;;  %v18865_v46 = vand.u32 4294901760, %v18802_v23  ;;  %v18873_v23 = vld [vmem:[#allocation62_spill] sm:$0xff]  ;;  %v18882_v41 = vld [vmem:[#allocation51_spill] sm:$0xff] }
 0x63c   :  { %8218 = vmatmul.f32.gmra.mxu0 %v18853_v6  ;;  %8263 = vmatmul.f32.gmra.mxu1 %v18854_v26  ;;  %v18883_v6 = vld [vmem:[#allocation71_spill] sm:$0xff] }
 0x63d   :  { %6818 = vmatpush.msra.mxu2 %v18855_v44  ;;  %6879 = vmatpush.msra.mxu3 %v18826_v53  ;;  %v18867_v53 = vld [vmem:[#allocation167_spill] sm:$0xff]  ;;  %v17411_v26 = vand.u32 4294901760, %v18883_v6 }
 0x63e   :  { %v18884_v44 = vld [vmem:[#allocation67_spill] sm:$0xff] }
 0x63f   :  { %6822 = vmatpush.msra.mxu2 %v18856_v3  ;;  %6881 = vmatpush.msra.mxu3 %v18830_v31  ;;  %v18863_v31 = vand.u32 4294901760, %v18798_v4  ;;  %v18871_v4 = vld [vmem:[#allocation42_spill] sm:$0xff]  ;;  %v18885_v3 = vld [vmem:[#allocation9_spill] sm:$0xff] }
 0x641   :  { %6826 = vmatpush.msra.mxu2 %v18857_v22  ;;  %6883 = vmatpush.msra.mxu3 %v18832_v0  ;;  %v18872_v0 = vld [vmem:[#allocation38_spill] sm:$0xff]  ;;  %v7317_v22 = vsub.f32 %v18880_v63, %v17412_v13  ;;  %v18913_v13 = vld [vmem:[#allocation55_spill] sm:$0xff] }
 0x642   :  { %6885 = vmatmul.f32.vlgmr.msra.gmra.mxu3 %v18821_v19 }
 0x643   :  { %7107 = vmatpush.msrb.mxu3 %v18858_v45  ;;  %6830 = vmatpush.msra.mxu2 %v18859_v10  ;;  %v18886_v45 = vld [vmem:[#allocation63_spill] sm:$0xff] }
 0x644   :  { %v17409_v10 = vand.u32 4294901760, %v18886_v45 }
 0x645   :  { %7109 = vmatpush.msrb.mxu3 %v18860_v51  ;;  %6834 = vmatpush.msra.mxu2 %v18861_v60  ;;  %v18887_v51 = vld [vmem:[#allocation41_spill] sm:$0xff]  ;;  %v18888_v60 = vld [vmem:[#allocation54_spill] sm:$0xff] }
 0x647   :  { %7111 = vmatpush.msrb.mxu3 %v18862_v29  ;;  %6838 = vmatpush.msra.mxu2 %v18863_v31  ;;  %v7323_v29 = vsub.f32 %v18883_v6, %v17411_v26  ;;  %v18889_v31 = vld [vmem:[#allocation69_spill] sm:$0xff] }
 0x649   :  { %7113 = vmatpush.msrb.mxu3 %v18864_v8  ;;  %6842 = vmatpush.msra.mxu2 %v18865_v46  ;;  %v17408_v8 = vand.u32 4294901760, %v18889_v31  ;;  %v18890_v46 = vld [vmem:[#allocation77_spill] sm:$0xff] }
 0x64a   :  { %6844 = vmatmul.f32.vlgmr.msra.gmra.mxu2 %v18821_v19  ;;  %6889 = vmatmul.f32.gmra.mxu3 %v18836_v14  ;;  %v17443_v19 = vand.u32 4294901760, %v18919_v27 }
 0x64b   :  { %7049 = vmatpush.msrb.mxu2 %v18866_v25  ;;  %7115 = vmatpush.msrb.mxu3 %v18867_v53  ;;  %v18891_v25 = vld [vmem:[#allocation58_spill] sm:$0xff]  ;;  %v7318_v53 = vand.u32 4294901760, %v7317_v22 }
 0x64d   :  { %7052 = vmatpush.msrb.mxu2 %v18868_v61  ;;  %7117 = vmatpush.msrb.mxu3 %v18869_v7  ;;  %v7329_v61 = vsub.f32 %v18886_v45, %v17409_v10  ;;  %v18892_v7 = vld [vmem:[#allocation56_spill] sm:$0xff]  ;;  %v18911_v10 = vld [vmem:[#allocation39_spill] sm:$0xff] }
 0x64f   :  { %7055 = vmatpush.msrb.mxu2 %v18870_v39  ;;  %7119 = vmatpush.msrb.mxu3 %v18871_v4  ;;  %v17407_v39 = vand.u32 4294901760, %v18892_v7  ;;  %v18893_v4 = vld [vmem:[#allocation60_spill] sm:$0xff] }
 0x651   :  { %7058 = vmatpush.msrb.mxu2 %v18872_v0  ;;  %7121 = vmatpush.msrb.mxu3 %v18873_v23  ;;  %v18894_v0 = vld [vmem:[#allocation59_spill] sm:$0xff]  ;;  %v7324_v23 = vand.u32 4294901760, %v7323_v29 }
 0x652   :  { %6848 = vmatmul.f32.gmra.mxu2 %v18836_v14  ;;  %v18916_v14 = vld [vmem:[#allocation74_spill] sm:$0xff] }
 0x653   :  { %7061 = vmatpush.msrb.mxu2 %v18874_v37  ;;  %7123 = vmatpush.msrb.mxu3 %v18875_v62  ;;  %v7335_v37 = vsub.f32 %v18889_v31, %v17408_v8  ;;  %v18895_v62 = vld [vmem:[#allocation79_spill] sm:$0xff]  ;;  %v5552_v8 = vpop.f32.mrf.mxu1 }
 0x655   :  { %7064 = vmatpush.msrb.mxu2 %v18876_v58  ;;  %7125 = vmatpush.msrb.mxu3 %v18877_v48  ;;  %v17405_v58 = vand.u32 4294901760, %v18895_v62  ;;  %v18896_v48 = vld [vmem:[#allocation27_spill] sm:$0xff]  ;;  %v7336_v22 = vand.u32 4294901760, %v7335_v37 }
 0x657   :  { %7067 = vmatpush.msrb.mxu2 %v18878_v47  ;;  %7127 = vmatpush.msrb.mxu3 %v18879_v40  ;;  %v18897_v47 = vld [vmem:[#allocation68_spill] sm:$0xff]  ;;  %v7330_v40 = vand.u32 4294901760, %v7329_v61  ;;  %v18902_v61 = vld [vmem:[#allocation179_spill] sm:$0xff] }
 0x659   :  { %7070 = vmatpush.msrb.mxu2 %v18881_v50  ;;  %7129 = vmatpush.msrb.mxu3 %v18882_v41  ;;  %v7341_v50 = vsub.f32 %v18892_v7, %v17407_v39  ;;  %v18898_v41 = vld [vmem:[#allocation173_spill] sm:$0xff]  ;;  %v18910_v39 = vld [vmem:[#allocation183_spill] sm:$0xff] }
 0x65b   :  { %7073 = vmatpush.msrb.mxu2 %v18884_v44  ;;  %7131 = vmatpush.msrb.mxu3 %v18885_v3  ;;  %v17404_v44 = vand.u32 4294901760, %v18898_v41  ;;  %v18899_v3 = vld [vmem:[#allocation171_spill] sm:$0xff] }
 0x65d   :  { %7076 = vmatpush.msrb.mxu2 %v18887_v51  ;;  %7133 = vmatpush.msrb.mxu3 %v18888_v60  ;;  %v7347_v51 = vsub.f32 %v18895_v62, %v17405_v58  ;;  %v18900_v60 = vld [vmem:[#allocation176_spill] sm:$0xff]  ;;  %v18909_v58 = vld [vmem:[#allocation46_spill] sm:$0xff] }
 0x65e   :  { %v17406_v29 = vand.u32 4294901760, %v18900_v60 }
 0x65f   :  { %7079 = vmatpush.msrb.mxu2 %v18890_v46  ;;  %7135 = vmatpush.msrb.mxu3 %v18891_v25  ;;  %v18901_v46 = vld [vmem:[#allocation174_spill] sm:$0xff]  ;;  %v7342_v25 = vand.u32 4294901760, %v7341_v50  ;;  %v18906_v50 = vld [vmem:[#allocation83_spill] sm:$0xff] }
 0x660   :  { %v7359_v37 = vsub.f32 %v18900_v60, %v17406_v29 }
 0x661   :  { %7082 = vmatpush.msrb.mxu2 %v18893_v4  ;;  %7137 = vmatpush.msrb.mxu3 %v18894_v0  ;;  %v17410_v4 = vand.u32 4294901760, %v18902_v61  ;;  %v18903_v0 = vld [vmem:[#allocation61_spill] sm:$0xff] }
 0x662   :  { %7141 = vmatmul.f32.vlgmr.msrb.gmra.mxu3 %v18896_v48  ;;  %v18904_v48 = vld [vmem:[#allocation175_spill] sm:$0xff]  ;;  %v7360_v29 = vand.u32 4294901760, %v7359_v37 }
 0x663   :  { %7319 = vmatpush.msra.mxu3 %v7318_v53  ;;  %7085 = vmatpush.msrb.mxu2 %v18897_v47  ;;  %v7353_v53 = vsub.f32 %v18898_v41, %v17404_v44  ;;  %v17413_v47 = vand.u32 4294901760, %v18904_v48 }
 0x665   :  { %7325 = vmatpush.msra.mxu3 %v7324_v23  ;;  %7088 = vmatpush.msrb.mxu2 %v18899_v3  ;;  %v7348_v23 = vand.u32 4294901760, %v7347_v51  ;;  %v18905_v3 = vld [vmem:[#allocation16_spill] sm:$0xff]  ;;  %v7354_v44 = vand.u32 4294901760, %v7353_v53  ;;  %v18908_v51 = vld [vmem:[#allocation19_spill] sm:$0xff] }
 0x667   :  { %7331 = vmatpush.msra.mxu3 %v7330_v40  ;;  %7091 = vmatpush.msrb.mxu2 %v18901_v46  ;;  %v15649_v40 = vpop.f32.mrf.mxu0  ;;  %v18907_v46 = vld [vmem:[#allocation45_spill] sm:$0xff] }
 0x669   :  { %7337 = vmatpush.msra.mxu3 %v7336_v22  ;;  %7094 = vmatpush.msrb.mxu2 %v18903_v0  ;;  %v7365_v22 = vsub.f32 %v18902_v61, %v17410_v4  ;;  %v17417_v0 = vand.u32 4294901760, %v18908_v51  ;;  %v18912_v4 = vld [vmem:[#allocation185_spill] sm:$0xff] }
 0x66a   :  { %7097 = vmatmul.f32.vlgmr.msrb.gmra.mxu2 %v18905_v3  ;;  %7147 = vmatmul.f32.gmra.mxu3 %v18906_v50  ;;  %v7371_v3 = vsub.f32 %v18904_v48, %v17413_v47  ;;  %v17424_v50 = vand.u32 4294901760, %v18910_v39  ;;  %v17430_v26 = vand.u32 4294901760, %v18912_v4  ;;  %v18914_v47 = vld [vmem:[#allocation90_spill] sm:$0xff] }
 0x66b   :  { %7266 = vmatpush.msra.mxu2 %v18907_v46  ;;  %7343 = vmatpush.msra.mxu3 %v7342_v25  ;;  %v7366_v25 = vand.u32 4294901760, %v7365_v22  ;;  %v7377_v53 = vsub.f32 %v18908_v51, %v17417_v0  ;;  %v17433_v32 = vand.u32 4294901760, %v18914_v47  ;;  %v5610_v22 = vpop.f32.mrf.mxu2 }
 0x66c   :  { %v7383_v37 = vsub.f32 %v18910_v39, %v17424_v50  ;;  %v7389_v9 = vsub.f32 %v18912_v4, %v17430_v26  ;;  %v5556_v26 = vpop.f32.mrf.mxu1 }
 0x66d   :  { %7268 = vmatpush.msra.mxu2 %v18909_v58  ;;  %7349 = vmatpush.msra.mxu3 %v7348_v23  ;;  %v7372_v23 = vand.u32 4294901760, %v7371_v3  ;;  %v7378_v0 = vand.u32 4294901760, %v7377_v53 }
 0x66e   :  { %v7384_v50 = vand.u32 4294901760, %v7383_v37  ;;  %v7407_v37 = vsub.f32 %v18919_v27, %v17443_v19 }
 0x66f   :  { %7270 = vmatpush.msra.mxu2 %v18911_v10  ;;  %7355 = vmatpush.msra.mxu3 %v7354_v44  ;;  %v5654_v44 = vpop.f32.mrf.mxu3  ;;  %v5451_v16 = vpop.f32.mrf.mxu0 }
 0x671   :  { %7272 = vmatpush.msra.mxu2 %v18913_v13  ;;  %7361 = vmatpush.msra.mxu3 %v7360_v29  ;;  %v18917_v29 = vld [vmem:[#allocation184_spill] sm:$0xff] }
 0x672   :  { %7102 = vmatmul.f32.gmra.mxu2 %v18915_v5  ;;  %v17440_v3 = vand.u32 4294901760, %v18917_v29  ;;  %v7395_v5 = vsub.f32 %v18914_v47, %v17433_v32  ;;  %v18922_v32 = vld [vmem:[#allocation75_spill] sm:$0xff] }
 0x673   :  { %7274 = vmatpush.msra.mxu2 %v18916_v14  ;;  %7367 = vmatpush.msra.mxu3 %v7366_v25  ;;  %v7390_v25 = vand.u32 4294901760, %v7389_v9  ;;  %v5615_v9 = vpop.f32.mrf.mxu2 }
 0x674   :  { %v7401_v53 = vsub.f32 %v18917_v29, %v17440_v3  ;;  %v7408_v3 = vand.u32 4294901760, %v7407_v37  ;;  %v5770_v19 = vpop.f32.mrf.mxu1 }
 0x675   :  { %7276 = vmatpush.msra.mxu2 %v18918_v28  ;;  %7373 = vmatpush.msra.mxu3 %v7372_v23  ;;  %v7396_v23 = vand.u32 4294901760, %v7395_v5 }
 0x676   :  { %v7402_v33 = vand.u32 4294901760, %v7401_v53 }
 0x677   :  { %7278 = vmatpush.msra.mxu2 %v18920_v15  ;;  %7379 = vmatpush.msra.mxu3 %v7378_v0  ;;  %v5729_v20 = vpop.f32.mrf.mxu0  ;;  %v5660_v0 = vpop.f32.mrf.mxu3 }
 0x679   :  { %7280 = vmatpush.msra.mxu2 %v18921_v56  ;;  %7385 = vmatpush.msra.mxu3 %v7384_v50  ;;  %v15697_v50 = vld [vmem:[%s16471_s3] sm:$0xf] }
 0x67a   :  { %18924 = vst [vmem:[#allocation107_spill] sm:$0xff] %v15697_v50  ;;  %v2423_v5 = vperm.slane %v15697_v50, 2  ;;  %v18928_v50 = vld [vmem:[#allocation180_spill] sm:$0xff] }
 0x67b   :  { %7282 = vmatpush.msra.mxu2 %v18922_v32  ;;  %7391 = vmatpush.msra.mxu3 %v7390_v25  ;;  %v18926_v25 = vld [vmem:[#allocation24_spill] sm:$0xff]  ;;  %v5815_v30 = vpop.f32.mrf.mxu2 }
 0x67c   :  { %v5444_v53 = vadd.f32 %v15649_v40, %v2423_v5  ;;  %v18930_v40 = vld [vmem:[#allocation187_spill] sm:$0xff]  ;;  %v5774_v1 = vpop.f32.mrf.mxu1 }
 0x67d   :  { %7284 = vmatpush.msra.mxu2 %v18923_v11  ;;  %7397 = vmatpush.msra.mxu3 %v7396_v23  ;;  %v18927_v23 = vld [vmem:[#allocation178_spill] sm:$0xff] }
 0x67e   :  { %v5553_v43 = vadd.f32 %v5552_v8, %v5444_v53  ;;  %v18935_v53 = vand.u32 4294901760, %v18889_v31 }
 0x67f   :  { %7286 = vmatpush.msra.mxu2 %v18925_v17  ;;  %7403 = vmatpush.msra.mxu3 %v7402_v33  ;;  %v5924_v37 = vpop.f32.mrf.mxu3  ;;  %v5733_v33 = vpop.f32.mrf.mxu0 }
 0x681   :  { %7288 = vmatpush.msra.mxu2 %v18926_v25  ;;  %7409 = vmatpush.msra.mxu3 %v7408_v3  ;;  %v5611_v3 = vadd.f32 %v5610_v22, %v5553_v43 }
 0x682   :  { %7411 = vmatmul.f32.vlgmr.msra.gmra.mxu3 %v18233_v55 }
 0x683   :  { %7597 = vmatpush.msrb.mxu3 %v18907_v46  ;;  %7290 = vmatpush.msra.mxu2 %v18927_v23  ;;  %v5452_v46 = vadd.f32 %v5451_v16, %v2423_v5  ;;  %v5655_v8 = vadd.f32 %v5654_v44, %v5611_v3  ;;  %v5823_v16 = vpop.f32.mrf.mxu2  ;;  %v18938_v44 = vand.u32 4294901760, %v18895_v62  ;;  %v18940_v3 = vand.u32 4294901760, %v18900_v60 }
 0x684   :  { %v18942_v62 = vand.u32 4294901760, %v18904_v48  ;;  %v18943_v60 = vand.u32 4294901760, %v18908_v51 }
 0x685   :  { %7599 = vmatpush.msrb.mxu3 %v18909_v58  ;;  %7292 = vmatpush.msra.mxu2 %v18928_v50  ;;  %v18932_v58 = vand.u32 4294901760, %v18880_v63  ;;  %v5557_v43 = vadd.f32 %v5556_v26, %v5452_v46  ;;  %v5730_v63 = vadd.f32 %v5729_v20, %v5655_v8 }
 0x687   :  { %7601 = vmatpush.msrb.mxu3 %v18911_v10  ;;  %7294 = vmatpush.msra.mxu2 %v18929_v36  ;;  %v18933_v10 = vand.u32 4294901760, %v18883_v6  ;;  %v5928_v22 = vpop.f32.mrf.mxu3  ;;  %v5616_v5 = vadd.f32 %v5615_v9, %v5557_v43  ;;  %v6026_v6 = vpop.f32.mrf.mxu1 }
 0x689   :  { %7603 = vmatpush.msrb.mxu3 %v18913_v13  ;;  %7296 = vmatpush.msra.mxu2 %v18930_v40  ;;  %v5982_v13 = vpop.f32.mrf.mxu0  ;;  %v5661_v26 = vadd.f32 %v5660_v0, %v5616_v5  ;;  %v18957_v5 = vld [vmem:[#allocation108_spill] sm:$0xff] }
 0x68a   :  { %7302 = vmatmul.f32.vlgmr.msra.gmra.mxu2 %v18931_v49  ;;  %7415 = vmatmul.f32.gmra.mxu3 %v18714_v12  ;;  %v18934_v49 = vand.u32 4294901760, %v18886_v45  ;;  %v5771_v45 = vadd.f32 %v5770_v19, %v5730_v63  ;;  %v18941_v19 = vand.u32 4294901760, %v18902_v61  ;;  %v18958_v63 = vld [vmem:[#allocation110_spill] sm:$0xff] }
 0x68b   :  { %7526 = vmatpush.msrb.mxu2 %v18932_v58  ;;  %7605 = vmatpush.msrb.mxu3 %v18916_v14  ;;  %v18936_v14 = vld [vmem:[#allocation72_spill] sm:$0xff]  ;;  %v6101_v31 = vpop.f32.mrf.mxu2 }
 0x68d   :  { %7530 = vmatpush.msrb.mxu2 %v18933_v10  ;;  %7607 = vmatpush.msrb.mxu3 %v18918_v28  ;;  %v18937_v28 = vand.u32 4294901760, %v18892_v7  ;;  %v5734_v7 = vadd.f32 %v5733_v33, %v5661_v26  ;;  %v18947_v33 = vand.u32 4294901760, %v18917_v29 }
 0x68f   :  { %7534 = vmatpush.msrb.mxu2 %v18934_v49  ;;  %7609 = vmatpush.msrb.mxu3 %v18920_v15  ;;  %v5816_v15 = vadd.f32 %v5815_v30, %v5771_v45  ;;  %v6142_v20 = vpop.f32.mrf.mxu3  ;;  %v6032_v30 = vpop.f32.mrf.mxu1  ;;  %v18956_v49 = vld [vmem:[#allocation191_spill] sm:$0xff]  ;;  %v18959_v45 = vld [vmem:[#allocation188_spill] sm:$0xff] }
 0x691   :  { %7538 = vmatpush.msrb.mxu2 %v18935_v53  ;;  %7611 = vmatpush.msrb.mxu3 %v18921_v56  ;;  %v18939_v56 = vand.u32 4294901760, %v18898_v41  ;;  %v5987_v9 = vpop.f32.mrf.mxu0  ;;  %v8066_v53 = vand.u32 4294901760, %v18958_v63 }
 0x692   :  { %7310 = vmatmul.f32.gmra.mxu2 %v18936_v14 }
 0x693   :  { %7542 = vmatpush.msrb.mxu2 %v18937_v28  ;;  %7613 = vmatpush.msrb.mxu3 %v18922_v32  ;;  %v5925_v32 = vadd.f32 %v5924_v37, %v5816_v15  ;;  %v6105_v61 = vpop.f32.mrf.mxu2  ;;  %v18944_v37 = vand.u32 4294901760, %v18910_v39 }
 0x695   :  { %7546 = vmatpush.msrb.mxu2 %v18938_v44  ;;  %7615 = vmatpush.msrb.mxu3 %v18923_v11  ;;  %v5775_v11 = vadd.f32 %v5774_v1, %v5734_v7  ;;  %v5983_v41 = vadd.f32 %v5982_v13, %v5925_v32  ;;  %v18960_v44 = vld [vmem:[#allocation117_spill] sm:$0xff]  ;;  %v18963_v7 = vld [vmem:[#allocation120_spill] sm:$0xff]  ;;  %v18964_v32 = vld [vmem:[#allocation114_spill] sm:$0xff] }
 0x697   :  { %7550 = vmatpush.msrb.mxu2 %v18939_v56  ;;  %7617 = vmatpush.msrb.mxu3 %v18925_v17  ;;  %v5824_v17 = vadd.f32 %v5823_v16, %v5775_v11  ;;  %v6027_v48 = vadd.f32 %v6026_v6, %v5983_v41 }
 0x699   :  { %7554 = vmatpush.msrb.mxu2 %v18940_v3  ;;  %7619 = vmatpush.msrb.mxu3 %v18926_v25  ;;  %v6187_v0 = vpop.f32.mrf.mxu0  ;;  %v6146_v25 = vpop.f32.mrf.mxu3  ;;  %v5929_v1 = vadd.f32 %v5928_v22, %v5824_v17  ;;  %v6102_v51 = vadd.f32 %v6101_v31, %v6027_v48  ;;  %v18955_v22 = vld [vmem:[#allocation129_spill] sm:$0xff]  ;;  %v8067_v3 = vsub.f32 %v18958_v63, %v8066_v53  ;;  %v18966_v17 = vld [vmem:[#allocation86_spill] sm:$0xff] }
 0x69a   :  { %v8060_v16 = vand.u32 4294901760, %v18955_v22  ;;  %v18969_v48 = vld [vmem:[#allocation89_spill] sm:$0xff] }
 0x69b   :  { %7558 = vmatpush.msrb.mxu2 %v18941_v19  ;;  %7621 = vmatpush.msrb.mxu3 %v18927_v23  ;;  %v6296_v23 = vpop.f32.mrf.mxu1  ;;  %v5988_v39 = vadd.f32 %v5987_v9, %v5929_v1  ;;  %v6354_v58 = vpop.f32.mrf.mxu2  ;;  %v18962_v9 = vld [vmem:[#allocation190_spill] sm:$0xff]  ;;  %v8078_v19 = vand.u32 4294901760, %v18964_v32  ;;  %v18968_v1 = vld [vmem:[#allocation192_spill] sm:$0xff] }
 0x69c   :  { %v8061_v15 = vsub.f32 %v18955_v22, %v8060_v16  ;;  %v19008_v22 = vld [vmem:[#allocation177_spill] sm:$0xff] }
 0x69d   :  { %7562 = vmatpush.msrb.mxu2 %v18942_v62  ;;  %7623 = vmatpush.msrb.mxu3 %v18928_v50  ;;  %v18945_v50 = vand.u32 4294901760, %v18912_v4  ;;  %v6033_v8 = vadd.f32 %v6032_v30, %v5988_v39  ;;  %v18965_v62 = vld [vmem:[#allocation195_spill] sm:$0xff] }
 0x69e   :  { %v8062_v41 = vand.u32 4294901760, %v8061_v15  ;;  %v18983_v15 = vld [vmem:[#allocation131_spill] sm:$0xff] }
 0x69f   :  { %7566 = vmatpush.msrb.mxu2 %v18943_v60  ;;  %7625 = vmatpush.msrb.mxu3 %v18929_v36  ;;  %v18946_v36 = vand.u32 4294901760, %v18914_v47 }
 0x6a1   :  { %7570 = vmatpush.msrb.mxu2 %v18944_v37  ;;  %7627 = vmatpush.msrb.mxu3 %v18930_v40  ;;  %v6143_v40 = vadd.f32 %v6142_v20, %v6102_v51  ;;  %v6398_v46 = vpop.f32.mrf.mxu3  ;;  %v6195_v4 = vpop.f32.mrf.mxu0  ;;  %v18961_v20 = vld [vmem:[#allocation109_spill] sm:$0xff]  ;;  %v8079_v51 = vsub.f32 %v18964_v32, %v8078_v19 }
 0x6a2   :  { %7629 = vmatmul.f32.vlgmr.msrb.gmra.mxu3 %v18233_v55  ;;  %v8072_v31 = vand.u32 4294901760, %v18961_v20 }
 0x6a3   :  { %7851 = vmatpush.msra.mxu3 %v14809_v57  ;;  %7574 = vmatpush.msrb.mxu2 %v18945_v50  ;;  %v18948_v57 = vand.u32 4294901760, %v18919_v27  ;;  %v6359_v29 = vpop.f32.mrf.mxu2  ;;  %v8068_v50 = vand.u32 4294901760, %v8067_v3 }
 0x6a4   :  { %v8073_v60 = vsub.f32 %v18961_v20, %v8072_v31 }
 0x6a5   :  { %7853 = vmatpush.msra.mxu3 %v14826_v2  ;;  %7578 = vmatpush.msrb.mxu2 %v18946_v36  ;;  %v6188_v2 = vadd.f32 %v6187_v0, %v6143_v40  ;;  %v18967_v0 = vld [vmem:[#allocation116_spill] sm:$0xff]  ;;  %v18972_v40 = vld [vmem:[#allocation194_spill] sm:$0xff] }
 0x6a7   :  { %7855 = vmatpush.msra.mxu3 %v14848_v21  ;;  %7582 = vmatpush.msrb.mxu2 %v18947_v33  ;;  %v6106_v21 = vadd.f32 %v6105_v61, %v6033_v8  ;;  %v6297_v47 = vadd.f32 %v6296_v23, %v6188_v2  ;;  %v18970_v23 = vld [vmem:[#allocation119_spill] sm:$0xff] }
 0x6a8   :  { %v8090_v36 = vand.u32 4294901760, %v18970_v23  ;;  %v18971_v33 = vld [vmem:[#allocation43_spill] sm:$0xff] }
 0x6a9   :  { %7857 = vmatpush.msra.mxu3 %v14871_v38  ;;  %7586 = vmatpush.msrb.mxu2 %v18948_v57  ;;  %v6300_v38 = vpop.f32.mrf.mxu1  ;;  %v6147_v27 = vadd.f32 %v6146_v25, %v6106_v21  ;;  %v8084_v25 = vand.u32 4294901760, %v18967_v0  ;;  %v18973_v57 = vld [vmem:[#allocation127_spill] sm:$0xff] }
 0x6aa   :  { %7588 = vmatmul.f32.vlgmr.msrb.gmra.mxu2 %v18233_v55  ;;  %7633 = vmatmul.f32.gmra.mxu3 %v18714_v12  ;;  %v6473_v55 = vpop.f32.mrf.mxu0 }
 0x6ab   :  { %7793 = vmatpush.msra.mxu2 %v14846_v42  ;;  %7859 = vmatpush.msra.mxu3 %v14897_v34  ;;  %v6355_v42 = vadd.f32 %v6354_v58, %v6297_v47  ;;  %v6404_v34 = vpop.f32.mrf.mxu3  ;;  %v6196_v10 = vadd.f32 %v6195_v4, %v6147_v27  ;;  %v8085_v58 = vsub.f32 %v18967_v0, %v8084_v25  ;;  %v8096_v4 = vand.u32 4294901760, %v18973_v57  ;;  %v18974_v27 = vld [vmem:[#allocation196_spill] sm:$0xff] }
 0x6ac   :  { %v6559_v26 = vpop.f32.mrf.mxu2  ;;  %v8080_v47 = vand.u32 4294901760, %v8079_v51  ;;  %v18987_v51 = vld [vmem:[#allocation137_spill] sm:$0xff] }
 0x6ad   :  { %7796 = vmatpush.msra.mxu2 %v14869_v18  ;;  %7861 = vmatpush.msra.mxu3 %v14919_v54  ;;  %v18949_v18 = vld [vmem:[#allocation88_spill] sm:$0xff]  ;;  %v18950_v54 = vld [vmem:[#allocation186_spill] sm:$0xff]  ;;  %v6399_v43 = vadd.f32 %v6398_v46, %v6355_v42  ;;  %v8074_v46 = vand.u32 4294901760, %v8073_v60 }
 0x6ae   :  { %v18975_v42 = vld [vmem:[#allocation80_spill] sm:$0xff] }
 0x6af   :  { %7799 = vmatpush.msra.mxu2 %v14887_v35  ;;  %7863 = vmatpush.msra.mxu3 %v14939_v24  ;;  %v18951_v35 = vld [vmem:[#allocation78_spill] sm:$0xff]  ;;  %v18952_v24 = vld [vmem:[#allocation112_spill] sm:$0xff]  ;;  %v6474_v6 = vadd.f32 %v6473_v55, %v6399_v43  ;;  %v8091_v55 = vsub.f32 %v18970_v23, %v8090_v36 }
 0x6b1   :  { %7802 = vmatpush.msra.mxu2 %v18737_v59  ;;  %7865 = vmatpush.msra.mxu3 %v14957_v52  ;;  %v6514_v13 = vpop.f32.mrf.mxu1  ;;  %v18953_v59 = vld [vmem:[#allocation105_spill] sm:$0xff] }
 0x6b2   :  { %7592 = vmatmul.f32.gmra.mxu2 %v18714_v12  ;;  %v18954_v52 = vld [vmem:[#allocation193_spill] sm:$0xff]  ;;  %v6301_v12 = vadd.f32 %v6300_v38, %v6196_v10  ;;  %v6477_v56 = vpop.f32.mrf.mxu0  ;;  %v6515_v30 = vadd.f32 %v6514_v13, %v6474_v6  ;;  %v8097_v10 = vsub.f32 %v18973_v57, %v8096_v4  ;;  %v18980_v6 = vld [vmem:[#allocation7_spill] sm:$0xff] }
 0x6b3   :  { %7805 = vmatpush.msra.mxu2 %v18949_v18  ;;  %7867 = vmatpush.msra.mxu3 %v18950_v54  ;;  %v6668_v28 = vpop.f32.mrf.mxu3  ;;  %v18976_v18 = vld [vmem:[#allocation84_spill] sm:$0xff]  ;;  %v8086_v54 = vand.u32 4294901760, %v8085_v58 }
 0x6b4   :  { %v6360_v14 = vadd.f32 %v6359_v29, %v6301_v12  ;;  %v6560_v61 = vadd.f32 %v6559_v26, %v6515_v30  ;;  %v8092_v12 = vand.u32 4294901760, %v8091_v55  ;;  %v18982_v26 = vld [vmem:[#allocation96_spill] sm:$0xff] }
 0x6b5   :  { %7808 = vmatpush.msra.mxu2 %v18951_v35  ;;  %7869 = vmatpush.msra.mxu3 %v18952_v24  ;;  %v6567_v38 = vpop.f32.mrf.mxu2  ;;  %v18977_v35 = vld [vmem:[#allocation133_spill] sm:$0xff] }
 0x6b6   :  { %v6405_v11 = vadd.f32 %v6404_v34, %v6360_v14  ;;  %v6669_v21 = vadd.f32 %v6668_v28, %v6560_v61  ;;  %v8102_v34 = vand.u32 4294901760, %v18975_v42  ;;  %v8108_v24 = vand.u32 4294901760, %v18977_v35  ;;  %v18981_v28 = vld [vmem:[#allocation15_spill] sm:$0xff] }
 0x6b7   :  { %7811 = vmatpush.msra.mxu2 %v18953_v59  ;;  %7871 = vmatpush.msra.mxu3 %v18954_v52  ;;  %v18978_v52 = vld [vmem:[#allocation93_spill] sm:$0xff] }
 0x6b8   :  { %v6478_v39 = vadd.f32 %v6477_v56, %v6405_v11  ;;  %v8120_v56 = vand.u32 4294901760, %v18983_v15  ;;  %v18984_v11 = vld [vmem:[#allocation95_spill] sm:$0xff] }
 0x6b9   :  { %7814 = vmatpush.msra.mxu2 %v18956_v49  ;;  %7873 = vmatpush.msra.mxu3 %v18957_v5  ;;  %v6518_v37 = vpop.f32.mrf.mxu1  ;;  %v8103_v49 = vsub.f32 %v18975_v42, %v8102_v34  ;;  %v18979_v5 = vld [vmem:[#allocation64_spill] sm:$0xff] }
 0x6ba   :  { %v6726_v8 = vpop.f32.mrf.mxu0  ;;  %v6519_v29 = vadd.f32 %v6518_v37, %v6478_v39  ;;  %v8114_v14 = vand.u32 4294901760, %v18979_v5  ;;  %v8132_v39 = vand.u32 4294901760, %v18987_v51 }
 0x6bb   :  { %7817 = vmatpush.msra.mxu2 %v18959_v45  ;;  %7875 = vmatpush.msra.mxu3 %v18960_v44  ;;  %v6672_v2 = vpop.f32.mrf.mxu3  ;;  %v6727_v13 = vadd.f32 %v6726_v8, %v6669_v21  ;;  %v8098_v45 = vand.u32 4294901760, %v8097_v10  ;;  %v8109_v44 = vsub.f32 %v18977_v35, %v8108_v24  ;;  %v8104_v30 = vand.u32 4294901760, %v8103_v49  ;;  %v18989_v21 = vld [vmem:[#allocation85_spill] sm:$0xff] }
 0x6bc   :  { %v6568_v43 = vadd.f32 %v6567_v38, %v6519_v29  ;;  %v18990_v38 = vld [vmem:[#allocation36_spill] sm:$0xff]  ;;  %v8133_v29 = vsub.f32 %v18987_v51, %v8132_v39 }
 0x6bd   :  { %7820 = vmatpush.msra.mxu2 %v18962_v9  ;;  %7877 = vmatpush.msra.mxu3 %v18963_v7 }
 0x6be   :  { %v6673_v9 = vadd.f32 %v6672_v2, %v6568_v43  ;;  %v8138_v2 = vand.u32 4294901760, %v18989_v21  ;;  %v18993_v43 = vld [vmem:[#allocation113_spill] sm:$0xff] }
 0x6bf   :  { %7823 = vmatpush.msra.mxu2 %v18965_v62  ;;  %7879 = vmatpush.msra.mxu3 %v18966_v17  ;;  %v8115_v17 = vsub.f32 %v18979_v5, %v8114_v14 }
 0x6c1   :  { %7826 = vmatpush.msra.mxu2 %v18968_v1  ;;  %7881 = vmatpush.msra.mxu3 %v18969_v48  ;;  %v6770_v59 = vpop.f32.mrf.mxu1  ;;  %v18986_v1 = vld [vmem:[#allocation100_spill] sm:$0xff]  ;;  %v8110_v48 = vand.u32 4294901760, %v8109_v44  ;;  %v8116_v58 = vand.u32 4294901760, %v8115_v17  ;;  %v8134_v44 = vand.u32 4294901760, %v8133_v29  ;;  %v19005_v29 = vld [vmem:[#allocation25_spill] sm:$0xff] }
 0x6c2   :  { %7885 = vmatmul.f32.vlgmr.msra.gmra.mxu3 %v18971_v33  ;;  %v6771_v7 = vadd.f32 %v6770_v59, %v6727_v13  ;;  %v6731_v37 = vpop.f32.mrf.mxu0 }
 0x6c3   :  { %8063 = vmatpush.msrb.mxu3 %v8062_v41  ;;  %7829 = vmatpush.msra.mxu2 %v18972_v40  ;;  %v18985_v41 = vld [vmem:[#allocation136_spill] sm:$0xff]  ;;  %v6732_v40 = vadd.f32 %v6731_v37, %v6673_v9 }
 0x6c4   :  { %v8126_v60 = vand.u32 4294901760, %v18985_v41 }
 0x6c5   :  { %8069 = vmatpush.msrb.mxu3 %v8068_v50  ;;  %7832 = vmatpush.msra.mxu2 %v18974_v27  ;;  %v6886_v3 = vpop.f32.mrf.mxu3  ;;  %v8121_v50 = vsub.f32 %v18983_v15, %v8120_v56 }
 0x6c6   :  { %v8127_v8 = vsub.f32 %v18985_v41, %v8126_v60 }
 0x6c7   :  { %8075 = vmatpush.msrb.mxu3 %v8074_v46  ;;  %7835 = vmatpush.msra.mxu2 %v18976_v18  ;;  %v18988_v46 = vld [vmem:[#allocation97_spill] sm:$0xff]  ;;  %v8122_v55 = vand.u32 4294901760, %v8121_v50 }
 0x6c8   :  { %v18992_v18 = vld [vmem:[#allocation13_spill] sm:$0xff]  ;;  %v8128_v13 = vand.u32 4294901760, %v8127_v8 }
 0x6c9   :  { %8081 = vmatpush.msrb.mxu3 %v8080_v47  ;;  %7838 = vmatpush.msra.mxu2 %v18978_v52  ;;  %v6776_v27 = vpop.f32.mrf.mxu1  ;;  %v18991_v47 = vld [vmem:[#allocation104_spill] sm:$0xff]  ;;  %v8139_v52 = vsub.f32 %v18989_v21, %v8138_v2  ;;  %v19001_v8 = vld [vmem:[#allocation125_spill] sm:$0xff] }
 0x6ca   :  { %7841 = vmatmul.f32.vlgmr.msra.gmra.mxu2 %v18980_v6  ;;  %7891 = vmatmul.f32.gmra.mxu3 %v18981_v28  ;;  %v6777_v10 = vadd.f32 %v6776_v27, %v6732_v40  ;;  %v19003_v27 = vld [vmem:[#allocation92_spill] sm:$0xff]  ;;  %v6931_v63 = vpop.f32.mrf.mxu0 }
 0x6cb   :  { %8010 = vmatpush.msrb.mxu2 %v18982_v26  ;;  %8087 = vmatpush.msrb.mxu3 %v8086_v54  ;;  %v8144_v54 = vand.u32 4294901760, %v18992_v18 }
 0x6cd   :  { %8012 = vmatpush.msrb.mxu2 %v18984_v11  ;;  %8093 = vmatpush.msrb.mxu3 %v8092_v12  ;;  %v6845_v62 = vpop.f32.mrf.mxu2  ;;  %v18994_v12 = vld [vmem:[#allocation147_spill] sm:$0xff]  ;;  %v6890_v28 = vpop.f32.mrf.mxu3  ;;  %v8145_v9 = vsub.f32 %v18992_v18, %v8144_v54 }
 0x6ce   :  { %v6846_v61 = vadd.f32 %v6845_v62, %v6771_v7  ;;  %v8150_v49 = vand.u32 4294901760, %v18994_v12  ;;  %v8140_v62 = vand.u32 4294901760, %v8139_v52 }
 0x6cf   :  { %8014 = vmatpush.msrb.mxu2 %v18986_v1  ;;  %8099 = vmatpush.msrb.mxu3 %v8098_v45  ;;  %v18995_v45 = vld [vmem:[#allocation122_spill] sm:$0xff]  ;;  %v8146_v37 = vand.u32 4294901760, %v8145_v9 }
 0x6d0   :  { %v6887_v33 = vadd.f32 %v6886_v3, %v6846_v61  ;;  %v8151_v17 = vsub.f32 %v18994_v12, %v8150_v49  ;;  %v18997_v61 = vld [vmem:[#allocation134_spill] sm:$0xff] }
 0x6d1   :  { %8016 = vmatpush.msrb.mxu2 %v18988_v46  ;;  %8105 = vmatpush.msrb.mxu3 %v8104_v30  ;;  %v18996_v30 = vld [vmem:[#allocation121_spill] sm:$0xff] }
 0x6d2   :  { %9520 = vtanh.f32 %v6887_v33  ;;  %7846 = vmatmul.f32.gmra.mxu2 %v18990_v38  ;;  %v8152_v50 = vand.u32 4294901760, %v8151_v17  ;;  %v18999_v33 = vld [vmem:[#allocation144_spill] sm:$0xff]  ;;  %v19002_v38 = vld [vmem:[#allocation149_spill] sm:$0xff]  ;;  %v6939_v32 = vpop.f32.mrf.mxu0 }
 0x6d3   :  { %8018 = vmatpush.msrb.mxu2 %v18991_v47  ;;  %8111 = vmatpush.msrb.mxu3 %v8110_v48  ;;  %v18998_v48 = vld [vmem:[#allocation128_spill] sm:$0xff] }
 0x6d5   :  { %8020 = vmatpush.msrb.mxu2 %v18993_v43  ;;  %8117 = vmatpush.msrb.mxu3 %v8116_v58  ;;  %v6849_v59 = vpop.f32.mrf.mxu2  ;;  %v19000_v58 = vld [vmem:[#allocation132_spill] sm:$0xff] }
 0x6d6   :  { %v6850_v6 = vadd.f32 %v6849_v59, %v6777_v10  ;;  %v19006_v10 = vld [vmem:[#allocation57_spill] sm:$0xff] }
 0x6d7   :  { %8022 = vmatpush.msrb.mxu2 %v18995_v45  ;;  %8123 = vmatpush.msrb.mxu3 %v8122_v55  ;;  %v19004_v55 = vld [vmem:[#allocation143_spill] sm:$0xff] }
 0x6d8   :  { %v15867_v7 = vpop.eup %9520  ;;  %v6891_v3 = vadd.f32 %v6890_v28, %v6850_v6 }
 0x6d9   :  { %8024 = vmatpush.msrb.mxu2 %v18996_v30  ;;  %8129 = vmatpush.msrb.mxu3 %v8128_v13 }
 0x6da   :  { %9522 = vtanh.f32 %v6891_v3  ;;  %8443 = vrot.lane.b32.xlu0 %v15867_v7, %s9561_s9  ;;  %v7217_v0 = vpop.f32.mrf.mxu0 }
 0x6db   :  { %8026 = vmatpush.msrb.mxu2 %v18997_v61  ;;  %8135 = vmatpush.msrb.mxu3 %v8134_v44 }
 0x6dd   :  { %8028 = vmatpush.msrb.mxu2 %v18998_v48  ;;  %8141 = vmatpush.msrb.mxu3 %v8140_v62 }
 0x6df   :  { %8030 = vmatpush.msrb.mxu2 %v18999_v33  ;;  %8147 = vmatpush.msrb.mxu3 %v8146_v37 }
 0x6e0   :  { %v15878_v40 = vpop.eup %9522 }
 0x6e1   :  { %8032 = vmatpush.msrb.mxu2 %v19000_v58  ;;  %8153 = vmatpush.msrb.mxu3 %v8152_v50 }
 0x6e2   :  { %8155 = vmatmul.f32.vlgmr.msrb.gmra.mxu3 %v19001_v8  ;;  %8445 = vrot.lane.b32.xlu1 %v15878_v40, %s9561_s9  ;;  %v7221_v5 = vpop.f32.mrf.mxu0 }
 0x6e3   :  { %8341 = vmatpush.msra.mxu3 %v18982_v26  ;;  %8034 = vmatpush.msrb.mxu2 %v19002_v38  ;;  %v19007_v26 = vld [vmem:[#allocation138_spill] sm:$0xff] }
 0x6e4   :  { %8439 = vrot.lane.b32.xlu2 %v15878_v40, %s9560_s8 }
 0x6e5   :  { %8343 = vmatpush.msra.mxu3 %v18984_v11  ;;  %8036 = vmatpush.msrb.mxu2 %v19003_v27  ;;  %v7142_v20 = vpop.f32.mrf.mxu3 }
 0x6e7   :  { %8345 = vmatpush.msra.mxu3 %v18986_v1  ;;  %8038 = vmatpush.msrb.mxu2 %v19004_v55 }
 0x6e9   :  { %8347 = vmatpush.msra.mxu3 %v18988_v46  ;;  %8040 = vmatpush.msrb.mxu2 %v19005_v29 }
 0x6ea   :  { %8046 = vmatmul.f32.vlgmr.msrb.gmra.mxu2 %v19006_v10  ;;  %8159 = vmatmul.f32.gmra.mxu3 %v19007_v26 }
 0x6eb   :  { %8270 = vmatpush.msra.mxu2 %v8060_v16  ;;  %8349 = vmatpush.msra.mxu3 %v18991_v47  ;;  %v19009_v16 = vld [vmem:[#allocation153_spill] sm:$0xff] }
 0x6ec   :  { %8433 = vrot.lane.b32.xlu1 %v15878_v40, %s9559_s0 }
 0x6ed   :  { %8274 = vmatpush.msra.mxu2 %v8066_v53  ;;  %8351 = vmatpush.msra.mxu3 %v18993_v43  ;;  %v7040_v53 = vpop.f32.mrf.mxu1 }
 0x6ef   :  { %8278 = vmatpush.msra.mxu2 %v8072_v31  ;;  %8353 = vmatpush.msra.mxu3 %v18995_v45  ;;  %v7098_v31 = vpop.f32.mrf.mxu2 }
 0x6f1   :  { %8282 = vmatpush.msra.mxu2 %v8078_v19  ;;  %8355 = vmatpush.msra.mxu3 %v18996_v30 }
 0x6f2   :  { %8054 = vmatmul.f32.gmra.mxu2 %v19008_v22 }
 0x6f3   :  { %8286 = vmatpush.msra.mxu2 %v8084_v25  ;;  %8357 = vmatpush.msra.mxu3 %v18997_v61  ;;  %v7148_v25 = vpop.f32.mrf.mxu3 }
 0x6f4   :  { %8397 = vrot.lane.b32.xlu1 %v19009_v16, %s9560_s8 }
 0x6f5   :  { %8290 = vmatpush.msra.mxu2 %v8090_v36  ;;  %8359 = vmatpush.msra.mxu3 %v18998_v48  ;;  %v7044_v19 = vpop.f32.mrf.mxu1  ;;  %v19010_v36 = vld [vmem:[#allocation107_spill] sm:$0xff] }
 0x6f6   :  { %v2424_v57 = vperm.slane %v19010_v36, 3 }
 0x6f7   :  { %8294 = vmatpush.msra.mxu2 %v8096_v4  ;;  %8361 = vmatpush.msra.mxu3 %v18999_v33  ;;  %v7103_v23 = vpop.f32.mrf.mxu2 }
 0x6f8   :  { %v6932_v42 = vadd.f32 %v6931_v63, %v2424_v57  ;;  %v6940_v15 = vadd.f32 %v6939_v32, %v2424_v57 }
 0x6f9   :  { %8298 = vmatpush.msra.mxu2 %v8102_v34  ;;  %8363 = vmatpush.msra.mxu3 %v19000_v58 }
 0x6fa   :  { %v7045_v41 = vadd.f32 %v7044_v19, %v6940_v15 }
 0x6fb   :  { %8302 = vmatpush.msra.mxu2 %v8108_v24  ;;  %8365 = vmatpush.msra.mxu3 %v19002_v38  ;;  %v7041_v24 = vadd.f32 %v7040_v53, %v6932_v42 }
 0x6fc   :  { %8437 = vrot.lane.b32.xlu1 %v15867_v7, %s9560_s8 }
 0x6fd   :  { %8306 = vmatpush.msra.mxu2 %v8114_v14  ;;  %8367 = vmatpush.msra.mxu3 %v19003_v27  ;;  %v7258_v4 = vpop.f32.mrf.mxu1  ;;  %v7099_v14 = vadd.f32 %v7098_v31, %v7041_v24 }
 0x6ff   :  { %8310 = vmatpush.msra.mxu2 %v8120_v56  ;;  %8369 = vmatpush.msra.mxu3 %v19004_v55  ;;  %v7143_v11 = vadd.f32 %v7142_v20, %v7099_v14 }
 0x701   :  { %8314 = vmatpush.msra.mxu2 %v8126_v60  ;;  %8371 = vmatpush.msra.mxu3 %v19005_v29  ;;  %v7470_v60 = vpop.f32.mrf.mxu0  ;;  %v7218_v46 = vadd.f32 %v7217_v0, %v7143_v11 }
 0x702   :  { %8373 = vmatmul.f32.vlgmr.msra.gmra.mxu3 %v19001_v8 }
 0x703   :  { %8318 = vmatpush.msra.mxu2 %v8132_v39  ;;  %v7104_v39 = vadd.f32 %v7103_v23, %v7045_v41  ;;  %v7259_v47 = vadd.f32 %v7258_v4, %v7218_v46 }
 0x705   :  { %8322 = vmatpush.msra.mxu2 %v8138_v2  ;;  %v7412_v34 = vpop.f32.mrf.mxu3  ;;  %v7262_v56 = vpop.f32.mrf.mxu1  ;;  %v7149_v2 = vadd.f32 %v7148_v25, %v7104_v39 }
 0x707   :  { %8326 = vmatpush.msra.mxu2 %v8144_v54  ;;  %v7222_v59 = vadd.f32 %v7221_v5, %v7149_v2 }
 0x709   :  { %8330 = vmatpush.msra.mxu2 %v8150_v49  ;;  %v7475_v13 = vpop.f32.mrf.mxu0  ;;  %v7263_v12 = vadd.f32 %v7262_v56, %v7222_v59 }
 0x70a   :  { %8332 = vmatmul.f32.vlgmr.msra.gmra.mxu2 %v19001_v8  ;;  %8377 = vmatmul.f32.gmra.mxu3 %v19007_v26 }
 0x70d   :  { %v7303_v35 = vpop.f32.mrf.mxu2  ;;  %v7416_v1 = vpop.f32.mrf.mxu3 }
 0x70e   :  { %v7514_v21 = vpop.f32.mrf.mxu1  ;;  %v7304_v18 = vadd.f32 %v7303_v35, %v7259_v47 }
 0x710   :  { %v7413_v52 = vadd.f32 %v7412_v34, %v7304_v18 }
 0x711   :  { %v7675_v45 = vpop.f32.mrf.mxu0 }
 0x712   :  { %8336 = vmatmul.f32.gmra.mxu2 %v19007_v26  ;;  %v7471_v28 = vadd.f32 %v7470_v60, %v7413_v52 }
 0x714   :  { %v7515_v30 = vadd.f32 %v7514_v21, %v7471_v28  ;;  %v19011_v28 = vld [vmem:[#allocation101_spill] sm:$0xff] }
 0x715   :  { %v7311_v51 = vpop.f32.mrf.mxu2 }
 0x716   :  { %v7520_v49 = vpop.f32.mrf.mxu1  ;;  %v7312_v6 = vadd.f32 %v7311_v51, %v7263_v12 }
 0x718   :  { %v7417_v3 = vadd.f32 %v7416_v1, %v7312_v6 }
 0x719   :  { %v7683_v33 = vpop.f32.mrf.mxu0 }
 0x71a   :  { %v7476_v61 = vadd.f32 %v7475_v13, %v7417_v3 }
 0x71c   :  { %v7521_v58 = vadd.f32 %v7520_v49, %v7476_v61 }
 0x71e   :  { %v7784_v17 = vpop.f32.mrf.mxu1 }
 0x721   :  { %v7961_v10 = vpop.f32.mrf.mxu0 }
 0x725   :  { %v7630_v54 = vpop.f32.mrf.mxu3 }
 0x726   :  { %v7788_v27 = vpop.f32.mrf.mxu1 }
 0x729   :  { %v7965_v36 = vpop.f32.mrf.mxu0 }
 0x72d   :  { %v7589_v43 = vpop.f32.mrf.mxu2  ;;  %v7634_v44 = vpop.f32.mrf.mxu3 }
 0x72e   :  { %v7590_v62 = vadd.f32 %v7589_v43, %v7515_v30  ;;  %v8002_v31 = vpop.f32.mrf.mxu1 }
 0x730   :  { %v7631_v37 = vadd.f32 %v7630_v54, %v7590_v62  ;;  %v8426_v62 = vpop.permute.xlu0 %8425 }
 0x731   :  { %v8214_v24 = vpop.f32.mrf.mxu0 }
 0x732   :  { %v7676_v38 = vadd.f32 %v7675_v45, %v7631_v37  ;;  %v8406_v45 = vpop.permute.xlu2 %8405 }
 0x734   :  { %v7785_v29 = vadd.f32 %v7784_v17, %v7676_v38 }
 0x735   :  { %v7593_v9 = vpop.f32.mrf.mxu2 }
 0x736   :  { %v7594_v8 = vadd.f32 %v7593_v9, %v7521_v58  ;;  %v8006_v34 = vpop.f32.mrf.mxu1 }
 0x738   :  { %v7635_v55 = vadd.f32 %v7634_v44, %v7594_v8  ;;  %v15970_v44 = vpop.permute.xlu1 %8403  ;;  %v8414_v37 = vpop.permute.xlu0 %8413 }
 0x739   :  { %v8219_v2 = vpop.f32.mrf.mxu0 }
 0x73a   :  { %v7684_v53 = vadd.f32 %v7683_v33, %v7635_v55  ;;  %v8400_v9 = vpop.permute.xlu2 %8399  ;;  %v8723_v33 = vrot.slane %v8414_v37, 4 }
 0x73c   :  { %v7789_v32 = vadd.f32 %v7788_v27, %v7684_v53  ;;  %v19012_v27 = vld [vmem:[#allocation29_spill] sm:$0xff]  ;;  %v8724_v53 = vsel %vm1592_vm3, %v8426_v62, %v8723_v33 }
 0x73e   :  { %v8258_v60 = vpop.f32.mrf.mxu1 }
 0x740   :  { %v8394_v3 = vpop.permute.xlu1 %8393 }
 0x741   :  { %v8699_v8 = vrot.slane %v8394_v3, 4 }
 0x742   :  { %v15972_v30 = vpop.permute.xlu2 %8423 }
 0x745   :  { %v7886_v48 = vpop.f32.mrf.mxu3 }
 0x746   :  { %v8264_v54 = vpop.f32.mrf.mxu1 }
 0x748   :  { %v15974_v17 = vpop.permute.xlu1 %8417 }
 0x74a   :  { %v8420_v61 = vpop.permute.xlu2 %8419 }
 0x74b   :  { %v8709_v38 = vrot.slane %v8420_v61, 4 }
 0x74d   :  { %v7842_v50 = vpop.f32.mrf.mxu2  ;;  %v7892_v22 = vpop.f32.mrf.mxu3 }
 0x74e   :  { %v7843_v26 = vadd.f32 %v7842_v50, %v7785_v29  ;;  %v8697_v50 = vrot.slane %v8406_v45, 4 }
 0x750   :  { %v7887_v20 = vadd.f32 %v7886_v48, %v7843_v26  ;;  %v8685_v48 = vrot.slane %v8400_v9, 4  ;;  %v8698_v29 = vsel %vm1592_vm3, %v8697_v50, %v8394_v3 }
 0x752   :  { %v7962_v0 = vadd.f32 %v7961_v10, %v7887_v20  ;;  %v8686_v55 = vsel %vm1592_vm3, %v8685_v48, %v19012_v27  ;;  %v8721_v10 = vrot.slane %v8426_v62, 4  ;;  %v15981_v26 = vpop.permute.xlu2 %8439  ;;  %v19013_v20 = vld [vmem:[#allocation33_spill] sm:$0xff] }
 0x754   :  { %v8003_v4 = vadd.f32 %v8002_v31, %v7962_v0  ;;  %v15976_v58 = vpop.permute.xlu1 %8445  ;;  %v8692_v31 = vperm.slane %v8686_v55, %v19013_v20  ;;  %v19014_v0 = vld [vmem:[#allocation31_spill] sm:$0xff] }
 0x755   :  { %v7847_v63 = vpop.f32.mrf.mxu2 }
 0x756   :  { %v7848_v19 = vadd.f32 %v7847_v63, %v7789_v32  ;;  %v8722_v63 = vsel %vm1592_vm3, %v8721_v10, %v8414_v37  ;;  %v8700_v32 = vsel %vm1592_vm3, %v8406_v45, %v8699_v8  ;;  %v8809_v37 = vrot.slane %v15976_v58, 4 }
 0x758   :  { %v7893_v57 = vadd.f32 %v7892_v22, %v7848_v19  ;;  %v8687_v22 = vrot.slane %v19012_v27, 4  ;;  %v8704_v19 = vperm.slane %v8698_v29, %v19013_v20 }
 0x75a   :  { %v7966_v35 = vadd.f32 %v7965_v36, %v7893_v57  ;;  %v8711_v36 = vrot.slane %v19014_v0, 4  ;;  %v8728_v57 = vperm.slane %v8722_v63, %v19013_v20 }
 0x75c   :  { %v8007_v56 = vadd.f32 %v8006_v34, %v7966_v35  ;;  %v8712_v34 = vsel %vm1592_vm3, %v8420_v61, %v8711_v36 }
 0x765   :  { %v8156_v25 = vpop.f32.mrf.mxu3 }
 0x76d   :  { %v8047_v23 = vpop.f32.mrf.mxu2  ;;  %v8160_v14 = vpop.f32.mrf.mxu3 }
 0x76e   :  { %v8048_v42 = vadd.f32 %v8047_v23, %v8003_v4  ;;  %v8688_v23 = vsel %vm1592_vm3, %v8400_v9, %v8687_v22  ;;  %v8732_v4 = vperm.slane %v8724_v53, %v19013_v20 }
 0x770   :  { %v8157_v5 = vadd.f32 %v8156_v25, %v8048_v42  ;;  %v8710_v25 = vsel %vm1592_vm3, %v8709_v38, %v19014_v0  ;;  %v8708_v42 = vperm.slane %v8700_v32, %v19013_v20 }
 0x771   :  { %v8716_v35 = vperm.slane %v8710_v25, %v19013_v20 }
 0x772   :  { %v8215_v41 = vadd.f32 %v8214_v24, %v8157_v5  ;;  %v8696_v24 = vperm.slane %v8688_v23, %v19013_v20  ;;  %v8735_v5 = vrot.slane %v8692_v31, 4 }
 0x774   :  { %v8259_v51 = vadd.f32 %v8258_v60, %v8215_v41  ;;  %v8720_v41 = vperm.slane %v8712_v34, %v19013_v20  ;;  %v8757_v60 = vrot.slane %v8728_v57, 4 }
 0x775   :  { %v8055_v15 = vpop.f32.mrf.mxu2 }
 0x776   :  { %v8056_v11 = vadd.f32 %v8055_v15, %v8007_v56  ;;  %v8434_v15 = vpop.permute.xlu1 %8433  ;;  %v8758_v45 = vsel %vm1592_vm3, %v8757_v60, %v8716_v35 }
 0x777   :  { %v8811_v8 = vrot.slane %v8434_v15, 4  ;;  %v8810_v29 = vsel %vm1592_vm3, %v8809_v37, %v8434_v15  ;;  %v16072_v37 = vpop.permute.xlu0 %8443 }
 0x778   :  { %v8161_v1 = vadd.f32 %v8160_v14, %v8056_v11  ;;  %v8733_v14 = vrot.slane %v8704_v19, 4  ;;  %v8736_v11 = vsel %vm1592_vm3, %v8704_v19, %v8735_v5  ;;  %v8799_v19 = vrot.slane %v15878_v40, 4 }
 0x779   :  { %v8499_v5 = vrot.slane %v15972_v30, 4 }
 0x77a   :  { %v8220_v18 = vadd.f32 %v8219_v2, %v8161_v1  ;;  %v8769_v1 = vrot.slane %v8732_v4, 4  ;;  %v8734_v2 = vsel %vm1592_vm3, %v8733_v14, %v8692_v31 }
 0x77c   :  { %v8265_v43 = vadd.f32 %v8264_v54, %v8220_v18  ;;  %v19015_v18 = vld [vmem:[#allocation5_spill] sm:$0xff]  ;;  %v8770_v9 = vsel %vm1592_vm3, %v8769_v1, %v8720_v41 }
 0x77d   :  { %v8744_v54 = vperm.slane %v8736_v11, %v19015_v18  ;;  %v8740_v3 = vperm.slane %v8734_v2, %v19015_v18  ;;  %v8764_v38 = vperm.slane %v8758_v45, %v19015_v18  ;;  %v8776_v27 = vperm.slane %v8770_v9, %v19015_v18 }
 0x77e   :  { %v16035_v0 = vpop.permute.xlu1 %8397 }
 0x77f   :  { %v8787_v63 = vrot.slane %v8744_v54, 4  ;;  %v8783_v53 = vrot.slane %v8740_v3, 4  ;;  %v8789_v34 = vrot.slane %v8776_v27, 4 }
 0x785   :  { %v8374_v39 = vpop.f32.mrf.mxu3 }
 0x78d   :  { %v8333_v46 = vpop.f32.mrf.mxu2  ;;  %v8378_v52 = vpop.f32.mrf.mxu3 }
 0x78e   :  { %v8334_v21 = vadd.f32 %v8333_v46, %v8259_v51  ;;  %v8745_v51 = vrot.slane %v8708_v42, 4  ;;  %v8747_v46 = vrot.slane %v8696_v24, 4 }
 0x790   :  { %v8375_v47 = vadd.f32 %v8374_v39, %v8334_v21  ;;  %v8759_v39 = vrot.slane %v8716_v35, 4  ;;  %v8475_v21 = vrot.slane %v15970_v44, 4  ;;  %v8746_v62 = vsel %vm1592_vm3, %v8745_v51, %v8696_v24 }
 0x791   :  { %v8748_v61 = vsel %vm1592_vm3, %v8708_v42, %v8747_v46  ;;  %v8752_v10 = vperm.slane %v8746_v62, %v19015_v18  ;;  %v8781_v42 = vrot.slane %v8764_v38, 4  ;;  %v8800_v35 = vsel %vm1592_vm3, %v15981_v26, %v8799_v19 }
 0x792   :  { %9524 = vtanh.f32 %v8375_v47  ;;  %v8465_v47 = vrot.slane %v19009_v16, 4  ;;  %v8756_v22 = vperm.slane %v8748_v61, %v19015_v18  ;;  %v8808_v1 = vperm.slane %v8800_v35, %v19013_v20 }
 0x793   :  { %v8782_v46 = vsel %vm1592_vm3, %v8781_v42, %v8740_v3  ;;  %v8790_v2 = vsel %vm1592_vm3, %v8789_v34, %v8752_v10  ;;  %v8577_v19 = vrot.slane %v15867_v7, 4  ;;  %v8587_v42 = vrot.slane %v16072_v37, 4 }
 0x794   :  { %v8795_v24 = vrot.slane %v8756_v22, 4  ;;  %v16070_v62 = vsel %vm2136_vm0, %v8782_v46, -inf  ;;  %v8857_v61 = vrot.slane %v8808_v1, 4 }
 0x795   :  { %v8337_v13 = vpop.f32.mrf.mxu2 }
 0x796   :  { %v8338_v59 = vadd.f32 %v8337_v13, %v8265_v43  ;;  %v8489_v43 = vrot.slane %v19011_v28, 4  ;;  %v8760_v13 = vsel %vm1592_vm3, %v8728_v57, %v8759_v39  ;;  %v8812_v57 = vsel %vm1592_vm3, %v15976_v58, %v8811_v8  ;;  %v8438_v8 = vpop.permute.xlu1 %8437 }
 0x797   :  { %v8768_v50 = vperm.slane %v8760_v13, %v19015_v18  ;;  %v8784_v58 = vsel %vm1592_vm3, %v8764_v38, %v8783_v53 }
 0x798   :  { %v15952_v12 = vpop.eup %9524  ;;  %v8379_v49 = vadd.f32 %v8378_v52, %v8338_v59  ;;  %v8797_v59 = vrot.slane %v15981_v26, 4  ;;  %v8771_v52 = vrot.slane %v8720_v41, 4  ;;  %v8490_v48 = vsel %vm1592_vm3, %v15974_v17, %v8489_v43 }
 0x799   :  { %8457 = vrot.lane.b32.xlu2 %v15952_v12, %s9560_s8  ;;  %v16031_v31 = vperm.slane %v8490_v48, %v19013_v20  ;;  %v8785_v23 = vrot.slane %v8768_v50, 4  ;;  %v8788_v14 = vsel %vm1592_vm3, %v8768_v50, %v8787_v63  ;;  %v8820_v41 = vperm.slane %v8812_v57, %v19013_v20 }
 0x79a   :  { %9526 = vtanh.f32 %v8379_v49  ;;  %v8487_v49 = vrot.slane %v15974_v17, 4  ;;  %v8772_v33 = vsel %vm1592_vm3, %v8732_v4, %v8771_v52  ;;  %v8798_v55 = vsel %vm1592_vm3, %v8797_v59, %v15878_v40 }
 0x79b   :  { %v8780_v32 = vperm.slane %v8772_v33, %v19015_v18  ;;  %v8804_v36 = vperm.slane %v8798_v55, %v19013_v20  ;;  %v8816_v4 = vperm.slane %v8810_v29, %v19013_v20  ;;  %v8791_v40 = vrot.slane %v8752_v10, 4 }
 0x79c   :  { %v8488_v17 = vsel %vm1592_vm3, %v8487_v49, %v19011_v28  ;;  %v8549_v15 = vrot.slane %v16031_v31, 4  ;;  %v8786_v60 = vsel %vm1592_vm3, %v8785_v23, %v8744_v54  ;;  %v16057_v43 = vsel %vm2136_vm0, %v8788_v14, -inf }
 0x79d   :  { %v8793_v11 = vrot.slane %v8780_v32, 4  ;;  %v8845_v51 = vrot.slane %v8804_v36, 4  ;;  %v8843_v39 = vrot.slane %v8816_v4, 4  ;;  %v8792_v13 = vsel %vm1592_vm3, %v8776_v27, %v8791_v40 }
 0x79e   :  { %v8796_v59 = vsel %vm1592_vm3, %v8780_v32, %v8795_v24  ;;  %v16062_v52 = vsel %vm2136_vm0, %v8784_v58, -inf  ;;  %v16067_v45 = vsel %vm2136_vm0, %v8786_v60, -inf  ;;  %v8855_v9 = vrot.slane %v8820_v41, 4 }
 0x79f   :  { %v8846_v54 = vsel %vm1592_vm3, %v8816_v4, %v8845_v51  ;;  %v8794_v49 = vsel %vm1592_vm3, %v8793_v11, %v8756_v22  ;;  %v8844_v48 = vsel %vm1592_vm3, %v8843_v39, %v8804_v36  ;;  %v16076_v50 = vsel %vm2136_vm0, %v8790_v2, -inf }
 0x7a0   :  { %v15956_v6 = vpop.eup %9526  ;;  %v16079_v33 = vperm.slane %v8846_v54, %v19015_v18  ;;  %v16084_v29 = vsel %vm2136_vm0, %v8792_v13, -inf  ;;  %v8858_v10 = vsel %vm1592_vm3, %v8820_v41, %v8857_v61  ;;  %v8463_v22 = vrot.slane %v16035_v0, 4 }
 0x7a1   :  { %8459 = vrot.lane.b32.xlu0 %v15956_v6, %s9560_s8  ;;  %8411 = vrot.lane.b32.xlu2 %v19011_v28, %s9559_s0  ;;  %v16042_v28 = vperm.slane %v8488_v17, %v19013_v20  ;;  %v16089_v63 = vsel %vm2136_vm0, %v8794_v49, -inf  ;;  %v16092_v17 = vsel %vm2136_vm0, %v8796_v59, -inf  ;;  %v16095_v53 = vperm.slane %v8844_v48, %v19015_v18 }
 0x7a2   :  { %v8856_v32 = vsel %vm1592_vm3, %v8855_v9, %v8808_v1  ;;  %v8575_v23 = vrot.slane %v8438_v8, 4  ;;  %v8601_v36 = vrot.slane %v15952_v12, 4  ;;  %v16105_v34 = vperm.slane %v8858_v10, %v19015_v18 }
 0x7a3   :  { %v8537_v26 = vrot.slane %v16042_v28, 4  ;;  %v8897_v35 = vrot.slane %v16079_v33, 4  ;;  %v8464_v24 = vsel %vm1592_vm3, %v8463_v22, %v19009_v16  ;;  %v16120_v58 = vperm.slane %v8856_v32, %v19015_v18 }
 0x7a4   :  { %v8893_v11 = vrot.slane %v16095_v53, 4  ;;  %v16131_v1 = vperm.slane %v8464_v24, %v19013_v20 }
 0x7a9   :  { %8453 = vrot.lane.b32.xlu0 %v15956_v6, %s9559_s0  ;;  %8451 = vrot.lane.b32.xlu2 %v15952_v12, %s9559_s0 }
 0x7b1   :  { %8391 = vrot.lane.b32.xlu0 %v19009_v16, %s9559_s0  ;;  %v8576_v16 = vsel %vm1592_vm3, %v8575_v23, %v15867_v7 }
 0x7b2   :  { %v16142_v54 = vperm.slane %v8576_v16, %v19013_v20 }
 0x7b9   :  { %8431 = vrot.lane.b32.xlu0 %v15867_v7, %s9559_s0 }
 0x7f3   :  { %v15999_v56 = vpop.permute.xlu2 %8457 }
 0x7f4   :  { %v8599_v38 = vrot.slane %v15999_v56, 4 }
 0x7f6   :  { %v8600_v40 = vsel %vm1592_vm3, %v8599_v38, %v15952_v12  ;;  %v8578_v12 = vsel %vm1592_vm3, %v8438_v8, %v8577_v19  ;;  %v8901_v38 = vrot.slane %v16120_v58, 4 }
 0x7f7   :  { %v8606_v60 = vperm.slane %v8600_v40, %v19013_v20  ;;  %v16138_v2 = vperm.slane %v8578_v12, %v19013_v20 }
 0x7f9   :  { %v8647_v61 = vrot.slane %v8606_v60, 4 }
 0x7fb   :  { %v8412_v25 = vpop.permute.xlu2 %8411 }
 0x7fc   :  { %v8501_v3 = vrot.slane %v8412_v25, 4  ;;  %v8500_v27 = vsel %vm1592_vm3, %v8499_v5, %v8412_v25  ;;  %v8602_v5 = vsel %vm1592_vm3, %v15999_v56, %v8601_v36  ;;  %v8905_v56 = vrot.slane %v16105_v34, 4 }
 0x7fd   :  { %v8506_v57 = vperm.slane %v8500_v27, %v19013_v20  ;;  %v8610_v39 = vperm.slane %v8602_v5, %v19013_v20  ;;  %v8513_v36 = vrot.slane %v16131_v1, 4 }
 0x7fe   :  { %v8502_v25 = vsel %vm1592_vm3, %v15972_v30, %v8501_v3  ;;  %v8466_v30 = vsel %vm1592_vm3, %v16035_v0, %v8465_v47  ;;  %v8823_v3 = vrot.slane %v15956_v6, 4 }
 0x7ff   :  { %v8510_v14 = vperm.slane %v8502_v25, %v19013_v20  ;;  %v8535_v47 = vrot.slane %v8506_v57, 4  ;;  %v16134_v51 = vperm.slane %v8466_v30, %v19013_v20  ;;  %v8538_v7 = vsel %vm1592_vm3, %v8506_v57, %v8537_v26 }
 0x800   :  { %v16156_v10 = vperm.slane %v8538_v7, %v19015_v18  ;;  %v8623_v57 = vrot.slane %v16142_v54, 4 }
 0x801   :  { %v8547_v13 = vrot.slane %v8510_v14, 4  ;;  %v8536_v48 = vsel %vm1592_vm3, %v8535_v47, %v16042_v28  ;;  %v8550_v8 = vsel %vm1592_vm3, %v8510_v14, %v8549_v15  ;;  %v8525_v27 = vrot.slane %v16134_v51, 4 }
 0x802   :  { %v16164_v19 = vperm.slane %v8536_v48, %v19015_v18  ;;  %v8563_v47 = vrot.slane %v16156_v10, 4 }
 0x803   :  { %v8452_v55 = vpop.permute.xlu2 %8451  ;;  %v8548_v22 = vsel %vm1592_vm3, %v8547_v13, %v16031_v31  ;;  %v8635_v31 = vrot.slane %v16138_v2, 4 }
 0x804   :  { %v8611_v4 = vrot.slane %v8452_v55, 4  ;;  %v8616_v41 = vperm.slane %v8452_v55, %v19013_v20  ;;  %v8659_v55 = vrot.slane %v8610_v39, 4 }
 0x806   :  { %v8612_v0 = vsel %vm1592_vm3, 0.0, %v8611_v4  ;;  %v8645_v9 = vrot.slane %v8616_v41, 4  ;;  %v8648_v28 = vsel %vm1592_vm3, %v8616_v41, %v8647_v61  ;;  %v16174_v4 = vperm.slane %v8548_v22, %v19015_v18 }
 0x807   :  { %v8620_v49 = vperm.slane %v8612_v0, %v19013_v20  ;;  %v16177_v40 = vperm.slane %v8648_v28, %v19015_v18 }
 0x808   :  { %v8646_v25 = vsel %vm1592_vm3, %v8645_v9, %v8606_v60  ;;  %v8559_v60 = vrot.slane %v16164_v19, 4  ;;  %v8567_v9 = vrot.slane %v16174_v4, 4 }
 0x809   :  { %v8657_v23 = vrot.slane %v8620_v49, 4  ;;  %v8660_v24 = vsel %vm1592_vm3, %v8620_v49, %v8659_v55  ;;  %v16182_v14 = vperm.slane %v8646_v25, %v19015_v18 }
 0x80a   :  { %v16190_v7 = vperm.slane %v8660_v24, %v19015_v18 }
 0x80c   :  { %v8681_v24 = vrot.slane %v16190_v7, 4 }
 0x813   :  { %v8460_v46 = vpop.permute.xlu0 %8459 }
 0x814   :  { %v8821_v59 = vrot.slane %v8460_v46, 4  ;;  %v8824_v32 = vsel %vm1592_vm3, %v8460_v46, %v8823_v3  ;;  %v8658_v46 = vsel %vm1592_vm3, %v8657_v23, %v8610_v39  ;;  %v8669_v39 = vrot.slane %v16182_v14, 4  ;;  %v16208_v23 = vld [vmem:[%s16472_s4 + $0x18] sm:$0xff] }
 0x815   :  { %v8832_v30 = vperm.slane %v8824_v32, %v19013_v20 }
 0x816   :  { %v8822_v26 = vsel %vm1592_vm3, %v8821_v59, %v15956_v6  ;;  %v16167_v6 = vperm.slane %v8550_v8, %v19015_v18  ;;  %v16198_v8 = vperm.slane %v8658_v46, %v19015_v18 }
 0x817   :  { %v8828_v15 = vperm.slane %v8822_v26, %v19013_v20  ;;  %v8881_v3 = vrot.slane %v8832_v30, 4  ;;  %v8673_v26 = vrot.slane %v16177_v40, 4 }
 0x818   :  { %v8571_v0 = vrot.slane %v16167_v6, 4 }
 0x819   :  { %v8869_v12 = vrot.slane %v8828_v15, 4 }
 0x81b   :  { %v8454_v5 = vpop.permute.xlu0 %8453 }
 0x81c   :  { %v8833_v41 = vrot.slane %v8454_v5, 4  ;;  %v8838_v16 = vperm.slane %v8454_v5, %v19013_v20 }
 0x81e   :  { %v8834_v13 = vsel %vm1592_vm3, 0.0, %v8833_v41  ;;  %v8867_v59 = vrot.slane %v8838_v16, 4  ;;  %v8870_v49 = vsel %vm1592_vm3, %v8838_v16, %v8869_v12 }
 0x81f   :  { %v8842_v61 = vperm.slane %v8834_v13, %v19013_v20  ;;  %v8878_v48 = vperm.slane %v8870_v49, %v19015_v18 }
 0x820   :  { %v8868_v55 = vsel %vm1592_vm3, %v8867_v59, %v8828_v15  ;;  %v16216_v15 = vand.u32 4294901760, %v16208_v23 }
 0x821   :  { %v8874_v22 = vperm.slane %v8868_v55, %v19015_v18  ;;  %v8879_v28 = vrot.slane %v8842_v61, 4  ;;  %v8882_v32 = vsel %vm1592_vm3, %v8842_v61, %v8881_v3  ;;  %v8895_v25 = vrot.slane %v8878_v48, 4 }
 0x822   :  { %v8890_v5 = vperm.slane %v8882_v32, %v19015_v18  ;;  %v8898_v12 = vsel %vm1592_vm3, %v8878_v48, %v8897_v35  ;;  %9471 = vmatpush.msrb.mxu2 %v16216_v15  ;;  %9114 = vmatpush.msra.mxu0 %v16216_v15 }
 0x823   :  { %v8880_v41 = vsel %vm1592_vm3, %v8879_v28, %v8832_v30  ;;  %v8891_v16 = vrot.slane %v8874_v22, 4  ;;  %v8894_v46 = vsel %vm1592_vm3, %v8874_v22, %v8893_v11  ;;  %v8896_v13 = vsel %vm1592_vm3, %v8895_v25, %v16079_v33  ;;  %v8392_v25 = vpop.permute.xlu0 %8391 }
 0x824   :  { %v8886_v59 = vperm.slane %v8880_v41, %v19015_v18  ;;  %v8903_v49 = vrot.slane %v8890_v5, 4  ;;  %v8906_v35 = vsel %vm1592_vm3, %v8890_v5, %v8905_v56  ;;  %v8990_v3 = vsel %vm8908_vm6, %v8894_v46, -inf }
 0x825   :  { %v8892_v30 = vsel %vm1592_vm3, %v8891_v16, %v16095_v53  ;;  %v8991_v11 = vmax.f32 %v16062_v52, %v8990_v3  ;;  %v8999_v33 = vsel %vm8908_vm6, %v8896_v13, -inf  ;;  %v9008_v61 = vsel %vm8908_vm6, %v8898_v12, -inf }
 0x826   :  { %v8899_v48 = vrot.slane %v8886_v59, 4  ;;  %v8902_v56 = vsel %vm1592_vm3, %v8886_v59, %v8901_v38  ;;  %v8904_v55 = vsel %vm1592_vm3, %v8903_v49, %v16105_v34  ;;  %v8981_v22 = vsel %vm8908_vm6, %v8892_v30, -inf }
 0x827   :  { %v8982_v28 = vmax.f32 %v16070_v62, %v8981_v22  ;;  %v8992_v32 = vrot.slane %v8991_v11, 4  ;;  %v9000_v53 = vmax.f32 %v16067_v45, %v8999_v33  ;;  %v9009_v52 = vmax.f32 %v16057_v43, %v9008_v61 }
 0x828   :  { %v8900_v5 = vsel %vm1592_vm3, %v8899_v48, %v16120_v58  ;;  %v9026_v12 = vsel %vm8908_vm6, %v8902_v56, -inf  ;;  %v9035_v38 = vsel %vm8908_vm6, %v8904_v55, -inf  ;;  %v9044_v41 = vsel %vm8908_vm6, %v8906_v35, -inf }
 0x829   :  { %v8983_v34 = vrot.slane %v8982_v28, 4  ;;  %v8993_v16 = vmax.f32 %v8991_v11, %v8992_v32  ;;  %v9001_v46 = vrot.slane %v9000_v53, 4  ;;  %v9010_v13 = vrot.slane %v9009_v52, 4 }
 0x82a   :  { %v9017_v62 = vsel %vm8908_vm6, %v8900_v5, -inf  ;;  %v9027_v45 = vmax.f32 %v16084_v29, %v9026_v12  ;;  %v9036_v43 = vmax.f32 %v16089_v63, %v9035_v38  ;;  %v9045_v59 = vmax.f32 %v16092_v17, %v9044_v41 }
 0x82b   :  { %v8984_v58 = vmax.f32 %v8982_v28, %v8983_v34  ;;  %v8994_v49 = vrot.slane %v8993_v16, 2  ;;  %v9002_v3 = vmax.f32 %v9000_v53, %v9001_v46  ;;  %v9011_v30 = vmax.f32 %v9009_v52, %v9010_v13 }
 0x82c   :  { %v9018_v33 = vmax.f32 %v16076_v50, %v9017_v62  ;;  %v9028_v35 = vrot.slane %v9027_v45, 4  ;;  %v9037_v61 = vrot.slane %v9036_v43, 4  ;;  %v9046_v11 = vrot.slane %v9045_v59, 4  ;;  %v8432_v62 = vpop.permute.xlu0 %8431 }
 0x82d   :  { %v8985_v48 = vrot.slane %v8984_v58, 2  ;;  %v8995_v56 = vmax.f32 %v8993_v16, %v8994_v49  ;;  %v9003_v55 = vrot.slane %v9002_v3, 2  ;;  %v9012_v22 = vrot.slane %v9011_v30, 2 }
 0x82e   :  { %v9019_v32 = vrot.slane %v9018_v33, 4  ;;  %v9029_v29 = vmax.f32 %v9027_v45, %v9028_v35  ;;  %v16255_v5 = vmax.f32 %v9036_v43, %v9037_v61  ;;  %v16257_v63 = vmax.f32 %v9045_v59, %v9046_v11 }
 0x82f   :  { %v8986_v17 = vmax.f32 %v8984_v58, %v8985_v48  ;;  %v8996_v28 = vrot.slane %v8995_v56, 1  ;;  %v9004_v12 = vmax.f32 %v9002_v3, %v9003_v55  ;;  %v9013_v53 = vmax.f32 %v9011_v30, %v9012_v22 }
 0x830   :  { %v8677_v52 = vrot.slane %v16198_v8, 4  ;;  %v9020_v50 = vmax.f32 %v9018_v33, %v9019_v32  ;;  %v9030_v38 = vrot.slane %v9029_v29, 2  ;;  %v9039_v41 = vrot.slane %v16255_v5, 2 }
 0x831   :  { %v8987_v34 = vrot.slane %v8986_v17, 1  ;;  %v9005_v16 = vrot.slane %v9004_v12, 1  ;;  %v9014_v46 = vrot.slane %v9013_v53, 1  ;;  %v9048_v13 = vrot.slane %v16257_v63, 2 }
 0x832   :  { %v9021_v45 = vrot.slane %v9020_v50, 2  ;;  %v16262_v43 = vmax.f32 %v9029_v29, %v9030_v38  ;;  %v8476_v59 = vsel %vm1592_vm3, %v8475_v21, %v8392_v25  ;;  %v8477_v58 = vrot.slane %v8392_v25, 4 }
 0x833   :  { %v8988_v49 = vmax.f32 %v8986_v17, %v8987_v34  ;;  %v8997_v3 = vmax.f32 %v8995_v56, %v8996_v28  ;;  %v16267_v30 = vmax.f32 %v9004_v12, %v9005_v16  ;;  %v8482_v33 = vperm.slane %v8476_v59, %v19013_v20 }
 0x834   :  { %v16270_v35 = vmax.f32 %v9013_v53, %v9014_v46  ;;  %v16272_v61 = vmax.f32 %v9020_v50, %v9021_v45  ;;  %v8478_v11 = vsel %vm1592_vm3, %v15970_v44, %v8477_v58  ;;  %v8588_v48 = vsel %vm1592_vm3, %v8587_v42, %v8432_v62 }
 0x835   :  { %v9032_v21 = vrot.slane %v16262_v43, 1  ;;  %v8486_v25 = vperm.slane %v8478_v11, %v19013_v20  ;;  %v8511_v56 = vrot.slane %v8482_v33, 4  ;;  %v8514_v55 = vsel %vm1592_vm3, %v8482_v33, %v8513_v36 }
 0x836   :  { %v16285_v22 = vsel %vm9076_vm7, %v8997_v3, %v8988_v49  ;;  %v8522_v32 = vperm.slane %v8514_v55, %v19015_v18  ;;  %v8589_v29 = vrot.slane %v8432_v62, 4  ;;  %v8594_v44 = vperm.slane %v8588_v48, %v19013_v20 }
 0x837   :  { %v8512_v42 = vsel %vm1592_vm3, %v8511_v56, %v16131_v1  ;;  %v8523_v17 = vrot.slane %v8486_v25, 4  ;;  %v8526_v28 = vsel %vm1592_vm3, %v8486_v25, %v8525_v27  ;;  %v16296_v12 = vsub.f32 %v16208_v23, %v16216_v15 }
 0x838   :  { %v8518_v36 = vperm.slane %v8512_v42, %v19015_v18  ;;  %v8534_v53 = vperm.slane %v8526_v28, %v19015_v18  ;;  %v8564_v50 = vsel %vm1592_vm3, %v8563_v47, %v8522_v32  ;;  %v8565_v38 = vrot.slane %v8522_v32, 4 }
 0x839   :  { %v8524_v1 = vsel %vm1592_vm3, %v8523_v17, %v16134_v51  ;;  %v8926_v34 = vsel %vm2136_vm0, %v8564_v50, -inf  ;;  %v8590_v27 = vsel %vm1592_vm3, %v16072_v37, %v8589_v29  ;;  %v8621_v16 = vrot.slane %v8594_v44, 4 }
 0x83a   :  { %v8530_v23 = vperm.slane %v8524_v1, %v19015_v18  ;;  %v8560_v46 = vsel %vm1592_vm3, %v8559_v60, %v8518_v36  ;;  %v8561_v62 = vrot.slane %v8518_v36, 4  ;;  %v8566_v47 = vsel %vm1592_vm3, %v16156_v10, %v8565_v38 }
 0x83b   :  { %v8572_v51 = vsel %vm1592_vm3, %v8571_v0, %v8534_v53  ;;  %v8573_v45 = vrot.slane %v8534_v53, 4  ;;  %v8907_v59 = vsel %vm2136_vm0, %v8560_v46, -inf  ;;  %v8935_v37 = vsel %vm2136_vm0, %v8566_v47, -inf }
 0x83c   :  { %v8562_v58 = vsel %vm1592_vm3, %v16164_v19, %v8561_v62  ;;  %v8568_v60 = vsel %vm1592_vm3, %v8567_v9, %v8530_v23  ;;  %v8569_v49 = vrot.slane %v8530_v23, 4  ;;  %v8962_v3 = vsel %vm2136_vm0, %v8572_v51, -inf  ;;  %v16333_v19 = vld [vmem:[%s16472_s4 + $0x10] sm:$0xff]  ;;  %v16338_v9 = vld [vmem:[%s16472_s4 + $0x8] sm:$0xff] }
 0x83d   :  { %v8574_v10 = vsel %vm1592_vm3, %v16167_v6, %v8573_v45  ;;  %v8917_v0 = vsel %vm2136_vm0, %v8562_v58, -inf  ;;  %v8944_v33 = vsel %vm2136_vm0, %v8568_v60, -inf  ;;  %v8598_v11 = vperm.slane %v8590_v27, %v19013_v20 }
 0x83e   :  { %v8570_v48 = vsel %vm1592_vm3, %v16174_v4, %v8569_v49  ;;  %v8971_v6 = vsel %vm2136_vm0, %v8574_v10, -inf  ;;  %v8622_v25 = vsel %vm1592_vm3, %v8621_v16, %v16142_v54  ;;  %v8624_v20 = vsel %vm1592_vm3, %v8594_v44, %v8623_v57 }
 0x83f   :  { %v8953_v56 = vsel %vm2136_vm0, %v8570_v48, -inf  ;;  %v8628_v55 = vperm.slane %v8622_v25, %v19015_v18  ;;  %v8632_v32 = vperm.slane %v8624_v20, %v19015_v18  ;;  %v8633_v29 = vrot.slane %v8598_v11, 4 }
 0x840   :  { %v8636_v4 = vsel %vm1592_vm3, %v8598_v11, %v8635_v31  ;;  %v9152_v42 = vand.u32 4294901760, %v16296_v12  ;;  %v16356_v17 = vand.u32 4294901760, %v16333_v19  ;;  %v16359_v54 = vand.u32 4294901760, %v16338_v9 }
 0x841   :  { %v8634_v57 = vsel %vm1592_vm3, %v8633_v29, %v16138_v2  ;;  %v8644_v44 = vperm.slane %v8636_v4, %v19015_v18  ;;  %v8670_v28 = vsel %vm1592_vm3, %v8669_v39, %v8628_v55  ;;  %v8671_v36 = vrot.slane %v8628_v55, 4 }
 0x842   :  { %v8640_v31 = vperm.slane %v8634_v57, %v19015_v18  ;;  %v8674_v53 = vsel %vm1592_vm3, %v8673_v26, %v8632_v32  ;;  %v8675_v50 = vrot.slane %v8632_v32, 4  ;;  %v8909_v38 = vsel %vm8908_vm6, %v8670_v28, -inf  ;;  %9472 = vmatpush.msrb.mxu2 %v16356_v17  ;;  %9116 = vmatpush.msra.mxu0 %v16356_v17 }
 0x843   :  { %v8672_v2 = vsel %vm1592_vm3, %v16182_v14, %v8671_v36  ;;  %v8682_v39 = vsel %vm1592_vm3, %v8681_v24, %v8644_v44  ;;  %v8683_v1 = vrot.slane %v8644_v44, 4  ;;  %v8910_v18 = vmax.f32 %v8907_v59, %v8909_v38 }
 0x844   :  { %v8676_v27 = vsel %vm1592_vm3, %v16177_v40, %v8675_v50  ;;  %v8678_v26 = vsel %vm1592_vm3, %v8677_v52, %v8640_v31  ;;  %v8679_v16 = vrot.slane %v8640_v31, 4  ;;  %v8918_v23 = vsel %vm8908_vm6, %v8672_v2, -inf  ;;  %9473 = vmatpush.msrb.mxu2 %v16359_v54  ;;  %9118 = vmatpush.msra.mxu0 %v16359_v54 }
 0x845   :  { %v8684_v14 = vsel %vm1592_vm3, %v16190_v7, %v8683_v1  ;;  %v8911_v24 = vrot.slane %v8910_v18, 4  ;;  %v8919_v46 = vmax.f32 %v8917_v0, %v8918_v23  ;;  %v8927_v62 = vsel %vm8908_vm6, %v8674_v53, -inf }
 0x846   :  { %v8680_v40 = vsel %vm1592_vm3, %v16198_v8, %v8679_v16  ;;  %v8928_v47 = vmax.f32 %v8926_v34, %v8927_v62  ;;  %v8936_v52 = vsel %vm8908_vm6, %v8676_v27, -inf  ;;  %v8945_v51 = vsel %vm8908_vm6, %v8678_v26, -inf }
 0x847   :  { %v8912_v45 = vmax.f32 %v8910_v18, %v8911_v24  ;;  %v8920_v59 = vrot.slane %v8919_v46, 4  ;;  %v8937_v58 = vmax.f32 %v8935_v37, %v8936_v52  ;;  %v8946_v60 = vmax.f32 %v8944_v33, %v8945_v51  ;;  %v9052_v24 = vld [vmem:[%s16472_s4] sm:$0xff] }
 0x848   :  { %v8929_v49 = vrot.slane %v8928_v47, 4  ;;  %v8954_v10 = vsel %vm8908_vm6, %v8680_v40, -inf  ;;  %v8963_v7 = vsel %vm8908_vm6, %v8682_v39, -inf  ;;  %v8972_v0 = vsel %vm8908_vm6, %v8684_v14, -inf }
 0x849   :  { %v8913_v11 = vrot.slane %v8912_v45, 2  ;;  %v8921_v48 = vmax.f32 %v8919_v46, %v8920_v59  ;;  %v8938_v25 = vrot.slane %v8937_v58, 4  ;;  %v8947_v8 = vrot.slane %v8946_v60, 4 }
 0x84a   :  { %v8930_v34 = vmax.f32 %v8928_v47, %v8929_v49  ;;  %v8955_v20 = vmax.f32 %v8953_v56, %v8954_v10  ;;  %v8964_v55 = vmax.f32 %v8962_v3, %v8963_v7  ;;  %v8973_v32 = vmax.f32 %v8971_v6, %v8972_v0 }
 0x84b   :  { %v8914_v29 = vmax.f32 %v8912_v45, %v8913_v11  ;;  %v8922_v4 = vrot.slane %v8921_v48, 2  ;;  %v8939_v57 = vmax.f32 %v8937_v58, %v8938_v25  ;;  %v8948_v37 = vmax.f32 %v8946_v60, %v8947_v8 }
 0x84c   :  { %v8931_v33 = vrot.slane %v8930_v34, 2  ;;  %v8956_v44 = vrot.slane %v8955_v20, 4  ;;  %v8965_v28 = vrot.slane %v8964_v55, 4  ;;  %v8974_v36 = vrot.slane %v8973_v32, 4 }
 0x84d   :  { %v8915_v31 = vrot.slane %v8914_v29, 1  ;;  %v8923_v53 = vmax.f32 %v8921_v48, %v8922_v4  ;;  %v8940_v50 = vrot.slane %v8939_v57, 2  ;;  %v8949_v38 = vrot.slane %v8948_v37, 2 }
 0x84e   :  { %v9023_v2 = vrot.slane %v16272_v61, 1  ;;  %v8932_v39 = vmax.f32 %v8930_v34, %v8931_v33  ;;  %v8957_v1 = vmax.f32 %v8955_v20, %v8956_v44  ;;  %v8966_v18 = vmax.f32 %v8964_v55, %v8965_v28 }
 0x84f   :  { %v8916_v56 = vmax.f32 %v8914_v29, %v8915_v31  ;;  %v8924_v3 = vrot.slane %v8923_v53, 1  ;;  %v8941_v6 = vmax.f32 %v8939_v57, %v8940_v50  ;;  %v16398_v27 = vmax.f32 %v8973_v32, %v8974_v36 }
 0x850   :  { %v8933_v26 = vrot.slane %v8932_v39, 1  ;;  %v8950_v16 = vmax.f32 %v8948_v37, %v8949_v38  ;;  %v8967_v23 = vrot.slane %v8966_v18, 2  ;;  %v9153_v14 = vsub.f32 %v16296_v12, %v9152_v42 }
 0x851   :  { %v8925_v46 = vmax.f32 %v8923_v53, %v8924_v3  ;;  %v8942_v62 = vrot.slane %v8941_v6, 1  ;;  %v8958_v40 = vrot.slane %v8957_v1, 2  ;;  %v9157_v47 = vsub.f32 %v16333_v19, %v16356_v17 }
 0x852   :  { %v8934_v52 = vmax.f32 %v8932_v39, %v8933_v26  ;;  %v16408_v51 = vmax.f32 %v8966_v18, %v8967_v23  ;;  %v9154_v45 = vand.u32 4294901760, %v9153_v14  ;;  %v9163_v59 = vsub.f32 %v16338_v9, %v16359_v54 }
 0x853   :  { %v8943_v58 = vmax.f32 %v8941_v6, %v8942_v62  ;;  %v9077_v60 = vsel %vm9076_vm7, %v8925_v46, %v8916_v56  ;;  %v9158_v49 = vand.u32 4294901760, %v9157_v47  ;;  %v16413_v10 = vand.u32 4294901760, %v9052_v24 }
 0x854   :  { %9475 = vmatpush.msrb.mxu3 %v9154_v45  ;;  %v9164_v7 = vand.u32 4294901760, %v9163_v59  ;;  %v9024_v0 = vmax.f32 %v16272_v61, %v9023_v2  ;;  %v9033_v19 = vmax.f32 %v16262_v43, %v9032_v21  ;;  %v9040_v11 = vmax.f32 %v16255_v5, %v9039_v41  ;;  %9155 = vmatpush.msra.mxu1 %v9154_v45 }
 0x855   :  { %v8951_v9 = vrot.slane %v8950_v16, 1  ;;  %v9159_v48 = vsub.f32 %v9157_v47, %v9158_v49  ;;  %v9169_v25 = vsub.f32 %v9052_v24, %v16413_v10  ;;  %v9049_v8 = vmax.f32 %v16257_v63, %v9048_v13  ;;  %9474 = vmatpush.msrb.mxu2 %v16413_v10  ;;  %9120 = vmatpush.msra.mxu0 %v16413_v10 }
 0x856   :  { %v9165_v61 = vsub.f32 %v9163_v59, %v9164_v7  ;;  %v9041_v34 = vrot.slane %v9040_v11, 1  ;;  %v9091_v55 = vsel %vm9078_vm8, %v16267_v30, %v16285_v22  ;;  %v8969_v32 = vrot.slane %v16408_v51, 1 }
 0x857   :  { %9197 = vmatpush.msra.mxu2 %v16296_v12  ;;  %9266 = vmatpush.msrb.mxu0 %v9152_v42  ;;  %v9160_v5 = vand.u32 4294901760, %v9159_v48  ;;  %v9170_v41 = vand.u32 4294901760, %v9169_v25  ;;  %v9050_v43 = vrot.slane %v9049_v8, 1  ;;  %v9092_v12 = vsel %vm9080_vm9, %v16270_v35, %v9091_v55 }
 0x858   :  { %v9166_v21 = vand.u32 4294901760, %v9165_v61  ;;  %v9042_v20 = vmax.f32 %v9040_v11, %v9041_v34  ;;  %v8959_v42 = vmax.f32 %v8957_v1, %v8958_v40  ;;  %v8976_v29 = vrot.slane %v16398_v27, 2  ;;  %v9511_v40 = vld [vmem:[%s16473_s5] ss:$0 sm:$0xff]  ;;  %s9562_s5 = smov [#allocation2]  }
 0x859   :  { %9200 = vmatpush.msra.mxu2 %v9157_v47  ;;  %9270 = vmatpush.msrb.mxu0 %v9158_v49  ;;  %v9171_v63 = vsub.f32 %v9169_v25, %v9170_v41  ;;  %v9051_v13 = vmax.f32 %v9049_v8, %v9050_v43  ;;  %v9093_v57 = vsel %vm9082_vm10, %v9024_v0, %v9092_v12  ;;  %s9329_s26 = sshll.u32 %s9562_s5, 4  ;;  %s9330_s26 = int_to_ptr.vmem [resolvable:$true] %s9329_s26 }
 0x85a   :  { %9476 = vmatpush.msrb.mxu3 %v9160_v5  ;;  %9161 = vmatpush.msra.mxu1 %v9160_v5  ;;  %v8952_v37 = vmax.f32 %v8950_v16, %v8951_v9  ;;  %v9079_v33 = vsel %vm9078_vm8, %v8934_v52, %v9077_v60  ;;  %v9094_v30 = vsel %vm9084_vm11, %v9033_v19, %v9093_v57  ;;  %v8960_v22 = vrot.slane %v8959_v42, 1 }
 0x85b   :  { %9203 = vmatpush.msra.mxu2 %v9163_v59  ;;  %9274 = vmatpush.msrb.mxu0 %v9164_v7  ;;  %v9172_v4 = vand.u32 4294901760, %v9171_v63  ;;  %v8977_v35 = vmax.f32 %v16398_v27, %v8976_v29  ;;  %v9081_v44 = vsel %vm9080_vm9, %v8943_v58, %v9079_v33  ;;  %v9095_v28 = vsel %vm9086_vm12, %v9042_v20, %v9094_v30 }
 0x85c   :  { %9477 = vmatpush.msrb.mxu3 %v9166_v21  ;;  %9167 = vmatpush.msra.mxu1 %v9166_v21  ;;  %v9083_v36 = vsel %vm9082_vm10, %v8952_v37, %v9081_v44  ;;  %v9096_v31 = vsel %vm9088_vm13, %v9051_v13, %v9095_v28  ;;  %v8961_v53 = vmax.f32 %v8959_v42, %v8960_v22 }
 0x85d   :  { %9206 = vmatpush.msra.mxu2 %v9169_v25  ;;  %9278 = vmatpush.msrb.mxu0 %v9170_v41  ;;  %v8978_v50 = vrot.slane %v8977_v35, 1  ;;  %v9099_v38 = vsel %vm2136_vm0, %v9096_v31, 0  ;;  %v8970_v2 = vmax.f32 %v16408_v51, %v8969_v32 }
 0x85e   :  { %9478 = vmatpush.msrb.mxu3 %v9172_v4  ;;  %9173 = vmatpush.msra.mxu1 %v9172_v4  ;;  %v9129_v39 = vand.u32 4294901760, %v9099_v38  ;;  %v9085_v18 = vsel %vm9084_vm11, %v8961_v53, %v9083_v36 }
 0x85f   :  { %v8979_v1 = vmax.f32 %v8977_v35, %v8978_v50  ;;  %v9087_v56 = vsel %vm9086_vm12, %v8970_v2, %v9085_v18 }
 0x860   :  { %9231 = vmatpush.msra.mxu3 %v16216_v15  ;;  %9301 = vmatpush.msrb.mxu1 %v16216_v15  ;;  %v9130_v3 = vsub.f32 %v9099_v38, %v9129_v39 }
 0x861   :  { %9179 = vmatmul.f32.vlgmr.msrb.gmra.mxu3 %v9129_v39  ;;  %v9089_v6 = vsel %vm9088_vm13, %v8979_v1, %v9087_v56 }
 0x862   :  { %9233 = vmatpush.msra.mxu3 %v16356_v17  ;;  %9303 = vmatpush.msrb.mxu1 %v16356_v17  ;;  %v9097_v15 = vsel %vm2136_vm0, %v9089_v6, 0  ;;  %v9131_v27 = vand.u32 4294901760, %v9130_v3 }
 0x863   :  { %v9121_v26 = vand.u32 4294901760, %v9097_v15 }
 0x864   :  { %9305 = vmatpush.msrb.mxu1 %v16359_v54  ;;  %9235 = vmatpush.msra.mxu3 %v16359_v54  ;;  %v9132_v16 = vsub.f32 %v9130_v3, %v9131_v27 }
 0x865   :  { %9175 = vmatmul.f32.vlgmr.msra.gmra.mxu1 %v9121_v26  ;;  %v9122_v17 = vsub.f32 %v9097_v15, %v9121_v26 }
 0x866   :  { %9307 = vmatpush.msrb.mxu1 %v16413_v10  ;;  %9237 = vmatpush.msra.mxu3 %v16413_v10  ;;  %v9133_v23 = vand.u32 4294901760, %v9132_v16 }
 0x867   :  { %v9123_v14 = vand.u32 4294901760, %v9122_v17 }
 0x868   :  { %9134 = vmatmul.f32.vlgmr.msrb.gmra.mxu2 %v9133_v23 }
 0x869   :  { %9241 = vmatmul.f32.vlgmr.msra.gmra.mxu3 %v9123_v14  ;;  %v9124_v24 = vsub.f32 %v9122_v17, %v9123_v14 }
 0x86b   :  { %v9125_v46 = vand.u32 4294901760, %v9124_v24 }
 0x86d   :  { %9126 = vmatmul.f32.vlgmr.msra.gmra.mxu0 %v9125_v46  ;;  %9309 = vmatmul.f32.vlgmr.msrb.gmra.mxu1 %v9121_v26 }
 0x870   :  { %9209 = vmatmul.f32.vlgmr.msra.gmra.mxu2 %v9122_v17 }
 0x871   :  { %9247 = vmatmul.f32.gmra.mxu3 %v9131_v27 }
 0x875   :  { %9280 = vmatmul.f32.vlgmr.msrb.gmra.mxu0 %v9121_v26  ;;  %9313 = vmatmul.f32.gmra.mxu1 %v9129_v39 }
 0x878   :  { %9214 = vmatmul.f32.gmra.mxu2 %v9130_v3 }
 0x87d   :  { %9284 = vmatmul.f32.gmra.mxu0 %v9129_v39 }
 0x8e2   :  { %v9176_v51 = vpop.f32.mrf.mxu1 }
 0x8e4   :  { %v9180_v54 = vpop.f32.mrf.mxu3 }
 0x8ea   :  { %v9127_v62 = vpop.f32.mrf.mxu0  ;;  %v9310_v0 = vpop.f32.mrf.mxu1 }
 0x8eb   :  { %v9135_v47 = vpop.f32.mrf.mxu2  ;;  %v9128_v52 = vadd.f32 %v9511_v40, %v9127_v62 }
 0x8ec   :  { %v9242_v59 = vpop.f32.mrf.mxu3  ;;  %v9136_v10 = vadd.f32 %v9511_v40, %v9135_v47 }
 0x8ed   :  { %v9177_v45 = vadd.f32 %v9176_v51, %v9128_v52 }
 0x8ee   :  { %v9181_v11 = vadd.f32 %v9180_v54, %v9136_v10 }
 0x8f2   :  { %v9281_v60 = vpop.f32.mrf.mxu0  ;;  %v9314_v21 = vpop.f32.mrf.mxu1 }
 0x8f3   :  { %v9210_v58 = vpop.f32.mrf.mxu2 }
 0x8f4   :  { %v9211_v49 = vadd.f32 %v9210_v58, %v9177_v45  ;;  %v9248_v25 = vpop.f32.mrf.mxu3 }
 0x8f6   :  { %v9243_v7 = vadd.f32 %v9242_v59, %v9211_v49 }
 0x8f8   :  { %v9282_v19 = vadd.f32 %v9281_v60, %v9243_v7 }
 0x8fa   :  { %v9311_v9 = vadd.f32 %v9310_v0, %v9282_v19  ;;  %v9285_v34 = vpop.f32.mrf.mxu0 }
 0x8fb   :  { %v9215_v48 = vpop.f32.mrf.mxu2 }
 0x8fc   :  { %v9216_v8 = vadd.f32 %v9215_v48, %v9181_v11  ;;  %vm9317_vm14 = vcmp.gt.f32.partialorder %v9311_v9, 0.0  ;;  %v9319_v61 = vmul.f32 0.01, %v9311_v9 }
 0x8fe   :  { %v9321_v5 = vsel %vm9317_vm14, %v9311_v9, %v9319_v61  ;;  %v9249_v41 = vadd.f32 %v9248_v25, %v9216_v8 }
 0x8ff   :  { %9323 = vst.msk [vmem:[#allocation2] sm:$0xff] %vm2136_vm0, %v9321_v5 }
 0x900   :  { %v9286_v43 = vadd.f32 %v9285_v34, %v9249_v41 }
 0x902   :  { %v9315_v20 = vadd.f32 %v9314_v21, %v9286_v43 }
 0x904   :  { %vm9318_vm15 = vcmp.gt.f32.partialorder %v9315_v20, 0.0  ;;  %v9320_v63 = vmul.f32 0.01, %v9315_v20 }
 0x906   :  { %v9322_v13 = vsel %vm9318_vm15, %v9315_v20, %v9320_v63 }
 0x907   :  { %9324 = vst.msk [vmem:[#allocation2 + $0x8] sm:$0xff] %vm2136_vm0, %v9322_v13 }
 0x908   :  { %9337 = dma.vmem_to_hbm [thread:$0]  %s9330_s26, 256, %s9332_s29, [#allocation3], %s9563_s30, %s9563_s30, %s9564_s1  }
 0x909   :  { %9554 = dma.done.wait [#allocation3], 256  }
 0x90a   :  { %9555 = vsyncadd [#allocation3], 4294967040 }
 0x90b   :  { %9342 = vsyncpa [#allocation3], 1 }

</bundles_post_ra>
